<compile_context>
chip_gen: v6e
topology: v6e:2x2x1
jax: 0.10.0
libtpu: 0.0.40
codegen_flags: <defaults>
</compile_context>

<pallas_src>
import functools

import jax
import jax.numpy as jnp
from jax.experimental import pallas as pl
from jax.experimental.pallas import tpu as pltpu

EPS = 1e-5                    # PyTorch BatchNorm1d default eps
CELU_ALPHA = 0.06
WEIGHT_DTYPE = jnp.bfloat16   # streamed weight dtype
C1, C2, C3 = 256, 512, 512    # channel widths hard-coded in the module

# Row indices inside the packed per-channel affine/bias table `aff` (11, 512).
A_BNC1_S, A_BNC1_T = 0, 1
A_BNC2_S, A_BNC2_T, A_C2_B = 2, 3, 4
A_BNC21_S, A_BNC21_T, A_C21_B = 5, 6, 7
A_BNC22_S, A_BNC22_T, A_C22_B = 8, 9, 10
N_AFF = 11


def _celu(x, alpha):
    return jnp.where(x > 0, x,
                     alpha * (jnp.exp(jnp.minimum(x, 0.0) / alpha) - 1.0))


# ----------------------------------------------------------------------------
# Single fused Pallas kernel
# ----------------------------------------------------------------------------
def _fused_kernel(x_ref, w1_ref, b1_ref, aff_ref,
                  c1w_hbm, c2w_hbm, c21w_hbm, c22w_hbm,
                  w3_ref, b3_ref,
                  o_ref,
                  c1w_v, c2w_v, c21w_v, c22w_v, sems,
                  *, B, L1, Lh, Lo):
    f32 = jnp.float32
    cdt = w1_ref.dtype          # bf16 MXU operand dtype (f32 accumulation)

    # Kick off all conv-weight DMAs up front; they overlap the dense1 / conv1
    # / pooling compute and are waited on right before first use.
    cps = [pltpu.make_async_copy(c1w_hbm, c1w_v, sems.at[0]),
           pltpu.make_async_copy(c2w_hbm, c2w_v, sems.at[1]),
           pltpu.make_async_copy(c21w_hbm, c21w_v, sems.at[2]),
           pltpu.make_async_copy(c22w_hbm, c22w_v, sems.at[3])]
    for cp in cps:
        cp.start()

    aff = aff_ref[...]                                   # (11, 512) f32

    def shift_rows(a, s):
        """out[r] = a[r + s] if 0 <= r + s < rows else 0 (static shift)."""
        rows, cols = a.shape
        if s == 0:
            return a
        z = jnp.zeros((abs(s), cols), a.dtype)
        if s > 0:
            return jnp.concatenate([a[s:, :], z], axis=0)
        return jnp.concatenate([z, a[:rows + s, :]], axis=0)

    def conv_relu(slab, L, K, pad, w_ref, bias):
        """'same' Conv1d(+bias)+ReLU on a position-major (L*B, Cin) bf16 slab.

        One accumulating MXU matmul per tap; each tap is a whole-slab row
        shift by (k-pad)*B.  The zero fill of the shift is exactly PyTorch's
        conv zero padding (applied AFTER the preceding BatchNorm affine).
        """
        rows = L * B
        acc = None
        for k in range(K):
            s = (k - pad) * B
            if abs(s) >= rows:        # tap entirely out of range for every l
                continue
            tap = shift_rows(slab, s)
            y = jnp.dot(tap, w_ref[k], preferred_element_type=f32)
            acc = y if acc is None else acc + y
        if bias is not None:
            acc = acc + bias
        return jnp.maximum(acc, 0.0)

    # ---- dense1 (BN1 pre-folded, columns permuted to l*C1+c) + CELU ---------
    hfull = jnp.dot(x_ref[...].astype(cdt), w1_ref[...],
                    preferred_element_type=f32) + b1_ref[...]
    hfull = _celu(hfull, CELU_ALPHA)                     # (B, L1*C1) f32

    # ---- reshape to position-major row slab (row r = l*B + b) ---------------
    h_slab = jnp.concatenate(
        [hfull[:, l * C1:(l + 1) * C1] for l in range(L1)], axis=0)  # (L1*B,C1)

    # ---- BN_c1 affine, single cast to bf16 ----------------------------------
    h_slab = h_slab * aff[A_BNC1_S:A_BNC1_S + 1, :C1] \
        + aff[A_BNC1_T:A_BNC1_T + 1, :C1]
    h_bf = h_slab.astype(cdt)

    # ---- conv1 (k5, p2, bias=False) + ReLU -----------------------------------
    cps[0].wait()
    y1 = conv_relu(h_bf, L1, 5, 2, c1w_v, None)          # (L1*B, C2) f32

    # ---- AdaptiveAvgPool1d: L1 -> Lh (mean of adjacent position pairs) ------
    a = jnp.concatenate(
        [(y1[(2 * j) * B:(2 * j + 1) * B, :]
          + y1[(2 * j + 1) * B:(2 * j + 2) * B, :]) * 0.5
         for j in range(Lh)], axis=0)                    # (Lh*B, C2) f32

    # ---- BN_c2 -> conv2 (k3, p1) + ReLU  (saved as x_s) ---------------------
    a_bf = (a * aff[A_BNC2_S:A_BNC2_S + 1, :]
            + aff[A_BNC2_T:A_BNC2_T + 1, :]).astype(cdt)
    cps[1].wait()
    x_s = conv_relu(a_bf, Lh, 3, 1, c2w_v, aff[A_C2_B:A_C2_B + 1, :])

    # ---- BN_c2_1 -> conv2_1 (k3, p1) + ReLU ----------------------------------
    x1_bf = (x_s * aff[A_BNC21_S:A_BNC21_S + 1, :]
             + aff[A_BNC21_T:A_BNC21_T + 1, :]).astype(cdt)
    cps[2].wait()
    x1 = conv_relu(x1_bf, Lh, 3, 1, c21w_v, aff[A_C21_B:A_C21_B + 1, :])

    # ---- BN_c2_2 -> conv2_2 (k5, p2) + ReLU ----------------------------------
    x2_bf = (x1 * aff[A_BNC22_S:A_BNC22_S + 1, :]
             + aff[A_BNC22_T:A_BNC22_T + 1, :]).astype(cdt)
    cps[3].wait()
    x2 = conv_relu(x2_bf, Lh, 5, 2, c22w_v, aff[A_C22_B:A_C22_B + 1, :])

    x2 = x2 * x_s                                        # (Lh*B, C3) f32, >= 0

    # ---- MaxPool1d(kernel=4, stride=2, padding=1) ----------------------------
    # Windowed max over positions p-1..p+2 for every p (whole-slab shifts);
    # all values are >= 0 (product of two ReLU outputs), so zero fill at the
    # sequence edges is exactly the identity for max.
    m_full = x2
    for d in (-1, 1, 2):
        s = d * B
        if abs(s) >= Lh * B:
            continue
        m_full = jnp.maximum(m_full, shift_rows(x2, s))

    # ---- stride-2 selection + Flatten folded into dense3 (BN3 pre-folded) ---
    w3 = w3_ref[...]                                     # (Lo*C3, T) bf16
    acc3 = None
    for i in range(Lo):
        blk = m_full[2 * i * B: 2 * i * B + B, :].astype(cdt)      # (B, C3)
        y = jnp.dot(blk, w3[i * C3:(i + 1) * C3, :],
                    preferred_element_type=f32)
        acc3 = y if acc3 is None else acc3 + y
    o_ref[...] = (acc3 + b3_ref[...]).astype(o_ref.dtype)


def model_forward(kp, x):
    """Whole forward pass as one fused pallas_call."""
    B = x.shape[0]
    H = kp["w1"].shape[1]
    T = kp["w3"].shape[1]
    assert H % (C1 * 4) == 0, "hidden_size must be a multiple of 1024"
    L1 = H // C1                       # cha_1_reshape
    Lh = L1 // 2                       # cha_po_1 (after adaptive avg pool)
    Lo = (Lh + 2 - 4) // 2 + 1         # length after MaxPool1d(4, 2, 1)

    kern = functools.partial(_fused_kernel, B=B, L1=L1, Lh=Lh, Lo=Lo)

    def full2d(a):
        return pl.BlockSpec(a.shape, lambda i: (0, 0))

    any_spec = pl.BlockSpec(memory_space=pl.ANY)

    args = (x, kp["w1"], kp["b1"], kp["aff"],
            kp["c1_w"], kp["c2_w"], kp["c21_w"], kp["c22_w"],
            kp["w3"], kp["b3"])
    in_specs = [full2d(x), full2d(kp["w1"]), full2d(kp["b1"]), full2d(kp["aff"]),
                any_spec, any_spec, any_spec, any_spec,
                full2d(kp["w3"]), full2d(kp["b3"])]

    wdt = kp["c1_w"].dtype
    scratch = [pltpu.VMEM(kp["c1_w"].shape, wdt),
               pltpu.VMEM(kp["c2_w"].shape, wdt),
               pltpu.VMEM(kp["c21_w"].shape, wdt),
               pltpu.VMEM(kp["c22_w"].shape, wdt),
               pltpu.SemaphoreType.DMA((4,))]

    # Single grid step: weights are DMA'd into VMEM exactly once and every
    # intermediate activation stays on-chip.  (For large batch, tile the
    # row-slab M dimension over a "parallel" grid axis instead.)
    return pl.pallas_call(
        kern,
        out_shape=jax.ShapeDtypeStruct((B, T), jnp.float32),
        grid=(1,),
        in_specs=in_specs,
        out_specs=pl.BlockSpec((B, T), lambda i: (0, 0)),
        scratch_shapes=scratch,
        compiler_params=pltpu.CompilerParams(
            dimension_semantics=("arbitrary",),
            vmem_limit_bytes=32 * 1024 * 1024),
    )(*args)


# ----------------------------------------------------------------------------
# Parameter preparation: fold eval-mode BN, permute layouts, cast to bf16
# ----------------------------------------------------------------------------
def prepare_params(pt, weight_dtype=WEIGHT_DTYPE):
    H, F = pt["dense1_w"].shape
    T, P2 = pt["dense3_w"].shape
    L1 = H // C1
    Lo = P2 // C3

    def bn_affine(prefix):
        s = pt[prefix + "_g"] / jnp.sqrt(pt[prefix + "_rv"] + EPS)
        t = pt[prefix + "_b"] - pt[prefix + "_rm"] * s
        return s, t

    kp = {}

    # BN1 folded into dense1; output columns permuted from c*L1+l to l*C1+c.
    s1, t1 = bn_affine("bn1")
    w1 = (pt["dense1_w"] * s1[None, :]).T                       # (F, H)
    b1 = pt["dense1_b"] + pt["dense1_w"] @ t1                   # (H,)
    kp["w1"] = (w1.reshape(F, C1, L1).transpose(0, 2, 1)
                .reshape(F, H).astype(weight_dtype))
    kp["b1"] = b1.reshape(C1, L1).T.reshape(1, H).astype(jnp.float32)

    # Conv weights: (Cout, Cin, K) -> (K, Cin, Cout), one (Cin, Cout) slab/tap.
    def conv_w(name):
        return jnp.transpose(pt[name], (2, 1, 0)).astype(weight_dtype)

    kp["c1_w"] = conv_w("conv1_w")
    kp["c2_w"] = conv_w("conv2_w")
    kp["c21_w"] = conv_w("conv2_1_w")
    kp["c22_w"] = conv_w("conv2_2_w")

    # Packed per-channel affine/bias table (11, 512) f32.
    def pad512(v):
        return jnp.pad(v, (0, 512 - v.shape[0]))

    sc1, tc1 = bn_affine("bnc1")
    sc2, tc2 = bn_affine("bnc2")
    sc21, tc21 = bn_affine("bnc21")
    sc22, tc22 = bn_affine("bnc22")
    rows = [pad512(sc1), pad512(tc1),
            sc2, tc2, pt["conv2_b"],
            sc21, tc21, pt["conv2_1_b"],
            sc22, tc22, pt["conv2_2_b"]]
    kp["aff"] = jnp.stack(rows, axis=0).astype(jnp.float32)     # (N_AFF, 512)

    # BN3 folded into dense3; rows permuted from c*Lo+i to i*C3+c.
    s3, t3 = bn_affine("bn3")
    w3 = (pt["dense3_w"] * s3[None, :]).T                       # (P2, T)
    b3 = pt["dense3_b"] + pt["dense3_w"] @ t3                   # (T,)
    kp["w3"] = (w3.reshape(C3, Lo, T).transpose(1, 0, 2)
                .reshape(P2, T).astype(weight_dtype))
    kp["b3"] = b3.reshape(1, T).astype(jnp.float32)
    return kp


# ----------------------------------------------------------------------------
# Pure-JAX f32 reference (PyTorch layout), used only for a sanity check
# ----------------------------------------------------------------------------
def reference_forward(pt, x):
    def bn(v, prefix, axis):
        shape = [1] * v.ndim
        shape[axis] = -1
        s = pt[prefix + "_g"] / jnp.sqrt(pt[prefix + "_rv"] + EPS)
        t = pt[prefix + "_b"] - pt[prefix + "_rm"] * s
        return v * s.reshape(shape) + t.reshape(shape)

    def conv1d(v, w, bias, pad):                 # v: (B,Cin,L), w: (Cout,Cin,K)
        K = w.shape[2]
        L = v.shape[2]
        vp = jnp.pad(v, ((0, 0), (0, 0), (pad, pad)))
        out = sum(jnp.einsum("bcl,oc->bol", vp[:, :, k:k + L], w[:, :, k])
                  for k in range(K))
        if bias is not None:
            out = out + bias.reshape(1, -1, 1)
        return out

    B = x.shape[0]
    h = bn(x, "bn1", 1)
    h = _celu(h @ pt["dense1_w"].T + pt["dense1_b"], CELU_ALPHA)
    h = h.reshape(B, C1, -1)
    h = bn(h, "bnc1", 1)
    h = jnp.maximum(conv1d(h, pt["conv1_w"], None, 2), 0.0)
    Bx, C, L = h.shape
    h = h.reshape(Bx, C, L // 2, 2).mean(-1)                    # AdaptiveAvgPool1d
    h = bn(h, "bnc2", 1)
    x_s = jnp.maximum(conv1d(h, pt["conv2_w"], pt["conv2_b"], 1), 0.0)
    h = bn(x_s, "bnc21", 1)
    h = jnp.maximum(conv1d(h, pt["conv2_1_w"], pt["conv2_1_b"], 1), 0.0)
    h = bn(h, "bnc22", 1)
    h = jnp.maximum(conv1d(h, pt["conv2_2_w"], pt["conv2_2_b"], 2), 0.0)
    h = h * x_s
    Bx, C, L = h.shape                                           # MaxPool1d(4,2,1)
    hp = jnp.pad(h, ((0, 0), (0, 0), (1, 1)), constant_values=-jnp.inf)
    Lo = (L + 2 - 4) // 2 + 1
    h = jnp.stack([jnp.max(hp[:, :, 2 * i:2 * i + 4], axis=-1)
                   for i in range(Lo)], axis=-1)
    h = h.reshape(Bx, -1)                                        # Flatten
    h = bn(h, "bn3", 1)
    return h @ pt["dense3_w"].T + pt["dense3_b"]


# ----------------------------------------------------------------------------
# Deterministic synthetic parameters in PyTorch layout (no checkpoint)
# ----------------------------------------------------------------------------
def init_params(key, num_features, num_targets, hidden_size):
    L1 = hidden_size // C1
    cha_po_2 = (L1 // 4) * C3

    p = {}

    def bn(n, prefix):
        p[prefix + "_g"] = jnp.ones((n,), jnp.float32)
        p[prefix + "_b"] = jnp.zeros((n,), jnp.float32)
        p[prefix + "_rm"] = jnp.zeros((n,), jnp.float32)
        p[prefix + "_rv"] = jnp.ones((n,), jnp.float32)

    def uni(k, shape, fan_in):
        bound = 1.0 / (fan_in ** 0.5)
        return jax.random.uniform(k, shape, jnp.float32, -bound, bound)

    keys = jax.random.split(key, 11)
    bn(num_features, "bn1")
    p["dense1_w"] = uni(keys[0], (hidden_size, num_features), num_features)
    p["dense1_b"] = uni(keys[1], (hidden_size,), num_features)
    bn(C1, "bnc1")
    p["conv1_w"] = uni(keys[2], (C2, C1, 5), C1 * 5)
    bn(C2, "bnc2")
    p["conv2_w"] = uni(keys[3], (C2, C2, 3), C2 * 3)
    p["conv2_b"] = uni(keys[4], (C2,), C2 * 3)
    bn(C2, "bnc21")
    p["conv2_1_w"] = uni(keys[5], (C2, C2, 3), C2 * 3)
    p["conv2_1_b"] = uni(keys[6], (C2,), C2 * 3)
    bn(C2, "bnc22")
    p["conv2_2_w"] = uni(keys[7], (C3, C2, 5), C2 * 5)
    p["conv2_2_b"] = uni(keys[8], (C3,), C2 * 5)
    bn(cha_po_2, "bn3")
    p["dense3_w"] = uni(keys[9], (num_targets, cha_po_2), cha_po_2)
    p["dense3_b"] = uni(keys[10], (num_targets,), cha_po_2)
    return p


if __name__ == "__main__":
    # Channel widths (256/512) are hard-coded in __init__, so hidden_size must
    # be a multiple of 1024 for the pooling chain to be well-formed.
    batch = 2
    num_features = 32
    num_targets = 4
    hidden_size = 1024   # -> cha_1_reshape=4, cha_po_1=2, cha_po_2=512

    key = jax.random.PRNGKey(0)
    kx, kp_key = jax.random.split(key)
    x = jax.random.normal(kx, (batch, num_features), jnp.float32)

    torch_layout_params = init_params(kp_key, num_features, num_targets,
                                      hidden_size)
    kernel_params = prepare_params(torch_layout_params)

    out = jax.block_until_ready(jax.jit(model_forward)(kernel_params, x))
    assert out.shape == (batch, num_targets), out.shape
    assert bool(jnp.all(jnp.isfinite(out)))

    # Structural sanity check vs. a pure-JAX f32 reference (loose tolerance:
    # the kernel streams weights and activations in bf16).
    ref = jax.block_until_ready(jax.jit(reference_forward)(torch_layout_params, x))
    max_diff = float(jnp.max(jnp.abs(out - ref)))
    scale = float(jnp.max(jnp.abs(ref))) + 1e-6
    assert max_diff <= 0.1 * scale + 0.05, (max_diff, scale)

    print("KERNEL_OK")
</pallas_src>

<mosaic_0001>
module attributes {stable_mosaic.version = 11 : i64} {
  func.func @_fused_kernel(%arg0: i32, %arg1: memref<2x32xf32, #tpu.memory_space<vmem>>, %arg2: memref<32x1024xbf16, #tpu.memory_space<vmem>>, %arg3: memref<1x1024xf32, #tpu.memory_space<vmem>>, %arg4: memref<11x512xf32, #tpu.memory_space<vmem>>, %arg5: memref<5x256x512xbf16, #tpu.memory_space<any>>, %arg6: memref<3x512x512xbf16, #tpu.memory_space<any>>, %arg7: memref<3x512x512xbf16, #tpu.memory_space<any>>, %arg8: memref<5x512x512xbf16, #tpu.memory_space<any>>, %arg9: memref<512x4xbf16, #tpu.memory_space<vmem>>, %arg10: memref<1x4xf32, #tpu.memory_space<vmem>>, %arg11: memref<2x4xf32, #tpu.memory_space<vmem>>, %arg12: memref<5x256x512xbf16, #tpu.memory_space<vmem>>, %arg13: memref<3x512x512xbf16, #tpu.memory_space<vmem>>, %arg14: memref<3x512x512xbf16, #tpu.memory_space<vmem>>, %arg15: memref<5x512x512xbf16, #tpu.memory_space<vmem>>, %arg16: memref<4x!tpu.dma_semaphore, #tpu.memory_space<semaphore_mem>>) attributes {dimension_semantics = [#tpu.dimension_semantics<arbitrary>], iteration_bounds = array<i64: 1>, scalar_prefetch = 0 : i64, scratch_operands = 5 : i64, tpu.core_type = #tpu.core_type<tc>, window_params = [{pipeline_mode = #tpu.pipeline_mode<synchronous>, transform_indices = @transform_0, window_bounds = array<i64: 2, 32>}, {pipeline_mode = #tpu.pipeline_mode<synchronous>, transform_indices = @transform_1, window_bounds = array<i64: 32, 1024>}, {pipeline_mode = #tpu.pipeline_mode<synchronous>, transform_indices = @transform_2, window_bounds = array<i64: 1, 1024>}, {pipeline_mode = #tpu.pipeline_mode<synchronous>, transform_indices = @transform_3, window_bounds = array<i64: 11, 512>}, {}, {}, {}, {}, {pipeline_mode = #tpu.pipeline_mode<synchronous>, transform_indices = @transform_8, window_bounds = array<i64: 512, 4>}, {pipeline_mode = #tpu.pipeline_mode<synchronous>, transform_indices = @transform_9, window_bounds = array<i64: 1, 4>}, {pipeline_mode = #tpu.pipeline_mode<synchronous>, transform_indices = @transform_10, window_bounds = array<i64: 2, 4>}]} {
    %c0_i32 = arith.constant 0 : i32
    %0 = tpu.memref_slice %arg16[%c0_i32] : memref<4x!tpu.dma_semaphore, #tpu.memory_space<semaphore_mem>> -> memref<1x!tpu.dma_semaphore, #tpu.memory_space<semaphore_mem>>
    %1 = tpu.memref_squeeze %0 : memref<1x!tpu.dma_semaphore, #tpu.memory_space<semaphore_mem>> -> memref<!tpu.dma_semaphore, #tpu.memory_space<semaphore_mem>>
    tpu.enqueue_dma source(%arg5 : memref<5x256x512xbf16, #tpu.memory_space<any>>) target(%arg12 : memref<5x256x512xbf16, #tpu.memory_space<vmem>>) target_semaphore(%1 : memref<!tpu.dma_semaphore, #tpu.memory_space<semaphore_mem>>)
    %c1_i32 = arith.constant 1 : i32
    %2 = tpu.memref_slice %arg16[%c1_i32] : memref<4x!tpu.dma_semaphore, #tpu.memory_space<semaphore_mem>> -> memref<1x!tpu.dma_semaphore, #tpu.memory_space<semaphore_mem>>
    %3 = tpu.memref_squeeze %2 : memref<1x!tpu.dma_semaphore, #tpu.memory_space<semaphore_mem>> -> memref<!tpu.dma_semaphore, #tpu.memory_space<semaphore_mem>>
    tpu.enqueue_dma source(%arg6 : memref<3x512x512xbf16, #tpu.memory_space<any>>) target(%arg13 : memref<3x512x512xbf16, #tpu.memory_space<vmem>>) target_semaphore(%3 : memref<!tpu.dma_semaphore, #tpu.memory_space<semaphore_mem>>)
    %c2_i32 = arith.constant 2 : i32
    %4 = tpu.memref_slice %arg16[%c2_i32] : memref<4x!tpu.dma_semaphore, #tpu.memory_space<semaphore_mem>> -> memref<1x!tpu.dma_semaphore, #tpu.memory_space<semaphore_mem>>
    %5 = tpu.memref_squeeze %4 : memref<1x!tpu.dma_semaphore, #tpu.memory_space<semaphore_mem>> -> memref<!tpu.dma_semaphore, #tpu.memory_space<semaphore_mem>>
    tpu.enqueue_dma source(%arg7 : memref<3x512x512xbf16, #tpu.memory_space<any>>) target(%arg14 : memref<3x512x512xbf16, #tpu.memory_space<vmem>>) target_semaphore(%5 : memref<!tpu.dma_semaphore, #tpu.memory_space<semaphore_mem>>)
    %c3_i32 = arith.constant 3 : i32
    %6 = tpu.memref_slice %arg16[%c3_i32] : memref<4x!tpu.dma_semaphore, #tpu.memory_space<semaphore_mem>> -> memref<1x!tpu.dma_semaphore, #tpu.memory_space<semaphore_mem>>
    %7 = tpu.memref_squeeze %6 : memref<1x!tpu.dma_semaphore, #tpu.memory_space<semaphore_mem>> -> memref<!tpu.dma_semaphore, #tpu.memory_space<semaphore_mem>>
    tpu.enqueue_dma source(%arg8 : memref<5x512x512xbf16, #tpu.memory_space<any>>) target(%arg15 : memref<5x512x512xbf16, #tpu.memory_space<vmem>>) target_semaphore(%7 : memref<!tpu.dma_semaphore, #tpu.memory_space<semaphore_mem>>)
    %c0 = arith.constant 0 : index
    %c0_0 = arith.constant 0 : index
    %8 = vector.load %arg4[%c0, %c0_0] : memref<11x512xf32, #tpu.memory_space<vmem>>, vector<11x512xf32>
    %c0_1 = arith.constant 0 : index
    %c0_2 = arith.constant 0 : index
    %9 = vector.load %arg1[%c0_1, %c0_2] : memref<2x32xf32, #tpu.memory_space<vmem>>, vector<2x32xf32>
    %10 = arith.truncf %9 : vector<2x32xf32> to vector<2x32xbf16>
    %c0_3 = arith.constant 0 : index
    %c0_4 = arith.constant 0 : index
    %11 = vector.load %arg2[%c0_3, %c0_4] : memref<32x1024xbf16, #tpu.memory_space<vmem>>, vector<32x1024xbf16>
    %cst = arith.constant dense<0.000000e+00> : vector<2x1024xf32>
    %12 = tpu.matmul %10, %11, %cst {dimension_numbers = #tpu.dot_dimension_numbers<[1], [0], [0], [1], [0, 0, 1, 1], [], []>} : vector<2x32xbf16>, vector<32x1024xbf16>, vector<2x1024xf32> -> vector<2x1024xf32>
    %c0_5 = arith.constant 0 : index
    %c0_6 = arith.constant 0 : index
    %13 = vector.load %arg3[%c0_5, %c0_6] : memref<1x1024xf32, #tpu.memory_space<vmem>>, vector<1x1024xf32>
    %14 = vector.broadcast %13 : vector<1x1024xf32> to vector<2x1024xf32>
    %15 = arith.addf %12, %14 : vector<2x1024xf32>
    %cst_7 = arith.constant 0.000000e+00 : f32
    %16 = vector.broadcast %cst_7 : f32 to vector<2x1024xf32>
    %17 = arith.cmpf ogt, %15, %16 : vector<2x1024xf32>
    %cst_8 = arith.constant 0.000000e+00 : f32
    %18 = vector.broadcast %cst_8 : f32 to vector<2x1024xf32>
    %19 = arith.minimumf %15, %18 : vector<2x1024xf32>
    %cst_9 = arith.constant 6.000000e-02 : f32
    %20 = vector.broadcast %cst_9 : f32 to vector<2x1024xf32>
    %21 = arith.divf %19, %20 : vector<2x1024xf32>
    %22 = math.exp %21 : vector<2x1024xf32>
    %cst_10 = arith.constant 1.000000e+00 : f32
    %23 = vector.broadcast %cst_10 : f32 to vector<2x1024xf32>
    %24 = arith.subf %22, %23 : vector<2x1024xf32>
    %cst_11 = arith.constant 6.000000e-02 : f32
    %25 = vector.broadcast %cst_11 : f32 to vector<2x1024xf32>
    %26 = arith.mulf %25, %24 : vector<2x1024xf32>
    %27 = arith.select %17, %15, %26 : vector<2x1024xi1>, vector<2x1024xf32>
    %28 = vector.extract_strided_slice %27 {offsets = [0, 0], sizes = [2, 256], strides = [1, 1]} : vector<2x1024xf32> to vector<2x256xf32>
    %29 = vector.extract_strided_slice %27 {offsets = [0, 256], sizes = [2, 256], strides = [1, 1]} : vector<2x1024xf32> to vector<2x256xf32>
    %30 = vector.extract_strided_slice %27 {offsets = [0, 512], sizes = [2, 256], strides = [1, 1]} : vector<2x1024xf32> to vector<2x256xf32>
    %31 = vector.extract_strided_slice %27 {offsets = [0, 768], sizes = [2, 256], strides = [1, 1]} : vector<2x1024xf32> to vector<2x256xf32>
    %32 = tpu.concatenate %28, %29, %30, %31 in 0 : vector<2x256xf32>, vector<2x256xf32>, vector<2x256xf32>, vector<2x256xf32> -> vector<8x256xf32>
    %33 = vector.extract_strided_slice %8 {offsets = [0, 0], sizes = [1, 256], strides = [1, 1]} : vector<11x512xf32> to vector<1x256xf32>
    %34 = vector.broadcast %33 : vector<1x256xf32> to vector<8x256xf32>
    %35 = arith.mulf %32, %34 : vector<8x256xf32>
    %36 = vector.extract_strided_slice %8 {offsets = [1, 0], sizes = [1, 256], strides = [1, 1]} : vector<11x512xf32> to vector<1x256xf32>
    %37 = vector.broadcast %36 : vector<1x256xf32> to vector<8x256xf32>
    %38 = arith.addf %35, %37 : vector<8x256xf32>
    %39 = arith.truncf %38 : vector<8x256xf32> to vector<8x256xbf16>
    %c0_i32_12 = arith.constant 0 : i32
    %40 = tpu.memref_slice %arg16[%c0_i32_12] : memref<4x!tpu.dma_semaphore, #tpu.memory_space<semaphore_mem>> -> memref<1x!tpu.dma_semaphore, #tpu.memory_space<semaphore_mem>>
    %41 = tpu.memref_squeeze %40 : memref<1x!tpu.dma_semaphore, #tpu.memory_space<semaphore_mem>> -> memref<!tpu.dma_semaphore, #tpu.memory_space<semaphore_mem>>
    tpu.wait_dma2 semaphore(%41 : memref<!tpu.dma_semaphore, #tpu.memory_space<semaphore_mem>>) src(%arg5 : memref<5x256x512xbf16, #tpu.memory_space<any>>) dst(%arg12 : memref<5x256x512xbf16, #tpu.memory_space<vmem>>)
    %cst_13 = arith.constant 0.000000e+00 : bf16
    %42 = vector.broadcast %cst_13 : bf16 to vector<4x256xbf16>
    %43 = vector.extract_strided_slice %39 {offsets = [0, 0], sizes = [4, 256], strides = [1, 1]} : vector<8x256xbf16> to vector<4x256xbf16>
    %44 = tpu.concatenate %42, %43 in 0 : vector<4x256xbf16>, vector<4x256xbf16> -> vector<8x256xbf16>
    %c0_14 = arith.constant 0 : index
    %c0_15 = arith.constant 0 : index
    %c0_16 = arith.constant 0 : index
    %45 = vector.load %arg12[%c0_14, %c0_15, %c0_16] : memref<5x256x512xbf16, #tpu.memory_space<vmem>>, vector<1x256x512xbf16>
    %46 = vector.shape_cast %45 : vector<1x256x512xbf16> to vector<256x512xbf16>
    %cst_17 = arith.constant dense<0.000000e+00> : vector<8x512xf32>
    %47 = tpu.matmul %44, %46, %cst_17 {dimension_numbers = #tpu.dot_dimension_numbers<[1], [0], [0], [1], [0, 0, 1, 1], [], []>} : vector<8x256xbf16>, vector<256x512xbf16>, vector<8x512xf32> -> vector<8x512xf32>
    %cst_18 = arith.constant 0.000000e+00 : bf16
    %48 = vector.broadcast %cst_18 : bf16 to vector<2x256xbf16>
    %49 = vector.extract_strided_slice %39 {offsets = [0, 0], sizes = [6, 256], strides = [1, 1]} : vector<8x256xbf16> to vector<6x256xbf16>
    %50 = tpu.concatenate %48, %49 in 0 : vector<2x256xbf16>, vector<6x256xbf16> -> vector<8x256xbf16>
    %c1 = arith.constant 1 : index
    %c0_19 = arith.constant 0 : index
    %c0_20 = arith.constant 0 : index
    %51 = vector.load %arg12[%c1, %c0_19, %c0_20] : memref<5x256x512xbf16, #tpu.memory_space<vmem>>, vector<1x256x512xbf16>
    %52 = vector.shape_cast %51 : vector<1x256x512xbf16> to vector<256x512xbf16>
    %cst_21 = arith.constant dense<0.000000e+00> : vector<8x512xf32>
    %53 = tpu.matmul %50, %52, %cst_21 {dimension_numbers = #tpu.dot_dimension_numbers<[1], [0], [0], [1], [0, 0, 1, 1], [], []>} : vector<8x256xbf16>, vector<256x512xbf16>, vector<8x512xf32> -> vector<8x512xf32>
    %54 = arith.addf %47, %53 : vector<8x512xf32>
    %c2 = arith.constant 2 : index
    %c0_22 = arith.constant 0 : index
    %c0_23 = arith.constant 0 : index
    %55 = vector.load %arg12[%c2, %c0_22, %c0_23] : memref<5x256x512xbf16, #tpu.memory_space<vmem>>, vector<1x256x512xbf16>
    %56 = vector.shape_cast %55 : vector<1x256x512xbf16> to vector<256x512xbf16>
    %cst_24 = arith.constant dense<0.000000e+00> : vector<8x512xf32>
    %57 = tpu.matmul %39, %56, %cst_24 {dimension_numbers = #tpu.dot_dimension_numbers<[1], [0], [0], [1], [0, 0, 1, 1], [], []>} : vector<8x256xbf16>, vector<256x512xbf16>, vector<8x512xf32> -> vector<8x512xf32>
    %58 = arith.addf %54, %57 : vector<8x512xf32>
    %cst_25 = arith.constant 0.000000e+00 : bf16
    %59 = vector.broadcast %cst_25 : bf16 to vector<2x256xbf16>
    %60 = vector.extract_strided_slice %39 {offsets = [2, 0], sizes = [6, 256], strides = [1, 1]} : vector<8x256xbf16> to vector<6x256xbf16>
    %61 = tpu.concatenate %60, %59 in 0 : vector<6x256xbf16>, vector<2x256xbf16> -> vector<8x256xbf16>
    %c3 = arith.constant 3 : index
    %c0_26 = arith.constant 0 : index
    %c0_27 = arith.constant 0 : index
    %62 = vector.load %arg12[%c3, %c0_26, %c0_27] : memref<5x256x512xbf16, #tpu.memory_space<vmem>>, vector<1x256x512xbf16>
    %63 = vector.shape_cast %62 : vector<1x256x512xbf16> to vector<256x512xbf16>
    %cst_28 = arith.constant dense<0.000000e+00> : vector<8x512xf32>
    %64 = tpu.matmul %61, %63, %cst_28 {dimension_numbers = #tpu.dot_dimension_numbers<[1], [0], [0], [1], [0, 0, 1, 1], [], []>} : vector<8x256xbf16>, vector<256x512xbf16>, vector<8x512xf32> -> vector<8x512xf32>
    %65 = arith.addf %58, %64 : vector<8x512xf32>
    %cst_29 = arith.constant 0.000000e+00 : bf16
    %66 = vector.broadcast %cst_29 : bf16 to vector<4x256xbf16>
    %67 = vector.extract_strided_slice %39 {offsets = [4, 0], sizes = [4, 256], strides = [1, 1]} : vector<8x256xbf16> to vector<4x256xbf16>
    %68 = tpu.concatenate %67, %66 in 0 : vector<4x256xbf16>, vector<4x256xbf16> -> vector<8x256xbf16>
    %c4 = arith.constant 4 : index
    %c0_30 = arith.constant 0 : index
    %c0_31 = arith.constant 0 : index
    %69 = vector.load %arg12[%c4, %c0_30, %c0_31] : memref<5x256x512xbf16, #tpu.memory_space<vmem>>, vector<1x256x512xbf16>
    %70 = vector.shape_cast %69 : vector<1x256x512xbf16> to vector<256x512xbf16>
    %cst_32 = arith.constant dense<0.000000e+00> : vector<8x512xf32>
    %71 = tpu.matmul %68, %70, %cst_32 {dimension_numbers = #tpu.dot_dimension_numbers<[1], [0], [0], [1], [0, 0, 1, 1], [], []>} : vector<8x256xbf16>, vector<256x512xbf16>, vector<8x512xf32> -> vector<8x512xf32>
    %72 = arith.addf %65, %71 : vector<8x512xf32>
    %cst_33 = arith.constant 0.000000e+00 : f32
    %73 = vector.broadcast %cst_33 : f32 to vector<8x512xf32>
    %74 = arith.maximumf %72, %73 : vector<8x512xf32>
    %75 = vector.extract_strided_slice %74 {offsets = [0, 0], sizes = [2, 512], strides = [1, 1]} : vector<8x512xf32> to vector<2x512xf32>
    %76 = vector.extract_strided_slice %74 {offsets = [2, 0], sizes = [2, 512], strides = [1, 1]} : vector<8x512xf32> to vector<2x512xf32>
    %77 = arith.addf %75, %76 : vector<2x512xf32>
    %cst_34 = arith.constant 5.000000e-01 : f32
    %78 = vector.broadcast %cst_34 : f32 to vector<2x512xf32>
    %79 = arith.mulf %77, %78 : vector<2x512xf32>
    %80 = vector.extract_strided_slice %74 {offsets = [4, 0], sizes = [2, 512], strides = [1, 1]} : vector<8x512xf32> to vector<2x512xf32>
    %81 = vector.extract_strided_slice %74 {offsets = [6, 0], sizes = [2, 512], strides = [1, 1]} : vector<8x512xf32> to vector<2x512xf32>
    %82 = arith.addf %80, %81 : vector<2x512xf32>
    %cst_35 = arith.constant 5.000000e-01 : f32
    %83 = vector.broadcast %cst_35 : f32 to vector<2x512xf32>
    %84 = arith.mulf %82, %83 : vector<2x512xf32>
    %85 = tpu.concatenate %79, %84 in 0 : vector<2x512xf32>, vector<2x512xf32> -> vector<4x512xf32>
    %86 = vector.extract_strided_slice %8 {offsets = [2, 0], sizes = [1, 512], strides = [1, 1]} : vector<11x512xf32> to vector<1x512xf32>
    %87 = vector.broadcast %86 : vector<1x512xf32> to vector<4x512xf32>
    %88 = arith.mulf %85, %87 : vector<4x512xf32>
    %89 = vector.extract_strided_slice %8 {offsets = [3, 0], sizes = [1, 512], strides = [1, 1]} : vector<11x512xf32> to vector<1x512xf32>
    %90 = vector.broadcast %89 : vector<1x512xf32> to vector<4x512xf32>
    %91 = arith.addf %88, %90 : vector<4x512xf32>
    %92 = arith.truncf %91 : vector<4x512xf32> to vector<4x512xbf16>
    %c1_i32_36 = arith.constant 1 : i32
    %93 = tpu.memref_slice %arg16[%c1_i32_36] : memref<4x!tpu.dma_semaphore, #tpu.memory_space<semaphore_mem>> -> memref<1x!tpu.dma_semaphore, #tpu.memory_space<semaphore_mem>>
    %94 = tpu.memref_squeeze %93 : memref<1x!tpu.dma_semaphore, #tpu.memory_space<semaphore_mem>> -> memref<!tpu.dma_semaphore, #tpu.memory_space<semaphore_mem>>
    tpu.wait_dma2 semaphore(%94 : memref<!tpu.dma_semaphore, #tpu.memory_space<semaphore_mem>>) src(%arg6 : memref<3x512x512xbf16, #tpu.memory_space<any>>) dst(%arg13 : memref<3x512x512xbf16, #tpu.memory_space<vmem>>)
    %95 = vector.extract_strided_slice %8 {offsets = [4, 0], sizes = [1, 512], strides = [1, 1]} : vector<11x512xf32> to vector<1x512xf32>
    %cst_37 = arith.constant 0.000000e+00 : bf16
    %96 = vector.broadcast %cst_37 : bf16 to vector<2x512xbf16>
    %97 = vector.extract_strided_slice %92 {offsets = [0, 0], sizes = [2, 512], strides = [1, 1]} : vector<4x512xbf16> to vector<2x512xbf16>
    %98 = tpu.concatenate %96, %97 in 0 : vector<2x512xbf16>, vector<2x512xbf16> -> vector<4x512xbf16>
    %c0_38 = arith.constant 0 : index
    %c0_39 = arith.constant 0 : index
    %c0_40 = arith.constant 0 : index
    %99 = vector.load %arg13[%c0_38, %c0_39, %c0_40] : memref<3x512x512xbf16, #tpu.memory_space<vmem>>, vector<1x512x512xbf16>
    %100 = vector.shape_cast %99 : vector<1x512x512xbf16> to vector<512x512xbf16>
    %cst_41 = arith.constant dense<0.000000e+00> : vector<4x512xf32>
    %101 = tpu.matmul %98, %100, %cst_41 {dimension_numbers = #tpu.dot_dimension_numbers<[1], [0], [0], [1], [0, 0, 1, 1], [], []>} : vector<4x512xbf16>, vector<512x512xbf16>, vector<4x512xf32> -> vector<4x512xf32>
    %c1_42 = arith.constant 1 : index
    %c0_43 = arith.constant 0 : index
    %c0_44 = arith.constant 0 : index
    %102 = vector.load %arg13[%c1_42, %c0_43, %c0_44] : memref<3x512x512xbf16, #tpu.memory_space<vmem>>, vector<1x512x512xbf16>
    %103 = vector.shape_cast %102 : vector<1x512x512xbf16> to vector<512x512xbf16>
    %cst_45 = arith.constant dense<0.000000e+00> : vector<4x512xf32>
    %104 = tpu.matmul %92, %103, %cst_45 {dimension_numbers = #tpu.dot_dimension_numbers<[1], [0], [0], [1], [0, 0, 1, 1], [], []>} : vector<4x512xbf16>, vector<512x512xbf16>, vector<4x512xf32> -> vector<4x512xf32>
    %105 = arith.addf %101, %104 : vector<4x512xf32>
    %cst_46 = arith.constant 0.000000e+00 : bf16
    %106 = vector.broadcast %cst_46 : bf16 to vector<2x512xbf16>
    %107 = vector.extract_strided_slice %92 {offsets = [2, 0], sizes = [2, 512], strides = [1, 1]} : vector<4x512xbf16> to vector<2x512xbf16>
    %108 = tpu.concatenate %107, %106 in 0 : vector<2x512xbf16>, vector<2x512xbf16> -> vector<4x512xbf16>
    %c2_47 = arith.constant 2 : index
    %c0_48 = arith.constant 0 : index
    %c0_49 = arith.constant 0 : index
    %109 = vector.load %arg13[%c2_47, %c0_48, %c0_49] : memref<3x512x512xbf16, #tpu.memory_space<vmem>>, vector<1x512x512xbf16>
    %110 = vector.shape_cast %109 : vector<1x512x512xbf16> to vector<512x512xbf16>
    %cst_50 = arith.constant dense<0.000000e+00> : vector<4x512xf32>
    %111 = tpu.matmul %108, %110, %cst_50 {dimension_numbers = #tpu.dot_dimension_numbers<[1], [0], [0], [1], [0, 0, 1, 1], [], []>} : vector<4x512xbf16>, vector<512x512xbf16>, vector<4x512xf32> -> vector<4x512xf32>
    %112 = arith.addf %105, %111 : vector<4x512xf32>
    %113 = vector.broadcast %95 : vector<1x512xf32> to vector<4x512xf32>
    %114 = arith.addf %112, %113 : vector<4x512xf32>
    %cst_51 = arith.constant 0.000000e+00 : f32
    %115 = vector.broadcast %cst_51 : f32 to vector<4x512xf32>
    %116 = arith.maximumf %114, %115 : vector<4x512xf32>
    %117 = vector.extract_strided_slice %8 {offsets = [5, 0], sizes = [1, 512], strides = [1, 1]} : vector<11x512xf32> to vector<1x512xf32>
    %118 = vector.broadcast %117 : vector<1x512xf32> to vector<4x512xf32>
    %119 = arith.mulf %116, %118 : vector<4x512xf32>
    %120 = vector.extract_strided_slice %8 {offsets = [6, 0], sizes = [1, 512], strides = [1, 1]} : vector<11x512xf32> to vector<1x512xf32>
    %121 = vector.broadcast %120 : vector<1x512xf32> to vector<4x512xf32>
    %122 = arith.addf %119, %121 : vector<4x512xf32>
    %123 = arith.truncf %122 : vector<4x512xf32> to vector<4x512xbf16>
    %c2_i32_52 = arith.constant 2 : i32
    %124 = tpu.memref_slice %arg16[%c2_i32_52] : memref<4x!tpu.dma_semaphore, #tpu.memory_space<semaphore_mem>> -> memref<1x!tpu.dma_semaphore, #tpu.memory_space<semaphore_mem>>
    %125 = tpu.memref_squeeze %124 : memref<1x!tpu.dma_semaphore, #tpu.memory_space<semaphore_mem>> -> memref<!tpu.dma_semaphore, #tpu.memory_space<semaphore_mem>>
    tpu.wait_dma2 semaphore(%125 : memref<!tpu.dma_semaphore, #tpu.memory_space<semaphore_mem>>) src(%arg7 : memref<3x512x512xbf16, #tpu.memory_space<any>>) dst(%arg14 : memref<3x512x512xbf16, #tpu.memory_space<vmem>>)
    %126 = vector.extract_strided_slice %8 {offsets = [7, 0], sizes = [1, 512], strides = [1, 1]} : vector<11x512xf32> to vector<1x512xf32>
    %cst_53 = arith.constant 0.000000e+00 : bf16
    %127 = vector.broadcast %cst_53 : bf16 to vector<2x512xbf16>
    %128 = vector.extract_strided_slice %123 {offsets = [0, 0], sizes = [2, 512], strides = [1, 1]} : vector<4x512xbf16> to vector<2x512xbf16>
    %129 = tpu.concatenate %127, %128 in 0 : vector<2x512xbf16>, vector<2x512xbf16> -> vector<4x512xbf16>
    %c0_54 = arith.constant 0 : index
    %c0_55 = arith.constant 0 : index
    %c0_56 = arith.constant 0 : index
    %130 = vector.load %arg14[%c0_54, %c0_55, %c0_56] : memref<3x512x512xbf16, #tpu.memory_space<vmem>>, vector<1x512x512xbf16>
    %131 = vector.shape_cast %130 : vector<1x512x512xbf16> to vector<512x512xbf16>
    %cst_57 = arith.constant dense<0.000000e+00> : vector<4x512xf32>
    %132 = tpu.matmul %129, %131, %cst_57 {dimension_numbers = #tpu.dot_dimension_numbers<[1], [0], [0], [1], [0, 0, 1, 1], [], []>} : vector<4x512xbf16>, vector<512x512xbf16>, vector<4x512xf32> -> vector<4x512xf32>
    %c1_58 = arith.constant 1 : index
    %c0_59 = arith.constant 0 : index
    %c0_60 = arith.constant 0 : index
    %133 = vector.load %arg14[%c1_58, %c0_59, %c0_60] : memref<3x512x512xbf16, #tpu.memory_space<vmem>>, vector<1x512x512xbf16>
    %134 = vector.shape_cast %133 : vector<1x512x512xbf16> to vector<512x512xbf16>
    %cst_61 = arith.constant dense<0.000000e+00> : vector<4x512xf32>
    %135 = tpu.matmul %123, %134, %cst_61 {dimension_numbers = #tpu.dot_dimension_numbers<[1], [0], [0], [1], [0, 0, 1, 1], [], []>} : vector<4x512xbf16>, vector<512x512xbf16>, vector<4x512xf32> -> vector<4x512xf32>
    %136 = arith.addf %132, %135 : vector<4x512xf32>
    %cst_62 = arith.constant 0.000000e+00 : bf16
    %137 = vector.broadcast %cst_62 : bf16 to vector<2x512xbf16>
    %138 = vector.extract_strided_slice %123 {offsets = [2, 0], sizes = [2, 512], strides = [1, 1]} : vector<4x512xbf16> to vector<2x512xbf16>
    %139 = tpu.concatenate %138, %137 in 0 : vector<2x512xbf16>, vector<2x512xbf16> -> vector<4x512xbf16>
    %c2_63 = arith.constant 2 : index
    %c0_64 = arith.constant 0 : index
    %c0_65 = arith.constant 0 : index
    %140 = vector.load %arg14[%c2_63, %c0_64, %c0_65] : memref<3x512x512xbf16, #tpu.memory_space<vmem>>, vector<1x512x512xbf16>
    %141 = vector.shape_cast %140 : vector<1x512x512xbf16> to vector<512x512xbf16>
    %cst_66 = arith.constant dense<0.000000e+00> : vector<4x512xf32>
    %142 = tpu.matmul %139, %141, %cst_66 {dimension_numbers = #tpu.dot_dimension_numbers<[1], [0], [0], [1], [0, 0, 1, 1], [], []>} : vector<4x512xbf16>, vector<512x512xbf16>, vector<4x512xf32> -> vector<4x512xf32>
    %143 = arith.addf %136, %142 : vector<4x512xf32>
    %144 = vector.broadcast %126 : vector<1x512xf32> to vector<4x512xf32>
    %145 = arith.addf %143, %144 : vector<4x512xf32>
    %cst_67 = arith.constant 0.000000e+00 : f32
    %146 = vector.broadcast %cst_67 : f32 to vector<4x512xf32>
    %147 = arith.maximumf %145, %146 : vector<4x512xf32>
    %148 = vector.extract_strided_slice %8 {offsets = [8, 0], sizes = [1, 512], strides = [1, 1]} : vector<11x512xf32> to vector<1x512xf32>
    %149 = vector.broadcast %148 : vector<1x512xf32> to vector<4x512xf32>
    %150 = arith.mulf %147, %149 : vector<4x512xf32>
    %151 = vector.extract_strided_slice %8 {offsets = [9, 0], sizes = [1, 512], strides = [1, 1]} : vector<11x512xf32> to vector<1x512xf32>
    %152 = vector.broadcast %151 : vector<1x512xf32> to vector<4x512xf32>
    %153 = arith.addf %150, %152 : vector<4x512xf32>
    %154 = arith.truncf %153 : vector<4x512xf32> to vector<4x512xbf16>
    %c3_i32_68 = arith.constant 3 : i32
    %155 = tpu.memref_slice %arg16[%c3_i32_68] : memref<4x!tpu.dma_semaphore, #tpu.memory_space<semaphore_mem>> -> memref<1x!tpu.dma_semaphore, #tpu.memory_space<semaphore_mem>>
    %156 = tpu.memref_squeeze %155 : memref<1x!tpu.dma_semaphore, #tpu.memory_space<semaphore_mem>> -> memref<!tpu.dma_semaphore, #tpu.memory_space<semaphore_mem>>
    tpu.wait_dma2 semaphore(%156 : memref<!tpu.dma_semaphore, #tpu.memory_space<semaphore_mem>>) src(%arg8 : memref<5x512x512xbf16, #tpu.memory_space<any>>) dst(%arg15 : memref<5x512x512xbf16, #tpu.memory_space<vmem>>)
    %157 = vector.extract_strided_slice %8 {offsets = [10, 0], sizes = [1, 512], strides = [1, 1]} : vector<11x512xf32> to vector<1x512xf32>
    %cst_69 = arith.constant 0.000000e+00 : bf16
    %158 = vector.broadcast %cst_69 : bf16 to vector<2x512xbf16>
    %159 = vector.extract_strided_slice %154 {offsets = [0, 0], sizes = [2, 512], strides = [1, 1]} : vector<4x512xbf16> to vector<2x512xbf16>
    %160 = tpu.concatenate %158, %159 in 0 : vector<2x512xbf16>, vector<2x512xbf16> -> vector<4x512xbf16>
    %c1_70 = arith.constant 1 : index
    %c0_71 = arith.constant 0 : index
    %c0_72 = arith.constant 0 : index
    %161 = vector.load %arg15[%c1_70, %c0_71, %c0_72] : memref<5x512x512xbf16, #tpu.memory_space<vmem>>, vector<1x512x512xbf16>
    %162 = vector.shape_cast %161 : vector<1x512x512xbf16> to vector<512x512xbf16>
    %cst_73 = arith.constant dense<0.000000e+00> : vector<4x512xf32>
    %163 = tpu.matmul %160, %162, %cst_73 {dimension_numbers = #tpu.dot_dimension_numbers<[1], [0], [0], [1], [0, 0, 1, 1], [], []>} : vector<4x512xbf16>, vector<512x512xbf16>, vector<4x512xf32> -> vector<4x512xf32>
    %c2_74 = arith.constant 2 : index
    %c0_75 = arith.constant 0 : index
    %c0_76 = arith.constant 0 : index
    %164 = vector.load %arg15[%c2_74, %c0_75, %c0_76] : memref<5x512x512xbf16, #tpu.memory_space<vmem>>, vector<1x512x512xbf16>
    %165 = vector.shape_cast %164 : vector<1x512x512xbf16> to vector<512x512xbf16>
    %cst_77 = arith.constant dense<0.000000e+00> : vector<4x512xf32>
    %166 = tpu.matmul %154, %165, %cst_77 {dimension_numbers = #tpu.dot_dimension_numbers<[1], [0], [0], [1], [0, 0, 1, 1], [], []>} : vector<4x512xbf16>, vector<512x512xbf16>, vector<4x512xf32> -> vector<4x512xf32>
    %167 = arith.addf %163, %166 : vector<4x512xf32>
    %cst_78 = arith.constant 0.000000e+00 : bf16
    %168 = vector.broadcast %cst_78 : bf16 to vector<2x512xbf16>
    %169 = vector.extract_strided_slice %154 {offsets = [2, 0], sizes = [2, 512], strides = [1, 1]} : vector<4x512xbf16> to vector<2x512xbf16>
    %170 = tpu.concatenate %169, %168 in 0 : vector<2x512xbf16>, vector<2x512xbf16> -> vector<4x512xbf16>
    %c3_79 = arith.constant 3 : index
    %c0_80 = arith.constant 0 : index
    %c0_81 = arith.constant 0 : index
    %171 = vector.load %arg15[%c3_79, %c0_80, %c0_81] : memref<5x512x512xbf16, #tpu.memory_space<vmem>>, vector<1x512x512xbf16>
    %172 = vector.shape_cast %171 : vector<1x512x512xbf16> to vector<512x512xbf16>
    %cst_82 = arith.constant dense<0.000000e+00> : vector<4x512xf32>
    %173 = tpu.matmul %170, %172, %cst_82 {dimension_numbers = #tpu.dot_dimension_numbers<[1], [0], [0], [1], [0, 0, 1, 1], [], []>} : vector<4x512xbf16>, vector<512x512xbf16>, vector<4x512xf32> -> vector<4x512xf32>
    %174 = arith.addf %167, %173 : vector<4x512xf32>
    %175 = vector.broadcast %157 : vector<1x512xf32> to vector<4x512xf32>
    %176 = arith.addf %174, %175 : vector<4x512xf32>
    %cst_83 = arith.constant 0.000000e+00 : f32
    %177 = vector.broadcast %cst_83 : f32 to vector<4x512xf32>
    %178 = arith.maximumf %176, %177 : vector<4x512xf32>
    %179 = arith.mulf %178, %116 : vector<4x512xf32>
    %cst_84 = arith.constant 0.000000e+00 : f32
    %180 = vector.broadcast %cst_84 : f32 to vector<2x512xf32>
    %181 = vector.extract_strided_slice %179 {offsets = [0, 0], sizes = [2, 512], strides = [1, 1]} : vector<4x512xf32> to vector<2x512xf32>
    %182 = tpu.concatenate %180, %181 in 0 : vector<2x512xf32>, vector<2x512xf32> -> vector<4x512xf32>
    %183 = arith.maximumf %179, %182 : vector<4x512xf32>
    %cst_85 = arith.constant 0.000000e+00 : f32
    %184 = vector.broadcast %cst_85 : f32 to vector<2x512xf32>
    %185 = vector.extract_strided_slice %179 {offsets = [2, 0], sizes = [2, 512], strides = [1, 1]} : vector<4x512xf32> to vector<2x512xf32>
    %186 = tpu.concatenate %185, %184 in 0 : vector<2x512xf32>, vector<2x512xf32> -> vector<4x512xf32>
    %187 = arith.maximumf %183, %186 : vector<4x512xf32>
    %c0_86 = arith.constant 0 : index
    %c0_87 = arith.constant 0 : index
    %188 = vector.load %arg9[%c0_86, %c0_87] : memref<512x4xbf16, #tpu.memory_space<vmem>>, vector<512x4xbf16>
    %189 = vector.extract_strided_slice %187 {offsets = [0, 0], sizes = [2, 512], strides = [1, 1]} : vector<4x512xf32> to vector<2x512xf32>
    %190 = arith.truncf %189 : vector<2x512xf32> to vector<2x512xbf16>
    %cst_88 = arith.constant dense<0.000000e+00> : vector<2x4xf32>
    %191 = tpu.matmul %190, %188, %cst_88 {dimension_numbers = #tpu.dot_dimension_numbers<[1], [0], [0], [1], [0, 0, 1, 1], [], []>} : vector<2x512xbf16>, vector<512x4xbf16>, vector<2x4xf32> -> vector<2x4xf32>
    %c0_89 = arith.constant 0 : index
    %c0_90 = arith.constant 0 : index
    %192 = vector.load %arg10[%c0_89, %c0_90] : memref<1x4xf32, #tpu.memory_space<vmem>>, vector<1x4xf32>
    %193 = vector.broadcast %192 : vector<1x4xf32> to vector<2x4xf32>
    %194 = arith.addf %191, %193 : vector<2x4xf32>
    %c0_91 = arith.constant 0 : index
    %c0_92 = arith.constant 0 : index
    %195 = vector.load %arg11[%c0_91, %c0_92] : memref<2x4xf32, #tpu.memory_space<vmem>>, vector<2x4xf32>
    tpu.vector_store %arg11[%c0_91, %c0_92], %194 {strides = array<i32>} : memref<2x4xf32, #tpu.memory_space<vmem>>, vector<2x4xf32>,
    return
  }
  func.func @transform_0(%arg0: i32) -> (i32, i32) {
    %c0_i32 = arith.constant 0 : i32
    %c0_i32_0 = arith.constant 0 : i32
    %c0_i32_1 = arith.constant 0 : i32
    return %c0_i32, %c0_i32_0 : i32, i32
  }
  func.func @transform_1(%arg0: i32) -> (i32, i32) {
    %c0_i32 = arith.constant 0 : i32
    %c0_i32_0 = arith.constant 0 : i32
    %c0_i32_1 = arith.constant 0 : i32
    return %c0_i32, %c0_i32_0 : i32, i32
  }
  func.func @transform_2(%arg0: i32) -> (i32, i32) {
    %c0_i32 = arith.constant 0 : i32
    %c0_i32_0 = arith.constant 0 : i32
    %c0_i32_1 = arith.constant 0 : i32
    return %c0_i32, %c0_i32_0 : i32, i32
  }
  func.func @transform_3(%arg0: i32) -> (i32, i32) {
    %c0_i32 = arith.constant 0 : i32
    %c0_i32_0 = arith.constant 0 : i32
    %c0_i32_1 = arith.constant 0 : i32
    return %c0_i32, %c0_i32_0 : i32, i32
  }
  func.func @transform_8(%arg0: i32) -> (i32, i32) {
    %c0_i32 = arith.constant 0 : i32
    %c0_i32_0 = arith.constant 0 : i32
    %c0_i32_1 = arith.constant 0 : i32
    return %c0_i32, %c0_i32_0 : i32, i32
  }
  func.func @transform_9(%arg0: i32) -> (i32, i32) {
    %c0_i32 = arith.constant 0 : i32
    %c0_i32_0 = arith.constant 0 : i32
    %c0_i32_1 = arith.constant 0 : i32
    return %c0_i32, %c0_i32_0 : i32, i32
  }
  func.func @transform_10(%arg0: i32) -> (i32, i32) {
    %c0_i32 = arith.constant 0 : i32
    %c0_i32_0 = arith.constant 0 : i32
    %c0_i32_1 = arith.constant 0 : i32
    return %c0_i32, %c0_i32_0 : i32, i32
  }
}

</mosaic_0001>

<bundles_post_ra>
// kernel: model_forward.1
= control target key start
LH: loop header
LB: loop body
LE: loop exit
PB: predicated region body
PF: predicated region fallthrough
CT: control target
= control target key end

     0   :  { %15 = vsyncpa [#allocation8], 0  ;;  %s17079_s0 = inlined_call_operand.hbm [shape: f32[2,32], index: 0, kind: input, shape index: {}]   ;;  %s17080_s1 = inlined_call_operand.hbm [shape: bf16[32,1024], index: 1, kind: input, shape index: {}]   ;;  %s17081_s2 = inlined_call_operand.hbm [shape: f32[1,1024], index: 2, kind: input, shape index: {}]   ;;  %s17082_s3 = inlined_call_operand.hbm [shape: f32[11,512], index: 3, kind: input, shape index: {}]   ;;  %s17083_s4 = inlined_call_operand.hbm [shape: bf16[5,256,512], index: 4, kind: input, shape index: {}]   ;;  %s17084_s5 = inlined_call_operand.hbm [shape: bf16[3,512,512], index: 5, kind: input, shape index: {}]   ;;  %s17085_s6 = inlined_call_operand.hbm [shape: bf16[3,512,512], index: 6, kind: input, shape index: {}]   ;;  %s17086_s7 = inlined_call_operand.hbm [shape: bf16[5,512,512], index: 7, kind: input, shape index: {}]   ;;  %s17087_s8 = inlined_call_operand.vmem [shape: bf16[512,4], index: 8, kind: input, shape index: {}]   ;;  %s17088_s9 = inlined_call_operand.hbm [shape: f32[1,4], index: 9, kind: input, shape index: {}]   ;;  %s17089_s10 = inlined_call_operand.hbm [shape: f32[2,4], index: 10, kind: output, shape index: {}]  }
   0x1   :  { %16 = vsyncpa [#allocation11], 0 }
   0x2   :  { %17 = vsyncpa [#allocation14], 0 }
   0x3   :  { %18 = vsyncpa [#allocation9], 0  ;;  %s16321_s13 = smov [#allocation10]  }
   0x4   :  { %s34_s14 = sshll.u32 %s16321_s13, 4  ;;  %s35_s14 = int_to_ptr.vmem [resolvable:$true] %s34_s14 }
   0x5   :  { %s16113_s15 = scalar_lea.vmem %s35_s14, 2048  ;;  %p16118_p1 = scmp.lt.s32.totalorder %s35_s14, %s35_s14 }
   0x6   :  { %p16114_p0 = scmp.ne.s32.totalorder %s35_s14, %s16113_s15  ;;  %p16119_p2 = scmp.lt.s32.totalorder %s16113_s15, %s16113_s15 }
   0x8   :  { %p16120_p3 = por %p16119_p2, %p16118_p1 }
   0xa   :  { %p16121_p4 = pnand %p16120_p3, %p16114_p0 }
   0xc   :  { %16124 = shalt.err (!%p16121_p4)
}
   0xd   :  { %s16322_s16 = smov 512   ;;  %s16323_s17 = smov 32  }
   0xe   :  { %40 = dma.hbm_to_vmem [thread:$0]  %s17080_s1, 2048, %s35_s14, [#allocation11], %s16322_s16, %s16322_s16, %s16323_s17  }
   0xf   :  { %s16324_s20 = smov [#allocation13]   ;;  %s16325_s22 = smov [#allocation7]  }
  0x10   :  { %s56_s21 = sshll.u32 %s16324_s20, 4  ;;  %s25_s23 = sshll.u32 %s16325_s22, 4  ;;  %s57_s21 = int_to_ptr.vmem [resolvable:$true] %s56_s21  ;;  %s26_s23 = int_to_ptr.vmem [resolvable:$true] %s25_s23 }
  0x11   :  { %s16133_s24 = scalar_lea.vmem %s57_s21, 1024  ;;  %p16138_p6 = scmp.lt.s32.totalorder %s57_s21, %s57_s21 }
  0x12   :  { %p16134_p5 = scmp.ne.s32.totalorder %s57_s21, %s16133_s24  ;;  %p16139_p7 = scmp.lt.s32.totalorder %s16133_s24, %s16133_s24 }
  0x14   :  { %p16140_p8 = por %p16139_p7, %p16138_p6 }
  0x16   :  { %p16141_p9 = pnand %p16140_p8, %p16134_p5 }
  0x18   :  { %16144 = shalt.err (!%p16141_p9)
}
  0x19   :  { %62 = dma.hbm_to_vmem [thread:$0]  %s17082_s3, 1024, %s57_s21, [#allocation14], %s16322_s16, %s16322_s16, %s16323_s17  }
  0x1a   :  { %s16153_s27 = scalar_lea.vmem %s26_s23, 32  ;;  %p16158_p11 = scmp.lt.s32.totalorder %s26_s23, %s26_s23 }
  0x1b   :  { %p16154_p10 = scmp.ne.s32.totalorder %s26_s23, %s16153_s27  ;;  %p16159_p12 = scmp.lt.s32.totalorder %s16153_s27, %s16153_s27 }
  0x1d   :  { %p16160_p13 = por %p16159_p12, %p16158_p11 }
  0x1f   :  { %p16161_p0 = pnand %p16160_p13, %p16154_p10 }
  0x21   :  { %16164 = shalt.err (!%p16161_p0)
}
  0x22   :  { %28 = dma.hbm_to_vmem [thread:$0]  %s17079_s0, 32, %s26_s23, [#allocation8]  }
  0x23   :  { %s16326_s29 = smov [#allocation12]   ;;  %s16327_s11 = smov [#allocation15]  }
  0x24   :  { %s47_s30 = sshll.u32 %s16326_s29, 4  ;;  %s71_s12 = sshll.u32 %s16327_s11, 4  ;;  %s48_s30 = int_to_ptr.vmem [resolvable:$true] %s47_s30  ;;  %s72_s12 = int_to_ptr.vmem [resolvable:$true] %s71_s12 }
  0x25   :  { %s16173_s13 = scalar_lea.vmem %s48_s30, 128  ;;  %p16178_p2 = scmp.lt.s32.totalorder %s48_s30, %s48_s30 }
  0x26   :  { %p16174_p1 = scmp.ne.s32.totalorder %s48_s30, %s16173_s13  ;;  %p16179_p3 = scmp.lt.s32.totalorder %s16173_s13, %s16173_s13 }
  0x28   :  { %p16180_p4 = por %p16179_p3, %p16178_p2 }
  0x2a   :  { %p16181_p5 = pnand %p16180_p4, %p16174_p1 }
  0x2c   :  { %16184 = shalt.err (!%p16181_p5)
}
  0x2d   :  { %50 = dma.hbm_to_vmem [thread:$0]  %s17081_s2, 128, %s48_s30, [#allocation11]  }
  0x2e   :  { %s16193_s15 = scalar_lea.vmem %s72_s12, 16  ;;  %s16197_s0 = scalar_lea.vmem %s72_s12, 32 }
  0x2f   :  { %p16194_p6 = scmp.ne.s32.totalorder %s72_s12, %s16193_s15  ;;  %p16198_p7 = scmp.lt.s32.totalorder %s72_s12, %s72_s12 }
  0x30   :  { %p16199_p8 = scmp.lt.s32.totalorder %s16197_s0, %s16193_s15 }
  0x32   :  { %p16200_p9 = por %p16199_p8, %p16198_p7 }
  0x34   :  { %p16201_p10 = pnand %p16200_p9, %p16194_p6 }
  0x36   :  { %16204 = shalt.err (!%p16201_p10)
}
  0x37   :  { %74 = dma.hbm_to_vmem [thread:$0]  %s17088_s9, 16, %s72_s12, [#allocation14]  }
  0x38   :  { %16305 = dma.done.wait [#allocation8], 32  }
  0x39   :  { %16306 = vsyncadd [#allocation8], 4294967264 }
  0x3a   :  { %16307 = dma.done.wait [#allocation11], 2176  }
  0x3b   :  { %16308 = vsyncadd [#allocation11], 4294965120 }
  0x3c   :  { %16309 = dma.done.wait [#allocation14], 1040  }
  0x3d   :  { %16310 = vsyncadd [#allocation14], 4294966256  ;;  %v16328_v0 = vmov 0   ;;  %v16404_v1 = vld [vmem:[#allocation13 + $0x10] sm:$0xff]  ;;  %v16406_v2 = vld [vmem:[#allocation13 + $0x18] sm:$0xff]  ;;  %vm286_vm0 = vcmask 261120  }
  0x3e   :  { %322 = vmatprep.mubr.bf16.mxu0 %v16328_v0  ;;  %363 = vmatprep.mubr.bf16.mxu1 %v16328_v0  ;;  %v16408_v3 = vld [vmem:[#allocation13 + $0x20] sm:$0x7]  ;;  %v16410_v4 = vld [vmem:[#allocation13 + $0x28] sm:$0x7]  ;;  %v16412_v5 = vld [vmem:[#allocation13 + $0x30] sm:$0x7] }
  0x3f   :  { %v16414_v6 = vld [vmem:[#allocation13 + $0x38] sm:$0x7]  ;;  %v157_v9 = vld [vmem:[#allocation10 + $0x48] sm:$0xff]  ;;  %v158_v21 = vld [vmem:[#allocation10 + $0x50] sm:$0xff]  ;;  %s16329_s2 = smov [#allocation2]   ;;  %s16330_s18 = smov [#allocation3]  }
  0x40   :  { %v156_v7 = vld [vmem:[#allocation10 + $0x40] sm:$0xff]  ;;  %v161_v11 = vld [vmem:[#allocation10 + $0x68] sm:$0xff]  ;;  %v162_v22 = vld [vmem:[#allocation10 + $0x70] sm:$0xff]  ;;  %s98_s9 = sshll.u32 %s16329_s2, 4  ;;  %s110_s19 = sshll.u32 %s16330_s18, 4  ;;  %s99_s9 = int_to_ptr.vmem [resolvable:$true] %s98_s9  ;;  %s111_s19 = int_to_ptr.vmem [resolvable:$true] %s110_s19 }
  0x41   :  { %v160_v8 = vld [vmem:[#allocation10 + $0x60] sm:$0xff]  ;;  %v12170_v15 = vcombine.high %v157_v9, %v161_v11  ;;  %v12169_v16 = vcombine.low %v157_v9, %v161_v11  ;;  %v149_v18 = vld [vmem:[#allocation10 + $0x8] sm:$0xff]  ;;  %v159_v23 = vld [vmem:[#allocation10 + $0x58] sm:$0xff]  ;;  %v12172_v28 = vcombine.high %v158_v21, %v162_v22  ;;  %v12171_v35 = vcombine.low %v158_v21, %v162_v22  ;;  %s16213_s20 = scalar_lea.vmem %s99_s9, 40960  ;;  %p16218_p12 = scmp.lt.s32.totalorder %s99_s9, %s99_s9 }
  0x42   :  { %v12168_v10 = vcombine.high %v156_v7, %v160_v8  ;;  %v12167_v12 = vcombine.low %v156_v7, %v160_v8  ;;  %v148_v13 = vld [vmem:[#allocation10] sm:$0xff]  ;;  %v153_v19 = vld [vmem:[#allocation10 + $0x28] sm:$0xff]  ;;  %v146_v25 = vld [vmem:[#allocation7] sm:$0x3]  ;;  %p16214_p11 = scmp.ne.s32.totalorder %s99_s9, %s16213_s20  ;;  %p16219_p13 = scmp.lt.s32.totalorder %s16213_s20, %s16213_s20 }
  0x43   :  { %v152_v14 = vld [vmem:[#allocation10 + $0x20] sm:$0xff]  ;;  %v12162_v20 = vcombine.high %v149_v18, %v153_v19  ;;  %343 = vmatprep.subr.bf16.mxu1 %v12170_v15  ;;  %v163_v26 = vld [vmem:[#allocation10 + $0x78] sm:$0xff]  ;;  %v12161_v27 = vcombine.low %v149_v18, %v153_v19  ;;  %v150_v30 = vld [vmem:[#allocation10 + $0x10] sm:$0xff]  ;;  %v147_v32 = vpack.c.bf16 %v146_v25, %v146_v25 }
  0x44   :  { %v12160_v17 = vcombine.high %v148_v13, %v152_v14  ;;  %302 = vmatprep.subr.bf16.mxu0 %v12168_v10  ;;  %v12159_v24 = vcombine.low %v148_v13, %v152_v14  ;;  %344 = vmatpush1.bf16.msra.mxu1 %v12169_v16  ;;  %v12174_v29 = vcombine.high %v159_v23, %v163_v26  ;;  %v154_v31 = vld [vmem:[#allocation10 + $0x30] sm:$0xff]  ;;  %v151_v33 = vld [vmem:[#allocation10 + $0x18] sm:$0xff]  ;;  %p16220_p0 = por %p16219_p13, %p16218_p12 }
  0x45   :  { %303 = vmatpush1.bf16.msra.mxu0 %v12167_v12  ;;  %345 = vmatprep.subr.bf16.mxu1 %v12162_v20  ;;  %v155_v34 = vld [vmem:[#allocation10 + $0x38] sm:$0xff]  ;;  %v12173_v36 = vcombine.low %v159_v23, %v163_v26  ;;  %v12164_v37 = vcombine.high %v150_v30, %v154_v31  ;;  %v12163_v39 = vcombine.low %v150_v30, %v154_v31 }
  0x46   :  { %304 = vmatprep.subr.bf16.mxu0 %v12160_v17  ;;  %v12166_v38 = vcombine.high %v151_v33, %v155_v34  ;;  %v12165_v40 = vcombine.low %v151_v33, %v155_v34  ;;  %p16221_p1 = pnand %p16220_p0, %p16214_p11 }
  0x48   :  { %346 = vmatpush1.bf16.msra.mxu1 %v12161_v27 }
  0x49   :  { %305 = vmatpush1.bf16.msra.mxu0 %v12159_v24  ;;  %425 = vmatprep.subr.bf16.mxu1 %v12174_v29 }
  0x4a   :  { %384 = vmatprep.subr.bf16.mxu0 %v12172_v28 }
  0x4b   :  { %12176 = vmatmul.mubr.msk.bf16.vlgmr.msra.gmra.mxu1 %vm286_vm0, %v147_v32 }
  0x4c   :  { %12175 = vmatmul.mubr.msk.bf16.vlgmr.msra.gmra.mxu0 %vm286_vm0, %v147_v32  ;;  %426 = vmatpush1.bf16.msra.mxu1 %v12173_v36 }
  0x4d   :  { %385 = vmatpush1.bf16.msra.mxu0 %v12171_v35  ;;  %427 = vmatprep.subr.bf16.mxu1 %v12166_v38 }
  0x4e   :  { %386 = vmatprep.subr.bf16.mxu0 %v12164_v37  ;;  %404 = vmatprep.mubr.bf16.mxu0 %v16328_v0 }
  0x4f   :  { %445 = vmatprep.mubr.bf16.mxu1 %v16328_v0 }
  0x50   :  { %428 = vmatpush1.bf16.msra.mxu1 %v12165_v40 }
  0x51   :  { %387 = vmatpush1.bf16.msra.mxu0 %v12163_v39 }
  0x53   :  { %12178 = vmatmul.mubr.msk.bf16.vlgmr.msra.gmra.mxu1 %vm286_vm0, %v147_v32 }
  0x54   :  { %12177 = vmatmul.mubr.msk.bf16.vlgmr.msra.gmra.mxu0 %vm286_vm0, %v147_v32 }
  0x55   :  { %16224 = shalt.err (!%p16221_p1)  }
  0x56   :  { %101 = dma.hbm_to_vmem [thread:$0]  %s17083_s4, 40960, %s99_s9, [#allocation6] }
  0x57   :  { %s16233_s23 = scalar_lea.vmem %s111_s19, 49152  ;;  %p16238_p3 = scmp.lt.s32.totalorder %s111_s19, %s111_s19 }
  0x58   :  { %p16234_p2 = scmp.ne.s32.totalorder %s111_s19, %s16233_s23  ;;  %p16239_p4 = scmp.lt.s32.totalorder %s16233_s23, %s16233_s23 }
  0x5a   :  { %p16240_p5 = por %p16239_p4, %p16238_p3 }
  0x5c   :  { %p16241_p6 = pnand %p16240_p5, %p16234_p2 }
  0x5e   :  { %16244 = shalt.err (!%p16241_p6)  }
  0x5f   :  { %113 = dma.hbm_to_vmem [thread:$0]  %s17084_s5, 49152, %s111_s19, [#allocation6 + $0x1] }
  0x60   :  { %s16331_s26 = smov [#allocation4]   ;;  %s16332_s1 = smov [#allocation5]  }
  0x61   :  { %s122_s27 = sshll.u32 %s16331_s26, 4  ;;  %s134_s28 = sshll.u32 %s16332_s1, 4  ;;  %s123_s27 = int_to_ptr.vmem [resolvable:$true] %s122_s27  ;;  %s135_s28 = int_to_ptr.vmem [resolvable:$true] %s134_s28 }
  0x62   :  { %s16253_s29 = scalar_lea.vmem %s123_s27, 49152  ;;  %p16258_p8 = scmp.lt.s32.totalorder %s123_s27, %s123_s27 }
  0x63   :  { %p16254_p7 = scmp.ne.s32.totalorder %s123_s27, %s16253_s29  ;;  %p16259_p9 = scmp.lt.s32.totalorder %s16253_s29, %s16253_s29 }
  0x65   :  { %p16260_p10 = por %p16259_p9, %p16258_p8 }
  0x67   :  { %p16261_p11 = pnand %p16260_p10, %p16254_p7 }
  0x69   :  { %16264 = shalt.err (!%p16261_p11)  }
  0x6a   :  { %125 = dma.hbm_to_vmem [thread:$0]  %s17085_s6, 49152, %s123_s27, [#allocation6 + $0x2] }
  0x6b   :  { %s16273_s11 = scalar_lea.vmem %s135_s28, 81920  ;;  %p16278_p13 = scmp.lt.s32.totalorder %s135_s28, %s135_s28 }
  0x6c   :  { %p16274_p12 = scmp.ne.s32.totalorder %s135_s28, %s16273_s11  ;;  %p16279_p0 = scmp.lt.s32.totalorder %s16273_s11, %s16273_s11 }
  0x6e   :  { %p16280_p1 = por %p16279_p0, %p16278_p13 }
  0x70   :  { %p16281_p2 = pnand %p16280_p1, %p16274_p12 }
  0x72   :  { %16284 = shalt.err (!%p16281_p2)  }
  0x73   :  { %137 = dma.hbm_to_vmem [thread:$0]  %s17086_s7, 81920, %s135_s28, [#allocation6 + $0x3]  ;;  %v166_v41 = vlaneseq  ;;  %v164_v44 = vld [vmem:[#allocation12] sm:$0xff]  ;;  %vm537_vm2 = vcmask 1041408   ;;  %vm540_vm3 = vcmask 1043456   ;;  %vm543_vm6 = vcmask 1045504  }
  0x75   :  { %v167_v42 = vshrl.u32 %v166_v41, 7 }
  0x77   :  { %v16432_v43 = vsub.s32 0, %v167_v42  ;;  %v16434_v45 = vsub.s32 2, %v167_v42  ;;  %v16436_v46 = vsub.s32 1, %v167_v42  ;;  %v16438_v47 = vsub.s32 3, %v167_v42 }
  0x78   :  { %v16446_v55 = vsub.s32 4, %v167_v42  ;;  %v16450_v58 = vsub.s32 6, %v167_v42  ;;  %v16455_v62 = vsub.s32 5, %v167_v42  ;;  %v16460_v8 = vsub.s32 7, %v167_v42 }
  0x79   :  { %v169_v48 = vrot.slane %v164_v44, %v16432_v43  ;;  %v177_v49 = vrot.slane %v164_v44, %v16434_v45  ;;  %v173_v50 = vrot.slane %v164_v44, %v16436_v46  ;;  %v181_v52 = vrot.slane %v164_v44, %v16438_v47 }
  0x7a   :  { %v185_v12 = vrot.slane %v164_v44, %v16446_v55  ;;  %v193_v16 = vrot.slane %v164_v44, %v16450_v58  ;;  %v189_v20 = vrot.slane %v164_v44, %v16455_v62  ;;  %v197_v24 = vrot.slane %v164_v44, %v16460_v8 }
 0x10b   :  { %v365_v54 = vpop.f32.mrf.mxu1 }
 0x10c   :  { %v324_v51 = vpop.f32.mrf.mxu0  ;;  %v16448_v56 = vadd.f32 %v365_v54, %v177_v49 }
 0x10d   :  { %v16444_v53 = vadd.f32 %v324_v51, %v169_v48  ;;  %v367_v61 = vpop.f32.mrf.mxu1 }
 0x10e   :  { %v326_v57 = vpop.f32.mrf.mxu0  ;;  %v464_v63 = vmin.f32 %v16448_v56, 0.0  ;;  %v16458_v0 = vadd.f32 %v367_v61, %v181_v52  ;;  %vm456_vm1 = vcmp.gt.f32.partialorder %v16448_v56, 0.0 }
 0x10f   :  { %v462_v59 = vmin.f32 %v16444_v53, 0.0  ;;  %v16453_v60 = vadd.f32 %v326_v57, %v173_v50  ;;  %v369_v11 = vpop.f32.mrf.mxu1  ;;  %vm454_vm4 = vcmp.gt.f32.partialorder %v16444_v53, 0.0 }
 0x110   :  { %v328_v7 = vpop.f32.mrf.mxu0  ;;  %v473_v13 = vmul.f32 16.666668, %v464_v63  ;;  %v465_v14 = vmin.f32 %v16458_v0, 0.0  ;;  %vm457_vm5 = vcmp.gt.f32.partialorder %v16458_v0, 0.0 }
 0x111   :  { %v471_v9 = vmul.f32 16.666668, %v462_v59  ;;  %v463_v10 = vmin.f32 %v16453_v60, 0.0  ;;  %v370_v19 = vpop.f32.mrf.mxu1  ;;  %v16480_v7 = vld [vmem:[#allocation13] sm:$0xff]  ;;  %vm455_vm7 = vcmp.gt.f32.partialorder %v16453_v60, 0.0 }
 0x112   :  { %v329_v15 = vpop.f32.mrf.mxu0  ;;  %v483_v21 = vmul.f32 1.442695, %v473_v13  ;;  %v474_v22 = vmul.f32 16.666668, %v465_v14 }
 0x113   :  { %v479_v17 = vmul.f32 1.442695, %v471_v9  ;;  %v472_v18 = vmul.f32 16.666668, %v463_v10  ;;  %v447_v26 = vpop.f32.mrf.mxu1  ;;  %v16482_v9 = vld [vmem:[#allocation13 + $0x8] sm:$0xff]  ;;  %v549_v15 = vrot.slane %v16480_v7, %v16432_v43 }
 0x114   :  { %v406_v23 = vpop.f32.mrf.mxu0  ;;  %13849 = vpow2.f32 %v483_v21  ;;  %v485_v28 = vmul.f32 1.442695, %v474_v22  ;;  %v16470_v29 = vadd.f32 %v447_v26, %v193_v16  ;;  %v553_v16 = vrot.slane %v16482_v9, %v16432_v43 }
 0x115   :  { %v16468_v25 = vadd.f32 %v406_v23, %v185_v12  ;;  %v481_v27 = vmul.f32 1.442695, %v472_v18  ;;  %13851 = vpow2.f32 %v479_v17  ;;  %v449_v33 = vpop.f32.mrf.mxu1 }
 0x116   :  { %v408_v30 = vpop.f32.mrf.mxu0  ;;  %13853 = vpow2.f32 %v485_v28  ;;  %v468_v34 = vmin.f32 %v16470_v29, 0.0  ;;  %v16476_v35 = vadd.f32 %v449_v33, %v197_v24  ;;  %vm460_vm9 = vcmp.gt.f32.partialorder %v16470_v29, 0.0 }
 0x117   :  { %v466_v31 = vmin.f32 %v16468_v25, 0.0  ;;  %v16473_v32 = vadd.f32 %v408_v30, %v189_v20  ;;  %v451_v39 = vpop.f32.mrf.mxu1  ;;  %13855 = vpow2.f32 %v481_v27  ;;  %v559_v20 = vrot.slane %v16480_v7, %v16436_v46 }
 0x118   :  { %v410_v36 = vpop.f32.mrf.mxu0  ;;  %v477_v40 = vmul.f32 16.666668, %v468_v34  ;;  %v469_v41 = vmin.f32 %v16476_v35, 0.0  ;;  %vm458_vm8 = vcmp.gt.f32.partialorder %v16468_v25, 0.0  ;;  %vm461_vm11 = vcmp.gt.f32.partialorder %v16476_v35, 0.0 }
 0x119   :  { %v475_v37 = vmul.f32 16.666668, %v466_v31  ;;  %v467_v38 = vmin.f32 %v16473_v32, 0.0  ;;  %v452_v49 = vpop.f32.mrf.mxu1  ;;  %vm459_vm10 = vcmp.gt.f32.partialorder %v16473_v32, 0.0 }
 0x11a   :  { %v411_v42 = vpop.f32.mrf.mxu0  ;;  %v491_v50 = vmul.f32 1.442695, %v477_v40  ;;  %v478_v51 = vmul.f32 16.666668, %v469_v41 }
 0x11b   :  { %v487_v44 = vmul.f32 1.442695, %v475_v37  ;;  %v476_v48 = vmul.f32 16.666668, %v467_v38 }
 0x11c   :  { %v493_v54 = vmul.f32 1.442695, %v478_v51 }
 0x11d   :  { %13857 = vpow2.f32 %v487_v44  ;;  %v489_v52 = vmul.f32 1.442695, %v476_v48 }
 0x11e   :  { %13859 = vpow2.f32 %v491_v50 }
 0x11f   :  { %13861 = vpow2.f32 %v489_v52 }
 0x120   :  { %13863 = vpow2.f32 %v493_v54 }
 0x121   :  { %v13850_v57 = vpop.eup %13849 }
 0x122   :  { %v13852_v59 = vpop.eup %13851  ;;  %v12181_v61 = vadd.f32 -1.0, %v13850_v57  ;;  %v563_v57 = vrot.slane %v16482_v9, %v16436_v46 }
 0x123   :  { %v13854_v63 = vpop.eup %13853  ;;  %v12179_v13 = vadd.f32 -1.0, %v13852_v59 }
 0x124   :  { %v505_v10 = vmul.f32 0.06, %v12181_v61  ;;  %v12182_v11 = vadd.f32 -1.0, %v13854_v63  ;;  %v13856_v12 = vpop.eup %13855 }
 0x125   :  { %v12180_v19 = vadd.f32 -1.0, %v13856_v12  ;;  %v503_v24 = vmul.f32 0.06, %v12179_v13 }
 0x126   :  { %v506_v14 = vmul.f32 0.06, %v12182_v11  ;;  %v513_v18 = vsel %vm456_vm1, %v16448_v56, %v505_v10 }
 0x127   :  { %v521_v28 = vrot.slane %v513_v18, 6  ;;  %v504_v33 = vmul.f32 0.06, %v12180_v19 }
 0x128   :  { %v514_v26 = vsel %vm457_vm5, %v16458_v0, %v506_v14  ;;  %v511_v0 = vsel %vm454_vm4, %v16444_v53, %v503_v24 }
 0x129   :  { %v522_v37 = vrot.slane %v514_v26, 6  ;;  %v538_v44 = vsel %vm537_vm2, %v511_v0, %v521_v28 }
 0x12a   :  { %v13858_v17 = vpop.eup %13857 }
 0x12b   :  { %v13860_v21 = vpop.eup %13859  ;;  %v12183_v22 = vadd.f32 -1.0, %v13858_v17 }
 0x12c   :  { %v13862_v23 = vpop.eup %13861  ;;  %v12185_v27 = vadd.f32 -1.0, %v13860_v21 }
 0x12d   :  { %v13864_v56 = vpop.eup %13863  ;;  %v507_v30 = vmul.f32 0.06, %v12183_v22  ;;  %v12184_v31 = vadd.f32 -1.0, %v13862_v23 }
 0x12e   :  { %v509_v34 = vmul.f32 0.06, %v12185_v27  ;;  %v12186_v36 = vadd.f32 -1.0, %v13864_v56 }
 0x12f   :  { %v515_v38 = vsel %vm458_vm8, %v16468_v25, %v507_v30  ;;  %v508_v39 = vmul.f32 0.06, %v12184_v31  ;;  %v512_v25 = vsel %vm455_vm7, %v16453_v60, %v504_v33 }
 0x130   :  { %v527_v40 = vrot.slane %v515_v38, 4  ;;  %v517_v41 = vsel %vm460_vm9, %v16470_v29, %v509_v34  ;;  %v510_v42 = vmul.f32 0.06, %v12186_v36  ;;  %v539_v52 = vsel %vm537_vm2, %v512_v25, %v522_v37 }
 0x131   :  { %v533_v48 = vrot.slane %v517_v41, 2  ;;  %v516_v49 = vsel %vm459_vm10, %v16473_v32, %v508_v39 }
 0x132   :  { %v541_v50 = vsel %vm540_vm3, %v538_v44, %v527_v40  ;;  %v528_v51 = vrot.slane %v516_v49, 4  ;;  %v518_v53 = vsel %vm461_vm11, %v16476_v35, %v510_v42 }
 0x133   :  { %v544_v29 = vsel %vm543_vm6, %v541_v50, %v533_v48  ;;  %v534_v54 = vrot.slane %v518_v53, 2 }
 0x134   :  { %v554_v32 = vmul.f32 %v549_v15, %v544_v29  ;;  %v542_v59 = vsel %vm540_vm3, %v539_v52, %v528_v51 }
 0x135   :  { %v545_v61 = vsel %vm543_vm6, %v542_v59, %v534_v54 }
 0x136   :  { %v564_v63 = vadd.f32 %v559_v20, %v554_v32  ;;  %v555_v60 = vmul.f32 %v553_v16, %v545_v61 }
 0x138   :  { %v16518_v10 = vpack.c.bf16 %v564_v63, %v564_v63  ;;  %v565_v11 = vadd.f32 %v563_v57, %v555_v60 }
 0x13a   :  { %v16520_v12 = vpack.c.bf16 %v565_v11, %v565_v11 }
 0x13b   :  { %16311 = dma.done.wait [#allocation6], 40960 }
 0x13c   :  { %16312 = vsyncadd [#allocation6], 4294926336  ;;  %v649_v35 = vrot.slane %v16520_v12, 7  ;;  %vm650_vm12 = vcmask 1040384   ;;  %v13865_v14 = vld [vmem:[#allocation2 + $0x2e4] ss:$16 sps:$4 sm:$0xff]  }
 0x13d   :  { %vm16524_vm13 = vmneg %vm650_vm12  ;;  %v13867_v15 = vld [vmem:[#allocation2 + $0x2ec] ss:$16 sps:$4 sm:$0xff]   ;;  %1042 = vmatprep.subr.bf16.mxu0 %v13865_v14  ;;  %v13869_v16 = vld [vmem:[#allocation2 + $0x2e0] ss:$16 sps:$4 sm:$0xff]   ;;  %vm1999_vm15 = vcmask 1042432  }
 0x13e   :  { %12252 = vmatprep.mubr.msk.bf16.mxu0 %vm16524_vm13, %v649_v35  ;;  %12256 = vmatprep.mubr.msk.bf16.mxu1 %vm16524_vm13, %v649_v35  ;;  %v13870_v17 = vld [vmem:[#allocation2 + $0x2e8] ss:$16 sps:$4 sm:$0xff]   ;;  %v13871_v18 = vld [vmem:[#allocation2 + $0x2c4] ss:$16 sps:$4 sm:$0xff]   ;;  %v13873_v19 = vld [vmem:[#allocation2 + $0x2cc] ss:$16 sps:$4 sm:$0xff]  }
 0x13f   :  { %1083 = vmatprep.subr.bf16.mxu1 %v13867_v15  ;;  %1043 = vmatpush1.bf16.msra.mxu0 %v13869_v16  ;;  %v13875_v20 = vld [vmem:[#allocation2 + $0x2c0] ss:$16 sps:$4 sm:$0xff]   ;;  %v13876_v21 = vld [vmem:[#allocation2 + $0x2c8] ss:$16 sps:$4 sm:$0xff]   ;;  %v13877_v22 = vld [vmem:[#allocation2 + $0x2a4] ss:$16 sps:$4 sm:$0xff]  }
 0x140   :  { %1084 = vmatpush1.bf16.msra.mxu1 %v13870_v17  ;;  %1044 = vmatprep.subr.bf16.mxu0 %v13871_v18  ;;  %v13879_v23 = vld [vmem:[#allocation2 + $0x2ac] ss:$16 sps:$4 sm:$0xff]   ;;  %v13881_v24 = vld [vmem:[#allocation2 + $0x2a0] ss:$16 sps:$4 sm:$0xff]   ;;  %v13882_v26 = vld [vmem:[#allocation2 + $0x2a8] ss:$16 sps:$4 sm:$0xff]  }
 0x141   :  { %1085 = vmatprep.subr.bf16.mxu1 %v13873_v19  ;;  %v13883_v27 = vld [vmem:[#allocation2 + $0x284] ss:$16 sps:$4 sm:$0xff]   ;;  %v13885_v56 = vld [vmem:[#allocation2 + $0x28c] ss:$16 sps:$4 sm:$0xff]   ;;  %v13887_v28 = vld [vmem:[#allocation2 + $0x280] ss:$16 sps:$4 sm:$0xff]  }
 0x142   :  { %v13888_v30 = vld [vmem:[#allocation2 + $0x288] ss:$16 sps:$4 sm:$0xff]   ;;  %v13889_v31 = vld [vmem:[#allocation2 + $0x264] ss:$16 sps:$4 sm:$0xff]   ;;  %v13891_v33 = vld [vmem:[#allocation2 + $0x26c] ss:$16 sps:$4 sm:$0xff]  }
 0x143   :  { %1045 = vmatpush1.bf16.msra.mxu0 %v13875_v20  ;;  %v13893_v34 = vld [vmem:[#allocation2 + $0x260] ss:$16 sps:$4 sm:$0xff]   ;;  %v13894_v36 = vld [vmem:[#allocation2 + $0x268] ss:$16 sps:$4 sm:$0xff]   ;;  %v13895_v37 = vld [vmem:[#allocation2 + $0x244] ss:$16 sps:$4 sm:$0xff]  }
 0x144   :  { %1086 = vmatpush1.bf16.msra.mxu1 %v13876_v21  ;;  %1046 = vmatprep.subr.bf16.mxu0 %v13877_v22  ;;  %v13897_v38 = vld [vmem:[#allocation2 + $0x24c] ss:$16 sps:$4 sm:$0xff]   ;;  %v13899_v39 = vld [vmem:[#allocation2 + $0x240] ss:$16 sps:$4 sm:$0xff]   ;;  %v13900_v0 = vld [vmem:[#allocation2 + $0x248] ss:$16 sps:$4 sm:$0xff]  }
 0x145   :  { %1087 = vmatprep.subr.bf16.mxu1 %v13879_v23  ;;  %v13901_v40 = vld [vmem:[#allocation2 + $0x224] ss:$16 sps:$4 sm:$0xff]   ;;  %v13903_v41 = vld [vmem:[#allocation2 + $0x22c] ss:$16 sps:$4 sm:$0xff]   ;;  %v13905_v42 = vld [vmem:[#allocation2 + $0x220] ss:$16 sps:$4 sm:$0xff]  }
 0x146   :  { %v13906_v44 = vld [vmem:[#allocation2 + $0x228] ss:$16 sps:$4 sm:$0xff]   ;;  %v13907_v48 = vld [vmem:[#allocation2 + $0x204] ss:$16 sps:$4 sm:$0xff]   ;;  %v13909_v49 = vld [vmem:[#allocation2 + $0x20c] ss:$16 sps:$4 sm:$0xff]  }
 0x147   :  { %1047 = vmatpush1.bf16.msra.mxu0 %v13881_v24  ;;  %v13911_v25 = vld [vmem:[#allocation2 + $0x200] ss:$16 sps:$4 sm:$0xff]   ;;  %v13912_v50 = vld [vmem:[#allocation2 + $0x208] ss:$16 sps:$4 sm:$0xff]   ;;  %v13913_v51 = vld [vmem:[#allocation2 + $0x3e4] ss:$16 sps:$4 sm:$0xff]  }
 0x148   :  { %1088 = vmatpush1.bf16.msra.mxu1 %v13882_v26  ;;  %1048 = vmatprep.subr.bf16.mxu0 %v13883_v27  ;;  %v13915_v53 = vld [vmem:[#allocation2 + $0x3ec] ss:$16 sps:$4 sm:$0xff]   ;;  %v13917_v52 = vld [vmem:[#allocation2 + $0x3e0] ss:$16 sps:$4 sm:$0xff]   ;;  %v13918_v29 = vld [vmem:[#allocation2 + $0x3e8] ss:$16 sps:$4 sm:$0xff]  }
 0x149   :  { %1089 = vmatprep.subr.bf16.mxu1 %v13885_v56  ;;  %v13919_v54 = vld [vmem:[#allocation2 + $0x3c4] ss:$16 sps:$4 sm:$0xff]   ;;  %v13921_v57 = vld [vmem:[#allocation2 + $0x3cc] ss:$16 sps:$4 sm:$0xff]   ;;  %v13923_v32 = vld [vmem:[#allocation2 + $0x3c0] ss:$16 sps:$4 sm:$0xff]  }
 0x14a   :  { %v13924_v59 = vld [vmem:[#allocation2 + $0x3c8] ss:$16 sps:$4 sm:$0xff]   ;;  %v13925_v61 = vld [vmem:[#allocation2 + $0x3a4] ss:$16 sps:$4 sm:$0xff]   ;;  %v13927_v63 = vld [vmem:[#allocation2 + $0x3ac] ss:$16 sps:$4 sm:$0xff]  }
 0x14b   :  { %1049 = vmatpush1.bf16.msra.mxu0 %v13887_v28  ;;  %v13929_v60 = vld [vmem:[#allocation2 + $0x3a0] ss:$16 sps:$4 sm:$0xff]   ;;  %v13930_v11 = vld [vmem:[#allocation2 + $0x3a8] ss:$16 sps:$4 sm:$0xff]   ;;  %v13931_v35 = vld [vmem:[#allocation2 + $0x384] ss:$16 sps:$4 sm:$0xff]  }
 0x14c   :  { %1090 = vmatpush1.bf16.msra.mxu1 %v13888_v30  ;;  %1050 = vmatprep.subr.bf16.mxu0 %v13889_v31  ;;  %v13933_v14 = vld [vmem:[#allocation2 + $0x38c] ss:$16 sps:$4 sm:$0xff]   ;;  %v13935_v15 = vld [vmem:[#allocation2 + $0x380] ss:$16 sps:$4 sm:$0xff]   ;;  %v13936_v16 = vld [vmem:[#allocation2 + $0x388] ss:$16 sps:$4 sm:$0xff]  }
 0x14d   :  { %1091 = vmatprep.subr.bf16.mxu1 %v13891_v33  ;;  %v13937_v17 = vld [vmem:[#allocation2 + $0x364] ss:$16 sps:$4 sm:$0xff]   ;;  %v13939_v18 = vld [vmem:[#allocation2 + $0x36c] ss:$16 sps:$4 sm:$0xff]   ;;  %v13941_v19 = vld [vmem:[#allocation2 + $0x360] ss:$16 sps:$4 sm:$0xff]  }
 0x14e   :  { %v13942_v20 = vld [vmem:[#allocation2 + $0x368] ss:$16 sps:$4 sm:$0xff]   ;;  %v13943_v21 = vld [vmem:[#allocation2 + $0x344] ss:$16 sps:$4 sm:$0xff]   ;;  %v13945_v22 = vld [vmem:[#allocation2 + $0x34c] ss:$16 sps:$4 sm:$0xff]  }
 0x14f   :  { %1051 = vmatpush1.bf16.msra.mxu0 %v13893_v34  ;;  %v13947_v23 = vld [vmem:[#allocation2 + $0x340] ss:$16 sps:$4 sm:$0xff]   ;;  %v13948_v24 = vld [vmem:[#allocation2 + $0x348] ss:$16 sps:$4 sm:$0xff]   ;;  %v13949_v26 = vld [vmem:[#allocation2 + $0x324] ss:$16 sps:$4 sm:$0xff]  }
 0x150   :  { %1092 = vmatpush1.bf16.msra.mxu1 %v13894_v36  ;;  %1052 = vmatprep.subr.bf16.mxu0 %v13895_v37  ;;  %v13951_v27 = vld [vmem:[#allocation2 + $0x32c] ss:$16 sps:$4 sm:$0xff]   ;;  %v13953_v56 = vld [vmem:[#allocation2 + $0x320] ss:$16 sps:$4 sm:$0xff]   ;;  %v13954_v28 = vld [vmem:[#allocation2 + $0x328] ss:$16 sps:$4 sm:$0xff]  }
 0x151   :  { %1093 = vmatprep.subr.bf16.mxu1 %v13897_v38  ;;  %v13955_v30 = vld [vmem:[#allocation2 + $0x304] ss:$16 sps:$4 sm:$0xff]   ;;  %v13957_v31 = vld [vmem:[#allocation2 + $0x30c] ss:$16 sps:$4 sm:$0xff]   ;;  %v13959_v33 = vld [vmem:[#allocation2 + $0x300] ss:$16 sps:$4 sm:$0xff]  }
 0x152   :  { %v13960_v34 = vld [vmem:[#allocation2 + $0x308] ss:$16 sps:$4 sm:$0xff]   ;;  %v13963_v36 = vld [vmem:[#allocation2 + $0xe4] ss:$16 sps:$4 sm:$0xff]   ;;  %v13966_v37 = vld [vmem:[#allocation2 + $0xec] ss:$16 sps:$4 sm:$0xff]  }
 0x153   :  { %1053 = vmatpush1.bf16.msra.mxu0 %v13899_v39  ;;  %v648_v38 = vrot.slane %v16518_v10, 7  ;;  %v13961_v39 = vld [vmem:[#allocation2 + $0xe0] ss:$16 sps:$4 sm:$0xff]   ;;  %vm16539_vm14 = vmneg %vm537_vm2 }
 0x154   :  { %1094 = vmatpush1.bf16.msra.mxu1 %v13900_v0  ;;  %1054 = vmatprep.subr.bf16.mxu0 %v13901_v40  ;;  %v13964_v0 = vld [vmem:[#allocation2 + $0xe8] ss:$16 sps:$4 sm:$0xff]   ;;  %v13969_v40 = vld [vmem:[#allocation2 + $0xc4] ss:$16 sps:$4 sm:$0xff]  }
 0x155   :  { %1095 = vmatprep.subr.bf16.mxu1 %v13903_v41  ;;  %v13972_v41 = vld [vmem:[#allocation2 + $0xcc] ss:$16 sps:$4 sm:$0xff]  }
 0x157   :  { %1055 = vmatpush1.bf16.msra.mxu0 %v13905_v42  ;;  %v13967_v42 = vld [vmem:[#allocation2 + $0xc0] ss:$16 sps:$4 sm:$0xff]  }
 0x158   :  { %1096 = vmatpush1.bf16.msra.mxu1 %v13906_v44  ;;  %1056 = vmatprep.subr.bf16.mxu0 %v13907_v48  ;;  %v13970_v44 = vld [vmem:[#allocation2 + $0xc8] ss:$16 sps:$4 sm:$0xff]   ;;  %v13975_v48 = vld [vmem:[#allocation2 + $0xa4] ss:$16 sps:$4 sm:$0xff]  }
 0x159   :  { %1097 = vmatprep.subr.bf16.mxu1 %v13909_v49  ;;  %v13978_v49 = vld [vmem:[#allocation2 + $0xac] ss:$16 sps:$4 sm:$0xff]  }
 0x15b   :  { %1057 = vmatpush1.bf16.msra.mxu0 %v13911_v25  ;;  %v13973_v25 = vld [vmem:[#allocation2 + $0xa0] ss:$16 sps:$4 sm:$0xff]  }
 0x15c   :  { %1098 = vmatpush1.bf16.msra.mxu1 %v13912_v50  ;;  %1058 = vmatprep.subr.bf16.mxu0 %v13913_v51  ;;  %v13976_v50 = vld [vmem:[#allocation2 + $0xa8] ss:$16 sps:$4 sm:$0xff]   ;;  %v13981_v51 = vld [vmem:[#allocation2 + $0x84] ss:$16 sps:$4 sm:$0xff]  }
 0x15d   :  { %1099 = vmatprep.subr.bf16.mxu1 %v13915_v53  ;;  %v13984_v53 = vld [vmem:[#allocation2 + $0x8c] ss:$16 sps:$4 sm:$0xff]  }
 0x15f   :  { %1059 = vmatpush2.bf16.msra.mxu0 %v13917_v52  ;;  %v13979_v52 = vld [vmem:[#allocation2 + $0x80] ss:$16 sps:$4 sm:$0xff]  }
 0x160   :  { %1100 = vmatpush2.bf16.msra.mxu1 %v13918_v29  ;;  %1060 = vmatprep.subr.bf16.mxu0 %v13919_v54  ;;  %v13982_v29 = vld [vmem:[#allocation2 + $0x88] ss:$16 sps:$4 sm:$0xff]   ;;  %v13987_v54 = vld [vmem:[#allocation2 + $0x64] ss:$16 sps:$4 sm:$0xff]  }
 0x161   :  { %1101 = vmatprep.subr.bf16.mxu1 %v13921_v57  ;;  %v13990_v57 = vld [vmem:[#allocation2 + $0x6c] ss:$16 sps:$4 sm:$0xff]  }
 0x163   :  { %1061 = vmatpush2.bf16.msra.mxu0 %v13923_v32  ;;  %v13985_v32 = vld [vmem:[#allocation2 + $0x60] ss:$16 sps:$4 sm:$0xff]  }
 0x164   :  { %1102 = vmatpush2.bf16.msra.mxu1 %v13924_v59  ;;  %1062 = vmatprep.subr.bf16.mxu0 %v13925_v61  ;;  %v13988_v59 = vld [vmem:[#allocation2 + $0x68] ss:$16 sps:$4 sm:$0xff]   ;;  %v13993_v61 = vld [vmem:[#allocation2 + $0x44] ss:$16 sps:$4 sm:$0xff]  }
 0x165   :  { %1103 = vmatprep.subr.bf16.mxu1 %v13927_v63  ;;  %v13996_v63 = vld [vmem:[#allocation2 + $0x4c] ss:$16 sps:$4 sm:$0xff]  }
 0x167   :  { %1063 = vmatpush2.bf16.msra.mxu0 %v13929_v60  ;;  %v576_v60 = vrot.slane %v16520_v12, 6 }
 0x168   :  { %1104 = vmatpush2.bf16.msra.mxu1 %v13930_v11  ;;  %1064 = vmatprep.subr.bf16.mxu0 %v13931_v35  ;;  %v13991_v11 = vld [vmem:[#allocation2 + $0x40] ss:$16 sps:$4 sm:$0xff]   ;;  %v13994_v35 = vld [vmem:[#allocation2 + $0x48] ss:$16 sps:$4 sm:$0xff]  }
 0x169   :  { %1105 = vmatprep.subr.bf16.mxu1 %v13933_v14  ;;  %v13999_v14 = vld [vmem:[#allocation2 + $0x24] ss:$16 sps:$4 sm:$0xff]  }
 0x16b   :  { %1065 = vmatpush2.bf16.msra.mxu0 %v13935_v15  ;;  %v14002_v15 = vld [vmem:[#allocation2 + $0x2c] ss:$16 sps:$4 sm:$0xff]  }
 0x16c   :  { %1106 = vmatpush2.bf16.msra.mxu1 %v13936_v16  ;;  %1066 = vmatprep.subr.bf16.mxu0 %v13937_v17  ;;  %v13997_v17 = vld [vmem:[#allocation2 + $0x20] ss:$16 sps:$4 sm:$0xff]   ;;  %v14077_v16 = vld [vmem:[#allocation2 + $0x484] ss:$16 sps:$4 sm:$0xff]  }
 0x16d   :  { %1107 = vmatprep.subr.bf16.mxu1 %v13939_v18  ;;  %v14000_v18 = vld [vmem:[#allocation2 + $0x28] ss:$16 sps:$4 sm:$0xff]  }
 0x16f   :  { %1067 = vmatpush2.bf16.msra.mxu0 %v13941_v19  ;;  %v14005_v19 = vld [vmem:[#allocation2 + $0x4] ss:$16 sps:$4 sm:$0xff]  }
 0x170   :  { %1108 = vmatpush2.bf16.msra.mxu1 %v13942_v20  ;;  %1068 = vmatprep.subr.bf16.mxu0 %v13943_v21  ;;  %v14008_v20 = vld [vmem:[#allocation2 + $0xc] ss:$16 sps:$4 sm:$0xff]   ;;  %v14003_v21 = vld [vmem:[#allocation2] ss:$16 sps:$4 sm:$0xff]  }
 0x171   :  { %1109 = vmatprep.subr.bf16.mxu1 %v13945_v22  ;;  %v14006_v22 = vld [vmem:[#allocation2 + $0x8] ss:$16 sps:$4 sm:$0xff]  }
 0x173   :  { %1069 = vmatpush2.bf16.msra.mxu0 %v13947_v23  ;;  %v14011_v23 = vld [vmem:[#allocation2 + $0x1e4] ss:$16 sps:$4 sm:$0xff]  }
 0x174   :  { %1110 = vmatpush2.bf16.msra.mxu1 %v13948_v24  ;;  %1070 = vmatprep.subr.bf16.mxu0 %v13949_v26  ;;  %v14014_v24 = vld [vmem:[#allocation2 + $0x1ec] ss:$16 sps:$4 sm:$0xff]   ;;  %v14009_v26 = vld [vmem:[#allocation2 + $0x1e0] ss:$16 sps:$4 sm:$0xff]  }
 0x175   :  { %1111 = vmatprep.subr.bf16.mxu1 %v13951_v27  ;;  %v14012_v27 = vld [vmem:[#allocation2 + $0x1e8] ss:$16 sps:$4 sm:$0xff]  }
 0x177   :  { %1071 = vmatpush2.bf16.msra.mxu0 %v13953_v56  ;;  %v14017_v56 = vld [vmem:[#allocation2 + $0x1c4] ss:$16 sps:$4 sm:$0xff]  }
 0x178   :  { %1112 = vmatpush2.bf16.msra.mxu1 %v13954_v28  ;;  %1072 = vmatprep.subr.bf16.mxu0 %v13955_v30  ;;  %v14020_v28 = vld [vmem:[#allocation2 + $0x1cc] ss:$16 sps:$4 sm:$0xff]   ;;  %v14015_v30 = vld [vmem:[#allocation2 + $0x1c0] ss:$16 sps:$4 sm:$0xff]  }
 0x179   :  { %1113 = vmatprep.subr.bf16.mxu1 %v13957_v31  ;;  %v14018_v31 = vld [vmem:[#allocation2 + $0x1c8] ss:$16 sps:$4 sm:$0xff]  }
 0x17b   :  { %1073 = vmatpush2.bf16.msra.mxu0 %v13959_v33  ;;  %v14023_v33 = vld [vmem:[#allocation2 + $0x1a4] ss:$16 sps:$4 sm:$0xff]  }
 0x17c   :  { %1114 = vmatpush2.bf16.msra.mxu1 %v13960_v34  ;;  %1444 = vmatprep.subr.bf16.mxu0 %v13963_v36  ;;  %v14026_v34 = vld [vmem:[#allocation2 + $0x1ac] ss:$16 sps:$4 sm:$0xff]   ;;  %v14021_v36 = vld [vmem:[#allocation2 + $0x1a0] ss:$16 sps:$4 sm:$0xff]  }
 0x17d   :  { %1485 = vmatprep.subr.bf16.mxu1 %v13966_v37  ;;  %v14024_v37 = vld [vmem:[#allocation2 + $0x1a8] ss:$16 sps:$4 sm:$0xff]  }
 0x17e   :  { %12254 = vmatmul.mubr.msk.bf16.vlgmr.msra.gmra.mxu0 %vm16524_vm13, %v648_v38 }
 0x17f   :  { %12258 = vmatmul.mubr.msk.bf16.vlgmr.msra.gmra.mxu1 %vm16524_vm13, %v648_v38  ;;  %1445 = vmatpush1.bf16.msra.mxu0 %v13961_v39  ;;  %v14029_v38 = vld [vmem:[#allocation2 + $0x184] ss:$16 sps:$4 sm:$0xff]   ;;  %v14032_v39 = vld [vmem:[#allocation2 + $0x18c] ss:$16 sps:$4 sm:$0xff]  }
 0x180   :  { %1486 = vmatpush1.bf16.msra.mxu1 %v13964_v0  ;;  %1446 = vmatprep.subr.bf16.mxu0 %v13969_v40  ;;  %v14027_v0 = vld [vmem:[#allocation2 + $0x180] ss:$16 sps:$4 sm:$0xff]   ;;  %v14030_v40 = vld [vmem:[#allocation2 + $0x188] ss:$16 sps:$4 sm:$0xff]  }
 0x181   :  { %1487 = vmatprep.subr.bf16.mxu1 %v13972_v41  ;;  %12324 = vmatprep.mubr.msk.bf16.mxu0 %vm16539_vm14, %v576_v60  ;;  %v14035_v41 = vld [vmem:[#allocation2 + $0x164] ss:$16 sps:$4 sm:$0xff]  }
 0x182   :  { %12328 = vmatprep.mubr.msk.bf16.mxu1 %vm16539_vm14, %v576_v60  ;;  %v14062_v60 = vld [vmem:[#allocation2 + $0x4ec] ss:$16 sps:$4 sm:$0xff]  }
 0x183   :  { %1447 = vmatpush1.bf16.msra.mxu0 %v13967_v42  ;;  %v14038_v42 = vld [vmem:[#allocation2 + $0x16c] ss:$16 sps:$4 sm:$0xff]  }
 0x184   :  { %1488 = vmatpush1.bf16.msra.mxu1 %v13970_v44  ;;  %1448 = vmatprep.subr.bf16.mxu0 %v13975_v48  ;;  %v14033_v44 = vld [vmem:[#allocation2 + $0x160] ss:$16 sps:$4 sm:$0xff]   ;;  %v14036_v48 = vld [vmem:[#allocation2 + $0x168] ss:$16 sps:$4 sm:$0xff]  }
 0x185   :  { %1489 = vmatprep.subr.bf16.mxu1 %v13978_v49  ;;  %v14041_v49 = vld [vmem:[#allocation2 + $0x144] ss:$16 sps:$4 sm:$0xff]  }
 0x187   :  { %1449 = vmatpush1.bf16.msra.mxu0 %v13973_v25  ;;  %v14044_v25 = vld [vmem:[#allocation2 + $0x14c] ss:$16 sps:$4 sm:$0xff]  }
 0x188   :  { %1490 = vmatpush1.bf16.msra.mxu1 %v13976_v50  ;;  %1450 = vmatprep.subr.bf16.mxu0 %v13981_v51  ;;  %v14039_v50 = vld [vmem:[#allocation2 + $0x140] ss:$16 sps:$4 sm:$0xff]   ;;  %v14042_v51 = vld [vmem:[#allocation2 + $0x148] ss:$16 sps:$4 sm:$0xff]  }
 0x189   :  { %1491 = vmatprep.subr.bf16.mxu1 %v13984_v53  ;;  %v14047_v53 = vld [vmem:[#allocation2 + $0x124] ss:$16 sps:$4 sm:$0xff]  }
 0x18b   :  { %1451 = vmatpush1.bf16.msra.mxu0 %v13979_v52  ;;  %v14050_v52 = vld [vmem:[#allocation2 + $0x12c] ss:$16 sps:$4 sm:$0xff]  }
 0x18c   :  { %1492 = vmatpush1.bf16.msra.mxu1 %v13982_v29  ;;  %1452 = vmatprep.subr.bf16.mxu0 %v13987_v54  ;;  %v14045_v29 = vld [vmem:[#allocation2 + $0x120] ss:$16 sps:$4 sm:$0xff]   ;;  %v14048_v54 = vld [vmem:[#allocation2 + $0x128] ss:$16 sps:$4 sm:$0xff]  }
 0x18d   :  { %1493 = vmatprep.subr.bf16.mxu1 %v13990_v57  ;;  %v14053_v57 = vld [vmem:[#allocation2 + $0x104] ss:$16 sps:$4 sm:$0xff]  }
 0x18f   :  { %1453 = vmatpush1.bf16.msra.mxu0 %v13985_v32  ;;  %v14056_v32 = vld [vmem:[#allocation2 + $0x10c] ss:$16 sps:$4 sm:$0xff]  }
 0x190   :  { %1494 = vmatpush1.bf16.msra.mxu1 %v13988_v59  ;;  %1454 = vmatprep.subr.bf16.mxu0 %v13993_v61  ;;  %v14051_v59 = vld [vmem:[#allocation2 + $0x100] ss:$16 sps:$4 sm:$0xff]   ;;  %v14054_v61 = vld [vmem:[#allocation2 + $0x108] ss:$16 sps:$4 sm:$0xff]  }
 0x191   :  { %1495 = vmatprep.subr.bf16.mxu1 %v13996_v63  ;;  %v14059_v63 = vld [vmem:[#allocation2 + $0x4e4] ss:$16 sps:$4 sm:$0xff]  }
 0x193   :  { %1455 = vmatpush1.bf16.msra.mxu0 %v13991_v11  ;;  %v575_v11 = vrot.slane %v16518_v10, 6 }
 0x194   :  { %1496 = vmatpush1.bf16.msra.mxu1 %v13994_v35  ;;  %1456 = vmatprep.subr.bf16.mxu0 %v13999_v14  ;;  %v14057_v35 = vld [vmem:[#allocation2 + $0x4e0] ss:$16 sps:$4 sm:$0xff]   ;;  %v14060_v14 = vld [vmem:[#allocation2 + $0x4e8] ss:$16 sps:$4 sm:$0xff]  }
 0x195   :  { %1497 = vmatprep.subr.bf16.mxu1 %v14002_v15  ;;  %v14065_v15 = vld [vmem:[#allocation2 + $0x4c4] ss:$16 sps:$4 sm:$0xff]  }
 0x197   :  { %1457 = vmatpush1.bf16.msra.mxu0 %v13997_v17  ;;  %v14068_v17 = vld [vmem:[#allocation2 + $0x4cc] ss:$16 sps:$4 sm:$0xff]  }
 0x198   :  { %1498 = vmatpush1.bf16.msra.mxu1 %v14000_v18  ;;  %1458 = vmatprep.subr.bf16.mxu0 %v14005_v19  ;;  %v14063_v18 = vld [vmem:[#allocation2 + $0x4c0] ss:$16 sps:$4 sm:$0xff]   ;;  %v14066_v19 = vld [vmem:[#allocation2 + $0x4c8] ss:$16 sps:$4 sm:$0xff]  }
 0x199   :  { %1499 = vmatprep.subr.bf16.mxu1 %v14008_v20  ;;  %v14071_v20 = vld [vmem:[#allocation2 + $0x4a4] ss:$16 sps:$4 sm:$0xff]  }
 0x19b   :  { %1459 = vmatpush1.bf16.msra.mxu0 %v14003_v21  ;;  %v14074_v21 = vld [vmem:[#allocation2 + $0x4ac] ss:$16 sps:$4 sm:$0xff]  }
 0x19c   :  { %1500 = vmatpush1.bf16.msra.mxu1 %v14006_v22  ;;  %1460 = vmatprep.subr.bf16.mxu0 %v14011_v23  ;;  %v14069_v22 = vld [vmem:[#allocation2 + $0x4a0] ss:$16 sps:$4 sm:$0xff]   ;;  %v14072_v23 = vld [vmem:[#allocation2 + $0x4a8] ss:$16 sps:$4 sm:$0xff]  }
 0x19d   :  { %1501 = vmatprep.subr.bf16.mxu1 %v14014_v24  ;;  %v14080_v24 = vld [vmem:[#allocation2 + $0x48c] ss:$16 sps:$4 sm:$0xff]  }
 0x19f   :  { %1461 = vmatpush2.bf16.msra.mxu0 %v14009_v26  ;;  %v14075_v26 = vld [vmem:[#allocation2 + $0x480] ss:$16 sps:$4 sm:$0xff]  }
 0x1a0   :  { %1502 = vmatpush2.bf16.msra.mxu1 %v14012_v27  ;;  %1462 = vmatprep.subr.bf16.mxu0 %v14017_v56  ;;  %v14078_v27 = vld [vmem:[#allocation2 + $0x488] ss:$16 sps:$4 sm:$0xff]   ;;  %v14083_v56 = vld [vmem:[#allocation2 + $0x464] ss:$16 sps:$4 sm:$0xff]  }
 0x1a1   :  { %1503 = vmatprep.subr.bf16.mxu1 %v14020_v28  ;;  %v14086_v28 = vld [vmem:[#allocation2 + $0x46c] ss:$16 sps:$4 sm:$0xff]  }
 0x1a3   :  { %1463 = vmatpush2.bf16.msra.mxu0 %v14015_v30  ;;  %v14081_v30 = vld [vmem:[#allocation2 + $0x460] ss:$16 sps:$4 sm:$0xff]  }
 0x1a4   :  { %1504 = vmatpush2.bf16.msra.mxu1 %v14018_v31  ;;  %1464 = vmatprep.subr.bf16.mxu0 %v14023_v33  ;;  %v14084_v31 = vld [vmem:[#allocation2 + $0x468] ss:$16 sps:$4 sm:$0xff]   ;;  %v14089_v33 = vld [vmem:[#allocation2 + $0x444] ss:$16 sps:$4 sm:$0xff]  }
 0x1a5   :  { %1505 = vmatprep.subr.bf16.mxu1 %v14026_v34  ;;  %v14092_v34 = vld [vmem:[#allocation2 + $0x44c] ss:$16 sps:$4 sm:$0xff]  }
 0x1a7   :  { %1465 = vmatpush2.bf16.msra.mxu0 %v14021_v36  ;;  %v14087_v36 = vld [vmem:[#allocation2 + $0x440] ss:$16 sps:$4 sm:$0xff]  }
 0x1a8   :  { %1506 = vmatpush2.bf16.msra.mxu1 %v14024_v37  ;;  %1466 = vmatprep.subr.bf16.mxu0 %v14029_v38  ;;  %v14090_v37 = vld [vmem:[#allocation2 + $0x448] ss:$16 sps:$4 sm:$0xff]   ;;  %v14095_v38 = vld [vmem:[#allocation2 + $0x424] ss:$16 sps:$4 sm:$0xff]  }
 0x1a9   :  { %1507 = vmatprep.subr.bf16.mxu1 %v14032_v39  ;;  %v14098_v39 = vld [vmem:[#allocation2 + $0x42c] ss:$16 sps:$4 sm:$0xff]  }
 0x1ab   :  { %1467 = vmatpush2.bf16.msra.mxu0 %v14027_v0  ;;  %v14093_v0 = vld [vmem:[#allocation2 + $0x420] ss:$16 sps:$4 sm:$0xff]  }
 0x1ac   :  { %1508 = vmatpush2.bf16.msra.mxu1 %v14030_v40  ;;  %1468 = vmatprep.subr.bf16.mxu0 %v14035_v41  ;;  %v14096_v40 = vld [vmem:[#allocation2 + $0x428] ss:$16 sps:$4 sm:$0xff]   ;;  %v14101_v41 = vld [vmem:[#allocation2 + $0x404] ss:$16 sps:$4 sm:$0xff]  }
 0x1ad   :  { %1509 = vmatprep.subr.bf16.mxu1 %v14038_v42  ;;  %v14104_v42 = vld [vmem:[#allocation2 + $0x40c] ss:$16 sps:$4 sm:$0xff]  }
 0x1af   :  { %1469 = vmatpush2.bf16.msra.mxu0 %v14033_v44  ;;  %v14099_v44 = vld [vmem:[#allocation2 + $0x400] ss:$16 sps:$4 sm:$0xff]  }
 0x1b0   :  { %1510 = vmatpush2.bf16.msra.mxu1 %v14036_v48  ;;  %1470 = vmatprep.subr.bf16.mxu0 %v14041_v49  ;;  %v14102_v48 = vld [vmem:[#allocation2 + $0x408] ss:$16 sps:$4 sm:$0xff]   ;;  %v14107_v49 = vld [vmem:[#allocation2 + $0x5e4] ss:$16 sps:$4 sm:$0xff]  }
 0x1b1   :  { %1511 = vmatprep.subr.bf16.mxu1 %v14044_v25  ;;  %v14110_v25 = vld [vmem:[#allocation2 + $0x5ec] ss:$16 sps:$4 sm:$0xff]  }
 0x1b3   :  { %1471 = vmatpush2.bf16.msra.mxu0 %v14039_v50  ;;  %v14105_v50 = vld [vmem:[#allocation2 + $0x5e0] ss:$16 sps:$4 sm:$0xff]  }
 0x1b4   :  { %1512 = vmatpush2.bf16.msra.mxu1 %v14042_v51  ;;  %1472 = vmatprep.subr.bf16.mxu0 %v14047_v53  ;;  %v14108_v51 = vld [vmem:[#allocation2 + $0x5e8] ss:$16 sps:$4 sm:$0xff]   ;;  %v14113_v53 = vld [vmem:[#allocation2 + $0x5c4] ss:$16 sps:$4 sm:$0xff]  }
 0x1b5   :  { %1513 = vmatprep.subr.bf16.mxu1 %v14050_v52  ;;  %v14116_v52 = vld [vmem:[#allocation2 + $0x5cc] ss:$16 sps:$4 sm:$0xff]  }
 0x1b7   :  { %1473 = vmatpush2.bf16.msra.mxu0 %v14045_v29  ;;  %v14111_v29 = vld [vmem:[#allocation2 + $0x5c0] ss:$16 sps:$4 sm:$0xff]  }
 0x1b8   :  { %1514 = vmatpush2.bf16.msra.mxu1 %v14048_v54  ;;  %1474 = vmatprep.subr.bf16.mxu0 %v14053_v57  ;;  %v14114_v54 = vld [vmem:[#allocation2 + $0x5c8] ss:$16 sps:$4 sm:$0xff]   ;;  %v14119_v57 = vld [vmem:[#allocation2 + $0x5a4] ss:$16 sps:$4 sm:$0xff]  }
 0x1b9   :  { %1515 = vmatprep.subr.bf16.mxu1 %v14056_v32  ;;  %v14122_v32 = vld [vmem:[#allocation2 + $0x5ac] ss:$16 sps:$4 sm:$0xff]  }
 0x1bb   :  { %1475 = vmatpush2.bf16.msra.mxu0 %v14051_v59  ;;  %v14117_v59 = vld [vmem:[#allocation2 + $0x5a0] ss:$16 sps:$4 sm:$0xff]  }
 0x1bc   :  { %1516 = vmatpush2.bf16.msra.mxu1 %v14054_v61  ;;  %1911 = vmatprep.subr.bf16.mxu0 %v14059_v63  ;;  %v14120_v61 = vld [vmem:[#allocation2 + $0x5a8] ss:$16 sps:$4 sm:$0xff]   ;;  %v14125_v63 = vld [vmem:[#allocation2 + $0x584] ss:$16 sps:$4 sm:$0xff]  }
 0x1bd   :  { %1952 = vmatprep.subr.bf16.mxu1 %v14062_v60  ;;  %v14128_v60 = vld [vmem:[#allocation2 + $0x58c] ss:$16 sps:$4 sm:$0xff]  }
 0x1be   :  { %12326 = vmatmul.mubr.msk.bf16.vlgmr.msra.gmra.mxu0 %vm16539_vm14, %v575_v11 }
 0x1bf   :  { %12330 = vmatmul.mubr.msk.bf16.vlgmr.msra.gmra.mxu1 %vm16539_vm14, %v575_v11  ;;  %1912 = vmatpush1.bf16.msra.mxu0 %v14057_v35  ;;  %v14123_v11 = vld [vmem:[#allocation2 + $0x580] ss:$16 sps:$4 sm:$0xff]   ;;  %v14126_v35 = vld [vmem:[#allocation2 + $0x588] ss:$16 sps:$4 sm:$0xff]  }
 0x1c0   :  { %1953 = vmatpush1.bf16.msra.mxu1 %v14060_v14  ;;  %1913 = vmatprep.subr.bf16.mxu0 %v14065_v15  ;;  %v14131_v14 = vld [vmem:[#allocation2 + $0x564] ss:$16 sps:$4 sm:$0xff]   ;;  %v14134_v15 = vld [vmem:[#allocation2 + $0x56c] ss:$16 sps:$4 sm:$0xff]  }
 0x1c1   :  { %1954 = vmatprep.subr.bf16.mxu1 %v14068_v17  ;;  %1943 = vmatprep.mubr.bf16.mxu0 %v16520_v12  ;;  %v14129_v17 = vld [vmem:[#allocation2 + $0x560] ss:$16 sps:$4 sm:$0xff]  }
 0x1c2   :  { %1984 = vmatprep.mubr.bf16.mxu1 %v16520_v12 }
 0x1c3   :  { %1914 = vmatpush1.bf16.msra.mxu0 %v14063_v18  ;;  %v14132_v18 = vld [vmem:[#allocation2 + $0x568] ss:$16 sps:$4 sm:$0xff]  }
 0x1c4   :  { %1955 = vmatpush1.bf16.msra.mxu1 %v14066_v19  ;;  %1915 = vmatprep.subr.bf16.mxu0 %v14071_v20  ;;  %v14137_v19 = vld [vmem:[#allocation2 + $0x544] ss:$16 sps:$4 sm:$0xff]   ;;  %v14140_v20 = vld [vmem:[#allocation2 + $0x54c] ss:$16 sps:$4 sm:$0xff]  }
 0x1c5   :  { %1956 = vmatprep.subr.bf16.mxu1 %v14074_v21  ;;  %v14135_v21 = vld [vmem:[#allocation2 + $0x540] ss:$16 sps:$4 sm:$0xff]  }
 0x1c7   :  { %1916 = vmatpush1.bf16.msra.mxu0 %v14069_v22  ;;  %v14138_v22 = vld [vmem:[#allocation2 + $0x548] ss:$16 sps:$4 sm:$0xff]  }
 0x1c8   :  { %1957 = vmatpush1.bf16.msra.mxu1 %v14072_v23  ;;  %1917 = vmatprep.subr.bf16.mxu0 %v14077_v16  ;;  %v14143_v23 = vld [vmem:[#allocation2 + $0x524] ss:$16 sps:$4 sm:$0xff]   ;;  %v14146_v16 = vld [vmem:[#allocation2 + $0x52c] ss:$16 sps:$4 sm:$0xff]  }
 0x1c9   :  { %1958 = vmatprep.subr.bf16.mxu1 %v14080_v24  ;;  %v14141_v24 = vld [vmem:[#allocation2 + $0x520] ss:$16 sps:$4 sm:$0xff]  }
 0x1cb   :  { %1918 = vmatpush1.bf16.msra.mxu0 %v14075_v26  ;;  %v14144_v26 = vld [vmem:[#allocation2 + $0x528] ss:$16 sps:$4 sm:$0xff]  }
 0x1cc   :  { %1959 = vmatpush1.bf16.msra.mxu1 %v14078_v27  ;;  %1919 = vmatprep.subr.bf16.mxu0 %v14083_v56  ;;  %v14149_v27 = vld [vmem:[#allocation2 + $0x504] ss:$16 sps:$4 sm:$0xff]   ;;  %v14152_v56 = vld [vmem:[#allocation2 + $0x50c] ss:$16 sps:$4 sm:$0xff]  }
 0x1cd   :  { %1960 = vmatprep.subr.bf16.mxu1 %v14086_v28  ;;  %v14147_v28 = vld [vmem:[#allocation2 + $0x500] ss:$16 sps:$4 sm:$0xff]  }
 0x1cf   :  { %1920 = vmatpush1.bf16.msra.mxu0 %v14081_v30  ;;  %v14150_v30 = vld [vmem:[#allocation2 + $0x508] ss:$16 sps:$4 sm:$0xff]  }
 0x1d0   :  { %1961 = vmatpush1.bf16.msra.mxu1 %v14084_v31  ;;  %1921 = vmatprep.subr.bf16.mxu0 %v14089_v33  ;;  %v14155_v31 = vld [vmem:[#allocation2 + $0x6e4] ss:$16 sps:$4 sm:$0xff]   ;;  %v14158_v33 = vld [vmem:[#allocation2 + $0x6ec] ss:$16 sps:$4 sm:$0xff]  }
 0x1d1   :  { %1962 = vmatprep.subr.bf16.mxu1 %v14092_v34  ;;  %v14153_v34 = vld [vmem:[#allocation2 + $0x6e0] ss:$16 sps:$4 sm:$0xff]  }
 0x1d3   :  { %1922 = vmatpush1.bf16.msra.mxu0 %v14087_v36  ;;  %v14156_v36 = vld [vmem:[#allocation2 + $0x6e8] ss:$16 sps:$4 sm:$0xff]  }
 0x1d4   :  { %1963 = vmatpush1.bf16.msra.mxu1 %v14090_v37  ;;  %1923 = vmatprep.subr.bf16.mxu0 %v14095_v38  ;;  %v14161_v37 = vld [vmem:[#allocation2 + $0x6c4] ss:$16 sps:$4 sm:$0xff]   ;;  %v14164_v38 = vld [vmem:[#allocation2 + $0x6cc] ss:$16 sps:$4 sm:$0xff]  }
 0x1d5   :  { %1964 = vmatprep.subr.bf16.mxu1 %v14098_v39  ;;  %v1998_v39 = vrot.slane %v16520_v12, 1 }
 0x1d7   :  { %1924 = vmatpush1.bf16.msra.mxu0 %v14093_v0  ;;  %v14159_v0 = vld [vmem:[#allocation2 + $0x6c0] ss:$16 sps:$4 sm:$0xff]  }
 0x1d8   :  { %1965 = vmatpush1.bf16.msra.mxu1 %v14096_v40  ;;  %1925 = vmatprep.subr.bf16.mxu0 %v14101_v41  ;;  %v14162_v40 = vld [vmem:[#allocation2 + $0x6c8] ss:$16 sps:$4 sm:$0xff]   ;;  %v14167_v41 = vld [vmem:[#allocation2 + $0x6a4] ss:$16 sps:$4 sm:$0xff]  }
 0x1d9   :  { %1966 = vmatprep.subr.bf16.mxu1 %v14104_v42  ;;  %v14170_v42 = vld [vmem:[#allocation2 + $0x6ac] ss:$16 sps:$4 sm:$0xff]  }
 0x1db   :  { %1926 = vmatpush1.bf16.msra.mxu0 %v14099_v44  ;;  %v14165_v44 = vld [vmem:[#allocation2 + $0x6a0] ss:$16 sps:$4 sm:$0xff]  }
 0x1dc   :  { %1967 = vmatpush1.bf16.msra.mxu1 %v14102_v48  ;;  %1927 = vmatprep.subr.bf16.mxu0 %v14107_v49  ;;  %v14168_v48 = vld [vmem:[#allocation2 + $0x6a8] ss:$16 sps:$4 sm:$0xff]   ;;  %v14173_v49 = vld [vmem:[#allocation2 + $0x684] ss:$16 sps:$4 sm:$0xff]  }
 0x1dd   :  { %1968 = vmatprep.subr.bf16.mxu1 %v14110_v25  ;;  %v14176_v25 = vld [vmem:[#allocation2 + $0x68c] ss:$16 sps:$4 sm:$0xff]  }
 0x1df   :  { %1928 = vmatpush2.bf16.msra.mxu0 %v14105_v50  ;;  %v14171_v50 = vld [vmem:[#allocation2 + $0x680] ss:$16 sps:$4 sm:$0xff]  }
 0x1e0   :  { %1969 = vmatpush2.bf16.msra.mxu1 %v14108_v51  ;;  %1929 = vmatprep.subr.bf16.mxu0 %v14113_v53  ;;  %v14174_v51 = vld [vmem:[#allocation2 + $0x688] ss:$16 sps:$4 sm:$0xff]   ;;  %v14179_v53 = vld [vmem:[#allocation2 + $0x664] ss:$16 sps:$4 sm:$0xff]  }
 0x1e1   :  { %1970 = vmatprep.subr.bf16.mxu1 %v14116_v52  ;;  %v14182_v52 = vld [vmem:[#allocation2 + $0x66c] ss:$16 sps:$4 sm:$0xff]  }
 0x1e3   :  { %1930 = vmatpush2.bf16.msra.mxu0 %v14111_v29  ;;  %v14177_v29 = vld [vmem:[#allocation2 + $0x660] ss:$16 sps:$4 sm:$0xff]  }
 0x1e4   :  { %1971 = vmatpush2.bf16.msra.mxu1 %v14114_v54  ;;  %1931 = vmatprep.subr.bf16.mxu0 %v14119_v57  ;;  %v14180_v54 = vld [vmem:[#allocation2 + $0x668] ss:$16 sps:$4 sm:$0xff]   ;;  %v14185_v57 = vld [vmem:[#allocation2 + $0x644] ss:$16 sps:$4 sm:$0xff]  }
 0x1e5   :  { %1972 = vmatprep.subr.bf16.mxu1 %v14122_v32  ;;  %v14188_v32 = vld [vmem:[#allocation2 + $0x64c] ss:$16 sps:$4 sm:$0xff]  }
 0x1e7   :  { %1932 = vmatpush2.bf16.msra.mxu0 %v14117_v59  ;;  %v14183_v59 = vld [vmem:[#allocation2 + $0x640] ss:$16 sps:$4 sm:$0xff]  }
 0x1e8   :  { %1973 = vmatpush2.bf16.msra.mxu1 %v14120_v61  ;;  %1933 = vmatprep.subr.bf16.mxu0 %v14125_v63  ;;  %v14186_v61 = vld [vmem:[#allocation2 + $0x648] ss:$16 sps:$4 sm:$0xff]   ;;  %v14191_v63 = vld [vmem:[#allocation2 + $0x624] ss:$16 sps:$4 sm:$0xff]  }
 0x1e9   :  { %1974 = vmatprep.subr.bf16.mxu1 %v14128_v60  ;;  %v14194_v60 = vld [vmem:[#allocation2 + $0x62c] ss:$16 sps:$4 sm:$0xff]  }
 0x1eb   :  { %1934 = vmatpush2.bf16.msra.mxu0 %v14123_v11  ;;  %v14189_v11 = vld [vmem:[#allocation2 + $0x620] ss:$16 sps:$4 sm:$0xff]  }
 0x1ec   :  { %1975 = vmatpush2.bf16.msra.mxu1 %v14126_v35  ;;  %1935 = vmatprep.subr.bf16.mxu0 %v14131_v14  ;;  %v14192_v35 = vld [vmem:[#allocation2 + $0x628] ss:$16 sps:$4 sm:$0xff]   ;;  %v14197_v14 = vld [vmem:[#allocation2 + $0x604] ss:$16 sps:$4 sm:$0xff]  }
 0x1ed   :  { %1976 = vmatprep.subr.bf16.mxu1 %v14134_v15  ;;  %v14200_v15 = vld [vmem:[#allocation2 + $0x60c] ss:$16 sps:$4 sm:$0xff]  }
 0x1ef   :  { %1936 = vmatpush2.bf16.msra.mxu0 %v14129_v17  ;;  %v14195_v17 = vld [vmem:[#allocation2 + $0x600] ss:$16 sps:$4 sm:$0xff]  }
 0x1f0   :  { %1977 = vmatpush2.bf16.msra.mxu1 %v14132_v18  ;;  %1937 = vmatprep.subr.bf16.mxu0 %v14137_v19  ;;  %v14198_v18 = vld [vmem:[#allocation2 + $0x608] ss:$16 sps:$4 sm:$0xff]   ;;  %v14203_v19 = vld [vmem:[#allocation2 + $0x7e4] ss:$16 sps:$4 sm:$0xff]  }
 0x1f1   :  { %1978 = vmatprep.subr.bf16.mxu1 %v14140_v20  ;;  %v14206_v20 = vld [vmem:[#allocation2 + $0x7ec] ss:$16 sps:$4 sm:$0xff]  }
 0x1f3   :  { %1938 = vmatpush2.bf16.msra.mxu0 %v14135_v21  ;;  %v14201_v21 = vld [vmem:[#allocation2 + $0x7e0] ss:$16 sps:$4 sm:$0xff]  }
 0x1f4   :  { %1979 = vmatpush2.bf16.msra.mxu1 %v14138_v22  ;;  %1939 = vmatprep.subr.bf16.mxu0 %v14143_v23  ;;  %v14204_v22 = vld [vmem:[#allocation2 + $0x7e8] ss:$16 sps:$4 sm:$0xff]   ;;  %v14209_v23 = vld [vmem:[#allocation2 + $0x7c4] ss:$16 sps:$4 sm:$0xff]  }
 0x1f5   :  { %1980 = vmatprep.subr.bf16.mxu1 %v14146_v16  ;;  %v14212_v16 = vld [vmem:[#allocation2 + $0x7cc] ss:$16 sps:$4 sm:$0xff]  }
 0x1f7   :  { %1940 = vmatpush2.bf16.msra.mxu0 %v14141_v24  ;;  %v14207_v24 = vld [vmem:[#allocation2 + $0x7c0] ss:$16 sps:$4 sm:$0xff]  }
 0x1f8   :  { %1981 = vmatpush2.bf16.msra.mxu1 %v14144_v26  ;;  %1941 = vmatprep.subr.bf16.mxu0 %v14149_v27  ;;  %v14210_v26 = vld [vmem:[#allocation2 + $0x7c8] ss:$16 sps:$4 sm:$0xff]   ;;  %v14215_v27 = vld [vmem:[#allocation2 + $0x7a4] ss:$16 sps:$4 sm:$0xff]  }
 0x1f9   :  { %1982 = vmatprep.subr.bf16.mxu1 %v14152_v56  ;;  %v14218_v56 = vld [vmem:[#allocation2 + $0x7ac] ss:$16 sps:$4 sm:$0xff]  }
 0x1fb   :  { %1942 = vmatpush2.bf16.msra.mxu0 %v14147_v28  ;;  %v14213_v28 = vld [vmem:[#allocation2 + $0x7a0] ss:$16 sps:$4 sm:$0xff]  }
 0x1fc   :  { %1983 = vmatpush2.bf16.msra.mxu1 %v14150_v30  ;;  %2391 = vmatprep.subr.bf16.mxu0 %v14155_v31  ;;  %v14216_v30 = vld [vmem:[#allocation2 + $0x7a8] ss:$16 sps:$4 sm:$0xff]   ;;  %v14221_v31 = vld [vmem:[#allocation2 + $0x784] ss:$16 sps:$4 sm:$0xff]  }
 0x1fd   :  { %2432 = vmatprep.subr.bf16.mxu1 %v14158_v33  ;;  %v14224_v33 = vld [vmem:[#allocation2 + $0x78c] ss:$16 sps:$4 sm:$0xff]  }
 0x1fe   :  { %1944 = vmatmul.mubr.bf16.vlgmr.msra.gmra.mxu0 %v16518_v10 }
 0x1ff   :  { %1985 = vmatmul.mubr.bf16.vlgmr.msra.gmra.mxu1 %v16518_v10  ;;  %2392 = vmatpush1.bf16.msra.mxu0 %v14153_v34  ;;  %v14219_v34 = vld [vmem:[#allocation2 + $0x780] ss:$16 sps:$4 sm:$0xff]  }
 0x200   :  { %2433 = vmatpush1.bf16.msra.mxu1 %v14156_v36  ;;  %2393 = vmatprep.subr.bf16.mxu0 %v14161_v37  ;;  %v14222_v36 = vld [vmem:[#allocation2 + $0x788] ss:$16 sps:$4 sm:$0xff]   ;;  %v14227_v37 = vld [vmem:[#allocation2 + $0x764] ss:$16 sps:$4 sm:$0xff]  }
 0x201   :  { %2434 = vmatprep.subr.bf16.mxu1 %v14164_v38  ;;  %12459 = vmatprep.mubr.msk.bf16.mxu0 %vm1999_vm15, %v1998_v39  ;;  %v14230_v38 = vld [vmem:[#allocation2 + $0x76c] ss:$16 sps:$4 sm:$0xff]  }
 0x202   :  { %12461 = vmatprep.mubr.msk.bf16.mxu1 %vm1999_vm15, %v1998_v39  ;;  %v14225_v39 = vld [vmem:[#allocation2 + $0x760] ss:$16 sps:$4 sm:$0xff]  }
 0x203   :  { %2394 = vmatpush1.bf16.msra.mxu0 %v14159_v0  ;;  %v14228_v0 = vld [vmem:[#allocation2 + $0x768] ss:$16 sps:$4 sm:$0xff]  }
 0x204   :  { %2435 = vmatpush1.bf16.msra.mxu1 %v14162_v40  ;;  %2395 = vmatprep.subr.bf16.mxu0 %v14167_v41  ;;  %v14233_v40 = vld [vmem:[#allocation2 + $0x744] ss:$16 sps:$4 sm:$0xff]   ;;  %v14236_v41 = vld [vmem:[#allocation2 + $0x74c] ss:$16 sps:$4 sm:$0xff]  }
 0x205   :  { %2436 = vmatprep.subr.bf16.mxu1 %v14170_v42  ;;  %v14231_v42 = vld [vmem:[#allocation2 + $0x740] ss:$16 sps:$4 sm:$0xff]  }
 0x207   :  { %2396 = vmatpush1.bf16.msra.mxu0 %v14165_v44  ;;  %v14234_v44 = vld [vmem:[#allocation2 + $0x748] ss:$16 sps:$4 sm:$0xff]  }
 0x208   :  { %2437 = vmatpush1.bf16.msra.mxu1 %v14168_v48  ;;  %2397 = vmatprep.subr.bf16.mxu0 %v14173_v49  ;;  %v14239_v48 = vld [vmem:[#allocation2 + $0x724] ss:$16 sps:$4 sm:$0xff]   ;;  %v14242_v49 = vld [vmem:[#allocation2 + $0x72c] ss:$16 sps:$4 sm:$0xff]  }
 0x209   :  { %2438 = vmatprep.subr.bf16.mxu1 %v14176_v25  ;;  %v14237_v25 = vld [vmem:[#allocation2 + $0x720] ss:$16 sps:$4 sm:$0xff]  }
 0x20b   :  { %2398 = vmatpush1.bf16.msra.mxu0 %v14171_v50  ;;  %v14240_v50 = vld [vmem:[#allocation2 + $0x728] ss:$16 sps:$4 sm:$0xff]  }
 0x20c   :  { %2439 = vmatpush1.bf16.msra.mxu1 %v14174_v51  ;;  %2399 = vmatprep.subr.bf16.mxu0 %v14179_v53  ;;  %v14245_v51 = vld [vmem:[#allocation2 + $0x704] ss:$16 sps:$4 sm:$0xff]   ;;  %v14248_v53 = vld [vmem:[#allocation2 + $0x70c] ss:$16 sps:$4 sm:$0xff]  }
 0x20d   :  { %2440 = vmatprep.subr.bf16.mxu1 %v14182_v52  ;;  %v14243_v52 = vld [vmem:[#allocation2 + $0x700] ss:$16 sps:$4 sm:$0xff]  }
 0x20f   :  { %2400 = vmatpush1.bf16.msra.mxu0 %v14177_v29  ;;  %v14246_v29 = vld [vmem:[#allocation2 + $0x708] ss:$16 sps:$4 sm:$0xff]  }
 0x210   :  { %2441 = vmatpush1.bf16.msra.mxu1 %v14180_v54  ;;  %2401 = vmatprep.subr.bf16.mxu0 %v14185_v57  ;;  %v14251_v54 = vld [vmem:[#allocation2 + $0x8e4] ss:$16 sps:$4 sm:$0xff]   ;;  %v14254_v57 = vld [vmem:[#allocation2 + $0x8ec] ss:$16 sps:$4 sm:$0xff]  }
 0x211   :  { %2442 = vmatprep.subr.bf16.mxu1 %v14188_v32  ;;  %v1997_v32 = vrot.slane %v16518_v10, 1 }
 0x213   :  { %2402 = vmatpush1.bf16.msra.mxu0 %v14183_v59  ;;  %v14249_v59 = vld [vmem:[#allocation2 + $0x8e0] ss:$16 sps:$4 sm:$0xff]  }
 0x214   :  { %2443 = vmatpush1.bf16.msra.mxu1 %v14186_v61  ;;  %2403 = vmatprep.subr.bf16.mxu0 %v14191_v63  ;;  %v14252_v61 = vld [vmem:[#allocation2 + $0x8e8] ss:$16 sps:$4 sm:$0xff]   ;;  %v14257_v63 = vld [vmem:[#allocation2 + $0x8c4] ss:$16 sps:$4 sm:$0xff]  }
 0x215   :  { %2444 = vmatprep.subr.bf16.mxu1 %v14194_v60  ;;  %v14260_v60 = vld [vmem:[#allocation2 + $0x8cc] ss:$16 sps:$4 sm:$0xff]  }
 0x217   :  { %2404 = vmatpush1.bf16.msra.mxu0 %v14189_v11  ;;  %v2478_v11 = vrot.slane %v16520_v12, 2  ;;  %v14266_v12 = vld [vmem:[#allocation2 + $0x8ac] ss:$16 sps:$4 sm:$0xff]  }
 0x218   :  { %2445 = vmatpush1.bf16.msra.mxu1 %v14192_v35  ;;  %2405 = vmatprep.subr.bf16.mxu0 %v14197_v14 }
 0x219   :  { %2446 = vmatprep.subr.bf16.mxu1 %v14200_v15  ;;  %v14255_v15 = vld [vmem:[#allocation2 + $0x8c0] ss:$16 sps:$4 sm:$0xff]  }
 0x21b   :  { %2406 = vmatpush1.bf16.msra.mxu0 %v14195_v17  ;;  %v14258_v17 = vld [vmem:[#allocation2 + $0x8c8] ss:$16 sps:$4 sm:$0xff]  }
 0x21c   :  { %2447 = vmatpush1.bf16.msra.mxu1 %v14198_v18  ;;  %2407 = vmatprep.subr.bf16.mxu0 %v14203_v19 }
 0x21d   :  { %2448 = vmatprep.subr.bf16.mxu1 %v14206_v20  ;;  %v14263_v20 = vld [vmem:[#allocation2 + $0x8a4] ss:$16 sps:$4 sm:$0xff]  }
 0x21f   :  { %2408 = vmatpush2.bf16.msra.mxu0 %v14201_v21 }
 0x220   :  { %2449 = vmatpush2.bf16.msra.mxu1 %v14204_v22  ;;  %2409 = vmatprep.subr.bf16.mxu0 %v14209_v23  ;;  %v14261_v23 = vld [vmem:[#allocation2 + $0x8a0] ss:$16 sps:$4 sm:$0xff]  }
 0x221   :  { %2450 = vmatprep.subr.bf16.mxu1 %v14212_v16  ;;  %v14264_v16 = vld [vmem:[#allocation2 + $0x8a8] ss:$16 sps:$4 sm:$0xff]  }
 0x223   :  { %2410 = vmatpush2.bf16.msra.mxu0 %v14207_v24 }
 0x224   :  { %2451 = vmatpush2.bf16.msra.mxu1 %v14210_v26  ;;  %2411 = vmatprep.subr.bf16.mxu0 %v14215_v27  ;;  %v14269_v27 = vld [vmem:[#allocation2 + $0x884] ss:$16 sps:$4 sm:$0xff]  }
 0x225   :  { %2452 = vmatprep.subr.bf16.mxu1 %v14218_v56  ;;  %v14272_v56 = vld [vmem:[#allocation2 + $0x88c] ss:$16 sps:$4 sm:$0xff]  }
 0x227   :  { %2412 = vmatpush2.bf16.msra.mxu0 %v14213_v28  ;;  %v14267_v28 = vld [vmem:[#allocation2 + $0x880] ss:$16 sps:$4 sm:$0xff]  }
 0x228   :  { %2453 = vmatpush2.bf16.msra.mxu1 %v14216_v30  ;;  %2413 = vmatprep.subr.bf16.mxu0 %v14221_v31  ;;  %v14270_v30 = vld [vmem:[#allocation2 + $0x888] ss:$16 sps:$4 sm:$0xff]   ;;  %v14275_v31 = vld [vmem:[#allocation2 + $0x864] ss:$16 sps:$4 sm:$0xff]  }
 0x229   :  { %2454 = vmatprep.subr.bf16.mxu1 %v14224_v33  ;;  %v14278_v33 = vld [vmem:[#allocation2 + $0x86c] ss:$16 sps:$4 sm:$0xff]  }
 0x22b   :  { %2414 = vmatpush2.bf16.msra.mxu0 %v14219_v34  ;;  %v14273_v34 = vld [vmem:[#allocation2 + $0x860] ss:$16 sps:$4 sm:$0xff]  }
 0x22c   :  { %2455 = vmatpush2.bf16.msra.mxu1 %v14222_v36  ;;  %2415 = vmatprep.subr.bf16.mxu0 %v14227_v37  ;;  %v14276_v36 = vld [vmem:[#allocation2 + $0x868] ss:$16 sps:$4 sm:$0xff]   ;;  %v14281_v37 = vld [vmem:[#allocation2 + $0x844] ss:$16 sps:$4 sm:$0xff]  }
 0x22d   :  { %2456 = vmatprep.subr.bf16.mxu1 %v14230_v38  ;;  %v14284_v38 = vld [vmem:[#allocation2 + $0x84c] ss:$16 sps:$4 sm:$0xff]  }
 0x22f   :  { %2416 = vmatpush2.bf16.msra.mxu0 %v14225_v39  ;;  %v14279_v39 = vld [vmem:[#allocation2 + $0x840] ss:$16 sps:$4 sm:$0xff]  }
 0x230   :  { %2457 = vmatpush2.bf16.msra.mxu1 %v14228_v0  ;;  %2417 = vmatprep.subr.bf16.mxu0 %v14233_v40  ;;  %v14282_v0 = vld [vmem:[#allocation2 + $0x848] ss:$16 sps:$4 sm:$0xff]   ;;  %v14287_v40 = vld [vmem:[#allocation2 + $0x824] ss:$16 sps:$4 sm:$0xff]  }
 0x231   :  { %2458 = vmatprep.subr.bf16.mxu1 %v14236_v41  ;;  %v14290_v41 = vld [vmem:[#allocation2 + $0x82c] ss:$16 sps:$4 sm:$0xff]  }
 0x233   :  { %2418 = vmatpush2.bf16.msra.mxu0 %v14231_v42  ;;  %v14285_v42 = vld [vmem:[#allocation2 + $0x820] ss:$16 sps:$4 sm:$0xff]  }
 0x234   :  { %2459 = vmatpush2.bf16.msra.mxu1 %v14234_v44  ;;  %2419 = vmatprep.subr.bf16.mxu0 %v14239_v48  ;;  %v14288_v44 = vld [vmem:[#allocation2 + $0x828] ss:$16 sps:$4 sm:$0xff]   ;;  %v14293_v48 = vld [vmem:[#allocation2 + $0x804] ss:$16 sps:$4 sm:$0xff]  }
 0x235   :  { %2460 = vmatprep.subr.bf16.mxu1 %v14242_v49  ;;  %v14296_v49 = vld [vmem:[#allocation2 + $0x80c] ss:$16 sps:$4 sm:$0xff]  }
 0x237   :  { %2420 = vmatpush2.bf16.msra.mxu0 %v14237_v25  ;;  %v14291_v25 = vld [vmem:[#allocation2 + $0x800] ss:$16 sps:$4 sm:$0xff]  }
 0x238   :  { %2461 = vmatpush2.bf16.msra.mxu1 %v14240_v50  ;;  %2421 = vmatprep.subr.bf16.mxu0 %v14245_v51  ;;  %v14294_v50 = vld [vmem:[#allocation2 + $0x808] ss:$16 sps:$4 sm:$0xff]   ;;  %v14299_v51 = vld [vmem:[#allocation2 + $0x9e4] ss:$16 sps:$4 sm:$0xff]  }
 0x239   :  { %2462 = vmatprep.subr.bf16.mxu1 %v14248_v53  ;;  %v14302_v53 = vld [vmem:[#allocation2 + $0x9ec] ss:$16 sps:$4 sm:$0xff]  }
 0x23b   :  { %2422 = vmatpush2.bf16.msra.mxu0 %v14243_v52  ;;  %v14297_v52 = vld [vmem:[#allocation2 + $0x9e0] ss:$16 sps:$4 sm:$0xff]  }
 0x23c   :  { %2463 = vmatpush2.bf16.msra.mxu1 %v14246_v29  ;;  %2870 = vmatprep.subr.bf16.mxu0 %v14251_v54  ;;  %v14300_v29 = vld [vmem:[#allocation2 + $0x9e8] ss:$16 sps:$4 sm:$0xff]   ;;  %v14305_v54 = vld [vmem:[#allocation2 + $0x9c4] ss:$16 sps:$4 sm:$0xff]  }
 0x23d   :  { %2911 = vmatprep.subr.bf16.mxu1 %v14254_v57  ;;  %v14308_v57 = vld [vmem:[#allocation2 + $0x9cc] ss:$16 sps:$4 sm:$0xff]  }
 0x23e   :  { %v16561_v35 = vpop.f32.mrf.mxu0  ;;  %12460 = vmatmul.mubr.msk.bf16.vlgmr.msra.gmra.mxu0 %vm1999_vm15, %v1997_v32 }
 0x23f   :  { %v16563_v14 = vpop.f32.mrf.mxu1  ;;  %12462 = vmatmul.mubr.msk.bf16.vlgmr.msra.gmra.mxu1 %vm1999_vm15, %v1997_v32  ;;  %2871 = vmatpush1.bf16.msra.mxu0 %v14249_v59  ;;  %v14303_v32 = vld [vmem:[#allocation2 + $0x9c0] ss:$16 sps:$4 sm:$0xff]   ;;  %v14306_v59 = vld [vmem:[#allocation2 + $0x9c8] ss:$16 sps:$4 sm:$0xff]  }
 0x240   :  { %2912 = vmatpush1.bf16.msra.mxu1 %v14252_v61  ;;  %v16567_v18 = vpop.f32.mrf.mxu0  ;;  %2872 = vmatprep.subr.bf16.mxu0 %v14257_v63  ;;  %v14311_v61 = vld [vmem:[#allocation2 + $0x9a4] ss:$16 sps:$4 sm:$0xff]   ;;  %v14314_v63 = vld [vmem:[#allocation2 + $0x9ac] ss:$16 sps:$4 sm:$0xff]  }
 0x241   :  { %v16569_v19 = vpop.f32.mrf.mxu1  ;;  %2913 = vmatprep.subr.bf16.mxu1 %v14260_v60  ;;  %12527 = vmatprep.mubr.msk.bf16.mxu0 %vm537_vm2, %v2478_v11  ;;  %v14309_v60 = vld [vmem:[#allocation2 + $0x9a0] ss:$16 sps:$4 sm:$0xff]  }
 0x242   :  { %12529 = vmatprep.mubr.msk.bf16.mxu1 %vm537_vm2, %v2478_v11  ;;  %v1080_v21 = vpop.f32.mrf.mxu0  ;;  %v14312_v11 = vld [vmem:[#allocation2 + $0x9a8] ss:$16 sps:$4 sm:$0xff]  }
 0x243   :  { %v1121_v22 = vpop.f32.mrf.mxu1  ;;  %2873 = vmatpush1.bf16.msra.mxu0 %v14255_v15  ;;  %v14317_v15 = vld [vmem:[#allocation2 + $0x984] ss:$16 sps:$4 sm:$0xff]  }
 0x244   :  { %2914 = vmatpush1.bf16.msra.mxu1 %v14258_v17  ;;  %v1081_v24 = vpop.f32.mrf.mxu0  ;;  %2874 = vmatprep.subr.bf16.mxu0 %v14263_v20  ;;  %v14320_v17 = vld [vmem:[#allocation2 + $0x98c] ss:$16 sps:$4 sm:$0xff]   ;;  %v14315_v20 = vld [vmem:[#allocation2 + $0x980] ss:$16 sps:$4 sm:$0xff]   ;;  %v14323_v21 = vld [vmem:[#allocation2 + $0x964] ss:$16 sps:$4 sm:$0xff]  }
 0x245   :  { %v1122_v26 = vpop.f32.mrf.mxu1  ;;  %2915 = vmatprep.subr.bf16.mxu1 %v14266_v12  ;;  %v14318_v12 = vld [vmem:[#allocation2 + $0x988] ss:$16 sps:$4 sm:$0xff]   ;;  %v14326_v22 = vld [vmem:[#allocation2 + $0x96c] ss:$16 sps:$4 sm:$0xff]   ;;  %v14329_v24 = vld [vmem:[#allocation2 + $0x944] ss:$16 sps:$4 sm:$0xff]  }
 0x246   :  { %v14332_v26 = vld [vmem:[#allocation2 + $0x94c] ss:$16 sps:$4 sm:$0xff]  }
 0x247   :  { %2875 = vmatpush1.bf16.msra.mxu0 %v14261_v23  ;;  %v14321_v23 = vld [vmem:[#allocation2 + $0x960] ss:$16 sps:$4 sm:$0xff]  }
 0x248   :  { %2916 = vmatpush1.bf16.msra.mxu1 %v14264_v16  ;;  %2876 = vmatprep.subr.bf16.mxu0 %v14269_v27  ;;  %v14324_v16 = vld [vmem:[#allocation2 + $0x968] ss:$16 sps:$4 sm:$0xff]   ;;  %v14327_v27 = vld [vmem:[#allocation2 + $0x940] ss:$16 sps:$4 sm:$0xff]  }
 0x249   :  { %2917 = vmatprep.subr.bf16.mxu1 %v14272_v56  ;;  %v14330_v56 = vld [vmem:[#allocation2 + $0x948] ss:$16 sps:$4 sm:$0xff]  }
 0x24b   :  { %2877 = vmatpush1.bf16.msra.mxu0 %v14267_v28  ;;  %v14335_v28 = vld [vmem:[#allocation2 + $0x924] ss:$16 sps:$4 sm:$0xff]  }
 0x24c   :  { %2918 = vmatpush1.bf16.msra.mxu1 %v14270_v30  ;;  %2878 = vmatprep.subr.bf16.mxu0 %v14275_v31  ;;  %v14338_v30 = vld [vmem:[#allocation2 + $0x92c] ss:$16 sps:$4 sm:$0xff]   ;;  %v14333_v31 = vld [vmem:[#allocation2 + $0x920] ss:$16 sps:$4 sm:$0xff]  }
 0x24d   :  { %2919 = vmatprep.subr.bf16.mxu1 %v14278_v33  ;;  %v14336_v33 = vld [vmem:[#allocation2 + $0x928] ss:$16 sps:$4 sm:$0xff]  }
 0x24f   :  { %2879 = vmatpush1.bf16.msra.mxu0 %v14273_v34  ;;  %v14341_v34 = vld [vmem:[#allocation2 + $0x904] ss:$16 sps:$4 sm:$0xff]  }
 0x250   :  { %2920 = vmatpush1.bf16.msra.mxu1 %v14276_v36  ;;  %2880 = vmatprep.subr.bf16.mxu0 %v14281_v37  ;;  %v14344_v36 = vld [vmem:[#allocation2 + $0x90c] ss:$16 sps:$4 sm:$0xff]   ;;  %v14339_v37 = vld [vmem:[#allocation2 + $0x900] ss:$16 sps:$4 sm:$0xff]  }
 0x251   :  { %2921 = vmatprep.subr.bf16.mxu1 %v14284_v38  ;;  %v14342_v38 = vld [vmem:[#allocation2 + $0x908] ss:$16 sps:$4 sm:$0xff]  }
 0x253   :  { %2881 = vmatpush1.bf16.msra.mxu0 %v14279_v39  ;;  %v2477_v39 = vrot.slane %v16518_v10, 2 }
 0x254   :  { %2922 = vmatpush1.bf16.msra.mxu1 %v14282_v0  ;;  %2882 = vmatprep.subr.bf16.mxu0 %v14287_v40 }
 0x255   :  { %2923 = vmatprep.subr.bf16.mxu1 %v14290_v41 }
 0x257   :  { %2883 = vmatpush1.bf16.msra.mxu0 %v14285_v42 }
 0x258   :  { %2924 = vmatpush1.bf16.msra.mxu1 %v14288_v44  ;;  %2884 = vmatprep.subr.bf16.mxu0 %v14293_v48 }
 0x259   :  { %2925 = vmatprep.subr.bf16.mxu1 %v14296_v49 }
 0x25b   :  { %2885 = vmatpush1.bf16.msra.mxu0 %v14291_v25 }
 0x25c   :  { %2926 = vmatpush1.bf16.msra.mxu1 %v14294_v50  ;;  %2886 = vmatprep.subr.bf16.mxu0 %v14299_v51 }
 0x25d   :  { %2927 = vmatprep.subr.bf16.mxu1 %v14302_v53 }
 0x25f   :  { %2887 = vmatpush2.bf16.msra.mxu0 %v14297_v52 }
 0x260   :  { %2928 = vmatpush2.bf16.msra.mxu1 %v14300_v29  ;;  %2888 = vmatprep.subr.bf16.mxu0 %v14305_v54 }
 0x261   :  { %2929 = vmatprep.subr.bf16.mxu1 %v14308_v57 }
 0x263   :  { %2889 = vmatpush2.bf16.msra.mxu0 %v14303_v32 }
 0x264   :  { %2930 = vmatpush2.bf16.msra.mxu1 %v14306_v59  ;;  %2890 = vmatprep.subr.bf16.mxu0 %v14311_v61 }
 0x265   :  { %2931 = vmatprep.subr.bf16.mxu1 %v14314_v63 }
 0x267   :  { %2891 = vmatpush2.bf16.msra.mxu0 %v14309_v60 }
 0x268   :  { %2932 = vmatpush2.bf16.msra.mxu1 %v14312_v11  ;;  %2892 = vmatprep.subr.bf16.mxu0 %v14317_v15 }
 0x269   :  { %2933 = vmatprep.subr.bf16.mxu1 %v14320_v17 }
 0x26b   :  { %2893 = vmatpush2.bf16.msra.mxu0 %v14315_v20 }
 0x26c   :  { %2934 = vmatpush2.bf16.msra.mxu1 %v14318_v12  ;;  %2894 = vmatprep.subr.bf16.mxu0 %v14323_v21 }
 0x26d   :  { %2935 = vmatprep.subr.bf16.mxu1 %v14326_v22 }
 0x26f   :  { %2895 = vmatpush2.bf16.msra.mxu0 %v14321_v23 }
 0x270   :  { %2936 = vmatpush2.bf16.msra.mxu1 %v14324_v16  ;;  %2896 = vmatprep.subr.bf16.mxu0 %v14329_v24 }
 0x271   :  { %2937 = vmatprep.subr.bf16.mxu1 %v14332_v26 }
 0x273   :  { %2897 = vmatpush2.bf16.msra.mxu0 %v14327_v27 }
 0x274   :  { %2938 = vmatpush2.bf16.msra.mxu1 %v14330_v56  ;;  %2898 = vmatprep.subr.bf16.mxu0 %v14335_v28 }
 0x275   :  { %2939 = vmatprep.subr.bf16.mxu1 %v14338_v30 }
 0x277   :  { %2899 = vmatpush2.bf16.msra.mxu0 %v14333_v31 }
 0x278   :  { %2940 = vmatpush2.bf16.msra.mxu1 %v14336_v33  ;;  %2900 = vmatprep.subr.bf16.mxu0 %v14341_v34 }
 0x279   :  { %2941 = vmatprep.subr.bf16.mxu1 %v14344_v36 }
 0x27b   :  { %2901 = vmatpush2.bf16.msra.mxu0 %v14339_v37 }
 0x27c   :  { %2942 = vmatpush2.bf16.msra.mxu1 %v14342_v38 }
 0x27e   :  { %v1478_v0 = vpop.f32.mrf.mxu0  ;;  %12528 = vmatmul.mubr.msk.bf16.vlgmr.msra.gmra.mxu0 %vm537_vm2, %v2477_v39 }
 0x27f   :  { %v1519_v40 = vpop.f32.mrf.mxu1  ;;  %12530 = vmatmul.mubr.msk.bf16.vlgmr.msra.gmra.mxu1 %vm537_vm2, %v2477_v39  ;;  %v1479_v41 = vadd.f32 %v1478_v0, %v16561_v35 }
 0x280   :  { %v1520_v42 = vadd.f32 %v1519_v40, %v16563_v14  ;;  %v1480_v44 = vpop.f32.mrf.mxu0 }
 0x281   :  { %v1521_v48 = vpop.f32.mrf.mxu1  ;;  %v1481_v49 = vadd.f32 %v1480_v44, %v16567_v18 }
 0x282   :  { %v1522_v25 = vadd.f32 %v1521_v48, %v16569_v19  ;;  %v1482_v50 = vpop.f32.mrf.mxu0 }
 0x283   :  { %v1523_v10 = vpop.f32.mrf.mxu1 }
 0x284   :  { %v1483_v51 = vpop.f32.mrf.mxu0 }
 0x285   :  { %v1524_v53 = vpop.f32.mrf.mxu1 }
 0x2be   :  { %v1945_v52 = vpop.f32.mrf.mxu0 }
 0x2bf   :  { %v1986_v29 = vpop.f32.mrf.mxu1  ;;  %v1993_v54 = vadd.f32 %v1945_v52, %v1479_v41 }
 0x2c0   :  { %v1995_v57 = vadd.f32 %v1986_v29, %v1520_v42  ;;  %v1947_v32 = vpop.f32.mrf.mxu0 }
 0x2c1   :  { %v1988_v59 = vpop.f32.mrf.mxu1  ;;  %v1994_v61 = vadd.f32 %v1947_v32, %v1481_v49  ;;  %v3007_v32 = vrot.slane %v16404_v1, %v16434_v45 }
 0x2c2   :  { %v1996_v35 = vadd.f32 %v1988_v59, %v1522_v25  ;;  %v1949_v63 = vpop.f32.mrf.mxu0 }
 0x2c3   :  { %v1990_v14 = vpop.f32.mrf.mxu1 }
 0x2c4   :  { %v1950_v60 = vpop.f32.mrf.mxu0  ;;  %v3019_v14 = vrot.slane %v16480_v7, %v16438_v47 }
 0x2c5   :  { %v1991_v11 = vpop.f32.mrf.mxu1  ;;  %v3027_v60 = vrot.slane %v16404_v1, %v16438_v47 }
 0x2c6   :  { %v3003_v11 = vrot.slane %v16482_v9, %v16434_v45 }
 0x2fe   :  { %v2425_v15 = vpop.f32.mrf.mxu0 }
 0x2ff   :  { %v2466_v18 = vpop.f32.mrf.mxu1  ;;  %v2473_v17 = vadd.f32 %v2425_v15, %v1993_v54  ;;  %v3011_v15 = vrot.slane %v16406_v2, %v16434_v45 }
 0x300   :  { %v2475_v19 = vadd.f32 %v2466_v18, %v1995_v57  ;;  %v2427_v20 = vpop.f32.mrf.mxu0  ;;  %v2999_v57 = vrot.slane %v16480_v7, %v16434_v45 }
 0x301   :  { %v2468_v12 = vpop.f32.mrf.mxu1  ;;  %v2474_v27 = vadd.f32 %v2427_v20, %v1994_v61 }
 0x302   :  { %v2429_v21 = vpop.f32.mrf.mxu0  ;;  %v2476_v56 = vadd.f32 %v2468_v12, %v1996_v35 }
 0x303   :  { %v2470_v22 = vpop.f32.mrf.mxu1 }
 0x304   :  { %v2430_v23 = vpop.f32.mrf.mxu0  ;;  %v3023_v22 = vrot.slane %v16482_v9, %v16438_v47 }
 0x305   :  { %v2471_v16 = vpop.f32.mrf.mxu1  ;;  %v3031_v23 = vrot.slane %v16406_v2, %v16438_v47 }
 0x33e   :  { %v2904_v24 = vpop.f32.mrf.mxu0 }
 0x33f   :  { %v2945_v26 = vpop.f32.mrf.mxu1  ;;  %v2952_v28 = vadd.f32 %v2904_v24, %v2473_v17 }
 0x340   :  { %v2954_v30 = vadd.f32 %v2945_v26, %v2475_v19  ;;  %v2906_v31 = vpop.f32.mrf.mxu0 }
 0x341   :  { %v2947_v33 = vpop.f32.mrf.mxu1  ;;  %v2956_v34 = vmax.f32 %v2952_v28, 0.0  ;;  %v2953_v37 = vadd.f32 %v2906_v31, %v2474_v27 }
 0x342   :  { %v2958_v36 = vmax.f32 %v2954_v30, 0.0  ;;  %v2955_v38 = vadd.f32 %v2947_v33, %v2476_v56  ;;  %v2908_v39 = vpop.f32.mrf.mxu0 }
 0x343   :  { %v2949_v0 = vpop.f32.mrf.mxu1  ;;  %v2964_v40 = vrot.slane %v2956_v34, 2  ;;  %v2957_v42 = vmax.f32 %v2953_v37, 0.0 }
 0x344   :  { %v2966_v41 = vrot.slane %v2958_v36, 2  ;;  %v2959_v44 = vmax.f32 %v2955_v38, 0.0  ;;  %v2909_v48 = vpop.f32.mrf.mxu0 }
 0x345   :  { %v2950_v49 = vpop.f32.mrf.mxu1  ;;  %v2972_v25 = vadd.f32 %v2964_v40, %v2956_v34  ;;  %v2965_v10 = vrot.slane %v2957_v42, 2 }
 0x346   :  { %v2974_v50 = vadd.f32 %v2966_v41, %v2958_v36  ;;  %v2967_v51 = vrot.slane %v2959_v44, 2 }
 0x347   :  { %v2976_v53 = vmul.f32 0.5, %v2972_v25  ;;  %v2973_v29 = vadd.f32 %v2965_v10, %v2957_v42 }
 0x348   :  { %v2978_v52 = vmul.f32 0.5, %v2974_v50  ;;  %v2975_v54 = vadd.f32 %v2967_v51, %v2959_v44 }
 0x349   :  { %v2984_v59 = vrot.slane %v2976_v53, 2  ;;  %v2977_v35 = vmul.f32 0.5, %v2973_v29 }
 0x34a   :  { %v2986_v61 = vrot.slane %v2978_v52, 2  ;;  %v2979_v63 = vmul.f32 0.5, %v2975_v54 }
 0x34b   :  { %v2992_v18 = vsel %vm537_vm2, %v2976_v53, %v2984_v59  ;;  %v2985_v19 = vrot.slane %v2977_v35, 2 }
 0x34c   :  { %v2994_v17 = vsel %vm537_vm2, %v2978_v52, %v2986_v61  ;;  %v2987_v20 = vrot.slane %v2979_v63, 2  ;;  %v3012_v12 = vmul.f32 %v2999_v57, %v2992_v18 }
 0x34d   :  { %v3014_v21 = vmul.f32 %v3007_v32, %v2994_v17  ;;  %v2993_v16 = vsel %vm537_vm2, %v2977_v35, %v2985_v19 }
 0x34e   :  { %v2995_v24 = vsel %vm537_vm2, %v2979_v63, %v2987_v20  ;;  %v3032_v26 = vadd.f32 %v3019_v14, %v3012_v12  ;;  %v3013_v56 = vmul.f32 %v3003_v11, %v2993_v16 }
 0x34f   :  { %v3034_v27 = vadd.f32 %v3027_v60, %v3014_v21  ;;  %v3015_v28 = vmul.f32 %v3011_v15, %v2995_v24 }
 0x350   :  { %v16600_v30 = vpack.c.bf16 %v3032_v26, %v3032_v26  ;;  %v3033_v33 = vadd.f32 %v3023_v22, %v3013_v56 }
 0x351   :  { %v16602_v31 = vpack.c.bf16 %v3034_v27, %v3034_v27  ;;  %v3035_v34 = vadd.f32 %v3031_v23, %v3015_v28 }
 0x352   :  { %v16604_v36 = vpack.c.bf16 %v3033_v33, %v3033_v33 }
 0x353   :  { %v16606_v37 = vpack.c.bf16 %v3035_v34, %v3035_v34 }
 0x354   :  { %16313 = dma.done.wait [#allocation6 + $0x1], 49152 }
 0x355   :  { %16314 = vsyncadd [#allocation6 + $0x1], 4294918144  ;;  %3994 = vmatprep.mubr.bf16.mxu0 %v16604_v36  ;;  %4035 = vmatprep.mubr.bf16.mxu1 %v16606_v37  ;;  %v14345_v47 = vld [vmem:[#allocation3 + $0x4e4] ss:$16 sps:$4 sm:$0xff]   ;;  %v14349_v39 = vld [vmem:[#allocation3 + $0x4e0] ss:$16 sps:$4 sm:$0xff]  }
 0x356   :  { %v14347_v38 = vld [vmem:[#allocation3 + $0x6e4] ss:$16 sps:$4 sm:$0xff]   ;;  %3962 = vmatprep.subr.bf16.mxu0 %v14345_v47  ;;  %v14350_v0 = vld [vmem:[#allocation3 + $0x6e0] ss:$16 sps:$4 sm:$0xff]  }
 0x357   :  { %4003 = vmatprep.subr.bf16.mxu1 %v14347_v38  ;;  %v14351_v40 = vld [vmem:[#allocation3 + $0x4c4] ss:$16 sps:$4 sm:$0xff]   ;;  %3963 = vmatpush1.bf16.msra.mxu0 %v14349_v39  ;;  %v14355_v42 = vld [vmem:[#allocation3 + $0x4c0] ss:$16 sps:$4 sm:$0xff]  }
 0x358   :  { %4004 = vmatpush1.bf16.msra.mxu1 %v14350_v0  ;;  %v14353_v41 = vld [vmem:[#allocation3 + $0x6c4] ss:$16 sps:$4 sm:$0xff]   ;;  %3964 = vmatprep.subr.bf16.mxu0 %v14351_v40  ;;  %v14356_v44 = vld [vmem:[#allocation3 + $0x6c0] ss:$16 sps:$4 sm:$0xff]  }
 0x359   :  { %4005 = vmatprep.subr.bf16.mxu1 %v14353_v41  ;;  %v14357_v48 = vld [vmem:[#allocation3 + $0x4a4] ss:$16 sps:$4 sm:$0xff]   ;;  %v14361_v25 = vld [vmem:[#allocation3 + $0x4a0] ss:$16 sps:$4 sm:$0xff]  }
 0x35a   :  { %v14359_v49 = vld [vmem:[#allocation3 + $0x6a4] ss:$16 sps:$4 sm:$0xff]   ;;  %v14362_v50 = vld [vmem:[#allocation3 + $0x6a0] ss:$16 sps:$4 sm:$0xff]  }
 0x35b   :  { %3965 = vmatpush1.bf16.msra.mxu0 %v14355_v42  ;;  %v14363_v10 = vld [vmem:[#allocation3 + $0x484] ss:$16 sps:$4 sm:$0xff]   ;;  %v14367_v53 = vld [vmem:[#allocation3 + $0x480] ss:$16 sps:$4 sm:$0xff]  }
 0x35c   :  { %4006 = vmatpush1.bf16.msra.mxu1 %v14356_v44  ;;  %3966 = vmatprep.subr.bf16.mxu0 %v14357_v48  ;;  %v14365_v51 = vld [vmem:[#allocation3 + $0x684] ss:$16 sps:$4 sm:$0xff]   ;;  %v14368_v52 = vld [vmem:[#allocation3 + $0x680] ss:$16 sps:$4 sm:$0xff]  }
 0x35d   :  { %4007 = vmatprep.subr.bf16.mxu1 %v14359_v49  ;;  %v14369_v29 = vld [vmem:[#allocation3 + $0x464] ss:$16 sps:$4 sm:$0xff]   ;;  %v14373_v57 = vld [vmem:[#allocation3 + $0x460] ss:$16 sps:$4 sm:$0xff]  }
 0x35e   :  { %v14371_v54 = vld [vmem:[#allocation3 + $0x664] ss:$16 sps:$4 sm:$0xff]   ;;  %v14374_v32 = vld [vmem:[#allocation3 + $0x660] ss:$16 sps:$4 sm:$0xff]  }
 0x35f   :  { %3967 = vmatpush1.bf16.msra.mxu0 %v14361_v25  ;;  %v14375_v59 = vld [vmem:[#allocation3 + $0x444] ss:$16 sps:$4 sm:$0xff]   ;;  %v14379_v35 = vld [vmem:[#allocation3 + $0x440] ss:$16 sps:$4 sm:$0xff]  }
 0x360   :  { %4008 = vmatpush1.bf16.msra.mxu1 %v14362_v50  ;;  %3968 = vmatprep.subr.bf16.mxu0 %v14363_v10  ;;  %v14377_v61 = vld [vmem:[#allocation3 + $0x644] ss:$16 sps:$4 sm:$0xff]   ;;  %v14380_v63 = vld [vmem:[#allocation3 + $0x640] ss:$16 sps:$4 sm:$0xff]  }
 0x361   :  { %4009 = vmatprep.subr.bf16.mxu1 %v14365_v51  ;;  %v14381_v14 = vld [vmem:[#allocation3 + $0x424] ss:$16 sps:$4 sm:$0xff]   ;;  %v14385_v11 = vld [vmem:[#allocation3 + $0x420] ss:$16 sps:$4 sm:$0xff]  }
 0x362   :  { %v14383_v60 = vld [vmem:[#allocation3 + $0x624] ss:$16 sps:$4 sm:$0xff]   ;;  %v14386_v15 = vld [vmem:[#allocation3 + $0x620] ss:$16 sps:$4 sm:$0xff]  }
 0x363   :  { %3969 = vmatpush1.bf16.msra.mxu0 %v14367_v53  ;;  %v14387_v18 = vld [vmem:[#allocation3 + $0x404] ss:$16 sps:$4 sm:$0xff]   ;;  %v14391_v19 = vld [vmem:[#allocation3 + $0x400] ss:$16 sps:$4 sm:$0xff]  }
 0x364   :  { %4010 = vmatpush1.bf16.msra.mxu1 %v14368_v52  ;;  %3970 = vmatprep.subr.bf16.mxu0 %v14369_v29  ;;  %v14389_v17 = vld [vmem:[#allocation3 + $0x604] ss:$16 sps:$4 sm:$0xff]   ;;  %v14392_v20 = vld [vmem:[#allocation3 + $0x600] ss:$16 sps:$4 sm:$0xff]  }
 0x365   :  { %4011 = vmatprep.subr.bf16.mxu1 %v14371_v54  ;;  %v14393_v12 = vld [vmem:[#allocation3 + $0x5e4] ss:$16 sps:$4 sm:$0xff]   ;;  %v14397_v22 = vld [vmem:[#allocation3 + $0x5e0] ss:$16 sps:$4 sm:$0xff]  }
 0x366   :  { %v14395_v21 = vld [vmem:[#allocation3 + $0x7e4] ss:$16 sps:$4 sm:$0xff]   ;;  %v14398_v23 = vld [vmem:[#allocation3 + $0x7e0] ss:$16 sps:$4 sm:$0xff]  }
 0x367   :  { %3971 = vmatpush1.bf16.msra.mxu0 %v14373_v57  ;;  %v14399_v16 = vld [vmem:[#allocation3 + $0x5c4] ss:$16 sps:$4 sm:$0xff]   ;;  %v14403_v26 = vld [vmem:[#allocation3 + $0x5c0] ss:$16 sps:$4 sm:$0xff]  }
 0x368   :  { %4012 = vmatpush1.bf16.msra.mxu1 %v14374_v32  ;;  %3972 = vmatprep.subr.bf16.mxu0 %v14375_v59  ;;  %v14401_v24 = vld [vmem:[#allocation3 + $0x7c4] ss:$16 sps:$4 sm:$0xff]   ;;  %v14404_v27 = vld [vmem:[#allocation3 + $0x7c0] ss:$16 sps:$4 sm:$0xff]   ;;  %v14443_v59 = vld [vmem:[#allocation3 + $0x4ec] ss:$16 sps:$4 sm:$0xff]  }
 0x369   :  { %4013 = vmatprep.subr.bf16.mxu1 %v14377_v61  ;;  %v14405_v56 = vld [vmem:[#allocation3 + $0x5a4] ss:$16 sps:$4 sm:$0xff]   ;;  %v14409_v33 = vld [vmem:[#allocation3 + $0x5a0] ss:$16 sps:$4 sm:$0xff]   ;;  %v14446_v61 = vld [vmem:[#allocation3 + $0x6ec] ss:$16 sps:$4 sm:$0xff]  }
 0x36a   :  { %v14407_v28 = vld [vmem:[#allocation3 + $0x7a4] ss:$16 sps:$4 sm:$0xff]   ;;  %v14410_v34 = vld [vmem:[#allocation3 + $0x7a0] ss:$16 sps:$4 sm:$0xff]  }
 0x36b   :  { %3973 = vmatpush1.bf16.msra.mxu0 %v14379_v35  ;;  %v14411_v47 = vld [vmem:[#allocation3 + $0x584] ss:$16 sps:$4 sm:$0xff]   ;;  %v14415_v39 = vld [vmem:[#allocation3 + $0x580] ss:$16 sps:$4 sm:$0xff]   ;;  %v14441_v35 = vld [vmem:[#allocation3 + $0x4e8] ss:$16 sps:$4 sm:$0xff]  }
 0x36c   :  { %4014 = vmatpush1.bf16.msra.mxu1 %v14380_v63  ;;  %3974 = vmatprep.subr.bf16.mxu0 %v14381_v14  ;;  %v14413_v38 = vld [vmem:[#allocation3 + $0x784] ss:$16 sps:$4 sm:$0xff]   ;;  %v14416_v0 = vld [vmem:[#allocation3 + $0x780] ss:$16 sps:$4 sm:$0xff]   ;;  %v14444_v63 = vld [vmem:[#allocation3 + $0x6e8] ss:$16 sps:$4 sm:$0xff]  }
 0x36d   :  { %4015 = vmatprep.subr.bf16.mxu1 %v14383_v60  ;;  %v14417_v40 = vld [vmem:[#allocation3 + $0x564] ss:$16 sps:$4 sm:$0xff]   ;;  %v14421_v42 = vld [vmem:[#allocation3 + $0x560] ss:$16 sps:$4 sm:$0xff]   ;;  %v14449_v14 = vld [vmem:[#allocation3 + $0x4cc] ss:$16 sps:$4 sm:$0xff]  }
 0x36e   :  { %v14419_v41 = vld [vmem:[#allocation3 + $0x764] ss:$16 sps:$4 sm:$0xff]   ;;  %v14422_v44 = vld [vmem:[#allocation3 + $0x760] ss:$16 sps:$4 sm:$0xff]   ;;  %v14452_v60 = vld [vmem:[#allocation3 + $0x6cc] ss:$16 sps:$4 sm:$0xff]  }
 0x36f   :  { %3975 = vmatpush1.bf16.msra.mxu0 %v14385_v11  ;;  %v14423_v48 = vld [vmem:[#allocation3 + $0x544] ss:$16 sps:$4 sm:$0xff]   ;;  %v14427_v25 = vld [vmem:[#allocation3 + $0x540] ss:$16 sps:$4 sm:$0xff]   ;;  %v14447_v11 = vld [vmem:[#allocation3 + $0x4c8] ss:$16 sps:$4 sm:$0xff]  }
 0x370   :  { %4016 = vmatpush1.bf16.msra.mxu1 %v14386_v15  ;;  %3976 = vmatprep.subr.bf16.mxu0 %v14387_v18  ;;  %v14425_v49 = vld [vmem:[#allocation3 + $0x744] ss:$16 sps:$4 sm:$0xff]   ;;  %v14428_v50 = vld [vmem:[#allocation3 + $0x740] ss:$16 sps:$4 sm:$0xff]   ;;  %v14450_v15 = vld [vmem:[#allocation3 + $0x6c8] ss:$16 sps:$4 sm:$0xff]  }
 0x371   :  { %4017 = vmatprep.subr.bf16.mxu1 %v14389_v17  ;;  %v14429_v10 = vld [vmem:[#allocation3 + $0x524] ss:$16 sps:$4 sm:$0xff]   ;;  %v14433_v53 = vld [vmem:[#allocation3 + $0x520] ss:$16 sps:$4 sm:$0xff]   ;;  %v14455_v18 = vld [vmem:[#allocation3 + $0x4ac] ss:$16 sps:$4 sm:$0xff]  }
 0x372   :  { %v14431_v51 = vld [vmem:[#allocation3 + $0x724] ss:$16 sps:$4 sm:$0xff]   ;;  %v14434_v52 = vld [vmem:[#allocation3 + $0x720] ss:$16 sps:$4 sm:$0xff]   ;;  %v14458_v17 = vld [vmem:[#allocation3 + $0x6ac] ss:$16 sps:$4 sm:$0xff]  }
 0x373   :  { %3977 = vmatpush1.bf16.msra.mxu0 %v14391_v19  ;;  %v14435_v29 = vld [vmem:[#allocation3 + $0x504] ss:$16 sps:$4 sm:$0xff]   ;;  %v14439_v57 = vld [vmem:[#allocation3 + $0x500] ss:$16 sps:$4 sm:$0xff]   ;;  %v14453_v19 = vld [vmem:[#allocation3 + $0x4a8] ss:$16 sps:$4 sm:$0xff]  }
 0x374   :  { %4018 = vmatpush1.bf16.msra.mxu1 %v14392_v20  ;;  %3978 = vmatprep.subr.bf16.mxu0 %v14393_v12  ;;  %v14437_v54 = vld [vmem:[#allocation3 + $0x704] ss:$16 sps:$4 sm:$0xff]   ;;  %v14440_v32 = vld [vmem:[#allocation3 + $0x700] ss:$16 sps:$4 sm:$0xff]   ;;  %v14456_v20 = vld [vmem:[#allocation3 + $0x6a8] ss:$16 sps:$4 sm:$0xff]  }
 0x375   :  { %4019 = vmatprep.subr.bf16.mxu1 %v14395_v21  ;;  %v14461_v12 = vld [vmem:[#allocation3 + $0x48c] ss:$16 sps:$4 sm:$0xff]  }
 0x376   :  { %v14464_v21 = vld [vmem:[#allocation3 + $0x68c] ss:$16 sps:$4 sm:$0xff]  }
 0x377   :  { %3979 = vmatpush2.bf16.msra.mxu0 %v14397_v22  ;;  %v14459_v22 = vld [vmem:[#allocation3 + $0x488] ss:$16 sps:$4 sm:$0xff]  }
 0x378   :  { %4020 = vmatpush2.bf16.msra.mxu1 %v14398_v23  ;;  %3980 = vmatprep.subr.bf16.mxu0 %v14399_v16  ;;  %v14462_v23 = vld [vmem:[#allocation3 + $0x688] ss:$16 sps:$4 sm:$0xff]   ;;  %v14467_v16 = vld [vmem:[#allocation3 + $0x46c] ss:$16 sps:$4 sm:$0xff]  }
 0x379   :  { %4021 = vmatprep.subr.bf16.mxu1 %v14401_v24  ;;  %v14470_v24 = vld [vmem:[#allocation3 + $0x66c] ss:$16 sps:$4 sm:$0xff]  }
 0x37b   :  { %3981 = vmatpush2.bf16.msra.mxu0 %v14403_v26  ;;  %v14465_v26 = vld [vmem:[#allocation3 + $0x468] ss:$16 sps:$4 sm:$0xff]  }
 0x37c   :  { %4022 = vmatpush2.bf16.msra.mxu1 %v14404_v27  ;;  %3982 = vmatprep.subr.bf16.mxu0 %v14405_v56  ;;  %v14468_v27 = vld [vmem:[#allocation3 + $0x668] ss:$16 sps:$4 sm:$0xff]   ;;  %v14473_v56 = vld [vmem:[#allocation3 + $0x44c] ss:$16 sps:$4 sm:$0xff]  }
 0x37d   :  { %4023 = vmatprep.subr.bf16.mxu1 %v14407_v28  ;;  %v14476_v28 = vld [vmem:[#allocation3 + $0x64c] ss:$16 sps:$4 sm:$0xff]  }
 0x37f   :  { %3983 = vmatpush2.bf16.msra.mxu0 %v14409_v33  ;;  %v14471_v33 = vld [vmem:[#allocation3 + $0x448] ss:$16 sps:$4 sm:$0xff]  }
 0x380   :  { %4024 = vmatpush2.bf16.msra.mxu1 %v14410_v34  ;;  %3984 = vmatprep.subr.bf16.mxu0 %v14411_v47  ;;  %v14474_v34 = vld [vmem:[#allocation3 + $0x648] ss:$16 sps:$4 sm:$0xff]   ;;  %v14479_v47 = vld [vmem:[#allocation3 + $0x42c] ss:$16 sps:$4 sm:$0xff]  }
 0x381   :  { %4025 = vmatprep.subr.bf16.mxu1 %v14413_v38  ;;  %v14482_v38 = vld [vmem:[#allocation3 + $0x62c] ss:$16 sps:$4 sm:$0xff]  }
 0x383   :  { %3985 = vmatpush2.bf16.msra.mxu0 %v14415_v39  ;;  %v14477_v39 = vld [vmem:[#allocation3 + $0x428] ss:$16 sps:$4 sm:$0xff]  }
 0x384   :  { %4026 = vmatpush2.bf16.msra.mxu1 %v14416_v0  ;;  %3986 = vmatprep.subr.bf16.mxu0 %v14417_v40  ;;  %v14480_v0 = vld [vmem:[#allocation3 + $0x628] ss:$16 sps:$4 sm:$0xff]   ;;  %v14485_v40 = vld [vmem:[#allocation3 + $0x40c] ss:$16 sps:$4 sm:$0xff]  }
 0x385   :  { %4027 = vmatprep.subr.bf16.mxu1 %v14419_v41  ;;  %v14488_v41 = vld [vmem:[#allocation3 + $0x60c] ss:$16 sps:$4 sm:$0xff]  }
 0x387   :  { %3987 = vmatpush2.bf16.msra.mxu0 %v14421_v42  ;;  %v14483_v42 = vld [vmem:[#allocation3 + $0x408] ss:$16 sps:$4 sm:$0xff]  }
 0x388   :  { %4028 = vmatpush2.bf16.msra.mxu1 %v14422_v44  ;;  %3988 = vmatprep.subr.bf16.mxu0 %v14423_v48  ;;  %v14486_v44 = vld [vmem:[#allocation3 + $0x608] ss:$16 sps:$4 sm:$0xff]   ;;  %v14491_v48 = vld [vmem:[#allocation3 + $0x5ec] ss:$16 sps:$4 sm:$0xff]  }
 0x389   :  { %4029 = vmatprep.subr.bf16.mxu1 %v14425_v49  ;;  %v14494_v49 = vld [vmem:[#allocation3 + $0x7ec] ss:$16 sps:$4 sm:$0xff]  }
 0x38b   :  { %3989 = vmatpush2.bf16.msra.mxu0 %v14427_v25  ;;  %v14489_v25 = vld [vmem:[#allocation3 + $0x5e8] ss:$16 sps:$4 sm:$0xff]  }
 0x38c   :  { %4030 = vmatpush2.bf16.msra.mxu1 %v14428_v50  ;;  %3990 = vmatprep.subr.bf16.mxu0 %v14429_v10  ;;  %v14492_v50 = vld [vmem:[#allocation3 + $0x7e8] ss:$16 sps:$4 sm:$0xff]   ;;  %v14497_v10 = vld [vmem:[#allocation3 + $0x5cc] ss:$16 sps:$4 sm:$0xff]  }
 0x38d   :  { %4031 = vmatprep.subr.bf16.mxu1 %v14431_v51  ;;  %v14500_v51 = vld [vmem:[#allocation3 + $0x7cc] ss:$16 sps:$4 sm:$0xff]  }
 0x38f   :  { %3991 = vmatpush2.bf16.msra.mxu0 %v14433_v53  ;;  %v14495_v53 = vld [vmem:[#allocation3 + $0x5c8] ss:$16 sps:$4 sm:$0xff]  }
 0x390   :  { %4032 = vmatpush2.bf16.msra.mxu1 %v14434_v52  ;;  %3992 = vmatprep.subr.bf16.mxu0 %v14435_v29  ;;  %v14498_v52 = vld [vmem:[#allocation3 + $0x7c8] ss:$16 sps:$4 sm:$0xff]   ;;  %v14503_v29 = vld [vmem:[#allocation3 + $0x5ac] ss:$16 sps:$4 sm:$0xff]  }
 0x391   :  { %4033 = vmatprep.subr.bf16.mxu1 %v14437_v54  ;;  %v14506_v54 = vld [vmem:[#allocation3 + $0x7ac] ss:$16 sps:$4 sm:$0xff]  }
 0x393   :  { %3993 = vmatpush2.bf16.msra.mxu0 %v14439_v57  ;;  %v14501_v57 = vld [vmem:[#allocation3 + $0x5a8] ss:$16 sps:$4 sm:$0xff]  }
 0x394   :  { %4034 = vmatpush2.bf16.msra.mxu1 %v14440_v32  ;;  %4044 = vmatprep.subr.bf16.mxu0 %v14443_v59  ;;  %v14504_v32 = vld [vmem:[#allocation3 + $0x7a8] ss:$16 sps:$4 sm:$0xff]   ;;  %v14509_v59 = vld [vmem:[#allocation3 + $0x58c] ss:$16 sps:$4 sm:$0xff]  }
 0x395   :  { %4085 = vmatprep.subr.bf16.mxu1 %v14446_v61  ;;  %v14512_v61 = vld [vmem:[#allocation3 + $0x78c] ss:$16 sps:$4 sm:$0xff]  }
 0x396   :  { %3995 = vmatmul.mubr.bf16.vlgmr.msra.gmra.mxu0 %v16600_v30 }
 0x397   :  { %4036 = vmatmul.mubr.bf16.vlgmr.msra.gmra.mxu1 %v16602_v31  ;;  %4045 = vmatpush1.bf16.msra.mxu0 %v14441_v35  ;;  %v14507_v35 = vld [vmem:[#allocation3 + $0x588] ss:$16 sps:$4 sm:$0xff]  }
 0x398   :  { %4086 = vmatpush1.bf16.msra.mxu1 %v14444_v63  ;;  %4046 = vmatprep.subr.bf16.mxu0 %v14449_v14  ;;  %v14510_v63 = vld [vmem:[#allocation3 + $0x788] ss:$16 sps:$4 sm:$0xff]   ;;  %v14515_v14 = vld [vmem:[#allocation3 + $0x56c] ss:$16 sps:$4 sm:$0xff]  }
 0x399   :  { %4087 = vmatprep.subr.bf16.mxu1 %v14452_v60  ;;  %4076 = vmatprep.mubr.bf16.mxu0 %v16604_v36  ;;  %v14518_v60 = vld [vmem:[#allocation3 + $0x76c] ss:$16 sps:$4 sm:$0xff]  }
 0x39a   :  { %4117 = vmatprep.mubr.bf16.mxu1 %v16606_v37 }
 0x39b   :  { %4047 = vmatpush1.bf16.msra.mxu0 %v14447_v11  ;;  %v14513_v11 = vld [vmem:[#allocation3 + $0x568] ss:$16 sps:$4 sm:$0xff]  }
 0x39c   :  { %4088 = vmatpush1.bf16.msra.mxu1 %v14450_v15  ;;  %4048 = vmatprep.subr.bf16.mxu0 %v14455_v18  ;;  %v14516_v15 = vld [vmem:[#allocation3 + $0x768] ss:$16 sps:$4 sm:$0xff]   ;;  %v14521_v18 = vld [vmem:[#allocation3 + $0x54c] ss:$16 sps:$4 sm:$0xff]  }
 0x39d   :  { %4089 = vmatprep.subr.bf16.mxu1 %v14458_v17  ;;  %v14524_v17 = vld [vmem:[#allocation3 + $0x74c] ss:$16 sps:$4 sm:$0xff]  }
 0x39f   :  { %4049 = vmatpush1.bf16.msra.mxu0 %v14453_v19  ;;  %v14519_v19 = vld [vmem:[#allocation3 + $0x548] ss:$16 sps:$4 sm:$0xff]  }
 0x3a0   :  { %4090 = vmatpush1.bf16.msra.mxu1 %v14456_v20  ;;  %4050 = vmatprep.subr.bf16.mxu0 %v14461_v12  ;;  %v14522_v20 = vld [vmem:[#allocation3 + $0x748] ss:$16 sps:$4 sm:$0xff]   ;;  %v14527_v12 = vld [vmem:[#allocation3 + $0x52c] ss:$16 sps:$4 sm:$0xff]  }
 0x3a1   :  { %4091 = vmatprep.subr.bf16.mxu1 %v14464_v21  ;;  %v14530_v21 = vld [vmem:[#allocation3 + $0x72c] ss:$16 sps:$4 sm:$0xff]  }
 0x3a3   :  { %4051 = vmatpush1.bf16.msra.mxu0 %v14459_v22  ;;  %v14525_v22 = vld [vmem:[#allocation3 + $0x528] ss:$16 sps:$4 sm:$0xff]  }
 0x3a4   :  { %4092 = vmatpush1.bf16.msra.mxu1 %v14462_v23  ;;  %4052 = vmatprep.subr.bf16.mxu0 %v14467_v16  ;;  %v14528_v23 = vld [vmem:[#allocation3 + $0x728] ss:$16 sps:$4 sm:$0xff]   ;;  %v14533_v16 = vld [vmem:[#allocation3 + $0x50c] ss:$16 sps:$4 sm:$0xff]  }
 0x3a5   :  { %4093 = vmatprep.subr.bf16.mxu1 %v14470_v24  ;;  %v14536_v24 = vld [vmem:[#allocation3 + $0x70c] ss:$16 sps:$4 sm:$0xff]  }
 0x3a7   :  { %4053 = vmatpush1.bf16.msra.mxu0 %v14465_v26  ;;  %v14531_v26 = vld [vmem:[#allocation3 + $0x508] ss:$16 sps:$4 sm:$0xff]  }
 0x3a8   :  { %4094 = vmatpush1.bf16.msra.mxu1 %v14468_v27  ;;  %4054 = vmatprep.subr.bf16.mxu0 %v14473_v56  ;;  %v14534_v27 = vld [vmem:[#allocation3 + $0x708] ss:$16 sps:$4 sm:$0xff]   ;;  %v14539_v56 = vld [vmem:[#allocation3 + $0xe4] ss:$16 sps:$4 sm:$0xff]  }
 0x3a9   :  { %4095 = vmatprep.subr.bf16.mxu1 %v14476_v28  ;;  %v14542_v28 = vld [vmem:[#allocation3 + $0x2e4] ss:$16 sps:$4 sm:$0xff]  }
 0x3ab   :  { %4055 = vmatpush1.bf16.msra.mxu0 %v14471_v33  ;;  %v14537_v33 = vld [vmem:[#allocation3 + $0xe0] ss:$16 sps:$4 sm:$0xff]  }
 0x3ac   :  { %4096 = vmatpush1.bf16.msra.mxu1 %v14474_v34  ;;  %4056 = vmatprep.subr.bf16.mxu0 %v14479_v47  ;;  %v14540_v34 = vld [vmem:[#allocation3 + $0x2e0] ss:$16 sps:$4 sm:$0xff]   ;;  %v14545_v47 = vld [vmem:[#allocation3 + $0xc4] ss:$16 sps:$4 sm:$0xff]  }
 0x3ad   :  { %4097 = vmatprep.subr.bf16.mxu1 %v14482_v38  ;;  %v14548_v38 = vld [vmem:[#allocation3 + $0x2c4] ss:$16 sps:$4 sm:$0xff]  }
 0x3af   :  { %4057 = vmatpush1.bf16.msra.mxu0 %v14477_v39  ;;  %v3050_v39 = vrot.slane %v16604_v36, 7 }
 0x3b0   :  { %4098 = vmatpush1.bf16.msra.mxu1 %v14480_v0  ;;  %4058 = vmatprep.subr.bf16.mxu0 %v14485_v40  ;;  %v3052_v0 = vrot.slane %v16606_v37, 7  ;;  %v14543_v40 = vld [vmem:[#allocation3 + $0xc0] ss:$16 sps:$4 sm:$0xff]  }
 0x3b1   :  { %4099 = vmatprep.subr.bf16.mxu1 %v14488_v41  ;;  %v14546_v41 = vld [vmem:[#allocation3 + $0x2c0] ss:$16 sps:$4 sm:$0xff]  }
 0x3b3   :  { %4059 = vmatpush1.bf16.msra.mxu0 %v14483_v42  ;;  %v14551_v42 = vld [vmem:[#allocation3 + $0xa4] ss:$16 sps:$4 sm:$0xff]  }
 0x3b4   :  { %4100 = vmatpush1.bf16.msra.mxu1 %v14486_v44  ;;  %4060 = vmatprep.subr.bf16.mxu0 %v14491_v48  ;;  %v14554_v44 = vld [vmem:[#allocation3 + $0x2a4] ss:$16 sps:$4 sm:$0xff]   ;;  %v14549_v48 = vld [vmem:[#allocation3 + $0xa0] ss:$16 sps:$4 sm:$0xff]  }
 0x3b5   :  { %4101 = vmatprep.subr.bf16.mxu1 %v14494_v49  ;;  %v14552_v49 = vld [vmem:[#allocation3 + $0x2a0] ss:$16 sps:$4 sm:$0xff]  }
 0x3b7   :  { %4061 = vmatpush2.bf16.msra.mxu0 %v14489_v25  ;;  %v14557_v25 = vld [vmem:[#allocation3 + $0x84] ss:$16 sps:$4 sm:$0xff]  }
 0x3b8   :  { %4102 = vmatpush2.bf16.msra.mxu1 %v14492_v50  ;;  %4062 = vmatprep.subr.bf16.mxu0 %v14497_v10  ;;  %v14560_v50 = vld [vmem:[#allocation3 + $0x284] ss:$16 sps:$4 sm:$0xff]   ;;  %v14555_v10 = vld [vmem:[#allocation3 + $0x80] ss:$16 sps:$4 sm:$0xff]  }
 0x3b9   :  { %4103 = vmatprep.subr.bf16.mxu1 %v14500_v51  ;;  %v14558_v51 = vld [vmem:[#allocation3 + $0x280] ss:$16 sps:$4 sm:$0xff]  }
 0x3bb   :  { %4063 = vmatpush2.bf16.msra.mxu0 %v14495_v53  ;;  %v14563_v53 = vld [vmem:[#allocation3 + $0x64] ss:$16 sps:$4 sm:$0xff]  }
 0x3bc   :  { %4104 = vmatpush2.bf16.msra.mxu1 %v14498_v52  ;;  %4064 = vmatprep.subr.bf16.mxu0 %v14503_v29  ;;  %v14566_v52 = vld [vmem:[#allocation3 + $0x264] ss:$16 sps:$4 sm:$0xff]   ;;  %v14561_v29 = vld [vmem:[#allocation3 + $0x60] ss:$16 sps:$4 sm:$0xff]  }
 0x3bd   :  { %4105 = vmatprep.subr.bf16.mxu1 %v14506_v54  ;;  %v14564_v54 = vld [vmem:[#allocation3 + $0x260] ss:$16 sps:$4 sm:$0xff]  }
 0x3bf   :  { %4065 = vmatpush2.bf16.msra.mxu0 %v14501_v57  ;;  %v14569_v57 = vld [vmem:[#allocation3 + $0x44] ss:$16 sps:$4 sm:$0xff]  }
 0x3c0   :  { %4106 = vmatpush2.bf16.msra.mxu1 %v14504_v32  ;;  %4066 = vmatprep.subr.bf16.mxu0 %v14509_v59  ;;  %v14572_v32 = vld [vmem:[#allocation3 + $0x244] ss:$16 sps:$4 sm:$0xff]   ;;  %v14567_v59 = vld [vmem:[#allocation3 + $0x40] ss:$16 sps:$4 sm:$0xff]  }
 0x3c1   :  { %4107 = vmatprep.subr.bf16.mxu1 %v14512_v61  ;;  %v14570_v61 = vld [vmem:[#allocation3 + $0x240] ss:$16 sps:$4 sm:$0xff]  }
 0x3c3   :  { %4067 = vmatpush2.bf16.msra.mxu0 %v14507_v35  ;;  %v14575_v35 = vld [vmem:[#allocation3 + $0x24] ss:$16 sps:$4 sm:$0xff]  }
 0x3c4   :  { %4108 = vmatpush2.bf16.msra.mxu1 %v14510_v63  ;;  %4068 = vmatprep.subr.bf16.mxu0 %v14515_v14  ;;  %v14578_v63 = vld [vmem:[#allocation3 + $0x224] ss:$16 sps:$4 sm:$0xff]   ;;  %v14573_v14 = vld [vmem:[#allocation3 + $0x20] ss:$16 sps:$4 sm:$0xff]  }
 0x3c5   :  { %4109 = vmatprep.subr.bf16.mxu1 %v14518_v60  ;;  %v14576_v60 = vld [vmem:[#allocation3 + $0x220] ss:$16 sps:$4 sm:$0xff]  }
 0x3c7   :  { %4069 = vmatpush2.bf16.msra.mxu0 %v14513_v11  ;;  %v14581_v11 = vld [vmem:[#allocation3 + $0x4] ss:$16 sps:$4 sm:$0xff]  }
 0x3c8   :  { %4110 = vmatpush2.bf16.msra.mxu1 %v14516_v15  ;;  %4070 = vmatprep.subr.bf16.mxu0 %v14521_v18  ;;  %v14584_v15 = vld [vmem:[#allocation3 + $0x204] ss:$16 sps:$4 sm:$0xff]   ;;  %v14579_v18 = vld [vmem:[#allocation3] ss:$16 sps:$4 sm:$0xff]  }
 0x3c9   :  { %4111 = vmatprep.subr.bf16.mxu1 %v14524_v17  ;;  %v14582_v17 = vld [vmem:[#allocation3 + $0x200] ss:$16 sps:$4 sm:$0xff]  }
 0x3cb   :  { %4071 = vmatpush2.bf16.msra.mxu0 %v14519_v19  ;;  %v14587_v19 = vld [vmem:[#allocation3 + $0x1e4] ss:$16 sps:$4 sm:$0xff]  }
 0x3cc   :  { %4112 = vmatpush2.bf16.msra.mxu1 %v14522_v20  ;;  %4072 = vmatprep.subr.bf16.mxu0 %v14527_v12  ;;  %v14590_v20 = vld [vmem:[#allocation3 + $0x3e4] ss:$16 sps:$4 sm:$0xff]   ;;  %v14585_v12 = vld [vmem:[#allocation3 + $0x1e0] ss:$16 sps:$4 sm:$0xff]  }
 0x3cd   :  { %4113 = vmatprep.subr.bf16.mxu1 %v14530_v21  ;;  %v14588_v21 = vld [vmem:[#allocation3 + $0x3e0] ss:$16 sps:$4 sm:$0xff]  }
 0x3cf   :  { %4073 = vmatpush2.bf16.msra.mxu0 %v14525_v22  ;;  %v14593_v22 = vld [vmem:[#allocation3 + $0x1c4] ss:$16 sps:$4 sm:$0xff]  }
 0x3d0   :  { %4114 = vmatpush2.bf16.msra.mxu1 %v14528_v23  ;;  %4074 = vmatprep.subr.bf16.mxu0 %v14533_v16  ;;  %v14596_v23 = vld [vmem:[#allocation3 + $0x3c4] ss:$16 sps:$4 sm:$0xff]   ;;  %v14591_v16 = vld [vmem:[#allocation3 + $0x1c0] ss:$16 sps:$4 sm:$0xff]  }
 0x3d1   :  { %4115 = vmatprep.subr.bf16.mxu1 %v14536_v24  ;;  %v14594_v24 = vld [vmem:[#allocation3 + $0x3c0] ss:$16 sps:$4 sm:$0xff]  }
 0x3d3   :  { %4075 = vmatpush2.bf16.msra.mxu0 %v14531_v26  ;;  %v14599_v26 = vld [vmem:[#allocation3 + $0x1a4] ss:$16 sps:$4 sm:$0xff]  }
 0x3d4   :  { %4116 = vmatpush2.bf16.msra.mxu1 %v14534_v27  ;;  %4766 = vmatprep.subr.bf16.mxu0 %v14539_v56  ;;  %v14602_v27 = vld [vmem:[#allocation3 + $0x3a4] ss:$16 sps:$4 sm:$0xff]   ;;  %v14597_v56 = vld [vmem:[#allocation3 + $0x1a0] ss:$16 sps:$4 sm:$0xff]  }
 0x3d5   :  { %4807 = vmatprep.subr.bf16.mxu1 %v14542_v28  ;;  %v14600_v28 = vld [vmem:[#allocation3 + $0x3a0] ss:$16 sps:$4 sm:$0xff]  }
 0x3d6   :  { %4077 = vmatmul.mubr.bf16.vlgmr.msra.gmra.mxu0 %v16600_v30 }
 0x3d7   :  { %4118 = vmatmul.mubr.bf16.vlgmr.msra.gmra.mxu1 %v16602_v31  ;;  %4767 = vmatpush1.bf16.msra.mxu0 %v14537_v33  ;;  %v14605_v33 = vld [vmem:[#allocation3 + $0x184] ss:$16 sps:$4 sm:$0xff]  }
 0x3d8   :  { %4808 = vmatpush1.bf16.msra.mxu1 %v14540_v34  ;;  %4768 = vmatprep.subr.bf16.mxu0 %v14545_v47  ;;  %v14608_v34 = vld [vmem:[#allocation3 + $0x384] ss:$16 sps:$4 sm:$0xff]   ;;  %v14603_v47 = vld [vmem:[#allocation3 + $0x180] ss:$16 sps:$4 sm:$0xff]  }
 0x3d9   :  { %4809 = vmatprep.subr.bf16.mxu1 %v14548_v38  ;;  %12788 = vmatprep.mubr.msk.bf16.mxu0 %vm16524_vm13, %v3050_v39  ;;  %v14606_v38 = vld [vmem:[#allocation3 + $0x380] ss:$16 sps:$4 sm:$0xff]  }
 0x3da   :  { %12792 = vmatprep.mubr.msk.bf16.mxu1 %vm16524_vm13, %v3052_v0 }
 0x3db   :  { %4769 = vmatpush1.bf16.msra.mxu0 %v14543_v40  ;;  %v14611_v40 = vld [vmem:[#allocation3 + $0x164] ss:$16 sps:$4 sm:$0xff]  }
 0x3dc   :  { %4810 = vmatpush1.bf16.msra.mxu1 %v14546_v41  ;;  %4770 = vmatprep.subr.bf16.mxu0 %v14551_v42  ;;  %v14614_v41 = vld [vmem:[#allocation3 + $0x364] ss:$16 sps:$4 sm:$0xff]   ;;  %v14609_v42 = vld [vmem:[#allocation3 + $0x160] ss:$16 sps:$4 sm:$0xff]  }
 0x3dd   :  { %4811 = vmatprep.subr.bf16.mxu1 %v14554_v44  ;;  %v14612_v44 = vld [vmem:[#allocation3 + $0x360] ss:$16 sps:$4 sm:$0xff]  }
 0x3df   :  { %4771 = vmatpush1.bf16.msra.mxu0 %v14549_v48  ;;  %v14617_v48 = vld [vmem:[#allocation3 + $0x144] ss:$16 sps:$4 sm:$0xff]  }
 0x3e0   :  { %4812 = vmatpush1.bf16.msra.mxu1 %v14552_v49  ;;  %4772 = vmatprep.subr.bf16.mxu0 %v14557_v25  ;;  %v14620_v49 = vld [vmem:[#allocation3 + $0x344] ss:$16 sps:$4 sm:$0xff]   ;;  %v14615_v25 = vld [vmem:[#allocation3 + $0x140] ss:$16 sps:$4 sm:$0xff]  }
 0x3e1   :  { %4813 = vmatprep.subr.bf16.mxu1 %v14560_v50  ;;  %v14618_v50 = vld [vmem:[#allocation3 + $0x340] ss:$16 sps:$4 sm:$0xff]  }
 0x3e3   :  { %4773 = vmatpush1.bf16.msra.mxu0 %v14555_v10  ;;  %v14623_v10 = vld [vmem:[#allocation3 + $0x124] ss:$16 sps:$4 sm:$0xff]  }
 0x3e4   :  { %4814 = vmatpush1.bf16.msra.mxu1 %v14558_v51  ;;  %4774 = vmatprep.subr.bf16.mxu0 %v14563_v53  ;;  %v14626_v51 = vld [vmem:[#allocation3 + $0x324] ss:$16 sps:$4 sm:$0xff]   ;;  %v14621_v53 = vld [vmem:[#allocation3 + $0x120] ss:$16 sps:$4 sm:$0xff]  }
 0x3e5   :  { %4815 = vmatprep.subr.bf16.mxu1 %v14566_v52  ;;  %v14624_v52 = vld [vmem:[#allocation3 + $0x320] ss:$16 sps:$4 sm:$0xff]  }
 0x3e7   :  { %4775 = vmatpush1.bf16.msra.mxu0 %v14561_v29  ;;  %v14629_v29 = vld [vmem:[#allocation3 + $0x104] ss:$16 sps:$4 sm:$0xff]  }
 0x3e8   :  { %4816 = vmatpush1.bf16.msra.mxu1 %v14564_v54  ;;  %4776 = vmatprep.subr.bf16.mxu0 %v14569_v57  ;;  %v14632_v54 = vld [vmem:[#allocation3 + $0x304] ss:$16 sps:$4 sm:$0xff]   ;;  %v14627_v57 = vld [vmem:[#allocation3 + $0x100] ss:$16 sps:$4 sm:$0xff]  }
 0x3e9   :  { %4817 = vmatprep.subr.bf16.mxu1 %v14572_v32  ;;  %v14630_v32 = vld [vmem:[#allocation3 + $0x300] ss:$16 sps:$4 sm:$0xff]  }
 0x3eb   :  { %4777 = vmatpush1.bf16.msra.mxu0 %v14567_v59  ;;  %v14635_v59 = vld [vmem:[#allocation3 + $0xec] ss:$16 sps:$4 sm:$0xff]  }
 0x3ec   :  { %4818 = vmatpush1.bf16.msra.mxu1 %v14570_v61  ;;  %4778 = vmatprep.subr.bf16.mxu0 %v14575_v35  ;;  %v14638_v61 = vld [vmem:[#allocation3 + $0x2ec] ss:$16 sps:$4 sm:$0xff]   ;;  %v3049_v35 = vrot.slane %v16600_v30, 7 }
 0x3ed   :  { %4819 = vmatprep.subr.bf16.mxu1 %v14578_v63  ;;  %v3051_v63 = vrot.slane %v16602_v31, 7 }
 0x3ef   :  { %4779 = vmatpush1.bf16.msra.mxu0 %v14573_v14  ;;  %v14633_v14 = vld [vmem:[#allocation3 + $0xe8] ss:$16 sps:$4 sm:$0xff]  }
 0x3f0   :  { %4820 = vmatpush1.bf16.msra.mxu1 %v14576_v60  ;;  %4780 = vmatprep.subr.bf16.mxu0 %v14581_v11  ;;  %v14636_v60 = vld [vmem:[#allocation3 + $0x2e8] ss:$16 sps:$4 sm:$0xff]   ;;  %v14641_v11 = vld [vmem:[#allocation3 + $0xcc] ss:$16 sps:$4 sm:$0xff]  }
 0x3f1   :  { %4821 = vmatprep.subr.bf16.mxu1 %v14584_v15  ;;  %v14644_v15 = vld [vmem:[#allocation3 + $0x2cc] ss:$16 sps:$4 sm:$0xff]  }
 0x3f3   :  { %4781 = vmatpush1.bf16.msra.mxu0 %v14579_v18  ;;  %v14639_v18 = vld [vmem:[#allocation3 + $0xc8] ss:$16 sps:$4 sm:$0xff]  }
 0x3f4   :  { %4822 = vmatpush1.bf16.msra.mxu1 %v14582_v17  ;;  %4782 = vmatprep.subr.bf16.mxu0 %v14587_v19  ;;  %v14642_v17 = vld [vmem:[#allocation3 + $0x2c8] ss:$16 sps:$4 sm:$0xff]   ;;  %v14647_v19 = vld [vmem:[#allocation3 + $0xac] ss:$16 sps:$4 sm:$0xff]  }
 0x3f5   :  { %4823 = vmatprep.subr.bf16.mxu1 %v14590_v20  ;;  %v14650_v20 = vld [vmem:[#allocation3 + $0x2ac] ss:$16 sps:$4 sm:$0xff]  }
 0x3f7   :  { %4783 = vmatpush2.bf16.msra.mxu0 %v14585_v12  ;;  %v14645_v12 = vld [vmem:[#allocation3 + $0xa8] ss:$16 sps:$4 sm:$0xff]  }
 0x3f8   :  { %4824 = vmatpush2.bf16.msra.mxu1 %v14588_v21  ;;  %4784 = vmatprep.subr.bf16.mxu0 %v14593_v22  ;;  %v14648_v21 = vld [vmem:[#allocation3 + $0x2a8] ss:$16 sps:$4 sm:$0xff]   ;;  %v14653_v22 = vld [vmem:[#allocation3 + $0x8c] ss:$16 sps:$4 sm:$0xff]  }
 0x3f9   :  { %4825 = vmatprep.subr.bf16.mxu1 %v14596_v23  ;;  %v14656_v23 = vld [vmem:[#allocation3 + $0x28c] ss:$16 sps:$4 sm:$0xff]  }
 0x3fb   :  { %4785 = vmatpush2.bf16.msra.mxu0 %v14591_v16  ;;  %v14651_v16 = vld [vmem:[#allocation3 + $0x88] ss:$16 sps:$4 sm:$0xff]  }
 0x3fc   :  { %4826 = vmatpush2.bf16.msra.mxu1 %v14594_v24  ;;  %4786 = vmatprep.subr.bf16.mxu0 %v14599_v26  ;;  %v14654_v24 = vld [vmem:[#allocation3 + $0x288] ss:$16 sps:$4 sm:$0xff]   ;;  %v14659_v26 = vld [vmem:[#allocation3 + $0x6c] ss:$16 sps:$4 sm:$0xff]  }
 0x3fd   :  { %4827 = vmatprep.subr.bf16.mxu1 %v14602_v27  ;;  %v14657_v27 = vld [vmem:[#allocation3 + $0x68] ss:$16 sps:$4 sm:$0xff]  }
 0x3ff   :  { %4787 = vmatpush2.bf16.msra.mxu0 %v14597_v56  ;;  %v14660_v56 = vld [vmem:[#allocation3 + $0x268] ss:$16 sps:$4 sm:$0xff]  }
 0x400   :  { %4828 = vmatpush2.bf16.msra.mxu1 %v14600_v28  ;;  %4788 = vmatprep.subr.bf16.mxu0 %v14605_v33  ;;  %v14668_v28 = vld [vmem:[#allocation3 + $0x24c] ss:$16 sps:$4 sm:$0xff]   ;;  %v14663_v33 = vld [vmem:[#allocation3 + $0x48] ss:$16 sps:$4 sm:$0xff]  }
 0x401   :  { %4829 = vmatprep.subr.bf16.mxu1 %v14608_v34  ;;  %v14666_v34 = vld [vmem:[#allocation3 + $0x248] ss:$16 sps:$4 sm:$0xff]  }
 0x403   :  { %4789 = vmatpush2.bf16.msra.mxu0 %v14603_v47  ;;  %v14671_v47 = vld [vmem:[#allocation3 + $0x2c] ss:$16 sps:$4 sm:$0xff]  }
 0x404   :  { %4830 = vmatpush2.bf16.msra.mxu1 %v14606_v38  ;;  %4790 = vmatprep.subr.bf16.mxu0 %v14611_v40  ;;  %v14674_v38 = vld [vmem:[#allocation3 + $0x22c] ss:$16 sps:$4 sm:$0xff]   ;;  %v14669_v40 = vld [vmem:[#allocation3 + $0x28] ss:$16 sps:$4 sm:$0xff]  }
 0x405   :  { %4831 = vmatprep.subr.bf16.mxu1 %v14614_v41  ;;  %v14672_v41 = vld [vmem:[#allocation3 + $0x228] ss:$16 sps:$4 sm:$0xff]  }
 0x407   :  { %4791 = vmatpush2.bf16.msra.mxu0 %v14609_v42  ;;  %v14677_v42 = vld [vmem:[#allocation3 + $0xc] ss:$16 sps:$4 sm:$0xff]  }
 0x408   :  { %4832 = vmatpush2.bf16.msra.mxu1 %v14612_v44  ;;  %4792 = vmatprep.subr.bf16.mxu0 %v14617_v48  ;;  %v14680_v44 = vld [vmem:[#allocation3 + $0x20c] ss:$16 sps:$4 sm:$0xff]   ;;  %v14675_v48 = vld [vmem:[#allocation3 + $0x8] ss:$16 sps:$4 sm:$0xff]  }
 0x409   :  { %4833 = vmatprep.subr.bf16.mxu1 %v14620_v49  ;;  %v14678_v49 = vld [vmem:[#allocation3 + $0x208] ss:$16 sps:$4 sm:$0xff]  }
 0x40b   :  { %4793 = vmatpush2.bf16.msra.mxu0 %v14615_v25  ;;  %v14683_v25 = vld [vmem:[#allocation3 + $0x1ec] ss:$16 sps:$4 sm:$0xff]  }
 0x40c   :  { %4834 = vmatpush2.bf16.msra.mxu1 %v14618_v50  ;;  %4794 = vmatprep.subr.bf16.mxu0 %v14623_v10  ;;  %v14686_v50 = vld [vmem:[#allocation3 + $0x3ec] ss:$16 sps:$4 sm:$0xff]   ;;  %v14681_v10 = vld [vmem:[#allocation3 + $0x1e8] ss:$16 sps:$4 sm:$0xff]  }
 0x40d   :  { %4835 = vmatprep.subr.bf16.mxu1 %v14626_v51  ;;  %v14684_v51 = vld [vmem:[#allocation3 + $0x3e8] ss:$16 sps:$4 sm:$0xff]  }
 0x40f   :  { %4795 = vmatpush2.bf16.msra.mxu0 %v14621_v53  ;;  %v14689_v53 = vld [vmem:[#allocation3 + $0x1cc] ss:$16 sps:$4 sm:$0xff]  }
 0x410   :  { %4836 = vmatpush2.bf16.msra.mxu1 %v14624_v52  ;;  %4796 = vmatprep.subr.bf16.mxu0 %v14629_v29  ;;  %v14692_v52 = vld [vmem:[#allocation3 + $0x3cc] ss:$16 sps:$4 sm:$0xff]   ;;  %v14687_v29 = vld [vmem:[#allocation3 + $0x1c8] ss:$16 sps:$4 sm:$0xff]  }
 0x411   :  { %4837 = vmatprep.subr.bf16.mxu1 %v14632_v54  ;;  %v14690_v54 = vld [vmem:[#allocation3 + $0x3c8] ss:$16 sps:$4 sm:$0xff]  }
 0x413   :  { %4797 = vmatpush2.bf16.msra.mxu0 %v14627_v57  ;;  %v14695_v57 = vld [vmem:[#allocation3 + $0x1ac] ss:$16 sps:$4 sm:$0xff]  }
 0x414   :  { %4838 = vmatpush2.bf16.msra.mxu1 %v14630_v32  ;;  %4848 = vmatprep.subr.bf16.mxu0 %v14635_v59  ;;  %v14698_v32 = vld [vmem:[#allocation3 + $0x3ac] ss:$16 sps:$4 sm:$0xff]   ;;  %v14693_v59 = vld [vmem:[#allocation3 + $0x1a8] ss:$16 sps:$4 sm:$0xff]  }
 0x415   :  { %4889 = vmatprep.subr.bf16.mxu1 %v14638_v61  ;;  %v14696_v61 = vld [vmem:[#allocation3 + $0x3a8] ss:$16 sps:$4 sm:$0xff]  }
 0x416   :  { %12790 = vmatmul.mubr.msk.bf16.vlgmr.msra.gmra.mxu0 %vm16524_vm13, %v3049_v35 }
 0x417   :  { %12794 = vmatmul.mubr.msk.bf16.vlgmr.msra.gmra.mxu1 %vm16524_vm13, %v3051_v63  ;;  %4849 = vmatpush1.bf16.msra.mxu0 %v14633_v14  ;;  %v14701_v14 = vld [vmem:[#allocation3 + $0x18c] ss:$16 sps:$4 sm:$0xff]  }
 0x418   :  { %4890 = vmatpush1.bf16.msra.mxu1 %v14636_v60  ;;  %4850 = vmatprep.subr.bf16.mxu0 %v14641_v11  ;;  %v14704_v60 = vld [vmem:[#allocation3 + $0x38c] ss:$16 sps:$4 sm:$0xff]   ;;  %v14699_v11 = vld [vmem:[#allocation3 + $0x188] ss:$16 sps:$4 sm:$0xff]  }
 0x419   :  { %4891 = vmatprep.subr.bf16.mxu1 %v14644_v15  ;;  %12796 = vmatprep.mubr.msk.bf16.mxu0 %vm16524_vm13, %v3050_v39  ;;  %v14662_v39 = vld [vmem:[#allocation3 + $0x26c] ss:$16 sps:$4 sm:$0xff]   ;;  %v14702_v15 = vld [vmem:[#allocation3 + $0x388] ss:$16 sps:$4 sm:$0xff]  }
 0x41a   :  { %12800 = vmatprep.mubr.msk.bf16.mxu1 %vm16524_vm13, %v3052_v0  ;;  %v14665_v0 = vld [vmem:[#allocation3 + $0x4c] ss:$16 sps:$4 sm:$0xff]  }
 0x41b   :  { %4851 = vmatpush1.bf16.msra.mxu0 %v14639_v18  ;;  %v14707_v18 = vld [vmem:[#allocation3 + $0x16c] ss:$16 sps:$4 sm:$0xff]  }
 0x41c   :  { %4892 = vmatpush1.bf16.msra.mxu1 %v14642_v17  ;;  %4852 = vmatprep.subr.bf16.mxu0 %v14647_v19  ;;  %v14710_v17 = vld [vmem:[#allocation3 + $0x36c] ss:$16 sps:$4 sm:$0xff]   ;;  %v14705_v19 = vld [vmem:[#allocation3 + $0x168] ss:$16 sps:$4 sm:$0xff]  }
 0x41d   :  { %4893 = vmatprep.subr.bf16.mxu1 %v14650_v20  ;;  %v14708_v20 = vld [vmem:[#allocation3 + $0x368] ss:$16 sps:$4 sm:$0xff]  }
 0x41f   :  { %4853 = vmatpush1.bf16.msra.mxu0 %v14645_v12  ;;  %v14713_v12 = vld [vmem:[#allocation3 + $0x14c] ss:$16 sps:$4 sm:$0xff]  }
 0x420   :  { %4894 = vmatpush1.bf16.msra.mxu1 %v14648_v21  ;;  %4854 = vmatprep.subr.bf16.mxu0 %v14653_v22  ;;  %v14716_v21 = vld [vmem:[#allocation3 + $0x34c] ss:$16 sps:$4 sm:$0xff]   ;;  %v14711_v22 = vld [vmem:[#allocation3 + $0x148] ss:$16 sps:$4 sm:$0xff]  }
 0x421   :  { %4895 = vmatprep.subr.bf16.mxu1 %v14656_v23  ;;  %v14714_v23 = vld [vmem:[#allocation3 + $0x348] ss:$16 sps:$4 sm:$0xff]  }
 0x423   :  { %4855 = vmatpush1.bf16.msra.mxu0 %v14651_v16  ;;  %v14719_v16 = vld [vmem:[#allocation3 + $0x12c] ss:$16 sps:$4 sm:$0xff]  }
 0x424   :  { %4896 = vmatpush1.bf16.msra.mxu1 %v14654_v24  ;;  %4856 = vmatprep.subr.bf16.mxu0 %v14659_v26  ;;  %v14722_v24 = vld [vmem:[#allocation3 + $0x32c] ss:$16 sps:$4 sm:$0xff]   ;;  %v14717_v26 = vld [vmem:[#allocation3 + $0x128] ss:$16 sps:$4 sm:$0xff]  }
 0x425   :  { %4897 = vmatprep.subr.bf16.mxu1 %v14662_v39  ;;  %v14720_v39 = vld [vmem:[#allocation3 + $0x328] ss:$16 sps:$4 sm:$0xff]  }
 0x427   :  { %4857 = vmatpush1.bf16.msra.mxu0 %v14657_v27  ;;  %v14725_v27 = vld [vmem:[#allocation3 + $0x10c] ss:$16 sps:$4 sm:$0xff]  }
 0x428   :  { %4898 = vmatpush1.bf16.msra.mxu1 %v14660_v56  ;;  %4858 = vmatprep.subr.bf16.mxu0 %v14665_v0  ;;  %v14728_v56 = vld [vmem:[#allocation3 + $0x30c] ss:$16 sps:$4 sm:$0xff]   ;;  %v14723_v0 = vld [vmem:[#allocation3 + $0x108] ss:$16 sps:$4 sm:$0xff]  }
 0x429   :  { %4899 = vmatprep.subr.bf16.mxu1 %v14668_v28  ;;  %v14726_v28 = vld [vmem:[#allocation3 + $0x308] ss:$16 sps:$4 sm:$0xff]  }
 0x42b   :  { %4859 = vmatpush1.bf16.msra.mxu0 %v14663_v33  ;;  %v14731_v33 = vld [vmem:[#allocation3 + $0x8e4] ss:$16 sps:$4 sm:$0xff]  }
 0x42c   :  { %4900 = vmatpush1.bf16.msra.mxu1 %v14666_v34  ;;  %4860 = vmatprep.subr.bf16.mxu0 %v14671_v47  ;;  %v14734_v34 = vld [vmem:[#allocation3 + $0xae4] ss:$16 sps:$4 sm:$0xff]   ;;  %v14729_v47 = vld [vmem:[#allocation3 + $0x8e0] ss:$16 sps:$4 sm:$0xff]  }
 0x42d   :  { %4901 = vmatprep.subr.bf16.mxu1 %v14674_v38  ;;  %v14732_v38 = vld [vmem:[#allocation3 + $0xae0] ss:$16 sps:$4 sm:$0xff]  }
 0x42f   :  { %4861 = vmatpush1.bf16.msra.mxu0 %v14669_v40  ;;  %v14737_v40 = vld [vmem:[#allocation3 + $0x8c4] ss:$16 sps:$4 sm:$0xff]  }
 0x430   :  { %4902 = vmatpush1.bf16.msra.mxu1 %v14672_v41  ;;  %4862 = vmatprep.subr.bf16.mxu0 %v14677_v42  ;;  %v14740_v41 = vld [vmem:[#allocation3 + $0xac4] ss:$16 sps:$4 sm:$0xff]   ;;  %v4931_v42 = vrot.slane %v16604_v36, 1  ;;  %v14843_v36 = vld [vmem:[#allocation3 + $0x888] ss:$16 sps:$4 sm:$0xff]  }
 0x431   :  { %4903 = vmatprep.subr.bf16.mxu1 %v14680_v44  ;;  %v4933_v44 = vrot.slane %v16606_v37, 1  ;;  %v14851_v37 = vld [vmem:[#allocation3 + $0x86c] ss:$16 sps:$4 sm:$0xff]  }
 0x433   :  { %4863 = vmatpush1.bf16.msra.mxu0 %v14675_v48 }
 0x434   :  { %4904 = vmatpush1.bf16.msra.mxu1 %v14678_v49  ;;  %4864 = vmatprep.subr.bf16.mxu0 %v14683_v25 }
 0x435   :  { %4905 = vmatprep.subr.bf16.mxu1 %v14686_v50  ;;  %v14735_v50 = vld [vmem:[#allocation3 + $0x8c0] ss:$16 sps:$4 sm:$0xff]  }
 0x437   :  { %4865 = vmatpush2.bf16.msra.mxu0 %v14681_v10  ;;  %v14738_v10 = vld [vmem:[#allocation3 + $0xac0] ss:$16 sps:$4 sm:$0xff]  }
 0x438   :  { %4906 = vmatpush2.bf16.msra.mxu1 %v14684_v51  ;;  %4866 = vmatprep.subr.bf16.mxu0 %v14689_v53 }
 0x439   :  { %4907 = vmatprep.subr.bf16.mxu1 %v14692_v52  ;;  %v14743_v52 = vld [vmem:[#allocation3 + $0x8a4] ss:$16 sps:$4 sm:$0xff]  }
 0x43b   :  { %4867 = vmatpush2.bf16.msra.mxu0 %v14687_v29  ;;  %v14746_v29 = vld [vmem:[#allocation3 + $0xaa4] ss:$16 sps:$4 sm:$0xff]  }
 0x43c   :  { %4908 = vmatpush2.bf16.msra.mxu1 %v14690_v54  ;;  %4868 = vmatprep.subr.bf16.mxu0 %v14695_v57  ;;  %v14741_v57 = vld [vmem:[#allocation3 + $0x8a0] ss:$16 sps:$4 sm:$0xff]  }
 0x43d   :  { %4909 = vmatprep.subr.bf16.mxu1 %v14698_v32  ;;  %v14744_v32 = vld [vmem:[#allocation3 + $0xaa0] ss:$16 sps:$4 sm:$0xff]  }
 0x43f   :  { %4869 = vmatpush2.bf16.msra.mxu0 %v14693_v59 }
 0x440   :  { %4910 = vmatpush2.bf16.msra.mxu1 %v14696_v61  ;;  %4870 = vmatprep.subr.bf16.mxu0 %v14701_v14  ;;  %v14749_v14 = vld [vmem:[#allocation3 + $0x884] ss:$16 sps:$4 sm:$0xff]  }
 0x441   :  { %4911 = vmatprep.subr.bf16.mxu1 %v14704_v60  ;;  %v14752_v60 = vld [vmem:[#allocation3 + $0xa84] ss:$16 sps:$4 sm:$0xff]  }
 0x443   :  { %4871 = vmatpush2.bf16.msra.mxu0 %v14699_v11  ;;  %v14747_v11 = vld [vmem:[#allocation3 + $0x880] ss:$16 sps:$4 sm:$0xff]  }
 0x444   :  { %4912 = vmatpush2.bf16.msra.mxu1 %v14702_v15  ;;  %4872 = vmatprep.subr.bf16.mxu0 %v14707_v18  ;;  %v14750_v15 = vld [vmem:[#allocation3 + $0xa80] ss:$16 sps:$4 sm:$0xff]   ;;  %v14755_v18 = vld [vmem:[#allocation3 + $0x864] ss:$16 sps:$4 sm:$0xff]  }
 0x445   :  { %4913 = vmatprep.subr.bf16.mxu1 %v14710_v17  ;;  %v14758_v17 = vld [vmem:[#allocation3 + $0xa64] ss:$16 sps:$4 sm:$0xff]  }
 0x447   :  { %4873 = vmatpush2.bf16.msra.mxu0 %v14705_v19  ;;  %v14753_v19 = vld [vmem:[#allocation3 + $0x860] ss:$16 sps:$4 sm:$0xff]  }
 0x448   :  { %4914 = vmatpush2.bf16.msra.mxu1 %v14708_v20  ;;  %4874 = vmatprep.subr.bf16.mxu0 %v14713_v12  ;;  %v14756_v20 = vld [vmem:[#allocation3 + $0xa60] ss:$16 sps:$4 sm:$0xff]   ;;  %v14761_v12 = vld [vmem:[#allocation3 + $0x844] ss:$16 sps:$4 sm:$0xff]  }
 0x449   :  { %4915 = vmatprep.subr.bf16.mxu1 %v14716_v21  ;;  %v14764_v21 = vld [vmem:[#allocation3 + $0xa44] ss:$16 sps:$4 sm:$0xff]  }
 0x44b   :  { %4875 = vmatpush2.bf16.msra.mxu0 %v14711_v22  ;;  %v14759_v22 = vld [vmem:[#allocation3 + $0x840] ss:$16 sps:$4 sm:$0xff]  }
 0x44c   :  { %4916 = vmatpush2.bf16.msra.mxu1 %v14714_v23  ;;  %4876 = vmatprep.subr.bf16.mxu0 %v14719_v16  ;;  %v14762_v23 = vld [vmem:[#allocation3 + $0xa40] ss:$16 sps:$4 sm:$0xff]   ;;  %v14767_v16 = vld [vmem:[#allocation3 + $0x824] ss:$16 sps:$4 sm:$0xff]  }
 0x44d   :  { %4917 = vmatprep.subr.bf16.mxu1 %v14722_v24  ;;  %v14770_v24 = vld [vmem:[#allocation3 + $0xa24] ss:$16 sps:$4 sm:$0xff]  }
 0x44f   :  { %4877 = vmatpush2.bf16.msra.mxu0 %v14717_v26  ;;  %v14765_v26 = vld [vmem:[#allocation3 + $0x820] ss:$16 sps:$4 sm:$0xff]  }
 0x450   :  { %4918 = vmatpush2.bf16.msra.mxu1 %v14720_v39  ;;  %4878 = vmatprep.subr.bf16.mxu0 %v14725_v27  ;;  %v14768_v39 = vld [vmem:[#allocation3 + $0xa20] ss:$16 sps:$4 sm:$0xff]   ;;  %v14773_v27 = vld [vmem:[#allocation3 + $0x804] ss:$16 sps:$4 sm:$0xff]  }
 0x451   :  { %4919 = vmatprep.subr.bf16.mxu1 %v14728_v56  ;;  %v14776_v56 = vld [vmem:[#allocation3 + $0xa04] ss:$16 sps:$4 sm:$0xff]  }
 0x453   :  { %4879 = vmatpush2.bf16.msra.mxu0 %v14723_v0  ;;  %v14771_v0 = vld [vmem:[#allocation3 + $0x800] ss:$16 sps:$4 sm:$0xff]  }
 0x454   :  { %4920 = vmatpush2.bf16.msra.mxu1 %v14726_v28  ;;  %5715 = vmatprep.subr.bf16.mxu0 %v14731_v33  ;;  %v14774_v28 = vld [vmem:[#allocation3 + $0xa00] ss:$16 sps:$4 sm:$0xff]   ;;  %v14779_v33 = vld [vmem:[#allocation3 + $0x9e4] ss:$16 sps:$4 sm:$0xff]  }
 0x455   :  { %5756 = vmatprep.subr.bf16.mxu1 %v14734_v34  ;;  %v14782_v34 = vld [vmem:[#allocation3 + $0xbe4] ss:$16 sps:$4 sm:$0xff]  }
 0x456   :  { %v3996_v48 = vpop.f32.mrf.mxu0  ;;  %12798 = vmatmul.mubr.msk.bf16.vlgmr.msra.gmra.mxu0 %vm16524_vm13, %v3049_v35 }
 0x457   :  { %v4037_v49 = vpop.f32.mrf.mxu1  ;;  %12802 = vmatmul.mubr.msk.bf16.vlgmr.msra.gmra.mxu1 %vm16524_vm13, %v3051_v63  ;;  %5716 = vmatpush1.bf16.msra.mxu0 %v14729_v47  ;;  %v14777_v47 = vld [vmem:[#allocation3 + $0x9e0] ss:$16 sps:$4 sm:$0xff]  }
 0x458   :  { %v16654_v25 = vadd.f32 %v4037_v49, %v3996_v48  ;;  %5757 = vmatpush1.bf16.msra.mxu1 %v14732_v38  ;;  %v3998_v51 = vpop.f32.mrf.mxu0  ;;  %5717 = vmatprep.subr.bf16.mxu0 %v14737_v40  ;;  %v14780_v38 = vld [vmem:[#allocation3 + $0xbe0] ss:$16 sps:$4 sm:$0xff]   ;;  %v14785_v40 = vld [vmem:[#allocation3 + $0x9c4] ss:$16 sps:$4 sm:$0xff]  }
 0x459   :  { %v4039_v53 = vpop.f32.mrf.mxu1  ;;  %5758 = vmatprep.subr.bf16.mxu1 %v14740_v41  ;;  %12931 = vmatprep.mubr.msk.bf16.mxu0 %vm650_vm12, %v4931_v42  ;;  %v14788_v41 = vld [vmem:[#allocation3 + $0xbc4] ss:$16 sps:$4 sm:$0xff]   ;;  %v14783_v48 = vld [vmem:[#allocation3 + $0x9c0] ss:$16 sps:$4 sm:$0xff]  }
 0x45a   :  { %v16656_v54 = vadd.f32 %v4039_v53, %v3998_v51  ;;  %12933 = vmatprep.mubr.msk.bf16.mxu1 %vm650_vm12, %v4933_v44  ;;  %v4000_v35 = vpop.f32.mrf.mxu0  ;;  %v14786_v49 = vld [vmem:[#allocation3 + $0xbc0] ss:$16 sps:$4 sm:$0xff]  }
 0x45b   :  { %v4041_v63 = vpop.f32.mrf.mxu1  ;;  %5718 = vmatpush1.bf16.msra.mxu0 %v14735_v50  ;;  %v14791_v50 = vld [vmem:[#allocation3 + $0x9a4] ss:$16 sps:$4 sm:$0xff]   ;;  %v14789_v51 = vld [vmem:[#allocation3 + $0x9a0] ss:$16 sps:$4 sm:$0xff]  }
 0x45c   :  { %5759 = vmatpush1.bf16.msra.mxu1 %v14738_v10  ;;  %v4001_v59 = vpop.f32.mrf.mxu0  ;;  %5719 = vmatprep.subr.bf16.mxu0 %v14743_v52  ;;  %v14794_v10 = vld [vmem:[#allocation3 + $0xba4] ss:$16 sps:$4 sm:$0xff]   ;;  %v14792_v53 = vld [vmem:[#allocation3 + $0xba0] ss:$16 sps:$4 sm:$0xff]  }
 0x45d   :  { %v4042_v61 = vpop.f32.mrf.mxu1  ;;  %5760 = vmatprep.subr.bf16.mxu1 %v14746_v29  ;;  %v14797_v52 = vld [vmem:[#allocation3 + $0x984] ss:$16 sps:$4 sm:$0xff]   ;;  %v14795_v35 = vld [vmem:[#allocation3 + $0x980] ss:$16 sps:$4 sm:$0xff]  }
 0x45e   :  { %v14800_v29 = vld [vmem:[#allocation3 + $0xb84] ss:$16 sps:$4 sm:$0xff]   ;;  %v14798_v63 = vld [vmem:[#allocation3 + $0xb80] ss:$16 sps:$4 sm:$0xff]  }
 0x45f   :  { %5720 = vmatpush1.bf16.msra.mxu0 %v14741_v57  ;;  %v14803_v57 = vld [vmem:[#allocation3 + $0x964] ss:$16 sps:$4 sm:$0xff]   ;;  %v14801_v59 = vld [vmem:[#allocation3 + $0x960] ss:$16 sps:$4 sm:$0xff]  }
 0x460   :  { %5761 = vmatpush1.bf16.msra.mxu1 %v14744_v32  ;;  %5721 = vmatprep.subr.bf16.mxu0 %v14749_v14  ;;  %v14806_v32 = vld [vmem:[#allocation3 + $0xb64] ss:$16 sps:$4 sm:$0xff]   ;;  %v14804_v61 = vld [vmem:[#allocation3 + $0xb60] ss:$16 sps:$4 sm:$0xff]  }
 0x461   :  { %5762 = vmatprep.subr.bf16.mxu1 %v14752_v60  ;;  %v14809_v14 = vld [vmem:[#allocation3 + $0x944] ss:$16 sps:$4 sm:$0xff]  }
 0x462   :  { %v14812_v60 = vld [vmem:[#allocation3 + $0xb44] ss:$16 sps:$4 sm:$0xff]  }
 0x463   :  { %5722 = vmatpush1.bf16.msra.mxu0 %v14747_v11  ;;  %v14807_v11 = vld [vmem:[#allocation3 + $0x940] ss:$16 sps:$4 sm:$0xff]  }
 0x464   :  { %5763 = vmatpush1.bf16.msra.mxu1 %v14750_v15  ;;  %5723 = vmatprep.subr.bf16.mxu0 %v14755_v18  ;;  %v14810_v15 = vld [vmem:[#allocation3 + $0xb40] ss:$16 sps:$4 sm:$0xff]   ;;  %v14815_v18 = vld [vmem:[#allocation3 + $0x924] ss:$16 sps:$4 sm:$0xff]  }
 0x465   :  { %5764 = vmatprep.subr.bf16.mxu1 %v14758_v17  ;;  %v14818_v17 = vld [vmem:[#allocation3 + $0xb24] ss:$16 sps:$4 sm:$0xff]  }
 0x467   :  { %5724 = vmatpush1.bf16.msra.mxu0 %v14753_v19  ;;  %v14813_v19 = vld [vmem:[#allocation3 + $0x920] ss:$16 sps:$4 sm:$0xff]  }
 0x468   :  { %5765 = vmatpush1.bf16.msra.mxu1 %v14756_v20  ;;  %5725 = vmatprep.subr.bf16.mxu0 %v14761_v12  ;;  %v14816_v20 = vld [vmem:[#allocation3 + $0xb20] ss:$16 sps:$4 sm:$0xff]   ;;  %v14821_v12 = vld [vmem:[#allocation3 + $0x904] ss:$16 sps:$4 sm:$0xff]  }
 0x469   :  { %5766 = vmatprep.subr.bf16.mxu1 %v14764_v21  ;;  %v14824_v21 = vld [vmem:[#allocation3 + $0xb04] ss:$16 sps:$4 sm:$0xff]  }
 0x46b   :  { %5726 = vmatpush1.bf16.msra.mxu0 %v14759_v22  ;;  %v14819_v22 = vld [vmem:[#allocation3 + $0x900] ss:$16 sps:$4 sm:$0xff]  }
 0x46c   :  { %5767 = vmatpush1.bf16.msra.mxu1 %v14762_v23  ;;  %5727 = vmatprep.subr.bf16.mxu0 %v14767_v16  ;;  %v14822_v23 = vld [vmem:[#allocation3 + $0xb00] ss:$16 sps:$4 sm:$0xff]   ;;  %v14827_v16 = vld [vmem:[#allocation3 + $0x8ec] ss:$16 sps:$4 sm:$0xff]  }
 0x46d   :  { %5768 = vmatprep.subr.bf16.mxu1 %v14770_v24  ;;  %v14830_v24 = vld [vmem:[#allocation3 + $0xaec] ss:$16 sps:$4 sm:$0xff]  }
 0x46f   :  { %5728 = vmatpush1.bf16.msra.mxu0 %v14765_v26  ;;  %v4930_v26 = vrot.slane %v16600_v30, 1 }
 0x470   :  { %5769 = vmatpush1.bf16.msra.mxu1 %v14768_v39  ;;  %5729 = vmatprep.subr.bf16.mxu0 %v14773_v27  ;;  %v4932_v39 = vrot.slane %v16602_v31, 1  ;;  %v14825_v27 = vld [vmem:[#allocation3 + $0x8e8] ss:$16 sps:$4 sm:$0xff]  }
 0x471   :  { %5770 = vmatprep.subr.bf16.mxu1 %v14776_v56  ;;  %v14828_v56 = vld [vmem:[#allocation3 + $0xae8] ss:$16 sps:$4 sm:$0xff]  }
 0x473   :  { %5730 = vmatpush1.bf16.msra.mxu0 %v14771_v0  ;;  %v14833_v0 = vld [vmem:[#allocation3 + $0x8cc] ss:$16 sps:$4 sm:$0xff]  }
 0x474   :  { %5771 = vmatpush1.bf16.msra.mxu1 %v14774_v28  ;;  %5731 = vmatprep.subr.bf16.mxu0 %v14779_v33  ;;  %v14836_v28 = vld [vmem:[#allocation3 + $0xacc] ss:$16 sps:$4 sm:$0xff]  }
 0x475   :  { %5772 = vmatprep.subr.bf16.mxu1 %v14782_v34 }
 0x477   :  { %5732 = vmatpush2.bf16.msra.mxu0 %v14777_v47 }
 0x478   :  { %5773 = vmatpush2.bf16.msra.mxu1 %v14780_v38  ;;  %5733 = vmatprep.subr.bf16.mxu0 %v14785_v40  ;;  %v14831_v38 = vld [vmem:[#allocation3 + $0x8c8] ss:$16 sps:$4 sm:$0xff]  }
 0x479   :  { %5774 = vmatprep.subr.bf16.mxu1 %v14788_v41  ;;  %v14834_v40 = vld [vmem:[#allocation3 + $0xac8] ss:$16 sps:$4 sm:$0xff]  }
 0x47b   :  { %5734 = vmatpush2.bf16.msra.mxu0 %v14783_v48 }
 0x47c   :  { %5775 = vmatpush2.bf16.msra.mxu1 %v14786_v49  ;;  %5735 = vmatprep.subr.bf16.mxu0 %v14791_v50  ;;  %v14839_v49 = vld [vmem:[#allocation3 + $0x8ac] ss:$16 sps:$4 sm:$0xff]  }
 0x47d   :  { %5776 = vmatprep.subr.bf16.mxu1 %v14794_v10  ;;  %v14842_v50 = vld [vmem:[#allocation3 + $0xaac] ss:$16 sps:$4 sm:$0xff]  }
 0x47f   :  { %5736 = vmatpush2.bf16.msra.mxu0 %v14789_v51 }
 0x480   :  { %5777 = vmatpush2.bf16.msra.mxu1 %v14792_v53  ;;  %5737 = vmatprep.subr.bf16.mxu0 %v14797_v52  ;;  %v14837_v52 = vld [vmem:[#allocation3 + $0x8a8] ss:$16 sps:$4 sm:$0xff]  }
 0x481   :  { %5778 = vmatprep.subr.bf16.mxu1 %v14800_v29  ;;  %v14840_v29 = vld [vmem:[#allocation3 + $0xaa8] ss:$16 sps:$4 sm:$0xff]  }
 0x483   :  { %5738 = vmatpush2.bf16.msra.mxu0 %v14795_v35 }
 0x484   :  { %5779 = vmatpush2.bf16.msra.mxu1 %v14798_v63  ;;  %5739 = vmatprep.subr.bf16.mxu0 %v14803_v57  ;;  %v14845_v57 = vld [vmem:[#allocation3 + $0x88c] ss:$16 sps:$4 sm:$0xff]  }
 0x485   :  { %5780 = vmatprep.subr.bf16.mxu1 %v14806_v32  ;;  %v14848_v32 = vld [vmem:[#allocation3 + $0xa8c] ss:$16 sps:$4 sm:$0xff]  }
 0x487   :  { %5740 = vmatpush2.bf16.msra.mxu0 %v14801_v59  ;;  %v14849_v59 = vld [vmem:[#allocation3 + $0x868] ss:$16 sps:$4 sm:$0xff]  }
 0x488   :  { %5781 = vmatpush2.bf16.msra.mxu1 %v14804_v61  ;;  %5741 = vmatprep.subr.bf16.mxu0 %v14809_v14  ;;  %v14852_v61 = vld [vmem:[#allocation3 + $0xa68] ss:$16 sps:$4 sm:$0xff]   ;;  %v14857_v14 = vld [vmem:[#allocation3 + $0x84c] ss:$16 sps:$4 sm:$0xff]  }
 0x489   :  { %5782 = vmatprep.subr.bf16.mxu1 %v14812_v60  ;;  %v14860_v60 = vld [vmem:[#allocation3 + $0xa4c] ss:$16 sps:$4 sm:$0xff]  }
 0x48b   :  { %5742 = vmatpush2.bf16.msra.mxu0 %v14807_v11  ;;  %v14855_v11 = vld [vmem:[#allocation3 + $0x848] ss:$16 sps:$4 sm:$0xff]  }
 0x48c   :  { %5783 = vmatpush2.bf16.msra.mxu1 %v14810_v15  ;;  %5743 = vmatprep.subr.bf16.mxu0 %v14815_v18  ;;  %v14858_v15 = vld [vmem:[#allocation3 + $0xa48] ss:$16 sps:$4 sm:$0xff]   ;;  %v14863_v18 = vld [vmem:[#allocation3 + $0x82c] ss:$16 sps:$4 sm:$0xff]  }
 0x48d   :  { %5784 = vmatprep.subr.bf16.mxu1 %v14818_v17  ;;  %v14866_v17 = vld [vmem:[#allocation3 + $0xa2c] ss:$16 sps:$4 sm:$0xff]  }
 0x48f   :  { %5744 = vmatpush2.bf16.msra.mxu0 %v14813_v19  ;;  %v14861_v19 = vld [vmem:[#allocation3 + $0x828] ss:$16 sps:$4 sm:$0xff]  }
 0x490   :  { %5785 = vmatpush2.bf16.msra.mxu1 %v14816_v20  ;;  %5745 = vmatprep.subr.bf16.mxu0 %v14821_v12  ;;  %v14864_v20 = vld [vmem:[#allocation3 + $0xa28] ss:$16 sps:$4 sm:$0xff]   ;;  %v14869_v12 = vld [vmem:[#allocation3 + $0x80c] ss:$16 sps:$4 sm:$0xff]  }
 0x491   :  { %5786 = vmatprep.subr.bf16.mxu1 %v14824_v21  ;;  %v14872_v21 = vld [vmem:[#allocation3 + $0xa0c] ss:$16 sps:$4 sm:$0xff]  }
 0x493   :  { %5746 = vmatpush2.bf16.msra.mxu0 %v14819_v22  ;;  %v14867_v22 = vld [vmem:[#allocation3 + $0x808] ss:$16 sps:$4 sm:$0xff]  }
 0x494   :  { %5787 = vmatpush2.bf16.msra.mxu1 %v14822_v23  ;;  %5797 = vmatprep.subr.bf16.mxu0 %v14827_v16  ;;  %v14870_v23 = vld [vmem:[#allocation3 + $0xa08] ss:$16 sps:$4 sm:$0xff]   ;;  %v14875_v16 = vld [vmem:[#allocation3 + $0x9ec] ss:$16 sps:$4 sm:$0xff]  }
 0x495   :  { %5838 = vmatprep.subr.bf16.mxu1 %v14830_v24  ;;  %v14878_v24 = vld [vmem:[#allocation3 + $0xbec] ss:$16 sps:$4 sm:$0xff]  }
 0x496   :  { %v4078_v33 = vpop.f32.mrf.mxu0  ;;  %12932 = vmatmul.mubr.msk.bf16.vlgmr.msra.gmra.mxu0 %vm650_vm12, %v4930_v26 }
 0x497   :  { %v4119_v34 = vpop.f32.mrf.mxu1  ;;  %12934 = vmatmul.mubr.msk.bf16.vlgmr.msra.gmra.mxu1 %vm650_vm12, %v4932_v39  ;;  %5798 = vmatpush1.bf16.msra.mxu0 %v14825_v27  ;;  %v14873_v27 = vld [vmem:[#allocation3 + $0x9e8] ss:$16 sps:$4 sm:$0xff]  }
 0x498   :  { %v16672_v47 = vadd.f32 %v4119_v34, %v4078_v33  ;;  %5839 = vmatpush1.bf16.msra.mxu1 %v14828_v56  ;;  %v4080_v41 = vpop.f32.mrf.mxu0  ;;  %5799 = vmatprep.subr.bf16.mxu0 %v14833_v0  ;;  %v14876_v56 = vld [vmem:[#allocation3 + $0xbe8] ss:$16 sps:$4 sm:$0xff]   ;;  %v14881_v0 = vld [vmem:[#allocation3 + $0x9cc] ss:$16 sps:$4 sm:$0xff]  }
 0x499   :  { %v4121_v48 = vpop.f32.mrf.mxu1  ;;  %5840 = vmatprep.subr.bf16.mxu1 %v14836_v28  ;;  %12935 = vmatprep.mubr.msk.bf16.mxu0 %vm650_vm12, %v4931_v42  ;;  %v14846_v42 = vld [vmem:[#allocation3 + $0xa88] ss:$16 sps:$4 sm:$0xff]   ;;  %v14884_v28 = vld [vmem:[#allocation3 + $0xbcc] ss:$16 sps:$4 sm:$0xff]  }
 0x49a   :  { %v16674_v10 = vadd.f32 %v4121_v48, %v4080_v41  ;;  %12937 = vmatprep.mubr.msk.bf16.mxu1 %vm650_vm12, %v4933_v44  ;;  %v4082_v51 = vpop.f32.mrf.mxu0  ;;  %v14854_v44 = vld [vmem:[#allocation3 + $0xa6c] ss:$16 sps:$4 sm:$0xff]   ;;  %v14879_v33 = vld [vmem:[#allocation3 + $0x9c8] ss:$16 sps:$4 sm:$0xff]  }
 0x49b   :  { %v4123_v53 = vpop.f32.mrf.mxu1  ;;  %5800 = vmatpush1.bf16.msra.mxu0 %v14831_v38  ;;  %v14882_v34 = vld [vmem:[#allocation3 + $0xbc8] ss:$16 sps:$4 sm:$0xff]   ;;  %v14887_v38 = vld [vmem:[#allocation3 + $0x9ac] ss:$16 sps:$4 sm:$0xff]  }
 0x49c   :  { %5841 = vmatpush1.bf16.msra.mxu1 %v14834_v40  ;;  %v4083_v35 = vpop.f32.mrf.mxu0  ;;  %5801 = vmatprep.subr.bf16.mxu0 %v14839_v49  ;;  %v14890_v40 = vld [vmem:[#allocation3 + $0xbac] ss:$16 sps:$4 sm:$0xff]   ;;  %v14885_v41 = vld [vmem:[#allocation3 + $0x9a8] ss:$16 sps:$4 sm:$0xff]  }
 0x49d   :  { %v4124_v63 = vpop.f32.mrf.mxu1  ;;  %5842 = vmatprep.subr.bf16.mxu1 %v14842_v50  ;;  %v14888_v48 = vld [vmem:[#allocation3 + $0xba8] ss:$16 sps:$4 sm:$0xff]   ;;  %v14893_v49 = vld [vmem:[#allocation3 + $0x98c] ss:$16 sps:$4 sm:$0xff]  }
 0x49e   :  { %v14896_v50 = vld [vmem:[#allocation3 + $0xb8c] ss:$16 sps:$4 sm:$0xff]   ;;  %v14891_v51 = vld [vmem:[#allocation3 + $0x988] ss:$16 sps:$4 sm:$0xff]  }
 0x49f   :  { %5802 = vmatpush1.bf16.msra.mxu0 %v14837_v52  ;;  %v14894_v53 = vld [vmem:[#allocation3 + $0xb88] ss:$16 sps:$4 sm:$0xff]   ;;  %v14899_v52 = vld [vmem:[#allocation3 + $0x96c] ss:$16 sps:$4 sm:$0xff]  }
 0x4a0   :  { %5843 = vmatpush1.bf16.msra.mxu1 %v14840_v29  ;;  %5803 = vmatprep.subr.bf16.mxu0 %v14845_v57  ;;  %v14902_v29 = vld [vmem:[#allocation3 + $0xb6c] ss:$16 sps:$4 sm:$0xff]   ;;  %v14897_v35 = vld [vmem:[#allocation3 + $0x968] ss:$16 sps:$4 sm:$0xff]  }
 0x4a1   :  { %5844 = vmatprep.subr.bf16.mxu1 %v14848_v32  ;;  %v14900_v63 = vld [vmem:[#allocation3 + $0xb68] ss:$16 sps:$4 sm:$0xff]   ;;  %v14905_v57 = vld [vmem:[#allocation3 + $0x94c] ss:$16 sps:$4 sm:$0xff]  }
 0x4a2   :  { %v14908_v32 = vld [vmem:[#allocation3 + $0xb4c] ss:$16 sps:$4 sm:$0xff]  }
 0x4a3   :  { %5804 = vmatpush1.bf16.msra.mxu0 %v14843_v36  ;;  %v14903_v36 = vld [vmem:[#allocation3 + $0x948] ss:$16 sps:$4 sm:$0xff]  }
 0x4a4   :  { %5845 = vmatpush1.bf16.msra.mxu1 %v14846_v42  ;;  %5805 = vmatprep.subr.bf16.mxu0 %v14851_v37  ;;  %v14906_v42 = vld [vmem:[#allocation3 + $0xb48] ss:$16 sps:$4 sm:$0xff]   ;;  %v14911_v37 = vld [vmem:[#allocation3 + $0x92c] ss:$16 sps:$4 sm:$0xff]  }
 0x4a5   :  { %5846 = vmatprep.subr.bf16.mxu1 %v14854_v44  ;;  %v14914_v44 = vld [vmem:[#allocation3 + $0xb2c] ss:$16 sps:$4 sm:$0xff]  }
 0x4a7   :  { %5806 = vmatpush1.bf16.msra.mxu0 %v14849_v59  ;;  %v14909_v59 = vld [vmem:[#allocation3 + $0x928] ss:$16 sps:$4 sm:$0xff]  }
 0x4a8   :  { %5847 = vmatpush1.bf16.msra.mxu1 %v14852_v61  ;;  %5807 = vmatprep.subr.bf16.mxu0 %v14857_v14  ;;  %v14912_v61 = vld [vmem:[#allocation3 + $0xb28] ss:$16 sps:$4 sm:$0xff]   ;;  %v14917_v14 = vld [vmem:[#allocation3 + $0x90c] ss:$16 sps:$4 sm:$0xff]  }
 0x4a9   :  { %5848 = vmatprep.subr.bf16.mxu1 %v14860_v60  ;;  %v14920_v60 = vld [vmem:[#allocation3 + $0xb0c] ss:$16 sps:$4 sm:$0xff]  }
 0x4ab   :  { %5808 = vmatpush1.bf16.msra.mxu0 %v14855_v11  ;;  %v14915_v11 = vld [vmem:[#allocation3 + $0x908] ss:$16 sps:$4 sm:$0xff]  }
 0x4ac   :  { %5849 = vmatpush1.bf16.msra.mxu1 %v14858_v15  ;;  %5809 = vmatprep.subr.bf16.mxu0 %v14863_v18  ;;  %v14918_v15 = vld [vmem:[#allocation3 + $0xb08] ss:$16 sps:$4 sm:$0xff]  }
 0x4ad   :  { %5850 = vmatprep.subr.bf16.mxu1 %v14866_v17 }
 0x4af   :  { %5810 = vmatpush1.bf16.msra.mxu0 %v14861_v19 }
 0x4b0   :  { %5851 = vmatpush1.bf16.msra.mxu1 %v14864_v20  ;;  %5811 = vmatprep.subr.bf16.mxu0 %v14869_v12 }
 0x4b1   :  { %5852 = vmatprep.subr.bf16.mxu1 %v14872_v21 }
 0x4b3   :  { %5812 = vmatpush1.bf16.msra.mxu0 %v14867_v22 }
 0x4b4   :  { %5853 = vmatpush1.bf16.msra.mxu1 %v14870_v23  ;;  %5813 = vmatprep.subr.bf16.mxu0 %v14875_v16 }
 0x4b5   :  { %5854 = vmatprep.subr.bf16.mxu1 %v14878_v24 }
 0x4b7   :  { %5814 = vmatpush2.bf16.msra.mxu0 %v14873_v27 }
 0x4b8   :  { %5855 = vmatpush2.bf16.msra.mxu1 %v14876_v56  ;;  %5815 = vmatprep.subr.bf16.mxu0 %v14881_v0 }
 0x4b9   :  { %5856 = vmatprep.subr.bf16.mxu1 %v14884_v28 }
 0x4bb   :  { %5816 = vmatpush2.bf16.msra.mxu0 %v14879_v33 }
 0x4bc   :  { %5857 = vmatpush2.bf16.msra.mxu1 %v14882_v34  ;;  %5817 = vmatprep.subr.bf16.mxu0 %v14887_v38 }
 0x4bd   :  { %5858 = vmatprep.subr.bf16.mxu1 %v14890_v40 }
 0x4bf   :  { %5818 = vmatpush2.bf16.msra.mxu0 %v14885_v41 }
 0x4c0   :  { %5859 = vmatpush2.bf16.msra.mxu1 %v14888_v48  ;;  %5819 = vmatprep.subr.bf16.mxu0 %v14893_v49 }
 0x4c1   :  { %5860 = vmatprep.subr.bf16.mxu1 %v14896_v50  ;;  %v5886_v50 = vrot.slane %v16480_v7, %v16446_v55 }
 0x4c3   :  { %5820 = vmatpush2.bf16.msra.mxu0 %v14891_v51 }
 0x4c4   :  { %5861 = vmatpush2.bf16.msra.mxu1 %v14894_v53  ;;  %5821 = vmatprep.subr.bf16.mxu0 %v14899_v52 }
 0x4c5   :  { %5862 = vmatprep.subr.bf16.mxu1 %v14902_v29  ;;  %v5890_v29 = vrot.slane %v16482_v9, %v16446_v55 }
 0x4c7   :  { %5822 = vmatpush2.bf16.msra.mxu0 %v14897_v35 }
 0x4c8   :  { %5863 = vmatpush2.bf16.msra.mxu1 %v14900_v63  ;;  %5823 = vmatprep.subr.bf16.mxu0 %v14905_v57  ;;  %v5910_v57 = vrot.slane %v16480_v7, %v16455_v62 }
 0x4c9   :  { %5864 = vmatprep.subr.bf16.mxu1 %v14908_v32 }
 0x4cb   :  { %5824 = vmatpush2.bf16.msra.mxu0 %v14903_v36 }
 0x4cc   :  { %5865 = vmatpush2.bf16.msra.mxu1 %v14906_v42  ;;  %5825 = vmatprep.subr.bf16.mxu0 %v14911_v37 }
 0x4cd   :  { %5866 = vmatprep.subr.bf16.mxu1 %v14914_v44  ;;  %v5930_v44 = vrot.slane %v16480_v7, %v16450_v58 }
 0x4cf   :  { %5826 = vmatpush2.bf16.msra.mxu0 %v14909_v59 }
 0x4d0   :  { %5867 = vmatpush2.bf16.msra.mxu1 %v14912_v61  ;;  %5827 = vmatprep.subr.bf16.mxu0 %v14917_v14  ;;  %v5914_v61 = vrot.slane %v16482_v9, %v16455_v62 }
 0x4d1   :  { %5868 = vmatprep.subr.bf16.mxu1 %v14920_v60 }
 0x4d3   :  { %5828 = vmatpush2.bf16.msra.mxu0 %v14915_v11  ;;  %v5934_v11 = vrot.slane %v16482_v9, %v16450_v58 }
 0x4d4   :  { %5869 = vmatpush2.bf16.msra.mxu1 %v14918_v15 }
 0x4d6   :  { %v4800_v18 = vpop.f32.mrf.mxu0  ;;  %12936 = vmatmul.mubr.msk.bf16.vlgmr.msra.gmra.mxu0 %vm650_vm12, %v4930_v26 }
 0x4d7   :  { %v4841_v17 = vpop.f32.mrf.mxu1  ;;  %12938 = vmatmul.mubr.msk.bf16.vlgmr.msra.gmra.mxu1 %vm650_vm12, %v4932_v39  ;;  %v4801_v19 = vadd.f32 %v4800_v18, %v16654_v25 }
 0x4d8   :  { %v4802_v20 = vpop.f32.mrf.mxu0 }
 0x4d9   :  { %v4843_v12 = vpop.f32.mrf.mxu1  ;;  %v4842_v21 = vadd.f32 %v4841_v17, %v4801_v19  ;;  %v4803_v22 = vadd.f32 %v4802_v20, %v16656_v54 }
 0x4da   :  { %v4804_v23 = vpop.f32.mrf.mxu0 }
 0x4db   :  { %v4845_v16 = vpop.f32.mrf.mxu1  ;;  %v4844_v24 = vadd.f32 %v4843_v12, %v4803_v22  ;;  %v5894_v23 = vrot.slane %v16404_v1, %v16446_v55 }
 0x4dc   :  { %v4805_v27 = vpop.f32.mrf.mxu0 }
 0x4dd   :  { %v4846_v56 = vpop.f32.mrf.mxu1 }
 0x516   :  { %v4882_v0 = vpop.f32.mrf.mxu0 }
 0x517   :  { %v4923_v30 = vpop.f32.mrf.mxu1  ;;  %v4883_v26 = vadd.f32 %v4882_v0, %v16672_v47  ;;  %v5898_v0 = vrot.slane %v16406_v2, %v16446_v55  ;;  %v5922_v55 = vrot.slane %v16406_v2, %v16455_v62 }
 0x518   :  { %v4884_v28 = vpop.f32.mrf.mxu0 }
 0x519   :  { %v4925_v31 = vpop.f32.mrf.mxu1  ;;  %v4924_v33 = vadd.f32 %v4923_v30, %v4883_v26  ;;  %v4885_v39 = vadd.f32 %v4884_v28, %v16674_v10 }
 0x51a   :  { %v4886_v25 = vpop.f32.mrf.mxu0 }
 0x51b   :  { %v4927_v34 = vpop.f32.mrf.mxu1  ;;  %v4926_v38 = vadd.f32 %v4925_v31, %v4885_v39  ;;  %v5918_v31 = vrot.slane %v16404_v1, %v16455_v62 }
 0x51c   :  { %v4887_v40 = vpop.f32.mrf.mxu0 }
 0x51d   :  { %v4928_v41 = vpop.f32.mrf.mxu1 }
 0x51e   :  { %v5938_v41 = vrot.slane %v16404_v1, %v16450_v58 }
 0x556   :  { %v5749_v54 = vpop.f32.mrf.mxu0 }
 0x557   :  { %v5790_v48 = vpop.f32.mrf.mxu1 }
 0x558   :  { %v5791_v49 = vadd.f32 %v5790_v48, %v5749_v54  ;;  %v5751_v51 = vpop.f32.mrf.mxu0 }
 0x559   :  { %v5792_v53 = vpop.f32.mrf.mxu1 }
 0x55a   :  { %v5879_v52 = vadd.f32 %v5791_v49, %v4842_v21  ;;  %v5793_v47 = vadd.f32 %v5792_v53, %v5751_v51  ;;  %v5753_v35 = vpop.f32.mrf.mxu0 }
 0x55b   :  { %v5794_v10 = vpop.f32.mrf.mxu1 }
 0x55c   :  { %v16696_v63 = vadd.f32 %v5886_v50, %v5879_v52  ;;  %v5880_v32 = vadd.f32 %v5793_v47, %v4844_v24  ;;  %v5754_v36 = vpop.f32.mrf.mxu0 }
 0x55d   :  { %v5795_v42 = vpop.f32.mrf.mxu1 }
 0x55e   :  { %v5903_v37 = vmax.f32 %v16696_v63, 0.0  ;;  %v16703_v59 = vadd.f32 %v5890_v29, %v5880_v32 }
 0x560   :  { %v5923_v14 = vmul.f32 %v5910_v57, %v5903_v37  ;;  %v5904_v60 = vmax.f32 %v16703_v59, 0.0 }
 0x562   :  { %v5943_v15 = vadd.f32 %v5930_v44, %v5923_v14  ;;  %v5924_v18 = vmul.f32 %v5914_v61, %v5904_v60 }
 0x564   :  { %v16714_v17 = vpack.c.bf16 %v5943_v15, %v5943_v15  ;;  %v5944_v19 = vadd.f32 %v5934_v11, %v5924_v18 }
 0x566   :  { %v16716_v20 = vpack.c.bf16 %v5944_v19, %v5944_v19 }
 0x596   :  { %v5831_v12 = vpop.f32.mrf.mxu0 }
 0x597   :  { %v5872_v21 = vpop.f32.mrf.mxu1 }
 0x598   :  { %v5873_v22 = vadd.f32 %v5872_v21, %v5831_v12  ;;  %v5833_v16 = vpop.f32.mrf.mxu0 }
 0x599   :  { %v5874_v24 = vpop.f32.mrf.mxu1 }
 0x59a   :  { %v5881_v27 = vadd.f32 %v5873_v22, %v4924_v33  ;;  %v5875_v56 = vadd.f32 %v5874_v24, %v5833_v16  ;;  %v5835_v30 = vpop.f32.mrf.mxu0 }
 0x59b   :  { %v5876_v26 = vpop.f32.mrf.mxu1 }
 0x59c   :  { %v16722_v28 = vadd.f32 %v5894_v23, %v5881_v27  ;;  %v5882_v39 = vadd.f32 %v5875_v56, %v4926_v38  ;;  %v5836_v25 = vpop.f32.mrf.mxu0  ;;  %v5942_v38 = vrot.slane %v16406_v2, %v16450_v58 }
 0x59d   :  { %v5877_v34 = vpop.f32.mrf.mxu1 }
 0x59e   :  { %v5905_v40 = vmax.f32 %v16722_v28, 0.0  ;;  %v16729_v33 = vadd.f32 %v5898_v0, %v5882_v39 }
 0x5a0   :  { %v5925_v54 = vmul.f32 %v5918_v31, %v5905_v40  ;;  %v5906_v48 = vmax.f32 %v16729_v33, 0.0 }
 0x5a2   :  { %v5945_v49 = vadd.f32 %v5938_v41, %v5925_v54  ;;  %v5926_v50 = vmul.f32 %v5922_v55, %v5906_v48 }
 0x5a4   :  { %v16740_v51 = vpack.c.bf16 %v5945_v49, %v5945_v49  ;;  %v5946_v53 = vadd.f32 %v5942_v38, %v5926_v50 }
 0x5a6   :  { %v16742_v52 = vpack.c.bf16 %v5946_v53, %v5946_v53 }
 0x5a7   :  { %16315 = dma.done.wait [#allocation6 + $0x2], 49152 }
 0x5a8   :  { %16316 = vsyncadd [#allocation6 + $0x2], 4294918144  ;;  %6902 = vmatprep.mubr.bf16.mxu0 %v16716_v20  ;;  %6943 = vmatprep.mubr.bf16.mxu1 %v16742_v52  ;;  %v14921_v62 = vld [vmem:[#allocation4 + $0x4e4] ss:$16 sps:$4 sm:$0xff]   ;;  %v14925_v29 = vld [vmem:[#allocation4 + $0x4e0] ss:$16 sps:$4 sm:$0xff]  }
 0x5a9   :  { %v14923_v47 = vld [vmem:[#allocation4 + $0x6e4] ss:$16 sps:$4 sm:$0xff]   ;;  %6870 = vmatprep.subr.bf16.mxu0 %v14921_v62  ;;  %v14926_v58 = vld [vmem:[#allocation4 + $0x6e0] ss:$16 sps:$4 sm:$0xff]  }
 0x5aa   :  { %6911 = vmatprep.subr.bf16.mxu1 %v14923_v47  ;;  %v14927_v35 = vld [vmem:[#allocation4 + $0x4c4] ss:$16 sps:$4 sm:$0xff]   ;;  %6871 = vmatpush1.bf16.msra.mxu0 %v14925_v29  ;;  %v14931_v57 = vld [vmem:[#allocation4 + $0x4c0] ss:$16 sps:$4 sm:$0xff]  }
 0x5ab   :  { %6912 = vmatpush1.bf16.msra.mxu1 %v14926_v58  ;;  %v14929_v10 = vld [vmem:[#allocation4 + $0x6c4] ss:$16 sps:$4 sm:$0xff]   ;;  %6872 = vmatprep.subr.bf16.mxu0 %v14927_v35  ;;  %v14932_v32 = vld [vmem:[#allocation4 + $0x6c0] ss:$16 sps:$4 sm:$0xff]  }
 0x5ac   :  { %6913 = vmatprep.subr.bf16.mxu1 %v14929_v10  ;;  %v14933_v36 = vld [vmem:[#allocation4 + $0x4a4] ss:$16 sps:$4 sm:$0xff]   ;;  %v14937_v44 = vld [vmem:[#allocation4 + $0x4a0] ss:$16 sps:$4 sm:$0xff]  }
 0x5ad   :  { %v14935_v42 = vld [vmem:[#allocation4 + $0x6a4] ss:$16 sps:$4 sm:$0xff]   ;;  %v14938_v61 = vld [vmem:[#allocation4 + $0x6a0] ss:$16 sps:$4 sm:$0xff]  }
 0x5ae   :  { %6873 = vmatpush1.bf16.msra.mxu0 %v14931_v57  ;;  %v14939_v14 = vld [vmem:[#allocation4 + $0x484] ss:$16 sps:$4 sm:$0xff]   ;;  %v14943_v15 = vld [vmem:[#allocation4 + $0x480] ss:$16 sps:$4 sm:$0xff]  }
 0x5af   :  { %6914 = vmatpush1.bf16.msra.mxu1 %v14932_v32  ;;  %6874 = vmatprep.subr.bf16.mxu0 %v14933_v36  ;;  %v14941_v11 = vld [vmem:[#allocation4 + $0x684] ss:$16 sps:$4 sm:$0xff]   ;;  %v14944_v18 = vld [vmem:[#allocation4 + $0x680] ss:$16 sps:$4 sm:$0xff]  }
 0x5b0   :  { %6915 = vmatprep.subr.bf16.mxu1 %v14935_v42  ;;  %v14945_v19 = vld [vmem:[#allocation4 + $0x464] ss:$16 sps:$4 sm:$0xff]   ;;  %v14949_v21 = vld [vmem:[#allocation4 + $0x460] ss:$16 sps:$4 sm:$0xff]  }
 0x5b1   :  { %v14947_v12 = vld [vmem:[#allocation4 + $0x664] ss:$16 sps:$4 sm:$0xff]   ;;  %v14950_v22 = vld [vmem:[#allocation4 + $0x660] ss:$16 sps:$4 sm:$0xff]  }
 0x5b2   :  { %6875 = vmatpush1.bf16.msra.mxu0 %v14937_v44  ;;  %v14951_v23 = vld [vmem:[#allocation4 + $0x444] ss:$16 sps:$4 sm:$0xff]   ;;  %v14955_v24 = vld [vmem:[#allocation4 + $0x440] ss:$16 sps:$4 sm:$0xff]  }
 0x5b3   :  { %6916 = vmatpush1.bf16.msra.mxu1 %v14938_v61  ;;  %6876 = vmatprep.subr.bf16.mxu0 %v14939_v14  ;;  %v14953_v16 = vld [vmem:[#allocation4 + $0x644] ss:$16 sps:$4 sm:$0xff]   ;;  %v14956_v27 = vld [vmem:[#allocation4 + $0x640] ss:$16 sps:$4 sm:$0xff]  }
 0x5b4   :  { %6917 = vmatprep.subr.bf16.mxu1 %v14941_v11  ;;  %v14957_v56 = vld [vmem:[#allocation4 + $0x424] ss:$16 sps:$4 sm:$0xff]   ;;  %v14961_v30 = vld [vmem:[#allocation4 + $0x420] ss:$16 sps:$4 sm:$0xff]  }
 0x5b5   :  { %v14959_v0 = vld [vmem:[#allocation4 + $0x624] ss:$16 sps:$4 sm:$0xff]   ;;  %v14962_v26 = vld [vmem:[#allocation4 + $0x620] ss:$16 sps:$4 sm:$0xff]  }
 0x5b6   :  { %6877 = vmatpush1.bf16.msra.mxu0 %v14943_v15  ;;  %v14963_v31 = vld [vmem:[#allocation4 + $0x404] ss:$16 sps:$4 sm:$0xff]   ;;  %v14967_v25 = vld [vmem:[#allocation4 + $0x400] ss:$16 sps:$4 sm:$0xff]  }
 0x5b7   :  { %6918 = vmatpush1.bf16.msra.mxu1 %v14944_v18  ;;  %6878 = vmatprep.subr.bf16.mxu0 %v14945_v19  ;;  %v14965_v39 = vld [vmem:[#allocation4 + $0x604] ss:$16 sps:$4 sm:$0xff]   ;;  %v14968_v34 = vld [vmem:[#allocation4 + $0x600] ss:$16 sps:$4 sm:$0xff]  }
 0x5b8   :  { %6919 = vmatprep.subr.bf16.mxu1 %v14947_v12  ;;  %v14969_v41 = vld [vmem:[#allocation4 + $0x5e4] ss:$16 sps:$4 sm:$0xff]   ;;  %v14973_v54 = vld [vmem:[#allocation4 + $0x5e0] ss:$16 sps:$4 sm:$0xff]  }
 0x5b9   :  { %v14971_v55 = vld [vmem:[#allocation4 + $0x7e4] ss:$16 sps:$4 sm:$0xff]   ;;  %v14974_v38 = vld [vmem:[#allocation4 + $0x7e0] ss:$16 sps:$4 sm:$0xff]  }
 0x5ba   :  { %6879 = vmatpush1.bf16.msra.mxu0 %v14949_v21  ;;  %v14975_v49 = vld [vmem:[#allocation4 + $0x5c4] ss:$16 sps:$4 sm:$0xff]   ;;  %v14979_v53 = vld [vmem:[#allocation4 + $0x5c0] ss:$16 sps:$4 sm:$0xff]  }
 0x5bb   :  { %6920 = vmatpush1.bf16.msra.mxu1 %v14950_v22  ;;  %6880 = vmatprep.subr.bf16.mxu0 %v14951_v23  ;;  %v14977_v50 = vld [vmem:[#allocation4 + $0x7c4] ss:$16 sps:$4 sm:$0xff]   ;;  %v14980_v62 = vld [vmem:[#allocation4 + $0x7c0] ss:$16 sps:$4 sm:$0xff]  }
 0x5bc   :  { %6921 = vmatprep.subr.bf16.mxu1 %v14953_v16  ;;  %v14981_v47 = vld [vmem:[#allocation4 + $0x5a4] ss:$16 sps:$4 sm:$0xff]   ;;  %v14985_v58 = vld [vmem:[#allocation4 + $0x5a0] ss:$16 sps:$4 sm:$0xff]  }
 0x5bd   :  { %v14983_v29 = vld [vmem:[#allocation4 + $0x7a4] ss:$16 sps:$4 sm:$0xff]   ;;  %v14986_v35 = vld [vmem:[#allocation4 + $0x7a0] ss:$16 sps:$4 sm:$0xff]  }
 0x5be   :  { %6881 = vmatpush1.bf16.msra.mxu0 %v14955_v24  ;;  %v14987_v10 = vld [vmem:[#allocation4 + $0x584] ss:$16 sps:$4 sm:$0xff]   ;;  %v14991_v32 = vld [vmem:[#allocation4 + $0x580] ss:$16 sps:$4 sm:$0xff]  }
 0x5bf   :  { %6922 = vmatpush1.bf16.msra.mxu1 %v14956_v27  ;;  %6882 = vmatprep.subr.bf16.mxu0 %v14957_v56  ;;  %v14989_v57 = vld [vmem:[#allocation4 + $0x784] ss:$16 sps:$4 sm:$0xff]   ;;  %v14992_v36 = vld [vmem:[#allocation4 + $0x780] ss:$16 sps:$4 sm:$0xff]  }
 0x5c0   :  { %6923 = vmatprep.subr.bf16.mxu1 %v14959_v0  ;;  %v14993_v42 = vld [vmem:[#allocation4 + $0x564] ss:$16 sps:$4 sm:$0xff]   ;;  %v14997_v61 = vld [vmem:[#allocation4 + $0x560] ss:$16 sps:$4 sm:$0xff]   ;;  %v15019_v0 = vld [vmem:[#allocation4 + $0x4ec] ss:$16 sps:$4 sm:$0xff]  }
 0x5c1   :  { %v14995_v44 = vld [vmem:[#allocation4 + $0x764] ss:$16 sps:$4 sm:$0xff]   ;;  %v14998_v14 = vld [vmem:[#allocation4 + $0x760] ss:$16 sps:$4 sm:$0xff]  }
 0x5c2   :  { %6883 = vmatpush1.bf16.msra.mxu0 %v14961_v30  ;;  %v14999_v11 = vld [vmem:[#allocation4 + $0x544] ss:$16 sps:$4 sm:$0xff]   ;;  %v15003_v18 = vld [vmem:[#allocation4 + $0x540] ss:$16 sps:$4 sm:$0xff]   ;;  %v15022_v30 = vld [vmem:[#allocation4 + $0x6ec] ss:$16 sps:$4 sm:$0xff]  }
 0x5c3   :  { %6924 = vmatpush1.bf16.msra.mxu1 %v14962_v26  ;;  %6884 = vmatprep.subr.bf16.mxu0 %v14963_v31  ;;  %v15001_v15 = vld [vmem:[#allocation4 + $0x744] ss:$16 sps:$4 sm:$0xff]   ;;  %v15004_v19 = vld [vmem:[#allocation4 + $0x740] ss:$16 sps:$4 sm:$0xff]   ;;  %v15017_v26 = vld [vmem:[#allocation4 + $0x4e8] ss:$16 sps:$4 sm:$0xff]  }
 0x5c4   :  { %6925 = vmatprep.subr.bf16.mxu1 %v14965_v39  ;;  %v15005_v12 = vld [vmem:[#allocation4 + $0x524] ss:$16 sps:$4 sm:$0xff]   ;;  %v15009_v22 = vld [vmem:[#allocation4 + $0x520] ss:$16 sps:$4 sm:$0xff]   ;;  %v15020_v31 = vld [vmem:[#allocation4 + $0x6e8] ss:$16 sps:$4 sm:$0xff]  }
 0x5c5   :  { %v15007_v21 = vld [vmem:[#allocation4 + $0x724] ss:$16 sps:$4 sm:$0xff]   ;;  %v15010_v23 = vld [vmem:[#allocation4 + $0x720] ss:$16 sps:$4 sm:$0xff]   ;;  %v15025_v39 = vld [vmem:[#allocation4 + $0x4cc] ss:$16 sps:$4 sm:$0xff]  }
 0x5c6   :  { %6885 = vmatpush1.bf16.msra.mxu0 %v14967_v25  ;;  %v15011_v16 = vld [vmem:[#allocation4 + $0x504] ss:$16 sps:$4 sm:$0xff]   ;;  %v15015_v27 = vld [vmem:[#allocation4 + $0x500] ss:$16 sps:$4 sm:$0xff]   ;;  %v15028_v25 = vld [vmem:[#allocation4 + $0x6cc] ss:$16 sps:$4 sm:$0xff]  }
 0x5c7   :  { %6926 = vmatpush1.bf16.msra.mxu1 %v14968_v34  ;;  %6886 = vmatprep.subr.bf16.mxu0 %v14969_v41  ;;  %v15013_v24 = vld [vmem:[#allocation4 + $0x704] ss:$16 sps:$4 sm:$0xff]   ;;  %v15016_v56 = vld [vmem:[#allocation4 + $0x700] ss:$16 sps:$4 sm:$0xff]   ;;  %v15023_v34 = vld [vmem:[#allocation4 + $0x4c8] ss:$16 sps:$4 sm:$0xff]  }
 0x5c8   :  { %6927 = vmatprep.subr.bf16.mxu1 %v14971_v55  ;;  %v15026_v41 = vld [vmem:[#allocation4 + $0x6c8] ss:$16 sps:$4 sm:$0xff]   ;;  %v15031_v55 = vld [vmem:[#allocation4 + $0x4ac] ss:$16 sps:$4 sm:$0xff]  }
 0x5ca   :  { %6887 = vmatpush2.bf16.msra.mxu0 %v14973_v54  ;;  %v15034_v54 = vld [vmem:[#allocation4 + $0x6ac] ss:$16 sps:$4 sm:$0xff]  }
 0x5cb   :  { %6928 = vmatpush2.bf16.msra.mxu1 %v14974_v38  ;;  %6888 = vmatprep.subr.bf16.mxu0 %v14975_v49  ;;  %v15029_v38 = vld [vmem:[#allocation4 + $0x4a8] ss:$16 sps:$4 sm:$0xff]  }
 0x5cc   :  { %6929 = vmatprep.subr.bf16.mxu1 %v14977_v50  ;;  %v15032_v49 = vld [vmem:[#allocation4 + $0x6a8] ss:$16 sps:$4 sm:$0xff]   ;;  %v15037_v50 = vld [vmem:[#allocation4 + $0x48c] ss:$16 sps:$4 sm:$0xff]  }
 0x5ce   :  { %6889 = vmatpush2.bf16.msra.mxu0 %v14979_v53  ;;  %v15040_v53 = vld [vmem:[#allocation4 + $0x68c] ss:$16 sps:$4 sm:$0xff]  }
 0x5cf   :  { %6930 = vmatpush2.bf16.msra.mxu1 %v14980_v62  ;;  %6890 = vmatprep.subr.bf16.mxu0 %v14981_v47  ;;  %v15035_v62 = vld [vmem:[#allocation4 + $0x488] ss:$16 sps:$4 sm:$0xff]  }
 0x5d0   :  { %6931 = vmatprep.subr.bf16.mxu1 %v14983_v29  ;;  %v15038_v47 = vld [vmem:[#allocation4 + $0x688] ss:$16 sps:$4 sm:$0xff]   ;;  %v15043_v29 = vld [vmem:[#allocation4 + $0x46c] ss:$16 sps:$4 sm:$0xff]  }
 0x5d2   :  { %6891 = vmatpush2.bf16.msra.mxu0 %v14985_v58  ;;  %v15046_v58 = vld [vmem:[#allocation4 + $0x66c] ss:$16 sps:$4 sm:$0xff]  }
 0x5d3   :  { %6932 = vmatpush2.bf16.msra.mxu1 %v14986_v35  ;;  %6892 = vmatprep.subr.bf16.mxu0 %v14987_v10  ;;  %v15041_v35 = vld [vmem:[#allocation4 + $0x468] ss:$16 sps:$4 sm:$0xff]  }
 0x5d4   :  { %6933 = vmatprep.subr.bf16.mxu1 %v14989_v57  ;;  %v15044_v10 = vld [vmem:[#allocation4 + $0x668] ss:$16 sps:$4 sm:$0xff]   ;;  %v15049_v57 = vld [vmem:[#allocation4 + $0x44c] ss:$16 sps:$4 sm:$0xff]  }
 0x5d6   :  { %6893 = vmatpush2.bf16.msra.mxu0 %v14991_v32  ;;  %v15052_v32 = vld [vmem:[#allocation4 + $0x64c] ss:$16 sps:$4 sm:$0xff]  }
 0x5d7   :  { %6934 = vmatpush2.bf16.msra.mxu1 %v14992_v36  ;;  %6894 = vmatprep.subr.bf16.mxu0 %v14993_v42  ;;  %v15047_v36 = vld [vmem:[#allocation4 + $0x448] ss:$16 sps:$4 sm:$0xff]  }
 0x5d8   :  { %6935 = vmatprep.subr.bf16.mxu1 %v14995_v44  ;;  %v15050_v42 = vld [vmem:[#allocation4 + $0x648] ss:$16 sps:$4 sm:$0xff]   ;;  %v15055_v44 = vld [vmem:[#allocation4 + $0x42c] ss:$16 sps:$4 sm:$0xff]  }
 0x5da   :  { %6895 = vmatpush2.bf16.msra.mxu0 %v14997_v61  ;;  %v15058_v61 = vld [vmem:[#allocation4 + $0x62c] ss:$16 sps:$4 sm:$0xff]  }
 0x5db   :  { %6936 = vmatpush2.bf16.msra.mxu1 %v14998_v14  ;;  %6896 = vmatprep.subr.bf16.mxu0 %v14999_v11  ;;  %v15053_v14 = vld [vmem:[#allocation4 + $0x428] ss:$16 sps:$4 sm:$0xff]  }
 0x5dc   :  { %6937 = vmatprep.subr.bf16.mxu1 %v15001_v15  ;;  %v15056_v11 = vld [vmem:[#allocation4 + $0x628] ss:$16 sps:$4 sm:$0xff]   ;;  %v15061_v15 = vld [vmem:[#allocation4 + $0x40c] ss:$16 sps:$4 sm:$0xff]  }
 0x5de   :  { %6897 = vmatpush2.bf16.msra.mxu0 %v15003_v18  ;;  %v15064_v18 = vld [vmem:[#allocation4 + $0x60c] ss:$16 sps:$4 sm:$0xff]  }
 0x5df   :  { %6938 = vmatpush2.bf16.msra.mxu1 %v15004_v19  ;;  %6898 = vmatprep.subr.bf16.mxu0 %v15005_v12  ;;  %v15059_v19 = vld [vmem:[#allocation4 + $0x408] ss:$16 sps:$4 sm:$0xff]  }
 0x5e0   :  { %6939 = vmatprep.subr.bf16.mxu1 %v15007_v21  ;;  %v15062_v12 = vld [vmem:[#allocation4 + $0x608] ss:$16 sps:$4 sm:$0xff]   ;;  %v15067_v21 = vld [vmem:[#allocation4 + $0x5ec] ss:$16 sps:$4 sm:$0xff]  }
 0x5e2   :  { %6899 = vmatpush2.bf16.msra.mxu0 %v15009_v22  ;;  %v15070_v22 = vld [vmem:[#allocation4 + $0x7ec] ss:$16 sps:$4 sm:$0xff]  }
 0x5e3   :  { %6940 = vmatpush2.bf16.msra.mxu1 %v15010_v23  ;;  %6900 = vmatprep.subr.bf16.mxu0 %v15011_v16  ;;  %v15065_v23 = vld [vmem:[#allocation4 + $0x5e8] ss:$16 sps:$4 sm:$0xff]  }
 0x5e4   :  { %6941 = vmatprep.subr.bf16.mxu1 %v15013_v24  ;;  %v15068_v16 = vld [vmem:[#allocation4 + $0x7e8] ss:$16 sps:$4 sm:$0xff]   ;;  %v15073_v24 = vld [vmem:[#allocation4 + $0x5cc] ss:$16 sps:$4 sm:$0xff]  }
 0x5e6   :  { %6901 = vmatpush2.bf16.msra.mxu0 %v15015_v27  ;;  %v15076_v27 = vld [vmem:[#allocation4 + $0x7cc] ss:$16 sps:$4 sm:$0xff]  }
 0x5e7   :  { %6942 = vmatpush2.bf16.msra.mxu1 %v15016_v56  ;;  %6952 = vmatprep.subr.bf16.mxu0 %v15019_v0  ;;  %v15071_v56 = vld [vmem:[#allocation4 + $0x5c8] ss:$16 sps:$4 sm:$0xff]  }
 0x5e8   :  { %6993 = vmatprep.subr.bf16.mxu1 %v15022_v30  ;;  %v15074_v0 = vld [vmem:[#allocation4 + $0x7c8] ss:$16 sps:$4 sm:$0xff]   ;;  %v15079_v30 = vld [vmem:[#allocation4 + $0x5ac] ss:$16 sps:$4 sm:$0xff]  }
 0x5e9   :  { %6903 = vmatmul.mubr.bf16.vlgmr.msra.gmra.mxu0 %v16714_v17 }
 0x5ea   :  { %6944 = vmatmul.mubr.bf16.vlgmr.msra.gmra.mxu1 %v16740_v51  ;;  %6953 = vmatpush1.bf16.msra.mxu0 %v15017_v26  ;;  %v15082_v26 = vld [vmem:[#allocation4 + $0x7ac] ss:$16 sps:$4 sm:$0xff]  }
 0x5eb   :  { %6994 = vmatpush1.bf16.msra.mxu1 %v15020_v31  ;;  %6954 = vmatprep.subr.bf16.mxu0 %v15025_v39  ;;  %v15077_v31 = vld [vmem:[#allocation4 + $0x5a8] ss:$16 sps:$4 sm:$0xff]  }
 0x5ec   :  { %6995 = vmatprep.subr.bf16.mxu1 %v15028_v25  ;;  %6984 = vmatprep.mubr.bf16.mxu0 %v16716_v20  ;;  %v15080_v39 = vld [vmem:[#allocation4 + $0x7a8] ss:$16 sps:$4 sm:$0xff]   ;;  %v15085_v25 = vld [vmem:[#allocation4 + $0x58c] ss:$16 sps:$4 sm:$0xff]  }
 0x5ed   :  { %7025 = vmatprep.mubr.bf16.mxu1 %v16742_v52 }
 0x5ee   :  { %6955 = vmatpush1.bf16.msra.mxu0 %v15023_v34  ;;  %v15088_v34 = vld [vmem:[#allocation4 + $0x78c] ss:$16 sps:$4 sm:$0xff]  }
 0x5ef   :  { %6996 = vmatpush1.bf16.msra.mxu1 %v15026_v41  ;;  %6956 = vmatprep.subr.bf16.mxu0 %v15031_v55  ;;  %v15083_v41 = vld [vmem:[#allocation4 + $0x588] ss:$16 sps:$4 sm:$0xff]  }
 0x5f0   :  { %6997 = vmatprep.subr.bf16.mxu1 %v15034_v54  ;;  %v15086_v55 = vld [vmem:[#allocation4 + $0x788] ss:$16 sps:$4 sm:$0xff]   ;;  %v15091_v54 = vld [vmem:[#allocation4 + $0x56c] ss:$16 sps:$4 sm:$0xff]  }
 0x5f2   :  { %6957 = vmatpush1.bf16.msra.mxu0 %v15029_v38  ;;  %v15094_v38 = vld [vmem:[#allocation4 + $0x76c] ss:$16 sps:$4 sm:$0xff]  }
 0x5f3   :  { %6998 = vmatpush1.bf16.msra.mxu1 %v15032_v49  ;;  %6958 = vmatprep.subr.bf16.mxu0 %v15037_v50  ;;  %v15089_v49 = vld [vmem:[#allocation4 + $0x568] ss:$16 sps:$4 sm:$0xff]  }
 0x5f4   :  { %6999 = vmatprep.subr.bf16.mxu1 %v15040_v53  ;;  %v15092_v50 = vld [vmem:[#allocation4 + $0x768] ss:$16 sps:$4 sm:$0xff]   ;;  %v15097_v53 = vld [vmem:[#allocation4 + $0x54c] ss:$16 sps:$4 sm:$0xff]  }
 0x5f6   :  { %6959 = vmatpush1.bf16.msra.mxu0 %v15035_v62  ;;  %v15100_v62 = vld [vmem:[#allocation4 + $0x74c] ss:$16 sps:$4 sm:$0xff]  }
 0x5f7   :  { %7000 = vmatpush1.bf16.msra.mxu1 %v15038_v47  ;;  %6960 = vmatprep.subr.bf16.mxu0 %v15043_v29  ;;  %v15095_v47 = vld [vmem:[#allocation4 + $0x548] ss:$16 sps:$4 sm:$0xff]  }
 0x5f8   :  { %7001 = vmatprep.subr.bf16.mxu1 %v15046_v58  ;;  %v15098_v29 = vld [vmem:[#allocation4 + $0x748] ss:$16 sps:$4 sm:$0xff]   ;;  %v15103_v58 = vld [vmem:[#allocation4 + $0x52c] ss:$16 sps:$4 sm:$0xff]  }
 0x5fa   :  { %6961 = vmatpush1.bf16.msra.mxu0 %v15041_v35  ;;  %v15106_v35 = vld [vmem:[#allocation4 + $0x72c] ss:$16 sps:$4 sm:$0xff]  }
 0x5fb   :  { %7002 = vmatpush1.bf16.msra.mxu1 %v15044_v10  ;;  %6962 = vmatprep.subr.bf16.mxu0 %v15049_v57  ;;  %v15101_v10 = vld [vmem:[#allocation4 + $0x528] ss:$16 sps:$4 sm:$0xff]  }
 0x5fc   :  { %7003 = vmatprep.subr.bf16.mxu1 %v15052_v32  ;;  %v15104_v57 = vld [vmem:[#allocation4 + $0x728] ss:$16 sps:$4 sm:$0xff]   ;;  %v15109_v32 = vld [vmem:[#allocation4 + $0x50c] ss:$16 sps:$4 sm:$0xff]  }
 0x5fe   :  { %6963 = vmatpush1.bf16.msra.mxu0 %v15047_v36  ;;  %v15112_v36 = vld [vmem:[#allocation4 + $0x70c] ss:$16 sps:$4 sm:$0xff]  }
 0x5ff   :  { %7004 = vmatpush1.bf16.msra.mxu1 %v15050_v42  ;;  %6964 = vmatprep.subr.bf16.mxu0 %v15055_v44  ;;  %v15107_v42 = vld [vmem:[#allocation4 + $0x508] ss:$16 sps:$4 sm:$0xff]  }
 0x600   :  { %7005 = vmatprep.subr.bf16.mxu1 %v15058_v61  ;;  %v15110_v44 = vld [vmem:[#allocation4 + $0x708] ss:$16 sps:$4 sm:$0xff]   ;;  %v15115_v61 = vld [vmem:[#allocation4 + $0xe4] ss:$16 sps:$4 sm:$0xff]  }
 0x602   :  { %6965 = vmatpush1.bf16.msra.mxu0 %v15053_v14  ;;  %v15118_v14 = vld [vmem:[#allocation4 + $0x2e4] ss:$16 sps:$4 sm:$0xff]  }
 0x603   :  { %7006 = vmatpush1.bf16.msra.mxu1 %v15056_v11  ;;  %6966 = vmatprep.subr.bf16.mxu0 %v15061_v15  ;;  %v15113_v11 = vld [vmem:[#allocation4 + $0xe0] ss:$16 sps:$4 sm:$0xff]  }
 0x604   :  { %7007 = vmatprep.subr.bf16.mxu1 %v15064_v18  ;;  %v15116_v15 = vld [vmem:[#allocation4 + $0x2e0] ss:$16 sps:$4 sm:$0xff]   ;;  %v15121_v18 = vld [vmem:[#allocation4 + $0xc4] ss:$16 sps:$4 sm:$0xff]  }
 0x606   :  { %6967 = vmatpush1.bf16.msra.mxu0 %v15059_v19  ;;  %v15124_v19 = vld [vmem:[#allocation4 + $0x2c4] ss:$16 sps:$4 sm:$0xff]  }
 0x607   :  { %7008 = vmatpush1.bf16.msra.mxu1 %v15062_v12  ;;  %6968 = vmatprep.subr.bf16.mxu0 %v15067_v21  ;;  %v5958_v12 = vrot.slane %v16716_v20, 7  ;;  %v5960_v21 = vrot.slane %v16742_v52, 7 }
 0x608   :  { %7009 = vmatprep.subr.bf16.mxu1 %v15070_v22  ;;  %v15119_v22 = vld [vmem:[#allocation4 + $0xc0] ss:$16 sps:$4 sm:$0xff]  }
 0x60a   :  { %6969 = vmatpush2.bf16.msra.mxu0 %v15065_v23  ;;  %v15122_v23 = vld [vmem:[#allocation4 + $0x2c0] ss:$16 sps:$4 sm:$0xff]  }
 0x60b   :  { %7010 = vmatpush2.bf16.msra.mxu1 %v15068_v16  ;;  %6970 = vmatprep.subr.bf16.mxu0 %v15073_v24  ;;  %v15127_v16 = vld [vmem:[#allocation4 + $0xa4] ss:$16 sps:$4 sm:$0xff]  }
 0x60c   :  { %7011 = vmatprep.subr.bf16.mxu1 %v15076_v27  ;;  %v15130_v24 = vld [vmem:[#allocation4 + $0x2a4] ss:$16 sps:$4 sm:$0xff]   ;;  %v15125_v27 = vld [vmem:[#allocation4 + $0xa0] ss:$16 sps:$4 sm:$0xff]  }
 0x60e   :  { %6971 = vmatpush2.bf16.msra.mxu0 %v15071_v56  ;;  %v15128_v56 = vld [vmem:[#allocation4 + $0x2a0] ss:$16 sps:$4 sm:$0xff]  }
 0x60f   :  { %7012 = vmatpush2.bf16.msra.mxu1 %v15074_v0  ;;  %6972 = vmatprep.subr.bf16.mxu0 %v15079_v30  ;;  %v15133_v0 = vld [vmem:[#allocation4 + $0x84] ss:$16 sps:$4 sm:$0xff]  }
 0x610   :  { %7013 = vmatprep.subr.bf16.mxu1 %v15082_v26  ;;  %v15136_v30 = vld [vmem:[#allocation4 + $0x284] ss:$16 sps:$4 sm:$0xff]   ;;  %v15131_v26 = vld [vmem:[#allocation4 + $0x80] ss:$16 sps:$4 sm:$0xff]  }
 0x612   :  { %6973 = vmatpush2.bf16.msra.mxu0 %v15077_v31  ;;  %v15134_v31 = vld [vmem:[#allocation4 + $0x280] ss:$16 sps:$4 sm:$0xff]  }
 0x613   :  { %7014 = vmatpush2.bf16.msra.mxu1 %v15080_v39  ;;  %6974 = vmatprep.subr.bf16.mxu0 %v15085_v25  ;;  %v15139_v39 = vld [vmem:[#allocation4 + $0x64] ss:$16 sps:$4 sm:$0xff]  }
 0x614   :  { %7015 = vmatprep.subr.bf16.mxu1 %v15088_v34  ;;  %v15142_v25 = vld [vmem:[#allocation4 + $0x264] ss:$16 sps:$4 sm:$0xff]   ;;  %v15137_v34 = vld [vmem:[#allocation4 + $0x60] ss:$16 sps:$4 sm:$0xff]  }
 0x616   :  { %6975 = vmatpush2.bf16.msra.mxu0 %v15083_v41  ;;  %v15140_v41 = vld [vmem:[#allocation4 + $0x260] ss:$16 sps:$4 sm:$0xff]  }
 0x617   :  { %7016 = vmatpush2.bf16.msra.mxu1 %v15086_v55  ;;  %6976 = vmatprep.subr.bf16.mxu0 %v15091_v54  ;;  %v15145_v55 = vld [vmem:[#allocation4 + $0x44] ss:$16 sps:$4 sm:$0xff]  }
 0x618   :  { %7017 = vmatprep.subr.bf16.mxu1 %v15094_v38  ;;  %v15148_v54 = vld [vmem:[#allocation4 + $0x244] ss:$16 sps:$4 sm:$0xff]   ;;  %v15143_v38 = vld [vmem:[#allocation4 + $0x40] ss:$16 sps:$4 sm:$0xff]  }
 0x61a   :  { %6977 = vmatpush2.bf16.msra.mxu0 %v15089_v49  ;;  %v15146_v49 = vld [vmem:[#allocation4 + $0x240] ss:$16 sps:$4 sm:$0xff]  }
 0x61b   :  { %7018 = vmatpush2.bf16.msra.mxu1 %v15092_v50  ;;  %6978 = vmatprep.subr.bf16.mxu0 %v15097_v53  ;;  %v15151_v50 = vld [vmem:[#allocation4 + $0x24] ss:$16 sps:$4 sm:$0xff]  }
 0x61c   :  { %7019 = vmatprep.subr.bf16.mxu1 %v15100_v62  ;;  %v15154_v53 = vld [vmem:[#allocation4 + $0x224] ss:$16 sps:$4 sm:$0xff]   ;;  %v15149_v62 = vld [vmem:[#allocation4 + $0x20] ss:$16 sps:$4 sm:$0xff]  }
 0x61e   :  { %6979 = vmatpush2.bf16.msra.mxu0 %v15095_v47  ;;  %v15152_v47 = vld [vmem:[#allocation4 + $0x220] ss:$16 sps:$4 sm:$0xff]  }
 0x61f   :  { %7020 = vmatpush2.bf16.msra.mxu1 %v15098_v29  ;;  %6980 = vmatprep.subr.bf16.mxu0 %v15103_v58  ;;  %v15157_v29 = vld [vmem:[#allocation4 + $0x4] ss:$16 sps:$4 sm:$0xff]  }
 0x620   :  { %7021 = vmatprep.subr.bf16.mxu1 %v15106_v35  ;;  %v15160_v58 = vld [vmem:[#allocation4 + $0x204] ss:$16 sps:$4 sm:$0xff]   ;;  %v15155_v35 = vld [vmem:[#allocation4] ss:$16 sps:$4 sm:$0xff]  }
 0x622   :  { %6981 = vmatpush2.bf16.msra.mxu0 %v15101_v10  ;;  %v15158_v10 = vld [vmem:[#allocation4 + $0x200] ss:$16 sps:$4 sm:$0xff]  }
 0x623   :  { %7022 = vmatpush2.bf16.msra.mxu1 %v15104_v57  ;;  %6982 = vmatprep.subr.bf16.mxu0 %v15109_v32  ;;  %v15163_v57 = vld [vmem:[#allocation4 + $0x1e4] ss:$16 sps:$4 sm:$0xff]  }
 0x624   :  { %7023 = vmatprep.subr.bf16.mxu1 %v15112_v36  ;;  %v15166_v32 = vld [vmem:[#allocation4 + $0x3e4] ss:$16 sps:$4 sm:$0xff]   ;;  %v15161_v36 = vld [vmem:[#allocation4 + $0x1e0] ss:$16 sps:$4 sm:$0xff]  }
 0x626   :  { %6983 = vmatpush2.bf16.msra.mxu0 %v15107_v42  ;;  %v15164_v42 = vld [vmem:[#allocation4 + $0x3e0] ss:$16 sps:$4 sm:$0xff]  }
 0x627   :  { %7024 = vmatpush2.bf16.msra.mxu1 %v15110_v44  ;;  %7674 = vmatprep.subr.bf16.mxu0 %v15115_v61  ;;  %v15169_v44 = vld [vmem:[#allocation4 + $0x1c4] ss:$16 sps:$4 sm:$0xff]  }
 0x628   :  { %7715 = vmatprep.subr.bf16.mxu1 %v15118_v14  ;;  %v15172_v61 = vld [vmem:[#allocation4 + $0x3c4] ss:$16 sps:$4 sm:$0xff]   ;;  %v15167_v14 = vld [vmem:[#allocation4 + $0x1c0] ss:$16 sps:$4 sm:$0xff]  }
 0x629   :  { %6985 = vmatmul.mubr.bf16.vlgmr.msra.gmra.mxu0 %v16714_v17 }
 0x62a   :  { %7026 = vmatmul.mubr.bf16.vlgmr.msra.gmra.mxu1 %v16740_v51  ;;  %7675 = vmatpush1.bf16.msra.mxu0 %v15113_v11  ;;  %v15170_v11 = vld [vmem:[#allocation4 + $0x3c0] ss:$16 sps:$4 sm:$0xff]  }
 0x62b   :  { %7716 = vmatpush1.bf16.msra.mxu1 %v15116_v15  ;;  %7676 = vmatprep.subr.bf16.mxu0 %v15121_v18  ;;  %v15175_v15 = vld [vmem:[#allocation4 + $0x1a4] ss:$16 sps:$4 sm:$0xff]  }
 0x62c   :  { %7717 = vmatprep.subr.bf16.mxu1 %v15124_v19  ;;  %13196 = vmatprep.mubr.msk.bf16.mxu0 %vm16524_vm13, %v5958_v12  ;;  %v15178_v18 = vld [vmem:[#allocation4 + $0x3a4] ss:$16 sps:$4 sm:$0xff]   ;;  %v15173_v19 = vld [vmem:[#allocation4 + $0x1a0] ss:$16 sps:$4 sm:$0xff]  }
 0x62d   :  { %13200 = vmatprep.mubr.msk.bf16.mxu1 %vm16524_vm13, %v5960_v21 }
 0x62e   :  { %7677 = vmatpush1.bf16.msra.mxu0 %v15119_v22  ;;  %v15176_v22 = vld [vmem:[#allocation4 + $0x3a0] ss:$16 sps:$4 sm:$0xff]  }
 0x62f   :  { %7718 = vmatpush1.bf16.msra.mxu1 %v15122_v23  ;;  %7678 = vmatprep.subr.bf16.mxu0 %v15127_v16  ;;  %v15181_v23 = vld [vmem:[#allocation4 + $0x184] ss:$16 sps:$4 sm:$0xff]  }
 0x630   :  { %7719 = vmatprep.subr.bf16.mxu1 %v15130_v24  ;;  %v15184_v16 = vld [vmem:[#allocation4 + $0x384] ss:$16 sps:$4 sm:$0xff]   ;;  %v15179_v24 = vld [vmem:[#allocation4 + $0x180] ss:$16 sps:$4 sm:$0xff]  }
 0x632   :  { %7679 = vmatpush1.bf16.msra.mxu0 %v15125_v27  ;;  %v15182_v27 = vld [vmem:[#allocation4 + $0x380] ss:$16 sps:$4 sm:$0xff]  }
 0x633   :  { %7720 = vmatpush1.bf16.msra.mxu1 %v15128_v56  ;;  %7680 = vmatprep.subr.bf16.mxu0 %v15133_v0  ;;  %v15187_v56 = vld [vmem:[#allocation4 + $0x164] ss:$16 sps:$4 sm:$0xff]  }
 0x634   :  { %7721 = vmatprep.subr.bf16.mxu1 %v15136_v30  ;;  %v15190_v0 = vld [vmem:[#allocation4 + $0x364] ss:$16 sps:$4 sm:$0xff]   ;;  %v15185_v30 = vld [vmem:[#allocation4 + $0x160] ss:$16 sps:$4 sm:$0xff]  }
 0x636   :  { %7681 = vmatpush1.bf16.msra.mxu0 %v15131_v26  ;;  %v15188_v26 = vld [vmem:[#allocation4 + $0x360] ss:$16 sps:$4 sm:$0xff]  }
 0x637   :  { %7722 = vmatpush1.bf16.msra.mxu1 %v15134_v31  ;;  %7682 = vmatprep.subr.bf16.mxu0 %v15139_v39  ;;  %v15193_v31 = vld [vmem:[#allocation4 + $0x144] ss:$16 sps:$4 sm:$0xff]  }
 0x638   :  { %7723 = vmatprep.subr.bf16.mxu1 %v15142_v25  ;;  %v15196_v39 = vld [vmem:[#allocation4 + $0x344] ss:$16 sps:$4 sm:$0xff]   ;;  %v15191_v25 = vld [vmem:[#allocation4 + $0x140] ss:$16 sps:$4 sm:$0xff]  }
 0x63a   :  { %7683 = vmatpush1.bf16.msra.mxu0 %v15137_v34  ;;  %v15194_v34 = vld [vmem:[#allocation4 + $0x340] ss:$16 sps:$4 sm:$0xff]  }
 0x63b   :  { %7724 = vmatpush1.bf16.msra.mxu1 %v15140_v41  ;;  %7684 = vmatprep.subr.bf16.mxu0 %v15145_v55  ;;  %v15199_v41 = vld [vmem:[#allocation4 + $0x124] ss:$16 sps:$4 sm:$0xff]  }
 0x63c   :  { %7725 = vmatprep.subr.bf16.mxu1 %v15148_v54  ;;  %v15202_v55 = vld [vmem:[#allocation4 + $0x324] ss:$16 sps:$4 sm:$0xff]   ;;  %v15197_v54 = vld [vmem:[#allocation4 + $0x120] ss:$16 sps:$4 sm:$0xff]  }
 0x63e   :  { %7685 = vmatpush1.bf16.msra.mxu0 %v15143_v38  ;;  %v15200_v38 = vld [vmem:[#allocation4 + $0x320] ss:$16 sps:$4 sm:$0xff]  }
 0x63f   :  { %7726 = vmatpush1.bf16.msra.mxu1 %v15146_v49  ;;  %7686 = vmatprep.subr.bf16.mxu0 %v15151_v50  ;;  %v15205_v49 = vld [vmem:[#allocation4 + $0x104] ss:$16 sps:$4 sm:$0xff]  }
 0x640   :  { %7727 = vmatprep.subr.bf16.mxu1 %v15154_v53  ;;  %v15208_v50 = vld [vmem:[#allocation4 + $0x304] ss:$16 sps:$4 sm:$0xff]   ;;  %v15203_v53 = vld [vmem:[#allocation4 + $0x100] ss:$16 sps:$4 sm:$0xff]  }
 0x642   :  { %7687 = vmatpush1.bf16.msra.mxu0 %v15149_v62  ;;  %v15206_v62 = vld [vmem:[#allocation4 + $0x300] ss:$16 sps:$4 sm:$0xff]  }
 0x643   :  { %7728 = vmatpush1.bf16.msra.mxu1 %v15152_v47  ;;  %7688 = vmatprep.subr.bf16.mxu0 %v15157_v29  ;;  %v15211_v47 = vld [vmem:[#allocation4 + $0xec] ss:$16 sps:$4 sm:$0xff]  }
 0x644   :  { %7729 = vmatprep.subr.bf16.mxu1 %v15160_v58  ;;  %v15214_v29 = vld [vmem:[#allocation4 + $0x2ec] ss:$16 sps:$4 sm:$0xff]   ;;  %v5957_v58 = vrot.slane %v16714_v17, 7 }
 0x646   :  { %7689 = vmatpush1.bf16.msra.mxu0 %v15155_v35  ;;  %v5959_v35 = vrot.slane %v16740_v51, 7 }
 0x647   :  { %7730 = vmatpush1.bf16.msra.mxu1 %v15158_v10  ;;  %7690 = vmatprep.subr.bf16.mxu0 %v15163_v57  ;;  %v15209_v10 = vld [vmem:[#allocation4 + $0xe8] ss:$16 sps:$4 sm:$0xff]  }
 0x648   :  { %7731 = vmatprep.subr.bf16.mxu1 %v15166_v32  ;;  %v15212_v57 = vld [vmem:[#allocation4 + $0x2e8] ss:$16 sps:$4 sm:$0xff]   ;;  %v15217_v32 = vld [vmem:[#allocation4 + $0xcc] ss:$16 sps:$4 sm:$0xff]  }
 0x64a   :  { %7691 = vmatpush2.bf16.msra.mxu0 %v15161_v36  ;;  %v15220_v36 = vld [vmem:[#allocation4 + $0x2cc] ss:$16 sps:$4 sm:$0xff]  }
 0x64b   :  { %7732 = vmatpush2.bf16.msra.mxu1 %v15164_v42  ;;  %7692 = vmatprep.subr.bf16.mxu0 %v15169_v44  ;;  %v15215_v42 = vld [vmem:[#allocation4 + $0xc8] ss:$16 sps:$4 sm:$0xff]  }
 0x64c   :  { %7733 = vmatprep.subr.bf16.mxu1 %v15172_v61  ;;  %v15218_v44 = vld [vmem:[#allocation4 + $0x2c8] ss:$16 sps:$4 sm:$0xff]   ;;  %v15223_v61 = vld [vmem:[#allocation4 + $0xac] ss:$16 sps:$4 sm:$0xff]  }
 0x64e   :  { %7693 = vmatpush2.bf16.msra.mxu0 %v15167_v14  ;;  %v15226_v14 = vld [vmem:[#allocation4 + $0x2ac] ss:$16 sps:$4 sm:$0xff]  }
 0x64f   :  { %7734 = vmatpush2.bf16.msra.mxu1 %v15170_v11  ;;  %7694 = vmatprep.subr.bf16.mxu0 %v15175_v15  ;;  %v15221_v11 = vld [vmem:[#allocation4 + $0xa8] ss:$16 sps:$4 sm:$0xff]  }
 0x650   :  { %7735 = vmatprep.subr.bf16.mxu1 %v15178_v18  ;;  %v15224_v15 = vld [vmem:[#allocation4 + $0x2a8] ss:$16 sps:$4 sm:$0xff]   ;;  %v15229_v18 = vld [vmem:[#allocation4 + $0x8c] ss:$16 sps:$4 sm:$0xff]  }
 0x652   :  { %7695 = vmatpush2.bf16.msra.mxu0 %v15173_v19  ;;  %v15232_v19 = vld [vmem:[#allocation4 + $0x28c] ss:$16 sps:$4 sm:$0xff]  }
 0x653   :  { %7736 = vmatpush2.bf16.msra.mxu1 %v15176_v22  ;;  %7696 = vmatprep.subr.bf16.mxu0 %v15181_v23  ;;  %v15227_v22 = vld [vmem:[#allocation4 + $0x88] ss:$16 sps:$4 sm:$0xff]  }
 0x654   :  { %7737 = vmatprep.subr.bf16.mxu1 %v15184_v16  ;;  %v15230_v23 = vld [vmem:[#allocation4 + $0x288] ss:$16 sps:$4 sm:$0xff]   ;;  %v15235_v16 = vld [vmem:[#allocation4 + $0x6c] ss:$16 sps:$4 sm:$0xff]  }
 0x656   :  { %7697 = vmatpush2.bf16.msra.mxu0 %v15179_v24  ;;  %v15233_v24 = vld [vmem:[#allocation4 + $0x68] ss:$16 sps:$4 sm:$0xff]  }
 0x657   :  { %7738 = vmatpush2.bf16.msra.mxu1 %v15182_v27  ;;  %7698 = vmatprep.subr.bf16.mxu0 %v15187_v56  ;;  %v15236_v27 = vld [vmem:[#allocation4 + $0x268] ss:$16 sps:$4 sm:$0xff]   ;;  %v15244_v56 = vld [vmem:[#allocation4 + $0x24c] ss:$16 sps:$4 sm:$0xff]  }
 0x658   :  { %7739 = vmatprep.subr.bf16.mxu1 %v15190_v0  ;;  %v15239_v0 = vld [vmem:[#allocation4 + $0x48] ss:$16 sps:$4 sm:$0xff]  }
 0x65a   :  { %7699 = vmatpush2.bf16.msra.mxu0 %v15185_v30  ;;  %v15242_v30 = vld [vmem:[#allocation4 + $0x248] ss:$16 sps:$4 sm:$0xff]  }
 0x65b   :  { %7740 = vmatpush2.bf16.msra.mxu1 %v15188_v26  ;;  %7700 = vmatprep.subr.bf16.mxu0 %v15193_v31  ;;  %v15247_v26 = vld [vmem:[#allocation4 + $0x2c] ss:$16 sps:$4 sm:$0xff]  }
 0x65c   :  { %7741 = vmatprep.subr.bf16.mxu1 %v15196_v39  ;;  %v15250_v31 = vld [vmem:[#allocation4 + $0x22c] ss:$16 sps:$4 sm:$0xff]   ;;  %v15245_v39 = vld [vmem:[#allocation4 + $0x28] ss:$16 sps:$4 sm:$0xff]  }
 0x65e   :  { %7701 = vmatpush2.bf16.msra.mxu0 %v15191_v25  ;;  %v15248_v25 = vld [vmem:[#allocation4 + $0x228] ss:$16 sps:$4 sm:$0xff]  }
 0x65f   :  { %7742 = vmatpush2.bf16.msra.mxu1 %v15194_v34  ;;  %7702 = vmatprep.subr.bf16.mxu0 %v15199_v41  ;;  %v15253_v34 = vld [vmem:[#allocation4 + $0xc] ss:$16 sps:$4 sm:$0xff]  }
 0x660   :  { %7743 = vmatprep.subr.bf16.mxu1 %v15202_v55  ;;  %v15256_v41 = vld [vmem:[#allocation4 + $0x20c] ss:$16 sps:$4 sm:$0xff]   ;;  %v15251_v55 = vld [vmem:[#allocation4 + $0x8] ss:$16 sps:$4 sm:$0xff]  }
 0x662   :  { %7703 = vmatpush2.bf16.msra.mxu0 %v15197_v54  ;;  %v15254_v54 = vld [vmem:[#allocation4 + $0x208] ss:$16 sps:$4 sm:$0xff]  }
 0x663   :  { %7744 = vmatpush2.bf16.msra.mxu1 %v15200_v38  ;;  %7704 = vmatprep.subr.bf16.mxu0 %v15205_v49  ;;  %v15259_v38 = vld [vmem:[#allocation4 + $0x1ec] ss:$16 sps:$4 sm:$0xff]  }
 0x664   :  { %7745 = vmatprep.subr.bf16.mxu1 %v15208_v50  ;;  %v15262_v49 = vld [vmem:[#allocation4 + $0x3ec] ss:$16 sps:$4 sm:$0xff]   ;;  %v15257_v50 = vld [vmem:[#allocation4 + $0x1e8] ss:$16 sps:$4 sm:$0xff]  }
 0x666   :  { %7705 = vmatpush2.bf16.msra.mxu0 %v15203_v53  ;;  %v15260_v53 = vld [vmem:[#allocation4 + $0x3e8] ss:$16 sps:$4 sm:$0xff]  }
 0x667   :  { %7746 = vmatpush2.bf16.msra.mxu1 %v15206_v62  ;;  %7756 = vmatprep.subr.bf16.mxu0 %v15211_v47  ;;  %v15265_v62 = vld [vmem:[#allocation4 + $0x1cc] ss:$16 sps:$4 sm:$0xff]  }
 0x668   :  { %7797 = vmatprep.subr.bf16.mxu1 %v15214_v29  ;;  %v15268_v47 = vld [vmem:[#allocation4 + $0x3cc] ss:$16 sps:$4 sm:$0xff]   ;;  %v15263_v29 = vld [vmem:[#allocation4 + $0x1c8] ss:$16 sps:$4 sm:$0xff]  }
 0x669   :  { %13198 = vmatmul.mubr.msk.bf16.vlgmr.msra.gmra.mxu0 %vm16524_vm13, %v5957_v58 }
 0x66a   :  { %13202 = vmatmul.mubr.msk.bf16.vlgmr.msra.gmra.mxu1 %vm16524_vm13, %v5959_v35  ;;  %7757 = vmatpush1.bf16.msra.mxu0 %v15209_v10  ;;  %v15266_v10 = vld [vmem:[#allocation4 + $0x3c8] ss:$16 sps:$4 sm:$0xff]  }
 0x66b   :  { %7798 = vmatpush1.bf16.msra.mxu1 %v15212_v57  ;;  %7758 = vmatprep.subr.bf16.mxu0 %v15217_v32  ;;  %v15271_v57 = vld [vmem:[#allocation4 + $0x1ac] ss:$16 sps:$4 sm:$0xff]  }
 0x66c   :  { %7799 = vmatprep.subr.bf16.mxu1 %v15220_v36  ;;  %13204 = vmatprep.mubr.msk.bf16.mxu0 %vm16524_vm13, %v5958_v12  ;;  %v15238_v12 = vld [vmem:[#allocation4 + $0x26c] ss:$16 sps:$4 sm:$0xff]   ;;  %v15269_v36 = vld [vmem:[#allocation4 + $0x1a8] ss:$16 sps:$4 sm:$0xff]  }
 0x66d   :  { %13208 = vmatprep.mubr.msk.bf16.mxu1 %vm16524_vm13, %v5960_v21  ;;  %v15241_v21 = vld [vmem:[#allocation4 + $0x4c] ss:$16 sps:$4 sm:$0xff]  }
 0x66e   :  { %7759 = vmatpush1.bf16.msra.mxu0 %v15215_v42  ;;  %v15274_v32 = vld [vmem:[#allocation4 + $0x3ac] ss:$16 sps:$4 sm:$0xff]   ;;  %v15272_v42 = vld [vmem:[#allocation4 + $0x3a8] ss:$16 sps:$4 sm:$0xff]  }
 0x66f   :  { %7800 = vmatpush1.bf16.msra.mxu1 %v15218_v44  ;;  %7760 = vmatprep.subr.bf16.mxu0 %v15223_v61  ;;  %v15277_v44 = vld [vmem:[#allocation4 + $0x18c] ss:$16 sps:$4 sm:$0xff]  }
 0x670   :  { %7801 = vmatprep.subr.bf16.mxu1 %v15226_v14  ;;  %v15280_v61 = vld [vmem:[#allocation4 + $0x38c] ss:$16 sps:$4 sm:$0xff]   ;;  %v15275_v14 = vld [vmem:[#allocation4 + $0x188] ss:$16 sps:$4 sm:$0xff]  }
 0x672   :  { %7761 = vmatpush1.bf16.msra.mxu0 %v15221_v11  ;;  %v15278_v11 = vld [vmem:[#allocation4 + $0x388] ss:$16 sps:$4 sm:$0xff]  }
 0x673   :  { %7802 = vmatpush1.bf16.msra.mxu1 %v15224_v15  ;;  %7762 = vmatprep.subr.bf16.mxu0 %v15229_v18  ;;  %v15283_v15 = vld [vmem:[#allocation4 + $0x16c] ss:$16 sps:$4 sm:$0xff]  }
 0x674   :  { %7803 = vmatprep.subr.bf16.mxu1 %v15232_v19  ;;  %v15286_v18 = vld [vmem:[#allocation4 + $0x36c] ss:$16 sps:$4 sm:$0xff]   ;;  %v15281_v19 = vld [vmem:[#allocation4 + $0x168] ss:$16 sps:$4 sm:$0xff]  }
 0x676   :  { %7763 = vmatpush1.bf16.msra.mxu0 %v15227_v22  ;;  %v15284_v22 = vld [vmem:[#allocation4 + $0x368] ss:$16 sps:$4 sm:$0xff]  }
 0x677   :  { %7804 = vmatpush1.bf16.msra.mxu1 %v15230_v23  ;;  %7764 = vmatprep.subr.bf16.mxu0 %v15235_v16  ;;  %v15289_v23 = vld [vmem:[#allocation4 + $0x14c] ss:$16 sps:$4 sm:$0xff]  }
 0x678   :  { %7805 = vmatprep.subr.bf16.mxu1 %v15238_v12  ;;  %v15292_v16 = vld [vmem:[#allocation4 + $0x34c] ss:$16 sps:$4 sm:$0xff]   ;;  %v15287_v12 = vld [vmem:[#allocation4 + $0x148] ss:$16 sps:$4 sm:$0xff]  }
 0x67a   :  { %7765 = vmatpush1.bf16.msra.mxu0 %v15233_v24  ;;  %v15290_v24 = vld [vmem:[#allocation4 + $0x348] ss:$16 sps:$4 sm:$0xff]  }
 0x67b   :  { %7806 = vmatpush1.bf16.msra.mxu1 %v15236_v27  ;;  %7766 = vmatprep.subr.bf16.mxu0 %v15241_v21  ;;  %v15295_v27 = vld [vmem:[#allocation4 + $0x12c] ss:$16 sps:$4 sm:$0xff]  }
 0x67c   :  { %7807 = vmatprep.subr.bf16.mxu1 %v15244_v56  ;;  %v15298_v21 = vld [vmem:[#allocation4 + $0x32c] ss:$16 sps:$4 sm:$0xff]   ;;  %v15293_v56 = vld [vmem:[#allocation4 + $0x128] ss:$16 sps:$4 sm:$0xff]  }
 0x67e   :  { %7767 = vmatpush1.bf16.msra.mxu0 %v15239_v0  ;;  %v15296_v0 = vld [vmem:[#allocation4 + $0x328] ss:$16 sps:$4 sm:$0xff]  }
 0x67f   :  { %7808 = vmatpush1.bf16.msra.mxu1 %v15242_v30  ;;  %7768 = vmatprep.subr.bf16.mxu0 %v15247_v26  ;;  %v15301_v30 = vld [vmem:[#allocation4 + $0x10c] ss:$16 sps:$4 sm:$0xff]  }
 0x680   :  { %7809 = vmatprep.subr.bf16.mxu1 %v15250_v31  ;;  %v15304_v26 = vld [vmem:[#allocation4 + $0x30c] ss:$16 sps:$4 sm:$0xff]   ;;  %v15299_v31 = vld [vmem:[#allocation4 + $0x108] ss:$16 sps:$4 sm:$0xff]  }
 0x682   :  { %7769 = vmatpush1.bf16.msra.mxu0 %v15245_v39  ;;  %v15302_v39 = vld [vmem:[#allocation4 + $0x308] ss:$16 sps:$4 sm:$0xff]  }
 0x683   :  { %7810 = vmatpush1.bf16.msra.mxu1 %v15248_v25  ;;  %7770 = vmatprep.subr.bf16.mxu0 %v15253_v34  ;;  %v15307_v25 = vld [vmem:[#allocation4 + $0x8e4] ss:$16 sps:$4 sm:$0xff]  }
 0x684   :  { %7811 = vmatprep.subr.bf16.mxu1 %v15256_v41  ;;  %v15310_v34 = vld [vmem:[#allocation4 + $0xae4] ss:$16 sps:$4 sm:$0xff]   ;;  %v15305_v41 = vld [vmem:[#allocation4 + $0x8e0] ss:$16 sps:$4 sm:$0xff]  }
 0x686   :  { %7771 = vmatpush1.bf16.msra.mxu0 %v15251_v55  ;;  %v15308_v55 = vld [vmem:[#allocation4 + $0xae0] ss:$16 sps:$4 sm:$0xff]  }
 0x687   :  { %7812 = vmatpush1.bf16.msra.mxu1 %v15254_v54  ;;  %7772 = vmatprep.subr.bf16.mxu0 %v15259_v38  ;;  %v15313_v54 = vld [vmem:[#allocation4 + $0x8c4] ss:$16 sps:$4 sm:$0xff]  }
 0x688   :  { %7813 = vmatprep.subr.bf16.mxu1 %v15262_v49  ;;  %v15316_v38 = vld [vmem:[#allocation4 + $0xac4] ss:$16 sps:$4 sm:$0xff]   ;;  %v7839_v49 = vrot.slane %v16716_v20, 1  ;;  %v15419_v20 = vld [vmem:[#allocation4 + $0x888] ss:$16 sps:$4 sm:$0xff]  }
 0x68a   :  { %7773 = vmatpush2.bf16.msra.mxu0 %v15257_v50  ;;  %v7841_v50 = vrot.slane %v16742_v52, 1  ;;  %v15427_v52 = vld [vmem:[#allocation4 + $0x86c] ss:$16 sps:$4 sm:$0xff]  }
 0x68b   :  { %7814 = vmatpush2.bf16.msra.mxu1 %v15260_v53  ;;  %7774 = vmatprep.subr.bf16.mxu0 %v15265_v62 }
 0x68c   :  { %7815 = vmatprep.subr.bf16.mxu1 %v15268_v47 }
 0x68e   :  { %7775 = vmatpush2.bf16.msra.mxu0 %v15263_v29  ;;  %v15311_v29 = vld [vmem:[#allocation4 + $0x8c0] ss:$16 sps:$4 sm:$0xff]  }
 0x68f   :  { %7816 = vmatpush2.bf16.msra.mxu1 %v15266_v10  ;;  %7776 = vmatprep.subr.bf16.mxu0 %v15271_v57  ;;  %v15314_v10 = vld [vmem:[#allocation4 + $0xac0] ss:$16 sps:$4 sm:$0xff]  }
 0x690   :  { %7817 = vmatprep.subr.bf16.mxu1 %v15274_v32 }
 0x692   :  { %7777 = vmatpush2.bf16.msra.mxu0 %v15269_v36  ;;  %v15319_v36 = vld [vmem:[#allocation4 + $0x8a4] ss:$16 sps:$4 sm:$0xff]  }
 0x693   :  { %7818 = vmatpush2.bf16.msra.mxu1 %v15272_v42  ;;  %7778 = vmatprep.subr.bf16.mxu0 %v15277_v44  ;;  %v15322_v42 = vld [vmem:[#allocation4 + $0xaa4] ss:$16 sps:$4 sm:$0xff]  }
 0x694   :  { %7819 = vmatprep.subr.bf16.mxu1 %v15280_v61  ;;  %v15317_v61 = vld [vmem:[#allocation4 + $0x8a0] ss:$16 sps:$4 sm:$0xff]  }
 0x696   :  { %7779 = vmatpush2.bf16.msra.mxu0 %v15275_v14  ;;  %v15320_v14 = vld [vmem:[#allocation4 + $0xaa0] ss:$16 sps:$4 sm:$0xff]  }
 0x697   :  { %7820 = vmatpush2.bf16.msra.mxu1 %v15278_v11  ;;  %7780 = vmatprep.subr.bf16.mxu0 %v15283_v15 }
 0x698   :  { %7821 = vmatprep.subr.bf16.mxu1 %v15286_v18  ;;  %v15325_v18 = vld [vmem:[#allocation4 + $0x884] ss:$16 sps:$4 sm:$0xff]  }
 0x69a   :  { %7781 = vmatpush2.bf16.msra.mxu0 %v15281_v19  ;;  %v15328_v19 = vld [vmem:[#allocation4 + $0xa84] ss:$16 sps:$4 sm:$0xff]  }
 0x69b   :  { %7822 = vmatpush2.bf16.msra.mxu1 %v15284_v22  ;;  %7782 = vmatprep.subr.bf16.mxu0 %v15289_v23  ;;  %v15323_v22 = vld [vmem:[#allocation4 + $0x880] ss:$16 sps:$4 sm:$0xff]  }
 0x69c   :  { %7823 = vmatprep.subr.bf16.mxu1 %v15292_v16  ;;  %v15326_v23 = vld [vmem:[#allocation4 + $0xa80] ss:$16 sps:$4 sm:$0xff]   ;;  %v15331_v16 = vld [vmem:[#allocation4 + $0x864] ss:$16 sps:$4 sm:$0xff]  }
 0x69e   :  { %7783 = vmatpush2.bf16.msra.mxu0 %v15287_v12  ;;  %v15334_v12 = vld [vmem:[#allocation4 + $0xa64] ss:$16 sps:$4 sm:$0xff]  }
 0x69f   :  { %7824 = vmatpush2.bf16.msra.mxu1 %v15290_v24  ;;  %7784 = vmatprep.subr.bf16.mxu0 %v15295_v27  ;;  %v15329_v24 = vld [vmem:[#allocation4 + $0x860] ss:$16 sps:$4 sm:$0xff]  }
 0x6a0   :  { %7825 = vmatprep.subr.bf16.mxu1 %v15298_v21  ;;  %v15332_v27 = vld [vmem:[#allocation4 + $0xa60] ss:$16 sps:$4 sm:$0xff]   ;;  %v15337_v21 = vld [vmem:[#allocation4 + $0x844] ss:$16 sps:$4 sm:$0xff]  }
 0x6a2   :  { %7785 = vmatpush2.bf16.msra.mxu0 %v15293_v56  ;;  %v15340_v56 = vld [vmem:[#allocation4 + $0xa44] ss:$16 sps:$4 sm:$0xff]  }
 0x6a3   :  { %7826 = vmatpush2.bf16.msra.mxu1 %v15296_v0  ;;  %7786 = vmatprep.subr.bf16.mxu0 %v15301_v30  ;;  %v15335_v0 = vld [vmem:[#allocation4 + $0x840] ss:$16 sps:$4 sm:$0xff]  }
 0x6a4   :  { %7827 = vmatprep.subr.bf16.mxu1 %v15304_v26  ;;  %v15338_v30 = vld [vmem:[#allocation4 + $0xa40] ss:$16 sps:$4 sm:$0xff]   ;;  %v15343_v26 = vld [vmem:[#allocation4 + $0x824] ss:$16 sps:$4 sm:$0xff]  }
 0x6a6   :  { %7787 = vmatpush2.bf16.msra.mxu0 %v15299_v31  ;;  %v15346_v31 = vld [vmem:[#allocation4 + $0xa24] ss:$16 sps:$4 sm:$0xff]  }
 0x6a7   :  { %7828 = vmatpush2.bf16.msra.mxu1 %v15302_v39  ;;  %8623 = vmatprep.subr.bf16.mxu0 %v15307_v25  ;;  %v15341_v39 = vld [vmem:[#allocation4 + $0x820] ss:$16 sps:$4 sm:$0xff]  }
 0x6a8   :  { %8664 = vmatprep.subr.bf16.mxu1 %v15310_v34  ;;  %v15344_v25 = vld [vmem:[#allocation4 + $0xa20] ss:$16 sps:$4 sm:$0xff]   ;;  %v15349_v34 = vld [vmem:[#allocation4 + $0x804] ss:$16 sps:$4 sm:$0xff]  }
 0x6a9   :  { %v6904_v53 = vpop.f32.mrf.mxu0  ;;  %13206 = vmatmul.mubr.msk.bf16.vlgmr.msra.gmra.mxu0 %vm16524_vm13, %v5957_v58 }
 0x6aa   :  { %v6945_v62 = vpop.f32.mrf.mxu1  ;;  %13210 = vmatmul.mubr.msk.bf16.vlgmr.msra.gmra.mxu1 %vm16524_vm13, %v5959_v35  ;;  %8624 = vmatpush1.bf16.msra.mxu0 %v15305_v41  ;;  %v15352_v41 = vld [vmem:[#allocation4 + $0xa04] ss:$16 sps:$4 sm:$0xff]  }
 0x6ab   :  { %v16790_v47 = vadd.f32 %v6945_v62, %v6904_v53  ;;  %8665 = vmatpush1.bf16.msra.mxu1 %v15308_v55  ;;  %v6906_v57 = vpop.f32.mrf.mxu0  ;;  %8625 = vmatprep.subr.bf16.mxu0 %v15313_v54  ;;  %v15347_v55 = vld [vmem:[#allocation4 + $0x800] ss:$16 sps:$4 sm:$0xff]   ;;  %v15358_v53 = vld [vmem:[#allocation4 + $0xbe4] ss:$16 sps:$4 sm:$0xff]  }
 0x6ac   :  { %v6947_v32 = vpop.f32.mrf.mxu1  ;;  %8666 = vmatprep.subr.bf16.mxu1 %v15316_v38  ;;  %13339 = vmatprep.mubr.msk.bf16.mxu0 %vm650_vm12, %v7839_v49  ;;  %v15350_v54 = vld [vmem:[#allocation4 + $0xa00] ss:$16 sps:$4 sm:$0xff]   ;;  %v15355_v38 = vld [vmem:[#allocation4 + $0x9e4] ss:$16 sps:$4 sm:$0xff]  }
 0x6ad   :  { %v16792_v44 = vadd.f32 %v6947_v32, %v6906_v57  ;;  %13341 = vmatprep.mubr.msk.bf16.mxu1 %vm650_vm12, %v7841_v50  ;;  %v6908_v58 = vpop.f32.mrf.mxu0  ;;  %v15353_v62 = vld [vmem:[#allocation4 + $0x9e0] ss:$16 sps:$4 sm:$0xff]   ;;  %v15364_v57 = vld [vmem:[#allocation4 + $0xbc4] ss:$16 sps:$4 sm:$0xff]  }
 0x6ae   :  { %v6949_v35 = vpop.f32.mrf.mxu1  ;;  %8626 = vmatpush1.bf16.msra.mxu0 %v15311_v29  ;;  %v15356_v29 = vld [vmem:[#allocation4 + $0xbe0] ss:$16 sps:$4 sm:$0xff]   ;;  %v15370_v58 = vld [vmem:[#allocation4 + $0xba4] ss:$16 sps:$4 sm:$0xff]  }
 0x6af   :  { %8667 = vmatpush1.bf16.msra.mxu1 %v15314_v10  ;;  %v6909_v11 = vpop.f32.mrf.mxu0  ;;  %8627 = vmatprep.subr.bf16.mxu0 %v15319_v36  ;;  %v15361_v10 = vld [vmem:[#allocation4 + $0x9c4] ss:$16 sps:$4 sm:$0xff]   ;;  %v15359_v32 = vld [vmem:[#allocation4 + $0x9c0] ss:$16 sps:$4 sm:$0xff]  }
 0x6b0   :  { %v6950_v15 = vpop.f32.mrf.mxu1  ;;  %8668 = vmatprep.subr.bf16.mxu1 %v15322_v42  ;;  %v15362_v36 = vld [vmem:[#allocation4 + $0xbc0] ss:$16 sps:$4 sm:$0xff]   ;;  %v15367_v42 = vld [vmem:[#allocation4 + $0x9a4] ss:$16 sps:$4 sm:$0xff]  }
 0x6b1   :  { %v15365_v35 = vld [vmem:[#allocation4 + $0x9a0] ss:$16 sps:$4 sm:$0xff]   ;;  %v15376_v11 = vld [vmem:[#allocation4 + $0xb84] ss:$16 sps:$4 sm:$0xff]  }
 0x6b2   :  { %8628 = vmatpush1.bf16.msra.mxu0 %v15317_v61  ;;  %v15368_v61 = vld [vmem:[#allocation4 + $0xba0] ss:$16 sps:$4 sm:$0xff]  }
 0x6b3   :  { %8669 = vmatpush1.bf16.msra.mxu1 %v15320_v14  ;;  %8629 = vmatprep.subr.bf16.mxu0 %v15325_v18  ;;  %v15373_v14 = vld [vmem:[#allocation4 + $0x984] ss:$16 sps:$4 sm:$0xff]   ;;  %v15371_v15 = vld [vmem:[#allocation4 + $0x980] ss:$16 sps:$4 sm:$0xff]  }
 0x6b4   :  { %8670 = vmatprep.subr.bf16.mxu1 %v15328_v19  ;;  %v15374_v18 = vld [vmem:[#allocation4 + $0xb80] ss:$16 sps:$4 sm:$0xff]   ;;  %v15379_v19 = vld [vmem:[#allocation4 + $0x964] ss:$16 sps:$4 sm:$0xff]  }
 0x6b6   :  { %8630 = vmatpush1.bf16.msra.mxu0 %v15323_v22  ;;  %v15382_v22 = vld [vmem:[#allocation4 + $0xb64] ss:$16 sps:$4 sm:$0xff]  }
 0x6b7   :  { %8671 = vmatpush1.bf16.msra.mxu1 %v15326_v23  ;;  %8631 = vmatprep.subr.bf16.mxu0 %v15331_v16  ;;  %v15377_v23 = vld [vmem:[#allocation4 + $0x960] ss:$16 sps:$4 sm:$0xff]  }
 0x6b8   :  { %8672 = vmatprep.subr.bf16.mxu1 %v15334_v12  ;;  %v15380_v16 = vld [vmem:[#allocation4 + $0xb60] ss:$16 sps:$4 sm:$0xff]   ;;  %v15385_v12 = vld [vmem:[#allocation4 + $0x944] ss:$16 sps:$4 sm:$0xff]  }
 0x6ba   :  { %8632 = vmatpush1.bf16.msra.mxu0 %v15329_v24  ;;  %v15388_v24 = vld [vmem:[#allocation4 + $0xb44] ss:$16 sps:$4 sm:$0xff]  }
 0x6bb   :  { %8673 = vmatpush1.bf16.msra.mxu1 %v15332_v27  ;;  %8633 = vmatprep.subr.bf16.mxu0 %v15337_v21  ;;  %v15383_v27 = vld [vmem:[#allocation4 + $0x940] ss:$16 sps:$4 sm:$0xff]  }
 0x6bc   :  { %8674 = vmatprep.subr.bf16.mxu1 %v15340_v56  ;;  %v15386_v21 = vld [vmem:[#allocation4 + $0xb40] ss:$16 sps:$4 sm:$0xff]   ;;  %v15391_v56 = vld [vmem:[#allocation4 + $0x924] ss:$16 sps:$4 sm:$0xff]  }
 0x6be   :  { %8634 = vmatpush1.bf16.msra.mxu0 %v15335_v0  ;;  %v15394_v0 = vld [vmem:[#allocation4 + $0xb24] ss:$16 sps:$4 sm:$0xff]  }
 0x6bf   :  { %8675 = vmatpush1.bf16.msra.mxu1 %v15338_v30  ;;  %8635 = vmatprep.subr.bf16.mxu0 %v15343_v26  ;;  %v15389_v30 = vld [vmem:[#allocation4 + $0x920] ss:$16 sps:$4 sm:$0xff]  }
 0x6c0   :  { %8676 = vmatprep.subr.bf16.mxu1 %v15346_v31  ;;  %v15392_v26 = vld [vmem:[#allocation4 + $0xb20] ss:$16 sps:$4 sm:$0xff]   ;;  %v15397_v31 = vld [vmem:[#allocation4 + $0x904] ss:$16 sps:$4 sm:$0xff]  }
 0x6c2   :  { %8636 = vmatpush1.bf16.msra.mxu0 %v15341_v39  ;;  %v15400_v39 = vld [vmem:[#allocation4 + $0xb04] ss:$16 sps:$4 sm:$0xff]  }
 0x6c3   :  { %8677 = vmatpush1.bf16.msra.mxu1 %v15344_v25  ;;  %8637 = vmatprep.subr.bf16.mxu0 %v15349_v34  ;;  %v15395_v25 = vld [vmem:[#allocation4 + $0x900] ss:$16 sps:$4 sm:$0xff]  }
 0x6c4   :  { %8678 = vmatprep.subr.bf16.mxu1 %v15352_v41  ;;  %v15398_v34 = vld [vmem:[#allocation4 + $0xb00] ss:$16 sps:$4 sm:$0xff]   ;;  %v15403_v41 = vld [vmem:[#allocation4 + $0x8ec] ss:$16 sps:$4 sm:$0xff]  }
 0x6c6   :  { %8638 = vmatpush1.bf16.msra.mxu0 %v15347_v55  ;;  %v15406_v55 = vld [vmem:[#allocation4 + $0xaec] ss:$16 sps:$4 sm:$0xff]  }
 0x6c7   :  { %8679 = vmatpush1.bf16.msra.mxu1 %v15350_v54  ;;  %8639 = vmatprep.subr.bf16.mxu0 %v15355_v38  ;;  %v7838_v54 = vrot.slane %v16714_v17, 1  ;;  %v7840_v38 = vrot.slane %v16740_v51, 1 }
 0x6c8   :  { %8680 = vmatprep.subr.bf16.mxu1 %v15358_v53  ;;  %v15401_v53 = vld [vmem:[#allocation4 + $0x8e8] ss:$16 sps:$4 sm:$0xff]  }
 0x6ca   :  { %8640 = vmatpush2.bf16.msra.mxu0 %v15353_v62  ;;  %v15404_v62 = vld [vmem:[#allocation4 + $0xae8] ss:$16 sps:$4 sm:$0xff]  }
 0x6cb   :  { %8681 = vmatpush2.bf16.msra.mxu1 %v15356_v29  ;;  %8641 = vmatprep.subr.bf16.mxu0 %v15361_v10  ;;  %v15409_v29 = vld [vmem:[#allocation4 + $0x8cc] ss:$16 sps:$4 sm:$0xff]  }
 0x6cc   :  { %8682 = vmatprep.subr.bf16.mxu1 %v15364_v57  ;;  %v15412_v10 = vld [vmem:[#allocation4 + $0xacc] ss:$16 sps:$4 sm:$0xff]  }
 0x6ce   :  { %8642 = vmatpush2.bf16.msra.mxu0 %v15359_v32 }
 0x6cf   :  { %8683 = vmatpush2.bf16.msra.mxu1 %v15362_v36  ;;  %8643 = vmatprep.subr.bf16.mxu0 %v15367_v42  ;;  %v15407_v42 = vld [vmem:[#allocation4 + $0x8c8] ss:$16 sps:$4 sm:$0xff]  }
 0x6d0   :  { %8684 = vmatprep.subr.bf16.mxu1 %v15370_v58  ;;  %v15410_v58 = vld [vmem:[#allocation4 + $0xac8] ss:$16 sps:$4 sm:$0xff]  }
 0x6d2   :  { %8644 = vmatpush2.bf16.msra.mxu0 %v15365_v35 }
 0x6d3   :  { %8685 = vmatpush2.bf16.msra.mxu1 %v15368_v61  ;;  %8645 = vmatprep.subr.bf16.mxu0 %v15373_v14  ;;  %v15415_v14 = vld [vmem:[#allocation4 + $0x8ac] ss:$16 sps:$4 sm:$0xff]  }
 0x6d4   :  { %8686 = vmatprep.subr.bf16.mxu1 %v15376_v11  ;;  %v15418_v11 = vld [vmem:[#allocation4 + $0xaac] ss:$16 sps:$4 sm:$0xff]  }
 0x6d6   :  { %8646 = vmatpush2.bf16.msra.mxu0 %v15371_v15 }
 0x6d7   :  { %8687 = vmatpush2.bf16.msra.mxu1 %v15374_v18  ;;  %8647 = vmatprep.subr.bf16.mxu0 %v15379_v19 }
 0x6d8   :  { %8688 = vmatprep.subr.bf16.mxu1 %v15382_v22  ;;  %v15413_v22 = vld [vmem:[#allocation4 + $0x8a8] ss:$16 sps:$4 sm:$0xff]  }
 0x6da   :  { %8648 = vmatpush2.bf16.msra.mxu0 %v15377_v23  ;;  %v15416_v23 = vld [vmem:[#allocation4 + $0xaa8] ss:$16 sps:$4 sm:$0xff]  }
 0x6db   :  { %8689 = vmatpush2.bf16.msra.mxu1 %v15380_v16  ;;  %8649 = vmatprep.subr.bf16.mxu0 %v15385_v12 }
 0x6dc   :  { %8690 = vmatprep.subr.bf16.mxu1 %v15388_v24  ;;  %v15421_v24 = vld [vmem:[#allocation4 + $0x88c] ss:$16 sps:$4 sm:$0xff]  }
 0x6de   :  { %8650 = vmatpush2.bf16.msra.mxu0 %v15383_v27  ;;  %v15424_v27 = vld [vmem:[#allocation4 + $0xa8c] ss:$16 sps:$4 sm:$0xff]  }
 0x6df   :  { %8691 = vmatpush2.bf16.msra.mxu1 %v15386_v21  ;;  %8651 = vmatprep.subr.bf16.mxu0 %v15391_v56  ;;  %v15425_v21 = vld [vmem:[#allocation4 + $0x868] ss:$16 sps:$4 sm:$0xff]  }
 0x6e0   :  { %8692 = vmatprep.subr.bf16.mxu1 %v15394_v0  ;;  %v15428_v56 = vld [vmem:[#allocation4 + $0xa68] ss:$16 sps:$4 sm:$0xff]   ;;  %v15433_v0 = vld [vmem:[#allocation4 + $0x84c] ss:$16 sps:$4 sm:$0xff]  }
 0x6e2   :  { %8652 = vmatpush2.bf16.msra.mxu0 %v15389_v30  ;;  %v15436_v30 = vld [vmem:[#allocation4 + $0xa4c] ss:$16 sps:$4 sm:$0xff]  }
 0x6e3   :  { %8693 = vmatpush2.bf16.msra.mxu1 %v15392_v26  ;;  %8653 = vmatprep.subr.bf16.mxu0 %v15397_v31  ;;  %v15431_v26 = vld [vmem:[#allocation4 + $0x848] ss:$16 sps:$4 sm:$0xff]  }
 0x6e4   :  { %8694 = vmatprep.subr.bf16.mxu1 %v15400_v39  ;;  %v15434_v31 = vld [vmem:[#allocation4 + $0xa48] ss:$16 sps:$4 sm:$0xff]   ;;  %v15439_v39 = vld [vmem:[#allocation4 + $0x82c] ss:$16 sps:$4 sm:$0xff]  }
 0x6e6   :  { %8654 = vmatpush2.bf16.msra.mxu0 %v15395_v25  ;;  %v15442_v25 = vld [vmem:[#allocation4 + $0xa2c] ss:$16 sps:$4 sm:$0xff]  }
 0x6e7   :  { %8695 = vmatpush2.bf16.msra.mxu1 %v15398_v34  ;;  %8705 = vmatprep.subr.bf16.mxu0 %v15403_v41  ;;  %v15437_v34 = vld [vmem:[#allocation4 + $0x828] ss:$16 sps:$4 sm:$0xff]  }
 0x6e8   :  { %8746 = vmatprep.subr.bf16.mxu1 %v15406_v55  ;;  %v15440_v41 = vld [vmem:[#allocation4 + $0xa28] ss:$16 sps:$4 sm:$0xff]   ;;  %v15445_v55 = vld [vmem:[#allocation4 + $0x80c] ss:$16 sps:$4 sm:$0xff]  }
 0x6e9   :  { %v6986_v57 = vpop.f32.mrf.mxu0  ;;  %13340 = vmatmul.mubr.msk.bf16.vlgmr.msra.gmra.mxu0 %vm650_vm12, %v7838_v54 }
 0x6ea   :  { %v7027_v32 = vpop.f32.mrf.mxu1  ;;  %13342 = vmatmul.mubr.msk.bf16.vlgmr.msra.gmra.mxu1 %vm650_vm12, %v7840_v38  ;;  %8706 = vmatpush1.bf16.msra.mxu0 %v15401_v53  ;;  %v15448_v53 = vld [vmem:[#allocation4 + $0xa0c] ss:$16 sps:$4 sm:$0xff]  }
 0x6eb   :  { %v16808_v36 = vadd.f32 %v7027_v32, %v6986_v57  ;;  %8747 = vmatpush1.bf16.msra.mxu1 %v15404_v62  ;;  %v6988_v35 = vpop.f32.mrf.mxu0  ;;  %8707 = vmatprep.subr.bf16.mxu0 %v15409_v29  ;;  %v15443_v62 = vld [vmem:[#allocation4 + $0x808] ss:$16 sps:$4 sm:$0xff]   ;;  %v15454_v57 = vld [vmem:[#allocation4 + $0xbec] ss:$16 sps:$4 sm:$0xff]  }
 0x6ec   :  { %v7029_v61 = vpop.f32.mrf.mxu1  ;;  %8748 = vmatprep.subr.bf16.mxu1 %v15412_v10  ;;  %13343 = vmatprep.mubr.msk.bf16.mxu0 %vm650_vm12, %v7839_v49  ;;  %v15422_v49 = vld [vmem:[#allocation4 + $0xa88] ss:$16 sps:$4 sm:$0xff]   ;;  %v15451_v10 = vld [vmem:[#allocation4 + $0x9ec] ss:$16 sps:$4 sm:$0xff]  }
 0x6ed   :  { %v16810_v15 = vadd.f32 %v7029_v61, %v6988_v35  ;;  %13345 = vmatprep.mubr.msk.bf16.mxu1 %vm650_vm12, %v7841_v50  ;;  %v6990_v18 = vpop.f32.mrf.mxu0  ;;  %v15430_v50 = vld [vmem:[#allocation4 + $0xa6c] ss:$16 sps:$4 sm:$0xff]   ;;  %v15446_v29 = vld [vmem:[#allocation4 + $0xa08] ss:$16 sps:$4 sm:$0xff]  }
 0x6ee   :  { %v7031_v19 = vpop.f32.mrf.mxu1  ;;  %8708 = vmatpush1.bf16.msra.mxu0 %v15407_v42  ;;  %v15449_v32 = vld [vmem:[#allocation4 + $0x9e8] ss:$16 sps:$4 sm:$0xff]   ;;  %v15460_v35 = vld [vmem:[#allocation4 + $0xbcc] ss:$16 sps:$4 sm:$0xff]  }
 0x6ef   :  { %8749 = vmatpush1.bf16.msra.mxu1 %v15410_v58  ;;  %v6991_v16 = vpop.f32.mrf.mxu0  ;;  %8709 = vmatprep.subr.bf16.mxu0 %v15415_v14  ;;  %v15452_v42 = vld [vmem:[#allocation4 + $0xbe8] ss:$16 sps:$4 sm:$0xff]   ;;  %v15457_v58 = vld [vmem:[#allocation4 + $0x9cc] ss:$16 sps:$4 sm:$0xff]  }
 0x6f0   :  { %v7032_v12 = vpop.f32.mrf.mxu1  ;;  %8750 = vmatprep.subr.bf16.mxu1 %v15418_v11  ;;  %v15455_v61 = vld [vmem:[#allocation4 + $0x9c8] ss:$16 sps:$4 sm:$0xff]   ;;  %v15463_v11 = vld [vmem:[#allocation4 + $0x9ac] ss:$16 sps:$4 sm:$0xff]  }
 0x6f1   :  { %v15458_v14 = vld [vmem:[#allocation4 + $0xbc8] ss:$16 sps:$4 sm:$0xff]   ;;  %v15466_v18 = vld [vmem:[#allocation4 + $0xbac] ss:$16 sps:$4 sm:$0xff]  }
 0x6f2   :  { %8710 = vmatpush1.bf16.msra.mxu0 %v15413_v22  ;;  %v15461_v19 = vld [vmem:[#allocation4 + $0x9a8] ss:$16 sps:$4 sm:$0xff]   ;;  %v15472_v16 = vld [vmem:[#allocation4 + $0xb8c] ss:$16 sps:$4 sm:$0xff]  }
 0x6f3   :  { %8751 = vmatpush1.bf16.msra.mxu1 %v15416_v23  ;;  %8711 = vmatprep.subr.bf16.mxu0 %v15421_v24  ;;  %v15464_v22 = vld [vmem:[#allocation4 + $0xba8] ss:$16 sps:$4 sm:$0xff]   ;;  %v15469_v23 = vld [vmem:[#allocation4 + $0x98c] ss:$16 sps:$4 sm:$0xff]  }
 0x6f4   :  { %8752 = vmatprep.subr.bf16.mxu1 %v15424_v27  ;;  %v15467_v12 = vld [vmem:[#allocation4 + $0x988] ss:$16 sps:$4 sm:$0xff]   ;;  %v15475_v27 = vld [vmem:[#allocation4 + $0x96c] ss:$16 sps:$4 sm:$0xff]  }
 0x6f5   :  { %v15470_v24 = vld [vmem:[#allocation4 + $0xb88] ss:$16 sps:$4 sm:$0xff]  }
 0x6f6   :  { %8712 = vmatpush1.bf16.msra.mxu0 %v15419_v20  ;;  %v15478_v20 = vld [vmem:[#allocation4 + $0xb6c] ss:$16 sps:$4 sm:$0xff]  }
 0x6f7   :  { %8753 = vmatpush1.bf16.msra.mxu1 %v15422_v49  ;;  %8713 = vmatprep.subr.bf16.mxu0 %v15427_v52  ;;  %v15473_v49 = vld [vmem:[#allocation4 + $0x968] ss:$16 sps:$4 sm:$0xff]  }
 0x6f8   :  { %8754 = vmatprep.subr.bf16.mxu1 %v15430_v50  ;;  %v15476_v52 = vld [vmem:[#allocation4 + $0xb68] ss:$16 sps:$4 sm:$0xff]   ;;  %v15481_v50 = vld [vmem:[#allocation4 + $0x94c] ss:$16 sps:$4 sm:$0xff]  }
 0x6fa   :  { %8714 = vmatpush1.bf16.msra.mxu0 %v15425_v21  ;;  %v15484_v21 = vld [vmem:[#allocation4 + $0xb4c] ss:$16 sps:$4 sm:$0xff]  }
 0x6fb   :  { %8755 = vmatpush1.bf16.msra.mxu1 %v15428_v56  ;;  %8715 = vmatprep.subr.bf16.mxu0 %v15433_v0  ;;  %v15479_v56 = vld [vmem:[#allocation4 + $0x948] ss:$16 sps:$4 sm:$0xff]  }
 0x6fc   :  { %8756 = vmatprep.subr.bf16.mxu1 %v15436_v30  ;;  %v15482_v0 = vld [vmem:[#allocation4 + $0xb48] ss:$16 sps:$4 sm:$0xff]   ;;  %v15487_v30 = vld [vmem:[#allocation4 + $0x92c] ss:$16 sps:$4 sm:$0xff]  }
 0x6fe   :  { %8716 = vmatpush1.bf16.msra.mxu0 %v15431_v26  ;;  %v15490_v26 = vld [vmem:[#allocation4 + $0xb2c] ss:$16 sps:$4 sm:$0xff]  }
 0x6ff   :  { %8757 = vmatpush1.bf16.msra.mxu1 %v15434_v31  ;;  %8717 = vmatprep.subr.bf16.mxu0 %v15439_v39  ;;  %v15485_v31 = vld [vmem:[#allocation4 + $0x928] ss:$16 sps:$4 sm:$0xff]  }
 0x700   :  { %8758 = vmatprep.subr.bf16.mxu1 %v15442_v25  ;;  %v15488_v39 = vld [vmem:[#allocation4 + $0xb28] ss:$16 sps:$4 sm:$0xff]   ;;  %v15493_v25 = vld [vmem:[#allocation4 + $0x90c] ss:$16 sps:$4 sm:$0xff]  }
 0x702   :  { %8718 = vmatpush1.bf16.msra.mxu0 %v15437_v34  ;;  %v15496_v34 = vld [vmem:[#allocation4 + $0xb0c] ss:$16 sps:$4 sm:$0xff]  }
 0x703   :  { %8759 = vmatpush1.bf16.msra.mxu1 %v15440_v41  ;;  %8719 = vmatprep.subr.bf16.mxu0 %v15445_v55  ;;  %v15491_v41 = vld [vmem:[#allocation4 + $0x908] ss:$16 sps:$4 sm:$0xff]  }
 0x704   :  { %8760 = vmatprep.subr.bf16.mxu1 %v15448_v53  ;;  %v15494_v55 = vld [vmem:[#allocation4 + $0xb08] ss:$16 sps:$4 sm:$0xff]  }
 0x706   :  { %8720 = vmatpush1.bf16.msra.mxu0 %v15443_v62 }
 0x707   :  { %8761 = vmatpush1.bf16.msra.mxu1 %v15446_v29  ;;  %8721 = vmatprep.subr.bf16.mxu0 %v15451_v10 }
 0x708   :  { %8762 = vmatprep.subr.bf16.mxu1 %v15454_v57 }
 0x70a   :  { %8722 = vmatpush2.bf16.msra.mxu0 %v15449_v32 }
 0x70b   :  { %8763 = vmatpush2.bf16.msra.mxu1 %v15452_v42  ;;  %8723 = vmatprep.subr.bf16.mxu0 %v15457_v58 }
 0x70c   :  { %8764 = vmatprep.subr.bf16.mxu1 %v15460_v35 }
 0x70e   :  { %8724 = vmatpush2.bf16.msra.mxu0 %v15455_v61 }
 0x70f   :  { %8765 = vmatpush2.bf16.msra.mxu1 %v15458_v14  ;;  %8725 = vmatprep.subr.bf16.mxu0 %v15463_v11 }
 0x710   :  { %8766 = vmatprep.subr.bf16.mxu1 %v15466_v18 }
 0x712   :  { %8726 = vmatpush2.bf16.msra.mxu0 %v15461_v19 }
 0x713   :  { %8767 = vmatpush2.bf16.msra.mxu1 %v15464_v22  ;;  %8727 = vmatprep.subr.bf16.mxu0 %v15469_v23 }
 0x714   :  { %8768 = vmatprep.subr.bf16.mxu1 %v15472_v16 }
 0x716   :  { %8728 = vmatpush2.bf16.msra.mxu0 %v15467_v12 }
 0x717   :  { %8769 = vmatpush2.bf16.msra.mxu1 %v15470_v24  ;;  %8729 = vmatprep.subr.bf16.mxu0 %v15475_v27 }
 0x718   :  { %8770 = vmatprep.subr.bf16.mxu1 %v15478_v20 }
 0x71a   :  { %8730 = vmatpush2.bf16.msra.mxu0 %v15473_v49  ;;  %v8794_v49 = vrot.slane %v16480_v7, %v16460_v8  ;;  %v8838_v7 = vrot.slane %v16408_v3, %v16436_v46 }
 0x71b   :  { %8771 = vmatpush2.bf16.msra.mxu1 %v15476_v52  ;;  %8731 = vmatprep.subr.bf16.mxu0 %v15481_v50 }
 0x71c   :  { %8772 = vmatprep.subr.bf16.mxu1 %v15484_v21 }
 0x71e   :  { %8732 = vmatpush2.bf16.msra.mxu0 %v15479_v56  ;;  %v8798_v56 = vrot.slane %v16482_v9, %v16460_v8  ;;  %v8842_v9 = vrot.slane %v16410_v4, %v16436_v46 }
 0x71f   :  { %8773 = vmatpush2.bf16.msra.mxu1 %v15482_v0  ;;  %8733 = vmatprep.subr.bf16.mxu0 %v15487_v30 }
 0x720   :  { %8774 = vmatprep.subr.bf16.mxu1 %v15490_v26  ;;  %v8818_v26 = vrot.slane %v16408_v3, %v16432_v43 }
 0x722   :  { %8734 = vmatpush2.bf16.msra.mxu0 %v15485_v31 }
 0x723   :  { %8775 = vmatpush2.bf16.msra.mxu1 %v15488_v39  ;;  %8735 = vmatprep.subr.bf16.mxu0 %v15493_v25 }
 0x724   :  { %8776 = vmatprep.subr.bf16.mxu1 %v15496_v34 }
 0x726   :  { %8736 = vmatpush2.bf16.msra.mxu0 %v15491_v41 }
 0x727   :  { %8777 = vmatpush2.bf16.msra.mxu1 %v15494_v55  ;;  %v8822_v55 = vrot.slane %v16410_v4, %v16432_v43 }
 0x729   :  { %v7708_v53 = vpop.f32.mrf.mxu0  ;;  %13344 = vmatmul.mubr.msk.bf16.vlgmr.msra.gmra.mxu0 %vm650_vm12, %v7838_v54 }
 0x72a   :  { %v7749_v62 = vpop.f32.mrf.mxu1  ;;  %13346 = vmatmul.mubr.msk.bf16.vlgmr.msra.gmra.mxu1 %vm650_vm12, %v7840_v38  ;;  %v7709_v29 = vadd.f32 %v7708_v53, %v16790_v47 }
 0x72b   :  { %v7710_v10 = vpop.f32.mrf.mxu0 }
 0x72c   :  { %v7751_v57 = vpop.f32.mrf.mxu1  ;;  %v7750_v32 = vadd.f32 %v7749_v62, %v7709_v29  ;;  %v7711_v42 = vadd.f32 %v7710_v10, %v16792_v44 }
 0x72d   :  { %v7712_v58 = vpop.f32.mrf.mxu0 }
 0x72e   :  { %v7753_v35 = vpop.f32.mrf.mxu1  ;;  %v7752_v61 = vadd.f32 %v7751_v57, %v7711_v42 }
 0x72f   :  { %v7713_v14 = vpop.f32.mrf.mxu0 }
 0x730   :  { %v7754_v11 = vpop.f32.mrf.mxu1  ;;  %v8802_v14 = vrot.slane %v16404_v1, %v16460_v8  ;;  %v8846_v1 = vrot.slane %v16412_v5, %v16436_v46 }
 0x769   :  { %v7790_v18 = vpop.f32.mrf.mxu0 }
 0x76a   :  { %v7831_v17 = vpop.f32.mrf.mxu1  ;;  %v7791_v54 = vadd.f32 %v7790_v18, %v16808_v36 }
 0x76b   :  { %v7792_v19 = vpop.f32.mrf.mxu0 }
 0x76c   :  { %v7833_v51 = vpop.f32.mrf.mxu1  ;;  %v7832_v22 = vadd.f32 %v7831_v17, %v7791_v54  ;;  %v7793_v38 = vadd.f32 %v7792_v19, %v16810_v15  ;;  %v8806_v19 = vrot.slane %v16406_v2, %v16460_v8  ;;  %v8850_v2 = vrot.slane %v16414_v6, %v16436_v46 }
 0x76d   :  { %v7794_v47 = vpop.f32.mrf.mxu0 }
 0x76e   :  { %v7835_v23 = vpop.f32.mrf.mxu1  ;;  %v7834_v16 = vadd.f32 %v7833_v51, %v7793_v38 }
 0x76f   :  { %v7795_v12 = vpop.f32.mrf.mxu0  ;;  %v8826_v23 = vrot.slane %v16412_v5, %v16432_v43 }
 0x770   :  { %v7836_v24 = vpop.f32.mrf.mxu1 }
 0x7a9   :  { %v8657_v44 = vpop.f32.mrf.mxu0 }
 0x7aa   :  { %v8698_v27 = vpop.f32.mrf.mxu1 }
 0x7ab   :  { %v8699_v20 = vadd.f32 %v8698_v27, %v8657_v44  ;;  %v8659_v52 = vpop.f32.mrf.mxu0 }
 0x7ac   :  { %v8700_v50 = vpop.f32.mrf.mxu1 }
 0x7ad   :  { %v8787_v21 = vadd.f32 %v8699_v20, %v7750_v32  ;;  %v8701_v36 = vadd.f32 %v8700_v50, %v8659_v52  ;;  %v8661_v0 = vpop.f32.mrf.mxu0 }
 0x7ae   :  { %v8702_v15 = vpop.f32.mrf.mxu1 }
 0x7af   :  { %v8807_v30 = vadd.f32 %v8794_v49, %v8787_v21  ;;  %v8788_v31 = vadd.f32 %v8701_v36, %v7752_v61  ;;  %v8662_v39 = vpop.f32.mrf.mxu0 }
 0x7b0   :  { %v8703_v25 = vpop.f32.mrf.mxu1 }
 0x7b1   :  { %v8811_v34 = vmax.f32 %v8807_v30, 0.0  ;;  %v8808_v41 = vadd.f32 %v8798_v56, %v8788_v31 }
 0x7b3   :  { %v8831_v53 = vmul.f32 %v8818_v26, %v8811_v34  ;;  %v8812_v62 = vmax.f32 %v8808_v41, 0.0 }
 0x7b5   :  { %v8851_v29 = vadd.f32 %v8838_v7, %v8831_v53  ;;  %v8832_v10 = vmul.f32 %v8822_v55, %v8812_v62 }
 0x7b7   :  { %v16840_v57 = vpack.c.bf16 %v8851_v29, %v8851_v29  ;;  %v8852_v32 = vadd.f32 %v8842_v9, %v8832_v10 }
 0x7b9   :  { %v16842_v42 = vpack.c.bf16 %v8852_v32, %v8852_v32 }
 0x7e9   :  { %v8739_v58 = vpop.f32.mrf.mxu0 }
 0x7ea   :  { %v8780_v35 = vpop.f32.mrf.mxu1 }
 0x7eb   :  { %v8781_v61 = vadd.f32 %v8780_v35, %v8739_v58  ;;  %v8741_v11 = vpop.f32.mrf.mxu0 }
 0x7ec   :  { %v8782_v18 = vpop.f32.mrf.mxu1 }
 0x7ed   :  { %v8789_v17 = vadd.f32 %v8781_v61, %v7832_v22  ;;  %v8783_v54 = vadd.f32 %v8782_v18, %v8741_v11  ;;  %v8743_v51 = vpop.f32.mrf.mxu0  ;;  %v8830_v22 = vrot.slane %v16414_v6, %v16432_v43 }
 0x7ee   :  { %v8784_v38 = vpop.f32.mrf.mxu1 }
 0x7ef   :  { %v8809_v47 = vadd.f32 %v8802_v14, %v8789_v17  ;;  %v8790_v12 = vadd.f32 %v8783_v54, %v7834_v16  ;;  %v8744_v24 = vpop.f32.mrf.mxu0 }
 0x7f0   :  { %v8785_v44 = vpop.f32.mrf.mxu1 }
 0x7f1   :  { %v8813_v27 = vmax.f32 %v8809_v47, 0.0  ;;  %v8810_v20 = vadd.f32 %v8806_v19, %v8790_v12 }
 0x7f3   :  { %v8833_v49 = vmul.f32 %v8826_v23, %v8813_v27  ;;  %v8814_v52 = vmax.f32 %v8810_v20, 0.0 }
 0x7f5   :  { %v8853_v8 = vadd.f32 %v8846_v1, %v8833_v49  ;;  %v8834_v50 = vmul.f32 %v8830_v22, %v8814_v52 }
 0x7f7   :  { %v16856_v21 = vpack.c.bf16 %v8853_v8, %v8853_v8  ;;  %v8854_v16 = vadd.f32 %v8850_v2, %v8834_v50 }
 0x7f9   :  { %v16858_v36 = vpack.c.bf16 %v8854_v16, %v8854_v16 }
 0x7fa   :  { %16317 = dma.done.wait [#allocation6 + $0x3], 81920 }
 0x7fb   :  { %16318 = vsyncadd [#allocation6 + $0x3], 4294885376  ;;  %9813 = vmatprep.mubr.bf16.mxu0 %v16842_v42  ;;  %9854 = vmatprep.mubr.bf16.mxu1 %v16858_v36  ;;  %v15497_v56 = vld [vmem:[#allocation5 + $0x8e4] ss:$16 sps:$4 sm:$0xff]   ;;  %v15501_v0 = vld [vmem:[#allocation5 + $0x8e0] ss:$16 sps:$4 sm:$0xff]  }
 0x7fc   :  { %v15499_v43 = vld [vmem:[#allocation5 + $0xae4] ss:$16 sps:$4 sm:$0xff]   ;;  %9781 = vmatprep.subr.bf16.mxu0 %v15497_v56  ;;  %v15502_v15 = vld [vmem:[#allocation5 + $0xae0] ss:$16 sps:$4 sm:$0xff]   ;;  %vm12113_vm0 = vcmask 25600  }
 0x7fd   :  { %9822 = vmatprep.subr.bf16.mxu1 %v15499_v43  ;;  %v15503_v46 = vld [vmem:[#allocation5 + $0x8c4] ss:$16 sps:$4 sm:$0xff]   ;;  %9782 = vmatpush1.bf16.msra.mxu0 %v15501_v0  ;;  %v15507_v26 = vld [vmem:[#allocation5 + $0x8c0] ss:$16 sps:$4 sm:$0xff]  }
 0x7fe   :  { %9823 = vmatpush1.bf16.msra.mxu1 %v15502_v15  ;;  %v15505_v30 = vld [vmem:[#allocation5 + $0xac4] ss:$16 sps:$4 sm:$0xff]   ;;  %9783 = vmatprep.subr.bf16.mxu0 %v15503_v46  ;;  %v15508_v31 = vld [vmem:[#allocation5 + $0xac0] ss:$16 sps:$4 sm:$0xff]  }
 0x7ff   :  { %9824 = vmatprep.subr.bf16.mxu1 %v15505_v30  ;;  %v15509_v39 = vld [vmem:[#allocation5 + $0x8a4] ss:$16 sps:$4 sm:$0xff]   ;;  %v15513_v34 = vld [vmem:[#allocation5 + $0x8a0] ss:$16 sps:$4 sm:$0xff]  }
 0x800   :  { %v15511_v25 = vld [vmem:[#allocation5 + $0xaa4] ss:$16 sps:$4 sm:$0xff]   ;;  %v15514_v7 = vld [vmem:[#allocation5 + $0xaa0] ss:$16 sps:$4 sm:$0xff]  }
 0x801   :  { %9784 = vmatpush1.bf16.msra.mxu0 %v15507_v26  ;;  %v15515_v41 = vld [vmem:[#allocation5 + $0x884] ss:$16 sps:$4 sm:$0xff]   ;;  %v15519_v53 = vld [vmem:[#allocation5 + $0x880] ss:$16 sps:$4 sm:$0xff]  }
 0x802   :  { %9825 = vmatpush1.bf16.msra.mxu1 %v15508_v31  ;;  %9785 = vmatprep.subr.bf16.mxu0 %v15509_v39  ;;  %v15517_v55 = vld [vmem:[#allocation5 + $0xa84] ss:$16 sps:$4 sm:$0xff]   ;;  %v15520_v62 = vld [vmem:[#allocation5 + $0xa80] ss:$16 sps:$4 sm:$0xff]  }
 0x803   :  { %9826 = vmatprep.subr.bf16.mxu1 %v15511_v25  ;;  %v15521_v9 = vld [vmem:[#allocation5 + $0x864] ss:$16 sps:$4 sm:$0xff]   ;;  %v15525_v10 = vld [vmem:[#allocation5 + $0x860] ss:$16 sps:$4 sm:$0xff]  }
 0x804   :  { %v15523_v29 = vld [vmem:[#allocation5 + $0xa64] ss:$16 sps:$4 sm:$0xff]   ;;  %v15526_v32 = vld [vmem:[#allocation5 + $0xa60] ss:$16 sps:$4 sm:$0xff]  }
 0x805   :  { %9786 = vmatpush1.bf16.msra.mxu0 %v15513_v34  ;;  %v15527_v58 = vld [vmem:[#allocation5 + $0x844] ss:$16 sps:$4 sm:$0xff]   ;;  %v15531_v61 = vld [vmem:[#allocation5 + $0x840] ss:$16 sps:$4 sm:$0xff]  }
 0x806   :  { %9827 = vmatpush1.bf16.msra.mxu1 %v15514_v7  ;;  %9787 = vmatprep.subr.bf16.mxu0 %v15515_v41  ;;  %v15529_v35 = vld [vmem:[#allocation5 + $0xa44] ss:$16 sps:$4 sm:$0xff]   ;;  %v15532_v14 = vld [vmem:[#allocation5 + $0xa40] ss:$16 sps:$4 sm:$0xff]  }
 0x807   :  { %9828 = vmatprep.subr.bf16.mxu1 %v15517_v55  ;;  %v15533_v11 = vld [vmem:[#allocation5 + $0x824] ss:$16 sps:$4 sm:$0xff]   ;;  %v15537_v17 = vld [vmem:[#allocation5 + $0x820] ss:$16 sps:$4 sm:$0xff]  }
 0x808   :  { %v15535_v18 = vld [vmem:[#allocation5 + $0xa24] ss:$16 sps:$4 sm:$0xff]   ;;  %v15538_v54 = vld [vmem:[#allocation5 + $0xa20] ss:$16 sps:$4 sm:$0xff]  }
 0x809   :  { %9788 = vmatpush1.bf16.msra.mxu0 %v15519_v53  ;;  %v15539_v19 = vld [vmem:[#allocation5 + $0x804] ss:$16 sps:$4 sm:$0xff]   ;;  %v15543_v38 = vld [vmem:[#allocation5 + $0x800] ss:$16 sps:$4 sm:$0xff]  }
 0x80a   :  { %9829 = vmatpush1.bf16.msra.mxu1 %v15520_v62  ;;  %9789 = vmatprep.subr.bf16.mxu0 %v15521_v9  ;;  %v15541_v51 = vld [vmem:[#allocation5 + $0xa04] ss:$16 sps:$4 sm:$0xff]   ;;  %v15544_v47 = vld [vmem:[#allocation5 + $0xa00] ss:$16 sps:$4 sm:$0xff]  }
 0x80b   :  { %9830 = vmatprep.subr.bf16.mxu1 %v15523_v29  ;;  %v15545_v23 = vld [vmem:[#allocation5 + $0x9e4] ss:$16 sps:$4 sm:$0xff]   ;;  %v15549_v24 = vld [vmem:[#allocation5 + $0x9e0] ss:$16 sps:$4 sm:$0xff]  }
 0x80c   :  { %v15547_v12 = vld [vmem:[#allocation5 + $0xbe4] ss:$16 sps:$4 sm:$0xff]   ;;  %v15550_v44 = vld [vmem:[#allocation5 + $0xbe0] ss:$16 sps:$4 sm:$0xff]  }
 0x80d   :  { %9790 = vmatpush1.bf16.msra.mxu0 %v15525_v10  ;;  %v15551_v27 = vld [vmem:[#allocation5 + $0x9c4] ss:$16 sps:$4 sm:$0xff]   ;;  %v15555_v20 = vld [vmem:[#allocation5 + $0x9c0] ss:$16 sps:$4 sm:$0xff]   ;;  %v15595_v10 = vld [vmem:[#allocation5 + $0x8ec] ss:$16 sps:$4 sm:$0xff]  }
 0x80e   :  { %9831 = vmatpush1.bf16.msra.mxu1 %v15526_v32  ;;  %9791 = vmatprep.subr.bf16.mxu0 %v15527_v58  ;;  %v15553_v1 = vld [vmem:[#allocation5 + $0xbc4] ss:$16 sps:$4 sm:$0xff]   ;;  %v15556_v22 = vld [vmem:[#allocation5 + $0xbc0] ss:$16 sps:$4 sm:$0xff]   ;;  %v15598_v32 = vld [vmem:[#allocation5 + $0xaec] ss:$16 sps:$4 sm:$0xff]  }
 0x80f   :  { %9832 = vmatprep.subr.bf16.mxu1 %v15529_v35  ;;  %v15557_v49 = vld [vmem:[#allocation5 + $0x9a4] ss:$16 sps:$4 sm:$0xff]   ;;  %v15561_v2 = vld [vmem:[#allocation5 + $0x9a0] ss:$16 sps:$4 sm:$0xff]   ;;  %v15593_v58 = vld [vmem:[#allocation5 + $0x8e8] ss:$16 sps:$4 sm:$0xff]  }
 0x810   :  { %v15559_v52 = vld [vmem:[#allocation5 + $0xba4] ss:$16 sps:$4 sm:$0xff]   ;;  %v15562_v8 = vld [vmem:[#allocation5 + $0xba0] ss:$16 sps:$4 sm:$0xff]   ;;  %v15596_v35 = vld [vmem:[#allocation5 + $0xae8] ss:$16 sps:$4 sm:$0xff]  }
 0x811   :  { %9792 = vmatpush1.bf16.msra.mxu0 %v15531_v61  ;;  %v15563_v50 = vld [vmem:[#allocation5 + $0x984] ss:$16 sps:$4 sm:$0xff]   ;;  %v15567_v56 = vld [vmem:[#allocation5 + $0x980] ss:$16 sps:$4 sm:$0xff]   ;;  %v15601_v61 = vld [vmem:[#allocation5 + $0x8cc] ss:$16 sps:$4 sm:$0xff]  }
 0x812   :  { %9833 = vmatpush1.bf16.msra.mxu1 %v15532_v14  ;;  %9793 = vmatprep.subr.bf16.mxu0 %v15533_v11  ;;  %v15565_v16 = vld [vmem:[#allocation5 + $0xb84] ss:$16 sps:$4 sm:$0xff]   ;;  %v15568_v43 = vld [vmem:[#allocation5 + $0xb80] ss:$16 sps:$4 sm:$0xff]   ;;  %v15604_v14 = vld [vmem:[#allocation5 + $0xacc] ss:$16 sps:$4 sm:$0xff]  }
 0x813   :  { %9834 = vmatprep.subr.bf16.mxu1 %v15535_v18  ;;  %v15569_v0 = vld [vmem:[#allocation5 + $0x964] ss:$16 sps:$4 sm:$0xff]   ;;  %v15573_v46 = vld [vmem:[#allocation5 + $0x960] ss:$16 sps:$4 sm:$0xff]   ;;  %v15599_v11 = vld [vmem:[#allocation5 + $0x8c8] ss:$16 sps:$4 sm:$0xff]  }
 0x814   :  { %v15571_v15 = vld [vmem:[#allocation5 + $0xb64] ss:$16 sps:$4 sm:$0xff]   ;;  %v15574_v30 = vld [vmem:[#allocation5 + $0xb60] ss:$16 sps:$4 sm:$0xff]   ;;  %v15602_v18 = vld [vmem:[#allocation5 + $0xac8] ss:$16 sps:$4 sm:$0xff]  }
 0x815   :  { %9794 = vmatpush1.bf16.msra.mxu0 %v15537_v17  ;;  %v15575_v26 = vld [vmem:[#allocation5 + $0x944] ss:$16 sps:$4 sm:$0xff]   ;;  %v15579_v39 = vld [vmem:[#allocation5 + $0x940] ss:$16 sps:$4 sm:$0xff]   ;;  %v15607_v17 = vld [vmem:[#allocation5 + $0x8ac] ss:$16 sps:$4 sm:$0xff]  }
 0x816   :  { %9835 = vmatpush1.bf16.msra.mxu1 %v15538_v54  ;;  %9795 = vmatprep.subr.bf16.mxu0 %v15539_v19  ;;  %v15577_v31 = vld [vmem:[#allocation5 + $0xb44] ss:$16 sps:$4 sm:$0xff]   ;;  %v15580_v25 = vld [vmem:[#allocation5 + $0xb40] ss:$16 sps:$4 sm:$0xff]   ;;  %v15610_v54 = vld [vmem:[#allocation5 + $0xaac] ss:$16 sps:$4 sm:$0xff]  }
 0x817   :  { %9836 = vmatprep.subr.bf16.mxu1 %v15541_v51  ;;  %v15581_v34 = vld [vmem:[#allocation5 + $0x924] ss:$16 sps:$4 sm:$0xff]   ;;  %v15585_v41 = vld [vmem:[#allocation5 + $0x920] ss:$16 sps:$4 sm:$0xff]   ;;  %v15605_v19 = vld [vmem:[#allocation5 + $0x8a8] ss:$16 sps:$4 sm:$0xff]  }
 0x818   :  { %v15583_v7 = vld [vmem:[#allocation5 + $0xb24] ss:$16 sps:$4 sm:$0xff]   ;;  %v15586_v55 = vld [vmem:[#allocation5 + $0xb20] ss:$16 sps:$4 sm:$0xff]   ;;  %v15608_v51 = vld [vmem:[#allocation5 + $0xaa8] ss:$16 sps:$4 sm:$0xff]  }
 0x819   :  { %9796 = vmatpush1.bf16.msra.mxu0 %v15543_v38  ;;  %v15587_v53 = vld [vmem:[#allocation5 + $0x904] ss:$16 sps:$4 sm:$0xff]   ;;  %v15591_v9 = vld [vmem:[#allocation5 + $0x900] ss:$16 sps:$4 sm:$0xff]   ;;  %v15613_v38 = vld [vmem:[#allocation5 + $0x88c] ss:$16 sps:$4 sm:$0xff]  }
 0x81a   :  { %9837 = vmatpush1.bf16.msra.mxu1 %v15544_v47  ;;  %9797 = vmatprep.subr.bf16.mxu0 %v15545_v23  ;;  %v15589_v62 = vld [vmem:[#allocation5 + $0xb04] ss:$16 sps:$4 sm:$0xff]   ;;  %v15592_v29 = vld [vmem:[#allocation5 + $0xb00] ss:$16 sps:$4 sm:$0xff]   ;;  %v15616_v47 = vld [vmem:[#allocation5 + $0xa8c] ss:$16 sps:$4 sm:$0xff]  }
 0x81b   :  { %9838 = vmatprep.subr.bf16.mxu1 %v15547_v12  ;;  %v15611_v23 = vld [vmem:[#allocation5 + $0x888] ss:$16 sps:$4 sm:$0xff]  }
 0x81c   :  { %v15614_v12 = vld [vmem:[#allocation5 + $0xa88] ss:$16 sps:$4 sm:$0xff]  }
 0x81d   :  { %9798 = vmatpush2.bf16.msra.mxu0 %v15549_v24  ;;  %v15619_v24 = vld [vmem:[#allocation5 + $0x86c] ss:$16 sps:$4 sm:$0xff]  }
 0x81e   :  { %9839 = vmatpush2.bf16.msra.mxu1 %v15550_v44  ;;  %9799 = vmatprep.subr.bf16.mxu0 %v15551_v27  ;;  %v15622_v44 = vld [vmem:[#allocation5 + $0xa6c] ss:$16 sps:$4 sm:$0xff]   ;;  %v15617_v27 = vld [vmem:[#allocation5 + $0x868] ss:$16 sps:$4 sm:$0xff]  }
 0x81f   :  { %9840 = vmatprep.subr.bf16.mxu1 %v15553_v1  ;;  %v15620_v1 = vld [vmem:[#allocation5 + $0xa68] ss:$16 sps:$4 sm:$0xff]  }
 0x821   :  { %9800 = vmatpush2.bf16.msra.mxu0 %v15555_v20  ;;  %v15625_v20 = vld [vmem:[#allocation5 + $0x84c] ss:$16 sps:$4 sm:$0xff]  }
 0x822   :  { %9841 = vmatpush2.bf16.msra.mxu1 %v15556_v22  ;;  %9801 = vmatprep.subr.bf16.mxu0 %v15557_v49  ;;  %v15628_v22 = vld [vmem:[#allocation5 + $0xa4c] ss:$16 sps:$4 sm:$0xff]   ;;  %v15623_v49 = vld [vmem:[#allocation5 + $0x848] ss:$16 sps:$4 sm:$0xff]  }
 0x823   :  { %9842 = vmatprep.subr.bf16.mxu1 %v15559_v52  ;;  %v15626_v52 = vld [vmem:[#allocation5 + $0xa48] ss:$16 sps:$4 sm:$0xff]  }
 0x825   :  { %9802 = vmatpush2.bf16.msra.mxu0 %v15561_v2  ;;  %v15631_v2 = vld [vmem:[#allocation5 + $0x82c] ss:$16 sps:$4 sm:$0xff]  }
 0x826   :  { %9843 = vmatpush2.bf16.msra.mxu1 %v15562_v8  ;;  %9803 = vmatprep.subr.bf16.mxu0 %v15563_v50  ;;  %v15634_v8 = vld [vmem:[#allocation5 + $0xa2c] ss:$16 sps:$4 sm:$0xff]   ;;  %v15629_v50 = vld [vmem:[#allocation5 + $0x828] ss:$16 sps:$4 sm:$0xff]  }
 0x827   :  { %9844 = vmatprep.subr.bf16.mxu1 %v15565_v16  ;;  %v15632_v16 = vld [vmem:[#allocation5 + $0xa28] ss:$16 sps:$4 sm:$0xff]  }
 0x829   :  { %9804 = vmatpush2.bf16.msra.mxu0 %v15567_v56  ;;  %v15637_v56 = vld [vmem:[#allocation5 + $0x80c] ss:$16 sps:$4 sm:$0xff]  }
 0x82a   :  { %9845 = vmatpush2.bf16.msra.mxu1 %v15568_v43  ;;  %9805 = vmatprep.subr.bf16.mxu0 %v15569_v0  ;;  %v15640_v43 = vld [vmem:[#allocation5 + $0xa0c] ss:$16 sps:$4 sm:$0xff]   ;;  %v15635_v0 = vld [vmem:[#allocation5 + $0x808] ss:$16 sps:$4 sm:$0xff]  }
 0x82b   :  { %9846 = vmatprep.subr.bf16.mxu1 %v15571_v15  ;;  %v15638_v15 = vld [vmem:[#allocation5 + $0xa08] ss:$16 sps:$4 sm:$0xff]  }
 0x82d   :  { %9806 = vmatpush2.bf16.msra.mxu0 %v15573_v46  ;;  %v15643_v46 = vld [vmem:[#allocation5 + $0x9ec] ss:$16 sps:$4 sm:$0xff]  }
 0x82e   :  { %9847 = vmatpush2.bf16.msra.mxu1 %v15574_v30  ;;  %9807 = vmatprep.subr.bf16.mxu0 %v15575_v26  ;;  %v15646_v30 = vld [vmem:[#allocation5 + $0xbec] ss:$16 sps:$4 sm:$0xff]   ;;  %v15641_v26 = vld [vmem:[#allocation5 + $0x9e8] ss:$16 sps:$4 sm:$0xff]  }
 0x82f   :  { %9848 = vmatprep.subr.bf16.mxu1 %v15577_v31  ;;  %v15644_v31 = vld [vmem:[#allocation5 + $0xbe8] ss:$16 sps:$4 sm:$0xff]  }
 0x831   :  { %9808 = vmatpush2.bf16.msra.mxu0 %v15579_v39  ;;  %v15649_v39 = vld [vmem:[#allocation5 + $0x9cc] ss:$16 sps:$4 sm:$0xff]  }
 0x832   :  { %9849 = vmatpush2.bf16.msra.mxu1 %v15580_v25  ;;  %9809 = vmatprep.subr.bf16.mxu0 %v15581_v34  ;;  %v15652_v25 = vld [vmem:[#allocation5 + $0xbcc] ss:$16 sps:$4 sm:$0xff]   ;;  %v15647_v34 = vld [vmem:[#allocation5 + $0x9c8] ss:$16 sps:$4 sm:$0xff]  }
 0x833   :  { %9850 = vmatprep.subr.bf16.mxu1 %v15583_v7  ;;  %v15650_v7 = vld [vmem:[#allocation5 + $0xbc8] ss:$16 sps:$4 sm:$0xff]  }
 0x835   :  { %9810 = vmatpush2.bf16.msra.mxu0 %v15585_v41  ;;  %v15655_v41 = vld [vmem:[#allocation5 + $0x9ac] ss:$16 sps:$4 sm:$0xff]  }
 0x836   :  { %9851 = vmatpush2.bf16.msra.mxu1 %v15586_v55  ;;  %9811 = vmatprep.subr.bf16.mxu0 %v15587_v53  ;;  %v15658_v55 = vld [vmem:[#allocation5 + $0xbac] ss:$16 sps:$4 sm:$0xff]   ;;  %v15653_v53 = vld [vmem:[#allocation5 + $0x9a8] ss:$16 sps:$4 sm:$0xff]  }
 0x837   :  { %9852 = vmatprep.subr.bf16.mxu1 %v15589_v62  ;;  %v15656_v62 = vld [vmem:[#allocation5 + $0xba8] ss:$16 sps:$4 sm:$0xff]  }
 0x839   :  { %9812 = vmatpush2.bf16.msra.mxu0 %v15591_v9  ;;  %v15661_v9 = vld [vmem:[#allocation5 + $0x98c] ss:$16 sps:$4 sm:$0xff]  }
 0x83a   :  { %9853 = vmatpush2.bf16.msra.mxu1 %v15592_v29  ;;  %9863 = vmatprep.subr.bf16.mxu0 %v15595_v10  ;;  %v15664_v29 = vld [vmem:[#allocation5 + $0xb8c] ss:$16 sps:$4 sm:$0xff]   ;;  %v15659_v10 = vld [vmem:[#allocation5 + $0x988] ss:$16 sps:$4 sm:$0xff]  }
 0x83b   :  { %9904 = vmatprep.subr.bf16.mxu1 %v15598_v32  ;;  %v15662_v32 = vld [vmem:[#allocation5 + $0xb88] ss:$16 sps:$4 sm:$0xff]  }
 0x83c   :  { %9814 = vmatmul.mubr.bf16.vlgmr.msra.gmra.mxu0 %v16840_v57 }
 0x83d   :  { %9855 = vmatmul.mubr.bf16.vlgmr.msra.gmra.mxu1 %v16856_v21  ;;  %9864 = vmatpush1.bf16.msra.mxu0 %v15593_v58  ;;  %v15667_v58 = vld [vmem:[#allocation5 + $0x96c] ss:$16 sps:$4 sm:$0xff]  }
 0x83e   :  { %9905 = vmatpush1.bf16.msra.mxu1 %v15596_v35  ;;  %9865 = vmatprep.subr.bf16.mxu0 %v15601_v61  ;;  %v15670_v35 = vld [vmem:[#allocation5 + $0xb6c] ss:$16 sps:$4 sm:$0xff]   ;;  %v15665_v61 = vld [vmem:[#allocation5 + $0x968] ss:$16 sps:$4 sm:$0xff]  }
 0x83f   :  { %9906 = vmatprep.subr.bf16.mxu1 %v15604_v14  ;;  %9895 = vmatprep.mubr.bf16.mxu0 %v16842_v42  ;;  %v15668_v14 = vld [vmem:[#allocation5 + $0xb68] ss:$16 sps:$4 sm:$0xff]  }
 0x840   :  { %9936 = vmatprep.mubr.bf16.mxu1 %v16858_v36 }
 0x841   :  { %9866 = vmatpush1.bf16.msra.mxu0 %v15599_v11  ;;  %v15673_v11 = vld [vmem:[#allocation5 + $0x94c] ss:$16 sps:$4 sm:$0xff]  }
 0x842   :  { %9907 = vmatpush1.bf16.msra.mxu1 %v15602_v18  ;;  %9867 = vmatprep.subr.bf16.mxu0 %v15607_v17  ;;  %v15676_v18 = vld [vmem:[#allocation5 + $0xb4c] ss:$16 sps:$4 sm:$0xff]   ;;  %v15671_v17 = vld [vmem:[#allocation5 + $0x948] ss:$16 sps:$4 sm:$0xff]  }
 0x843   :  { %9908 = vmatprep.subr.bf16.mxu1 %v15610_v54  ;;  %v15674_v54 = vld [vmem:[#allocation5 + $0xb48] ss:$16 sps:$4 sm:$0xff]  }
 0x845   :  { %9868 = vmatpush1.bf16.msra.mxu0 %v15605_v19  ;;  %v15679_v19 = vld [vmem:[#allocation5 + $0x92c] ss:$16 sps:$4 sm:$0xff]  }
 0x846   :  { %9909 = vmatpush1.bf16.msra.mxu1 %v15608_v51  ;;  %9869 = vmatprep.subr.bf16.mxu0 %v15613_v38  ;;  %v15682_v51 = vld [vmem:[#allocation5 + $0xb2c] ss:$16 sps:$4 sm:$0xff]   ;;  %v15677_v38 = vld [vmem:[#allocation5 + $0x928] ss:$16 sps:$4 sm:$0xff]  }
 0x847   :  { %9910 = vmatprep.subr.bf16.mxu1 %v15616_v47  ;;  %v15680_v47 = vld [vmem:[#allocation5 + $0xb28] ss:$16 sps:$4 sm:$0xff]  }
 0x849   :  { %9870 = vmatpush1.bf16.msra.mxu0 %v15611_v23  ;;  %v15685_v23 = vld [vmem:[#allocation5 + $0x90c] ss:$16 sps:$4 sm:$0xff]  }
 0x84a   :  { %9911 = vmatpush1.bf16.msra.mxu1 %v15614_v12  ;;  %9871 = vmatprep.subr.bf16.mxu0 %v15619_v24  ;;  %v15688_v12 = vld [vmem:[#allocation5 + $0xb0c] ss:$16 sps:$4 sm:$0xff]   ;;  %v15683_v24 = vld [vmem:[#allocation5 + $0x908] ss:$16 sps:$4 sm:$0xff]  }
 0x84b   :  { %9912 = vmatprep.subr.bf16.mxu1 %v15622_v44  ;;  %v15686_v44 = vld [vmem:[#allocation5 + $0xb08] ss:$16 sps:$4 sm:$0xff]  }
 0x84d   :  { %9872 = vmatpush1.bf16.msra.mxu0 %v15617_v27  ;;  %v15691_v27 = vld [vmem:[#allocation5 + $0x4e4] ss:$16 sps:$4 sm:$0xff]  }
 0x84e   :  { %9913 = vmatpush1.bf16.msra.mxu1 %v15620_v1  ;;  %9873 = vmatprep.subr.bf16.mxu0 %v15625_v20  ;;  %v15694_v1 = vld [vmem:[#allocation5 + $0x6e4] ss:$16 sps:$4 sm:$0xff]   ;;  %v15689_v20 = vld [vmem:[#allocation5 + $0x4e0] ss:$16 sps:$4 sm:$0xff]  }
 0x84f   :  { %9914 = vmatprep.subr.bf16.mxu1 %v15628_v22  ;;  %v15692_v22 = vld [vmem:[#allocation5 + $0x6e0] ss:$16 sps:$4 sm:$0xff]  }
 0x851   :  { %9874 = vmatpush1.bf16.msra.mxu0 %v15623_v49  ;;  %v15697_v49 = vld [vmem:[#allocation5 + $0x4c4] ss:$16 sps:$4 sm:$0xff]  }
 0x852   :  { %9915 = vmatpush1.bf16.msra.mxu1 %v15626_v52  ;;  %9875 = vmatprep.subr.bf16.mxu0 %v15631_v2  ;;  %v15700_v52 = vld [vmem:[#allocation5 + $0x6c4] ss:$16 sps:$4 sm:$0xff]   ;;  %v8868_v2 = vrot.slane %v16842_v42, 7 }
 0x853   :  { %9916 = vmatprep.subr.bf16.mxu1 %v15634_v8  ;;  %v8870_v8 = vrot.slane %v16858_v36, 7 }
 0x855   :  { %9876 = vmatpush1.bf16.msra.mxu0 %v15629_v50  ;;  %v15695_v50 = vld [vmem:[#allocation5 + $0x4c0] ss:$16 sps:$4 sm:$0xff]  }
 0x856   :  { %9917 = vmatpush1.bf16.msra.mxu1 %v15632_v16  ;;  %9877 = vmatprep.subr.bf16.mxu0 %v15637_v56  ;;  %v15698_v16 = vld [vmem:[#allocation5 + $0x6c0] ss:$16 sps:$4 sm:$0xff]   ;;  %v15703_v56 = vld [vmem:[#allocation5 + $0x4a4] ss:$16 sps:$4 sm:$0xff]  }
 0x857   :  { %9918 = vmatprep.subr.bf16.mxu1 %v15640_v43  ;;  %v15706_v43 = vld [vmem:[#allocation5 + $0x6a4] ss:$16 sps:$4 sm:$0xff]  }
 0x859   :  { %9878 = vmatpush1.bf16.msra.mxu0 %v15635_v0  ;;  %v15701_v0 = vld [vmem:[#allocation5 + $0x4a0] ss:$16 sps:$4 sm:$0xff]  }
 0x85a   :  { %9919 = vmatpush1.bf16.msra.mxu1 %v15638_v15  ;;  %9879 = vmatprep.subr.bf16.mxu0 %v15643_v46  ;;  %v15704_v15 = vld [vmem:[#allocation5 + $0x6a0] ss:$16 sps:$4 sm:$0xff]   ;;  %v15709_v46 = vld [vmem:[#allocation5 + $0x484] ss:$16 sps:$4 sm:$0xff]  }
 0x85b   :  { %9920 = vmatprep.subr.bf16.mxu1 %v15646_v30  ;;  %v15712_v30 = vld [vmem:[#allocation5 + $0x684] ss:$16 sps:$4 sm:$0xff]  }
 0x85d   :  { %9880 = vmatpush2.bf16.msra.mxu0 %v15641_v26  ;;  %v15707_v26 = vld [vmem:[#allocation5 + $0x480] ss:$16 sps:$4 sm:$0xff]  }
 0x85e   :  { %9921 = vmatpush2.bf16.msra.mxu1 %v15644_v31  ;;  %9881 = vmatprep.subr.bf16.mxu0 %v15649_v39  ;;  %v15710_v31 = vld [vmem:[#allocation5 + $0x680] ss:$16 sps:$4 sm:$0xff]   ;;  %v15715_v39 = vld [vmem:[#allocation5 + $0x464] ss:$16 sps:$4 sm:$0xff]  }
 0x85f   :  { %9922 = vmatprep.subr.bf16.mxu1 %v15652_v25  ;;  %v15718_v25 = vld [vmem:[#allocation5 + $0x664] ss:$16 sps:$4 sm:$0xff]  }
 0x861   :  { %9882 = vmatpush2.bf16.msra.mxu0 %v15647_v34  ;;  %v15713_v34 = vld [vmem:[#allocation5 + $0x460] ss:$16 sps:$4 sm:$0xff]  }
 0x862   :  { %9923 = vmatpush2.bf16.msra.mxu1 %v15650_v7  ;;  %9883 = vmatprep.subr.bf16.mxu0 %v15655_v41  ;;  %v15716_v7 = vld [vmem:[#allocation5 + $0x660] ss:$16 sps:$4 sm:$0xff]   ;;  %v15721_v41 = vld [vmem:[#allocation5 + $0x444] ss:$16 sps:$4 sm:$0xff]  }
 0x863   :  { %9924 = vmatprep.subr.bf16.mxu1 %v15658_v55  ;;  %v15724_v55 = vld [vmem:[#allocation5 + $0x644] ss:$16 sps:$4 sm:$0xff]  }
 0x865   :  { %9884 = vmatpush2.bf16.msra.mxu0 %v15653_v53  ;;  %v15719_v53 = vld [vmem:[#allocation5 + $0x440] ss:$16 sps:$4 sm:$0xff]  }
 0x866   :  { %9925 = vmatpush2.bf16.msra.mxu1 %v15656_v62  ;;  %9885 = vmatprep.subr.bf16.mxu0 %v15661_v9  ;;  %v15722_v62 = vld [vmem:[#allocation5 + $0x640] ss:$16 sps:$4 sm:$0xff]   ;;  %v15727_v9 = vld [vmem:[#allocation5 + $0x424] ss:$16 sps:$4 sm:$0xff]  }
 0x867   :  { %9926 = vmatprep.subr.bf16.mxu1 %v15664_v29  ;;  %v15730_v29 = vld [vmem:[#allocation5 + $0x624] ss:$16 sps:$4 sm:$0xff]  }
 0x869   :  { %9886 = vmatpush2.bf16.msra.mxu0 %v15659_v10  ;;  %v15725_v10 = vld [vmem:[#allocation5 + $0x420] ss:$16 sps:$4 sm:$0xff]  }
 0x86a   :  { %9927 = vmatpush2.bf16.msra.mxu1 %v15662_v32  ;;  %9887 = vmatprep.subr.bf16.mxu0 %v15667_v58  ;;  %v15728_v32 = vld [vmem:[#allocation5 + $0x620] ss:$16 sps:$4 sm:$0xff]   ;;  %v15733_v58 = vld [vmem:[#allocation5 + $0x404] ss:$16 sps:$4 sm:$0xff]  }
 0x86b   :  { %9928 = vmatprep.subr.bf16.mxu1 %v15670_v35  ;;  %v15736_v35 = vld [vmem:[#allocation5 + $0x604] ss:$16 sps:$4 sm:$0xff]  }
 0x86d   :  { %9888 = vmatpush2.bf16.msra.mxu0 %v15665_v61  ;;  %v15731_v61 = vld [vmem:[#allocation5 + $0x400] ss:$16 sps:$4 sm:$0xff]  }
 0x86e   :  { %9929 = vmatpush2.bf16.msra.mxu1 %v15668_v14  ;;  %9889 = vmatprep.subr.bf16.mxu0 %v15673_v11  ;;  %v15734_v14 = vld [vmem:[#allocation5 + $0x600] ss:$16 sps:$4 sm:$0xff]   ;;  %v15739_v11 = vld [vmem:[#allocation5 + $0x5e4] ss:$16 sps:$4 sm:$0xff]  }
 0x86f   :  { %9930 = vmatprep.subr.bf16.mxu1 %v15676_v18  ;;  %v15742_v18 = vld [vmem:[#allocation5 + $0x7e4] ss:$16 sps:$4 sm:$0xff]  }
 0x871   :  { %9890 = vmatpush2.bf16.msra.mxu0 %v15671_v17  ;;  %v15737_v17 = vld [vmem:[#allocation5 + $0x5e0] ss:$16 sps:$4 sm:$0xff]  }
 0x872   :  { %9931 = vmatpush2.bf16.msra.mxu1 %v15674_v54  ;;  %9891 = vmatprep.subr.bf16.mxu0 %v15679_v19  ;;  %v15740_v54 = vld [vmem:[#allocation5 + $0x7e0] ss:$16 sps:$4 sm:$0xff]   ;;  %v15745_v19 = vld [vmem:[#allocation5 + $0x5c4] ss:$16 sps:$4 sm:$0xff]  }
 0x873   :  { %9932 = vmatprep.subr.bf16.mxu1 %v15682_v51  ;;  %v15748_v51 = vld [vmem:[#allocation5 + $0x7c4] ss:$16 sps:$4 sm:$0xff]  }
 0x875   :  { %9892 = vmatpush2.bf16.msra.mxu0 %v15677_v38  ;;  %v15743_v38 = vld [vmem:[#allocation5 + $0x5c0] ss:$16 sps:$4 sm:$0xff]  }
 0x876   :  { %9933 = vmatpush2.bf16.msra.mxu1 %v15680_v47  ;;  %9893 = vmatprep.subr.bf16.mxu0 %v15685_v23  ;;  %v15746_v47 = vld [vmem:[#allocation5 + $0x7c0] ss:$16 sps:$4 sm:$0xff]   ;;  %v15751_v23 = vld [vmem:[#allocation5 + $0x5a4] ss:$16 sps:$4 sm:$0xff]  }
 0x877   :  { %9934 = vmatprep.subr.bf16.mxu1 %v15688_v12  ;;  %v15754_v12 = vld [vmem:[#allocation5 + $0x7a4] ss:$16 sps:$4 sm:$0xff]  }
 0x879   :  { %9894 = vmatpush2.bf16.msra.mxu0 %v15683_v24  ;;  %v15749_v24 = vld [vmem:[#allocation5 + $0x5a0] ss:$16 sps:$4 sm:$0xff]  }
 0x87a   :  { %9935 = vmatpush2.bf16.msra.mxu1 %v15686_v44  ;;  %10585 = vmatprep.subr.bf16.mxu0 %v15691_v27  ;;  %v15752_v44 = vld [vmem:[#allocation5 + $0x7a0] ss:$16 sps:$4 sm:$0xff]   ;;  %v15757_v27 = vld [vmem:[#allocation5 + $0x584] ss:$16 sps:$4 sm:$0xff]  }
 0x87b   :  { %10626 = vmatprep.subr.bf16.mxu1 %v15694_v1  ;;  %v15760_v1 = vld [vmem:[#allocation5 + $0x784] ss:$16 sps:$4 sm:$0xff]  }
 0x87c   :  { %9896 = vmatmul.mubr.bf16.vlgmr.msra.gmra.mxu0 %v16840_v57 }
 0x87d   :  { %9937 = vmatmul.mubr.bf16.vlgmr.msra.gmra.mxu1 %v16856_v21  ;;  %10586 = vmatpush1.bf16.msra.mxu0 %v15689_v20  ;;  %v15755_v20 = vld [vmem:[#allocation5 + $0x580] ss:$16 sps:$4 sm:$0xff]  }
 0x87e   :  { %10627 = vmatpush1.bf16.msra.mxu1 %v15692_v22  ;;  %10587 = vmatprep.subr.bf16.mxu0 %v15697_v49  ;;  %v15758_v22 = vld [vmem:[#allocation5 + $0x780] ss:$16 sps:$4 sm:$0xff]   ;;  %v15763_v49 = vld [vmem:[#allocation5 + $0x564] ss:$16 sps:$4 sm:$0xff]  }
 0x87f   :  { %10628 = vmatprep.subr.bf16.mxu1 %v15700_v52  ;;  %13604 = vmatprep.mubr.msk.bf16.mxu0 %vm16524_vm13, %v8868_v2  ;;  %v15766_v52 = vld [vmem:[#allocation5 + $0x764] ss:$16 sps:$4 sm:$0xff]  }
 0x880   :  { %13608 = vmatprep.mubr.msk.bf16.mxu1 %vm16524_vm13, %v8870_v8 }
 0x881   :  { %10588 = vmatpush1.bf16.msra.mxu0 %v15695_v50  ;;  %v15761_v50 = vld [vmem:[#allocation5 + $0x560] ss:$16 sps:$4 sm:$0xff]  }
 0x882   :  { %10629 = vmatpush1.bf16.msra.mxu1 %v15698_v16  ;;  %10589 = vmatprep.subr.bf16.mxu0 %v15703_v56  ;;  %v15764_v16 = vld [vmem:[#allocation5 + $0x760] ss:$16 sps:$4 sm:$0xff]   ;;  %v15769_v56 = vld [vmem:[#allocation5 + $0x544] ss:$16 sps:$4 sm:$0xff]  }
 0x883   :  { %10630 = vmatprep.subr.bf16.mxu1 %v15706_v43  ;;  %v15772_v43 = vld [vmem:[#allocation5 + $0x744] ss:$16 sps:$4 sm:$0xff]  }
 0x885   :  { %10590 = vmatpush1.bf16.msra.mxu0 %v15701_v0  ;;  %v15767_v0 = vld [vmem:[#allocation5 + $0x540] ss:$16 sps:$4 sm:$0xff]  }
 0x886   :  { %10631 = vmatpush1.bf16.msra.mxu1 %v15704_v15  ;;  %10591 = vmatprep.subr.bf16.mxu0 %v15709_v46  ;;  %v15770_v15 = vld [vmem:[#allocation5 + $0x740] ss:$16 sps:$4 sm:$0xff]   ;;  %v15775_v46 = vld [vmem:[#allocation5 + $0x524] ss:$16 sps:$4 sm:$0xff]  }
 0x887   :  { %10632 = vmatprep.subr.bf16.mxu1 %v15712_v30  ;;  %v15778_v30 = vld [vmem:[#allocation5 + $0x724] ss:$16 sps:$4 sm:$0xff]  }
 0x889   :  { %10592 = vmatpush1.bf16.msra.mxu0 %v15707_v26  ;;  %v15773_v26 = vld [vmem:[#allocation5 + $0x520] ss:$16 sps:$4 sm:$0xff]  }
 0x88a   :  { %10633 = vmatpush1.bf16.msra.mxu1 %v15710_v31  ;;  %10593 = vmatprep.subr.bf16.mxu0 %v15715_v39  ;;  %v15776_v31 = vld [vmem:[#allocation5 + $0x720] ss:$16 sps:$4 sm:$0xff]   ;;  %v15781_v39 = vld [vmem:[#allocation5 + $0x504] ss:$16 sps:$4 sm:$0xff]  }
 0x88b   :  { %10634 = vmatprep.subr.bf16.mxu1 %v15718_v25  ;;  %v15784_v25 = vld [vmem:[#allocation5 + $0x704] ss:$16 sps:$4 sm:$0xff]  }
 0x88d   :  { %10594 = vmatpush1.bf16.msra.mxu0 %v15713_v34  ;;  %v15779_v34 = vld [vmem:[#allocation5 + $0x500] ss:$16 sps:$4 sm:$0xff]  }
 0x88e   :  { %10635 = vmatpush1.bf16.msra.mxu1 %v15716_v7  ;;  %10595 = vmatprep.subr.bf16.mxu0 %v15721_v41  ;;  %v15782_v7 = vld [vmem:[#allocation5 + $0x700] ss:$16 sps:$4 sm:$0xff]   ;;  %v15787_v41 = vld [vmem:[#allocation5 + $0x4ec] ss:$16 sps:$4 sm:$0xff]  }
 0x88f   :  { %10636 = vmatprep.subr.bf16.mxu1 %v15724_v55  ;;  %v15790_v55 = vld [vmem:[#allocation5 + $0x6ec] ss:$16 sps:$4 sm:$0xff]  }
 0x891   :  { %10596 = vmatpush1.bf16.msra.mxu0 %v15719_v53  ;;  %v8867_v53 = vrot.slane %v16840_v57, 7 }
 0x892   :  { %10637 = vmatpush1.bf16.msra.mxu1 %v15722_v62  ;;  %10597 = vmatprep.subr.bf16.mxu0 %v15727_v9  ;;  %v8869_v62 = vrot.slane %v16856_v21, 7  ;;  %v15785_v9 = vld [vmem:[#allocation5 + $0x4e8] ss:$16 sps:$4 sm:$0xff]  }
 0x893   :  { %10638 = vmatprep.subr.bf16.mxu1 %v15730_v29  ;;  %v15788_v29 = vld [vmem:[#allocation5 + $0x6e8] ss:$16 sps:$4 sm:$0xff]  }
 0x895   :  { %10598 = vmatpush1.bf16.msra.mxu0 %v15725_v10  ;;  %v15793_v10 = vld [vmem:[#allocation5 + $0x4cc] ss:$16 sps:$4 sm:$0xff]  }
 0x896   :  { %10639 = vmatpush1.bf16.msra.mxu1 %v15728_v32  ;;  %10599 = vmatprep.subr.bf16.mxu0 %v15733_v58  ;;  %v15796_v32 = vld [vmem:[#allocation5 + $0x6cc] ss:$16 sps:$4 sm:$0xff]   ;;  %v15791_v58 = vld [vmem:[#allocation5 + $0x4c8] ss:$16 sps:$4 sm:$0xff]  }
 0x897   :  { %10640 = vmatprep.subr.bf16.mxu1 %v15736_v35  ;;  %v15794_v35 = vld [vmem:[#allocation5 + $0x6c8] ss:$16 sps:$4 sm:$0xff]  }
 0x899   :  { %10600 = vmatpush1.bf16.msra.mxu0 %v15731_v61  ;;  %v15799_v61 = vld [vmem:[#allocation5 + $0x4ac] ss:$16 sps:$4 sm:$0xff]  }
 0x89a   :  { %10641 = vmatpush1.bf16.msra.mxu1 %v15734_v14  ;;  %10601 = vmatprep.subr.bf16.mxu0 %v15739_v11  ;;  %v15802_v14 = vld [vmem:[#allocation5 + $0x6ac] ss:$16 sps:$4 sm:$0xff]   ;;  %v15797_v11 = vld [vmem:[#allocation5 + $0x4a8] ss:$16 sps:$4 sm:$0xff]  }
 0x89b   :  { %10642 = vmatprep.subr.bf16.mxu1 %v15742_v18  ;;  %v15800_v18 = vld [vmem:[#allocation5 + $0x6a8] ss:$16 sps:$4 sm:$0xff]  }
 0x89d   :  { %10602 = vmatpush2.bf16.msra.mxu0 %v15737_v17  ;;  %v15805_v17 = vld [vmem:[#allocation5 + $0x48c] ss:$16 sps:$4 sm:$0xff]  }
 0x89e   :  { %10643 = vmatpush2.bf16.msra.mxu1 %v15740_v54  ;;  %10603 = vmatprep.subr.bf16.mxu0 %v15745_v19  ;;  %v15808_v54 = vld [vmem:[#allocation5 + $0x68c] ss:$16 sps:$4 sm:$0xff]   ;;  %v15803_v19 = vld [vmem:[#allocation5 + $0x488] ss:$16 sps:$4 sm:$0xff]  }
 0x89f   :  { %10644 = vmatprep.subr.bf16.mxu1 %v15748_v51  ;;  %v15806_v51 = vld [vmem:[#allocation5 + $0x688] ss:$16 sps:$4 sm:$0xff]  }
 0x8a1   :  { %10604 = vmatpush2.bf16.msra.mxu0 %v15743_v38  ;;  %v15811_v38 = vld [vmem:[#allocation5 + $0x46c] ss:$16 sps:$4 sm:$0xff]  }
 0x8a2   :  { %10645 = vmatpush2.bf16.msra.mxu1 %v15746_v47  ;;  %10605 = vmatprep.subr.bf16.mxu0 %v15751_v23  ;;  %v15809_v47 = vld [vmem:[#allocation5 + $0x468] ss:$16 sps:$4 sm:$0xff]  }
 0x8a3   :  { %10646 = vmatprep.subr.bf16.mxu1 %v15754_v12  ;;  %v15812_v23 = vld [vmem:[#allocation5 + $0x668] ss:$16 sps:$4 sm:$0xff]   ;;  %v15820_v12 = vld [vmem:[#allocation5 + $0x64c] ss:$16 sps:$4 sm:$0xff]  }
 0x8a5   :  { %10606 = vmatpush2.bf16.msra.mxu0 %v15749_v24  ;;  %v15815_v24 = vld [vmem:[#allocation5 + $0x448] ss:$16 sps:$4 sm:$0xff]  }
 0x8a6   :  { %10647 = vmatpush2.bf16.msra.mxu1 %v15752_v44  ;;  %10607 = vmatprep.subr.bf16.mxu0 %v15757_v27  ;;  %v15818_v44 = vld [vmem:[#allocation5 + $0x648] ss:$16 sps:$4 sm:$0xff]   ;;  %v15823_v27 = vld [vmem:[#allocation5 + $0x42c] ss:$16 sps:$4 sm:$0xff]  }
 0x8a7   :  { %10648 = vmatprep.subr.bf16.mxu1 %v15760_v1  ;;  %v15826_v1 = vld [vmem:[#allocation5 + $0x62c] ss:$16 sps:$4 sm:$0xff]  }
 0x8a9   :  { %10608 = vmatpush2.bf16.msra.mxu0 %v15755_v20  ;;  %v15821_v20 = vld [vmem:[#allocation5 + $0x428] ss:$16 sps:$4 sm:$0xff]  }
 0x8aa   :  { %10649 = vmatpush2.bf16.msra.mxu1 %v15758_v22  ;;  %10609 = vmatprep.subr.bf16.mxu0 %v15763_v49  ;;  %v15824_v22 = vld [vmem:[#allocation5 + $0x628] ss:$16 sps:$4 sm:$0xff]   ;;  %v15829_v49 = vld [vmem:[#allocation5 + $0x40c] ss:$16 sps:$4 sm:$0xff]  }
 0x8ab   :  { %10650 = vmatprep.subr.bf16.mxu1 %v15766_v52  ;;  %v15832_v52 = vld [vmem:[#allocation5 + $0x60c] ss:$16 sps:$4 sm:$0xff]  }
 0x8ad   :  { %10610 = vmatpush2.bf16.msra.mxu0 %v15761_v50  ;;  %v15827_v50 = vld [vmem:[#allocation5 + $0x408] ss:$16 sps:$4 sm:$0xff]  }
 0x8ae   :  { %10651 = vmatpush2.bf16.msra.mxu1 %v15764_v16  ;;  %10611 = vmatprep.subr.bf16.mxu0 %v15769_v56  ;;  %v15830_v16 = vld [vmem:[#allocation5 + $0x608] ss:$16 sps:$4 sm:$0xff]   ;;  %v15835_v56 = vld [vmem:[#allocation5 + $0x5ec] ss:$16 sps:$4 sm:$0xff]  }
 0x8af   :  { %10652 = vmatprep.subr.bf16.mxu1 %v15772_v43  ;;  %v15838_v43 = vld [vmem:[#allocation5 + $0x7ec] ss:$16 sps:$4 sm:$0xff]  }
 0x8b1   :  { %10612 = vmatpush2.bf16.msra.mxu0 %v15767_v0  ;;  %v15833_v0 = vld [vmem:[#allocation5 + $0x5e8] ss:$16 sps:$4 sm:$0xff]  }
 0x8b2   :  { %10653 = vmatpush2.bf16.msra.mxu1 %v15770_v15  ;;  %10613 = vmatprep.subr.bf16.mxu0 %v15775_v46  ;;  %v15836_v15 = vld [vmem:[#allocation5 + $0x7e8] ss:$16 sps:$4 sm:$0xff]   ;;  %v15841_v46 = vld [vmem:[#allocation5 + $0x5cc] ss:$16 sps:$4 sm:$0xff]  }
 0x8b3   :  { %10654 = vmatprep.subr.bf16.mxu1 %v15778_v30  ;;  %v15844_v30 = vld [vmem:[#allocation5 + $0x7cc] ss:$16 sps:$4 sm:$0xff]  }
 0x8b5   :  { %10614 = vmatpush2.bf16.msra.mxu0 %v15773_v26  ;;  %v15839_v26 = vld [vmem:[#allocation5 + $0x5c8] ss:$16 sps:$4 sm:$0xff]  }
 0x8b6   :  { %10655 = vmatpush2.bf16.msra.mxu1 %v15776_v31  ;;  %10615 = vmatprep.subr.bf16.mxu0 %v15781_v39  ;;  %v15842_v31 = vld [vmem:[#allocation5 + $0x7c8] ss:$16 sps:$4 sm:$0xff]   ;;  %v15847_v39 = vld [vmem:[#allocation5 + $0x5ac] ss:$16 sps:$4 sm:$0xff]  }
 0x8b7   :  { %10656 = vmatprep.subr.bf16.mxu1 %v15784_v25  ;;  %v15850_v25 = vld [vmem:[#allocation5 + $0x7ac] ss:$16 sps:$4 sm:$0xff]  }
 0x8b9   :  { %10616 = vmatpush2.bf16.msra.mxu0 %v15779_v34  ;;  %v15845_v34 = vld [vmem:[#allocation5 + $0x5a8] ss:$16 sps:$4 sm:$0xff]  }
 0x8ba   :  { %10657 = vmatpush2.bf16.msra.mxu1 %v15782_v7  ;;  %10667 = vmatprep.subr.bf16.mxu0 %v15787_v41  ;;  %v15848_v7 = vld [vmem:[#allocation5 + $0x7a8] ss:$16 sps:$4 sm:$0xff]   ;;  %v15853_v41 = vld [vmem:[#allocation5 + $0x58c] ss:$16 sps:$4 sm:$0xff]  }
 0x8bb   :  { %10708 = vmatprep.subr.bf16.mxu1 %v15790_v55  ;;  %v15856_v55 = vld [vmem:[#allocation5 + $0x78c] ss:$16 sps:$4 sm:$0xff]  }
 0x8bc   :  { %13606 = vmatmul.mubr.msk.bf16.vlgmr.msra.gmra.mxu0 %vm16524_vm13, %v8867_v53 }
 0x8bd   :  { %13610 = vmatmul.mubr.msk.bf16.vlgmr.msra.gmra.mxu1 %vm16524_vm13, %v8869_v62  ;;  %10668 = vmatpush1.bf16.msra.mxu0 %v15785_v9  ;;  %v15851_v9 = vld [vmem:[#allocation5 + $0x588] ss:$16 sps:$4 sm:$0xff]  }
 0x8be   :  { %10709 = vmatpush1.bf16.msra.mxu1 %v15788_v29  ;;  %10669 = vmatprep.subr.bf16.mxu0 %v15793_v10  ;;  %v15854_v29 = vld [vmem:[#allocation5 + $0x788] ss:$16 sps:$4 sm:$0xff]   ;;  %v15859_v10 = vld [vmem:[#allocation5 + $0x56c] ss:$16 sps:$4 sm:$0xff]  }
 0x8bf   :  { %10710 = vmatprep.subr.bf16.mxu1 %v15796_v32  ;;  %13612 = vmatprep.mubr.msk.bf16.mxu0 %vm16524_vm13, %v8868_v2  ;;  %v15814_v2 = vld [vmem:[#allocation5 + $0x66c] ss:$16 sps:$4 sm:$0xff]  }
 0x8c0   :  { %13616 = vmatprep.mubr.msk.bf16.mxu1 %vm16524_vm13, %v8870_v8  ;;  %v15817_v8 = vld [vmem:[#allocation5 + $0x44c] ss:$16 sps:$4 sm:$0xff]  }
 0x8c1   :  { %10670 = vmatpush1.bf16.msra.mxu0 %v15791_v58  ;;  %v15862_v32 = vld [vmem:[#allocation5 + $0x76c] ss:$16 sps:$4 sm:$0xff]   ;;  %v15857_v58 = vld [vmem:[#allocation5 + $0x568] ss:$16 sps:$4 sm:$0xff]  }
 0x8c2   :  { %10711 = vmatpush1.bf16.msra.mxu1 %v15794_v35  ;;  %10671 = vmatprep.subr.bf16.mxu0 %v15799_v61  ;;  %v15860_v35 = vld [vmem:[#allocation5 + $0x768] ss:$16 sps:$4 sm:$0xff]   ;;  %v15865_v61 = vld [vmem:[#allocation5 + $0x54c] ss:$16 sps:$4 sm:$0xff]  }
 0x8c3   :  { %10712 = vmatprep.subr.bf16.mxu1 %v15802_v14  ;;  %v15868_v14 = vld [vmem:[#allocation5 + $0x74c] ss:$16 sps:$4 sm:$0xff]  }
 0x8c5   :  { %10672 = vmatpush1.bf16.msra.mxu0 %v15797_v11  ;;  %v15863_v11 = vld [vmem:[#allocation5 + $0x548] ss:$16 sps:$4 sm:$0xff]  }
 0x8c6   :  { %10713 = vmatpush1.bf16.msra.mxu1 %v15800_v18  ;;  %10673 = vmatprep.subr.bf16.mxu0 %v15805_v17  ;;  %v15866_v18 = vld [vmem:[#allocation5 + $0x748] ss:$16 sps:$4 sm:$0xff]   ;;  %v15871_v17 = vld [vmem:[#allocation5 + $0x52c] ss:$16 sps:$4 sm:$0xff]  }
 0x8c7   :  { %10714 = vmatprep.subr.bf16.mxu1 %v15808_v54  ;;  %v15874_v54 = vld [vmem:[#allocation5 + $0x72c] ss:$16 sps:$4 sm:$0xff]  }
 0x8c9   :  { %10674 = vmatpush1.bf16.msra.mxu0 %v15803_v19  ;;  %v15869_v19 = vld [vmem:[#allocation5 + $0x528] ss:$16 sps:$4 sm:$0xff]  }
 0x8ca   :  { %10715 = vmatpush1.bf16.msra.mxu1 %v15806_v51  ;;  %10675 = vmatprep.subr.bf16.mxu0 %v15811_v38  ;;  %v15872_v51 = vld [vmem:[#allocation5 + $0x728] ss:$16 sps:$4 sm:$0xff]   ;;  %v15877_v38 = vld [vmem:[#allocation5 + $0x50c] ss:$16 sps:$4 sm:$0xff]  }
 0x8cb   :  { %10716 = vmatprep.subr.bf16.mxu1 %v15814_v2  ;;  %v15880_v2 = vld [vmem:[#allocation5 + $0x70c] ss:$16 sps:$4 sm:$0xff]  }
 0x8cd   :  { %10676 = vmatpush1.bf16.msra.mxu0 %v15809_v47  ;;  %v15875_v47 = vld [vmem:[#allocation5 + $0x508] ss:$16 sps:$4 sm:$0xff]  }
 0x8ce   :  { %10717 = vmatpush1.bf16.msra.mxu1 %v15812_v23  ;;  %10677 = vmatprep.subr.bf16.mxu0 %v15817_v8  ;;  %v15878_v23 = vld [vmem:[#allocation5 + $0x708] ss:$16 sps:$4 sm:$0xff]   ;;  %v15883_v8 = vld [vmem:[#allocation5 + $0xce4] ss:$16 sps:$4 sm:$0xff]  }
 0x8cf   :  { %10718 = vmatprep.subr.bf16.mxu1 %v15820_v12  ;;  %v15886_v12 = vld [vmem:[#allocation5 + $0xee4] ss:$16 sps:$4 sm:$0xff]  }
 0x8d1   :  { %10678 = vmatpush1.bf16.msra.mxu0 %v15815_v24  ;;  %v15881_v24 = vld [vmem:[#allocation5 + $0xce0] ss:$16 sps:$4 sm:$0xff]  }
 0x8d2   :  { %10719 = vmatpush1.bf16.msra.mxu1 %v15818_v44  ;;  %10679 = vmatprep.subr.bf16.mxu0 %v15823_v27  ;;  %v15884_v44 = vld [vmem:[#allocation5 + $0xee0] ss:$16 sps:$4 sm:$0xff]   ;;  %v15889_v27 = vld [vmem:[#allocation5 + $0xcc4] ss:$16 sps:$4 sm:$0xff]  }
 0x8d3   :  { %10720 = vmatprep.subr.bf16.mxu1 %v15826_v1  ;;  %v15892_v1 = vld [vmem:[#allocation5 + $0xec4] ss:$16 sps:$4 sm:$0xff]  }
 0x8d5   :  { %10680 = vmatpush1.bf16.msra.mxu0 %v15821_v20  ;;  %v10750_v20 = vrot.slane %v16842_v42, 1  ;;  %v15995_v42 = vld [vmem:[#allocation5 + $0xc88] ss:$16 sps:$4 sm:$0xff]  }
 0x8d6   :  { %10721 = vmatpush1.bf16.msra.mxu1 %v15824_v22  ;;  %10681 = vmatprep.subr.bf16.mxu0 %v15829_v49  ;;  %v10752_v22 = vrot.slane %v16858_v36, 1  ;;  %v15887_v49 = vld [vmem:[#allocation5 + $0xcc0] ss:$16 sps:$4 sm:$0xff]   ;;  %v16003_v36 = vld [vmem:[#allocation5 + $0xc6c] ss:$16 sps:$4 sm:$0xff]  }
 0x8d7   :  { %10722 = vmatprep.subr.bf16.mxu1 %v15832_v52  ;;  %v15890_v52 = vld [vmem:[#allocation5 + $0xec0] ss:$16 sps:$4 sm:$0xff]  }
 0x8d9   :  { %10682 = vmatpush1.bf16.msra.mxu0 %v15827_v50 }
 0x8da   :  { %10723 = vmatpush1.bf16.msra.mxu1 %v15830_v16  ;;  %10683 = vmatprep.subr.bf16.mxu0 %v15835_v56  ;;  %v15895_v56 = vld [vmem:[#allocation5 + $0xca4] ss:$16 sps:$4 sm:$0xff]  }
 0x8db   :  { %10724 = vmatprep.subr.bf16.mxu1 %v15838_v43  ;;  %v15898_v43 = vld [vmem:[#allocation5 + $0xea4] ss:$16 sps:$4 sm:$0xff]  }
 0x8dd   :  { %10684 = vmatpush2.bf16.msra.mxu0 %v15833_v0 }
 0x8de   :  { %10725 = vmatpush2.bf16.msra.mxu1 %v15836_v15  ;;  %10685 = vmatprep.subr.bf16.mxu0 %v15841_v46 }
 0x8df   :  { %10726 = vmatprep.subr.bf16.mxu1 %v15844_v30 }
 0x8e1   :  { %10686 = vmatpush2.bf16.msra.mxu0 %v15839_v26  ;;  %v15893_v26 = vld [vmem:[#allocation5 + $0xca0] ss:$16 sps:$4 sm:$0xff]  }
 0x8e2   :  { %10727 = vmatpush2.bf16.msra.mxu1 %v15842_v31  ;;  %10687 = vmatprep.subr.bf16.mxu0 %v15847_v39  ;;  %v15896_v31 = vld [vmem:[#allocation5 + $0xea0] ss:$16 sps:$4 sm:$0xff]   ;;  %v15904_v39 = vld [vmem:[#allocation5 + $0xe84] ss:$16 sps:$4 sm:$0xff]  }
 0x8e3   :  { %10728 = vmatprep.subr.bf16.mxu1 %v15850_v25 }
 0x8e5   :  { %10688 = vmatpush2.bf16.msra.mxu0 %v15845_v34 }
 0x8e6   :  { %10729 = vmatpush2.bf16.msra.mxu1 %v15848_v7  ;;  %10689 = vmatprep.subr.bf16.mxu0 %v15853_v41  ;;  %v15899_v7 = vld [vmem:[#allocation5 + $0xc80] ss:$16 sps:$4 sm:$0xff]  }
 0x8e7   :  { %10730 = vmatprep.subr.bf16.mxu1 %v15856_v55  ;;  %v15902_v41 = vld [vmem:[#allocation5 + $0xe80] ss:$16 sps:$4 sm:$0xff]   ;;  %v15907_v55 = vld [vmem:[#allocation5 + $0xc64] ss:$16 sps:$4 sm:$0xff]  }
 0x8e9   :  { %10690 = vmatpush2.bf16.msra.mxu0 %v15851_v9  ;;  %v15910_v9 = vld [vmem:[#allocation5 + $0xe64] ss:$16 sps:$4 sm:$0xff]  }
 0x8ea   :  { %10731 = vmatpush2.bf16.msra.mxu1 %v15854_v29  ;;  %10691 = vmatprep.subr.bf16.mxu0 %v15859_v10  ;;  %v15905_v29 = vld [vmem:[#allocation5 + $0xc60] ss:$16 sps:$4 sm:$0xff]  }
 0x8eb   :  { %10732 = vmatprep.subr.bf16.mxu1 %v15862_v32  ;;  %v15908_v10 = vld [vmem:[#allocation5 + $0xe60] ss:$16 sps:$4 sm:$0xff]   ;;  %v15913_v32 = vld [vmem:[#allocation5 + $0xc44] ss:$16 sps:$4 sm:$0xff]  }
 0x8ed   :  { %10692 = vmatpush2.bf16.msra.mxu0 %v15857_v58  ;;  %v15916_v58 = vld [vmem:[#allocation5 + $0xe44] ss:$16 sps:$4 sm:$0xff]  }
 0x8ee   :  { %10733 = vmatpush2.bf16.msra.mxu1 %v15860_v35  ;;  %10693 = vmatprep.subr.bf16.mxu0 %v15865_v61  ;;  %v15911_v35 = vld [vmem:[#allocation5 + $0xc40] ss:$16 sps:$4 sm:$0xff]  }
 0x8ef   :  { %10734 = vmatprep.subr.bf16.mxu1 %v15868_v14  ;;  %v15914_v61 = vld [vmem:[#allocation5 + $0xe40] ss:$16 sps:$4 sm:$0xff]   ;;  %v15919_v14 = vld [vmem:[#allocation5 + $0xc24] ss:$16 sps:$4 sm:$0xff]  }
 0x8f1   :  { %10694 = vmatpush2.bf16.msra.mxu0 %v15863_v11  ;;  %v15922_v11 = vld [vmem:[#allocation5 + $0xe24] ss:$16 sps:$4 sm:$0xff]  }
 0x8f2   :  { %10735 = vmatpush2.bf16.msra.mxu1 %v15866_v18  ;;  %10695 = vmatprep.subr.bf16.mxu0 %v15871_v17  ;;  %v15917_v18 = vld [vmem:[#allocation5 + $0xc20] ss:$16 sps:$4 sm:$0xff]  }
 0x8f3   :  { %10736 = vmatprep.subr.bf16.mxu1 %v15874_v54  ;;  %v15920_v17 = vld [vmem:[#allocation5 + $0xe20] ss:$16 sps:$4 sm:$0xff]   ;;  %v15925_v54 = vld [vmem:[#allocation5 + $0xc04] ss:$16 sps:$4 sm:$0xff]  }
 0x8f5   :  { %10696 = vmatpush2.bf16.msra.mxu0 %v15869_v19  ;;  %v15928_v19 = vld [vmem:[#allocation5 + $0xe04] ss:$16 sps:$4 sm:$0xff]  }
 0x8f6   :  { %10737 = vmatpush2.bf16.msra.mxu1 %v15872_v51  ;;  %10697 = vmatprep.subr.bf16.mxu0 %v15877_v38  ;;  %v15923_v51 = vld [vmem:[#allocation5 + $0xc00] ss:$16 sps:$4 sm:$0xff]  }
 0x8f7   :  { %10738 = vmatprep.subr.bf16.mxu1 %v15880_v2  ;;  %v15926_v38 = vld [vmem:[#allocation5 + $0xe00] ss:$16 sps:$4 sm:$0xff]   ;;  %v15931_v2 = vld [vmem:[#allocation5 + $0xde4] ss:$16 sps:$4 sm:$0xff]  }
 0x8f9   :  { %10698 = vmatpush2.bf16.msra.mxu0 %v15875_v47  ;;  %v15934_v47 = vld [vmem:[#allocation5 + $0xfe4] ss:$16 sps:$4 sm:$0xff]  }
 0x8fa   :  { %10739 = vmatpush2.bf16.msra.mxu1 %v15878_v23  ;;  %11534 = vmatprep.subr.bf16.mxu0 %v15883_v8  ;;  %v15929_v23 = vld [vmem:[#allocation5 + $0xde0] ss:$16 sps:$4 sm:$0xff]  }
 0x8fb   :  { %11575 = vmatprep.subr.bf16.mxu1 %v15886_v12  ;;  %v15932_v8 = vld [vmem:[#allocation5 + $0xfe0] ss:$16 sps:$4 sm:$0xff]   ;;  %v15937_v12 = vld [vmem:[#allocation5 + $0xdc4] ss:$16 sps:$4 sm:$0xff]  }
 0x8fc   :  { %v9815_v50 = vpop.f32.mrf.mxu0  ;;  %13614 = vmatmul.mubr.msk.bf16.vlgmr.msra.gmra.mxu0 %vm16524_vm13, %v8867_v53 }
 0x8fd   :  { %v9856_v16 = vpop.f32.mrf.mxu1  ;;  %13618 = vmatmul.mubr.msk.bf16.vlgmr.msra.gmra.mxu1 %vm16524_vm13, %v8869_v62  ;;  %11535 = vmatpush1.bf16.msra.mxu0 %v15881_v24  ;;  %v15901_v62 = vld [vmem:[#allocation5 + $0xc84] ss:$16 sps:$4 sm:$0xff]  }
 0x8fe   :  { %v16906_v0 = vadd.f32 %v9856_v16, %v9815_v50  ;;  %11576 = vmatpush1.bf16.msra.mxu1 %v15884_v44  ;;  %v9817_v15 = vpop.f32.mrf.mxu0  ;;  %11536 = vmatprep.subr.bf16.mxu0 %v15889_v27  ;;  %v15940_v24 = vld [vmem:[#allocation5 + $0xfc4] ss:$16 sps:$4 sm:$0xff]   ;;  %v15935_v44 = vld [vmem:[#allocation5 + $0xdc0] ss:$16 sps:$4 sm:$0xff]  }
 0x8ff   :  { %v9858_v46 = vpop.f32.mrf.mxu1  ;;  %11577 = vmatprep.subr.bf16.mxu1 %v15892_v1  ;;  %13747 = vmatprep.mubr.msk.bf16.mxu0 %vm650_vm12, %v10750_v20  ;;  %v15938_v27 = vld [vmem:[#allocation5 + $0xfc0] ss:$16 sps:$4 sm:$0xff]   ;;  %v15943_v1 = vld [vmem:[#allocation5 + $0xda4] ss:$16 sps:$4 sm:$0xff]  }
 0x900   :  { %v16908_v30 = vadd.f32 %v9858_v46, %v9817_v15  ;;  %13749 = vmatprep.mubr.msk.bf16.mxu1 %vm650_vm12, %v10752_v22  ;;  %v9819_v13 = vpop.f32.mrf.mxu0  ;;  %v15944_v50 = vld [vmem:[#allocation5 + $0xfa0] ss:$16 sps:$4 sm:$0xff]   ;;  %v15949_v16 = vld [vmem:[#allocation5 + $0xd84] ss:$16 sps:$4 sm:$0xff]  }
 0x901   :  { %v9860_v53 = vpop.f32.mrf.mxu1  ;;  %11537 = vmatpush1.bf16.msra.mxu0 %v15887_v49  ;;  %v15946_v49 = vld [vmem:[#allocation5 + $0xfa4] ss:$16 sps:$4 sm:$0xff]   ;;  %v15950_v15 = vld [vmem:[#allocation5 + $0xf80] ss:$16 sps:$4 sm:$0xff]  }
 0x902   :  { %11578 = vmatpush1.bf16.msra.mxu1 %v15890_v52  ;;  %v9820_v25 = vpop.f32.mrf.mxu0  ;;  %11538 = vmatprep.subr.bf16.mxu0 %v15895_v56  ;;  %v15941_v52 = vld [vmem:[#allocation5 + $0xda0] ss:$16 sps:$4 sm:$0xff]   ;;  %v15952_v56 = vld [vmem:[#allocation5 + $0xf84] ss:$16 sps:$4 sm:$0xff]  }
 0x903   :  { %v9861_v34 = vpop.f32.mrf.mxu1  ;;  %11579 = vmatprep.subr.bf16.mxu1 %v15898_v43  ;;  %v15947_v43 = vld [vmem:[#allocation5 + $0xd80] ss:$16 sps:$4 sm:$0xff]   ;;  %v15955_v46 = vld [vmem:[#allocation5 + $0xd64] ss:$16 sps:$4 sm:$0xff]  }
 0x904   :  { %v15956_v13 = vld [vmem:[#allocation5 + $0xf60] ss:$16 sps:$4 sm:$0xff]   ;;  %v15961_v53 = vld [vmem:[#allocation5 + $0xd44] ss:$16 sps:$4 sm:$0xff]  }
 0x905   :  { %11539 = vmatpush1.bf16.msra.mxu0 %v15893_v26  ;;  %v15958_v26 = vld [vmem:[#allocation5 + $0xf64] ss:$16 sps:$4 sm:$0xff]   ;;  %v15962_v25 = vld [vmem:[#allocation5 + $0xf40] ss:$16 sps:$4 sm:$0xff]  }
 0x906   :  { %11580 = vmatpush1.bf16.msra.mxu1 %v15896_v31  ;;  %11540 = vmatprep.subr.bf16.mxu0 %v15901_v62  ;;  %v15953_v31 = vld [vmem:[#allocation5 + $0xd60] ss:$16 sps:$4 sm:$0xff]   ;;  %v15964_v62 = vld [vmem:[#allocation5 + $0xf44] ss:$16 sps:$4 sm:$0xff]  }
 0x907   :  { %11581 = vmatprep.subr.bf16.mxu1 %v15904_v39  ;;  %v15959_v39 = vld [vmem:[#allocation5 + $0xd40] ss:$16 sps:$4 sm:$0xff]   ;;  %v15967_v34 = vld [vmem:[#allocation5 + $0xd24] ss:$16 sps:$4 sm:$0xff]  }
 0x909   :  { %11541 = vmatpush1.bf16.msra.mxu0 %v15899_v7  ;;  %v15970_v7 = vld [vmem:[#allocation5 + $0xf24] ss:$16 sps:$4 sm:$0xff]  }
 0x90a   :  { %11582 = vmatpush1.bf16.msra.mxu1 %v15902_v41  ;;  %11542 = vmatprep.subr.bf16.mxu0 %v15907_v55  ;;  %v15965_v41 = vld [vmem:[#allocation5 + $0xd20] ss:$16 sps:$4 sm:$0xff]  }
 0x90b   :  { %11583 = vmatprep.subr.bf16.mxu1 %v15910_v9  ;;  %v15968_v55 = vld [vmem:[#allocation5 + $0xf20] ss:$16 sps:$4 sm:$0xff]   ;;  %v15973_v9 = vld [vmem:[#allocation5 + $0xd04] ss:$16 sps:$4 sm:$0xff]  }
 0x90d   :  { %11543 = vmatpush1.bf16.msra.mxu0 %v15905_v29  ;;  %v15976_v29 = vld [vmem:[#allocation5 + $0xf04] ss:$16 sps:$4 sm:$0xff]  }
 0x90e   :  { %11584 = vmatpush1.bf16.msra.mxu1 %v15908_v10  ;;  %11544 = vmatprep.subr.bf16.mxu0 %v15913_v32  ;;  %v15971_v10 = vld [vmem:[#allocation5 + $0xd00] ss:$16 sps:$4 sm:$0xff]  }
 0x90f   :  { %11585 = vmatprep.subr.bf16.mxu1 %v15916_v58  ;;  %v15974_v32 = vld [vmem:[#allocation5 + $0xf00] ss:$16 sps:$4 sm:$0xff]   ;;  %v15979_v58 = vld [vmem:[#allocation5 + $0xcec] ss:$16 sps:$4 sm:$0xff]  }
 0x911   :  { %11545 = vmatpush1.bf16.msra.mxu0 %v15911_v35  ;;  %v15982_v35 = vld [vmem:[#allocation5 + $0xeec] ss:$16 sps:$4 sm:$0xff]  }
 0x912   :  { %11586 = vmatpush1.bf16.msra.mxu1 %v15914_v61  ;;  %11546 = vmatprep.subr.bf16.mxu0 %v15919_v14  ;;  %v10749_v61 = vrot.slane %v16840_v57, 1  ;;  %v10751_v14 = vrot.slane %v16856_v21, 1  ;;  %v16077_v57 = vld [vmem:[%s17087_s8 + $0x68] sm:$0xff]  }
 0x913   :  { %11587 = vmatprep.subr.bf16.mxu1 %v15922_v11  ;;  %v15977_v11 = vld [vmem:[#allocation5 + $0xce8] ss:$16 sps:$4 sm:$0xff]  }
 0x915   :  { %11547 = vmatpush1.bf16.msra.mxu0 %v15917_v18  ;;  %v15980_v18 = vld [vmem:[#allocation5 + $0xee8] ss:$16 sps:$4 sm:$0xff]  }
 0x916   :  { %11588 = vmatpush1.bf16.msra.mxu1 %v15920_v17  ;;  %11548 = vmatprep.subr.bf16.mxu0 %v15925_v54  ;;  %v15985_v17 = vld [vmem:[#allocation5 + $0xccc] ss:$16 sps:$4 sm:$0xff]  }
 0x917   :  { %11589 = vmatprep.subr.bf16.mxu1 %v15928_v19  ;;  %v15988_v54 = vld [vmem:[#allocation5 + $0xecc] ss:$16 sps:$4 sm:$0xff]  }
 0x919   :  { %11549 = vmatpush1.bf16.msra.mxu0 %v15923_v51 }
 0x91a   :  { %11590 = vmatpush1.bf16.msra.mxu1 %v15926_v38  ;;  %11550 = vmatprep.subr.bf16.mxu0 %v15931_v2  ;;  %v15983_v2 = vld [vmem:[#allocation5 + $0xcc8] ss:$16 sps:$4 sm:$0xff]  }
 0x91b   :  { %11591 = vmatprep.subr.bf16.mxu1 %v15934_v47  ;;  %v15986_v47 = vld [vmem:[#allocation5 + $0xec8] ss:$16 sps:$4 sm:$0xff]  }
 0x91d   :  { %11551 = vmatpush2.bf16.msra.mxu0 %v15929_v23 }
 0x91e   :  { %11592 = vmatpush2.bf16.msra.mxu1 %v15932_v8  ;;  %11552 = vmatprep.subr.bf16.mxu0 %v15937_v12  ;;  %v15991_v12 = vld [vmem:[#allocation5 + $0xcac] ss:$16 sps:$4 sm:$0xff]  }
 0x91f   :  { %11593 = vmatprep.subr.bf16.mxu1 %v15940_v24  ;;  %v15994_v24 = vld [vmem:[#allocation5 + $0xeac] ss:$16 sps:$4 sm:$0xff]  }
 0x921   :  { %11553 = vmatpush2.bf16.msra.mxu0 %v15935_v44 }
 0x922   :  { %11594 = vmatpush2.bf16.msra.mxu1 %v15938_v27  ;;  %11554 = vmatprep.subr.bf16.mxu0 %v15943_v1 }
 0x923   :  { %11595 = vmatprep.subr.bf16.mxu1 %v15946_v49  ;;  %v15989_v49 = vld [vmem:[#allocation5 + $0xca8] ss:$16 sps:$4 sm:$0xff]  }
 0x925   :  { %11555 = vmatpush2.bf16.msra.mxu0 %v15941_v52  ;;  %v15992_v52 = vld [vmem:[#allocation5 + $0xea8] ss:$16 sps:$4 sm:$0xff]  }
 0x926   :  { %11596 = vmatpush2.bf16.msra.mxu1 %v15944_v50  ;;  %11556 = vmatprep.subr.bf16.mxu0 %v15949_v16 }
 0x927   :  { %11597 = vmatprep.subr.bf16.mxu1 %v15952_v56  ;;  %v15997_v56 = vld [vmem:[#allocation5 + $0xc8c] ss:$16 sps:$4 sm:$0xff]  }
 0x929   :  { %11557 = vmatpush2.bf16.msra.mxu0 %v15947_v43  ;;  %v16000_v43 = vld [vmem:[#allocation5 + $0xe8c] ss:$16 sps:$4 sm:$0xff]  }
 0x92a   :  { %11598 = vmatpush2.bf16.msra.mxu1 %v15950_v15  ;;  %11558 = vmatprep.subr.bf16.mxu0 %v15955_v46  ;;  %v16001_v15 = vld [vmem:[#allocation5 + $0xc68] ss:$16 sps:$4 sm:$0xff]  }
 0x92b   :  { %11599 = vmatprep.subr.bf16.mxu1 %v15958_v26  ;;  %v16004_v46 = vld [vmem:[#allocation5 + $0xe68] ss:$16 sps:$4 sm:$0xff]   ;;  %v16009_v26 = vld [vmem:[#allocation5 + $0xc4c] ss:$16 sps:$4 sm:$0xff]  }
 0x92d   :  { %11559 = vmatpush2.bf16.msra.mxu0 %v15953_v31  ;;  %v16012_v31 = vld [vmem:[#allocation5 + $0xe4c] ss:$16 sps:$4 sm:$0xff]  }
 0x92e   :  { %11600 = vmatpush2.bf16.msra.mxu1 %v15956_v13  ;;  %11560 = vmatprep.subr.bf16.mxu0 %v15961_v53  ;;  %v16007_v13 = vld [vmem:[#allocation5 + $0xc48] ss:$16 sps:$4 sm:$0xff]  }
 0x92f   :  { %11601 = vmatprep.subr.bf16.mxu1 %v15964_v62  ;;  %v16010_v53 = vld [vmem:[#allocation5 + $0xe48] ss:$16 sps:$4 sm:$0xff]   ;;  %v16015_v62 = vld [vmem:[#allocation5 + $0xc2c] ss:$16 sps:$4 sm:$0xff]  }
 0x931   :  { %11561 = vmatpush2.bf16.msra.mxu0 %v15959_v39  ;;  %v16018_v39 = vld [vmem:[#allocation5 + $0xe2c] ss:$16 sps:$4 sm:$0xff]  }
 0x932   :  { %11602 = vmatpush2.bf16.msra.mxu1 %v15962_v25  ;;  %11562 = vmatprep.subr.bf16.mxu0 %v15967_v34  ;;  %v16013_v25 = vld [vmem:[#allocation5 + $0xc28] ss:$16 sps:$4 sm:$0xff]  }
 0x933   :  { %11603 = vmatprep.subr.bf16.mxu1 %v15970_v7  ;;  %v16016_v34 = vld [vmem:[#allocation5 + $0xe28] ss:$16 sps:$4 sm:$0xff]   ;;  %v16021_v7 = vld [vmem:[#allocation5 + $0xc0c] ss:$16 sps:$4 sm:$0xff]  }
 0x935   :  { %11563 = vmatpush2.bf16.msra.mxu0 %v15965_v41  ;;  %v16024_v41 = vld [vmem:[#allocation5 + $0xe0c] ss:$16 sps:$4 sm:$0xff]  }
 0x936   :  { %11604 = vmatpush2.bf16.msra.mxu1 %v15968_v55  ;;  %11564 = vmatprep.subr.bf16.mxu0 %v15973_v9  ;;  %v16019_v55 = vld [vmem:[#allocation5 + $0xc08] ss:$16 sps:$4 sm:$0xff]  }
 0x937   :  { %11605 = vmatprep.subr.bf16.mxu1 %v15976_v29  ;;  %v16022_v9 = vld [vmem:[#allocation5 + $0xe08] ss:$16 sps:$4 sm:$0xff]   ;;  %v16027_v29 = vld [vmem:[#allocation5 + $0xdec] ss:$16 sps:$4 sm:$0xff]  }
 0x939   :  { %11565 = vmatpush2.bf16.msra.mxu0 %v15971_v10  ;;  %v16030_v10 = vld [vmem:[#allocation5 + $0xfec] ss:$16 sps:$4 sm:$0xff]  }
 0x93a   :  { %11606 = vmatpush2.bf16.msra.mxu1 %v15974_v32  ;;  %11616 = vmatprep.subr.bf16.mxu0 %v15979_v58  ;;  %v16025_v32 = vld [vmem:[#allocation5 + $0xde8] ss:$16 sps:$4 sm:$0xff]  }
 0x93b   :  { %11657 = vmatprep.subr.bf16.mxu1 %v15982_v35  ;;  %v16028_v58 = vld [vmem:[#allocation5 + $0xfe8] ss:$16 sps:$4 sm:$0xff]   ;;  %v16033_v35 = vld [vmem:[#allocation5 + $0xdcc] ss:$16 sps:$4 sm:$0xff]  }
 0x93c   :  { %v9897_v19 = vpop.f32.mrf.mxu0  ;;  %13748 = vmatmul.mubr.msk.bf16.vlgmr.msra.gmra.mxu0 %vm650_vm12, %v10749_v61 }
 0x93d   :  { %v9938_v51 = vpop.f32.mrf.mxu1  ;;  %13750 = vmatmul.mubr.msk.bf16.vlgmr.msra.gmra.mxu1 %vm650_vm12, %v10751_v14  ;;  %11617 = vmatpush1.bf16.msra.mxu0 %v15977_v11  ;;  %v16036_v11 = vld [vmem:[#allocation5 + $0xfcc] ss:$16 sps:$4 sm:$0xff]  }
 0x93e   :  { %v16924_v38 = vadd.f32 %v9938_v51, %v9897_v19  ;;  %11658 = vmatpush1.bf16.msra.mxu1 %v15980_v18  ;;  %v9899_v23 = vpop.f32.mrf.mxu0  ;;  %11618 = vmatprep.subr.bf16.mxu0 %v15985_v17  ;;  %v16031_v18 = vld [vmem:[#allocation5 + $0xdc8] ss:$16 sps:$4 sm:$0xff]   ;;  %v16042_v19 = vld [vmem:[#allocation5 + $0xfac] ss:$16 sps:$4 sm:$0xff]  }
 0x93f   :  { %v9940_v8 = vpop.f32.mrf.mxu1  ;;  %11659 = vmatprep.subr.bf16.mxu1 %v15988_v54  ;;  %13751 = vmatprep.mubr.msk.bf16.mxu0 %vm650_vm12, %v10750_v20  ;;  %v15998_v20 = vld [vmem:[#allocation5 + $0xe88] ss:$16 sps:$4 sm:$0xff]   ;;  %v16039_v54 = vld [vmem:[#allocation5 + $0xdac] ss:$16 sps:$4 sm:$0xff]  }
 0x940   :  { %v16926_v44 = vadd.f32 %v9940_v8, %v9899_v23  ;;  %13753 = vmatprep.mubr.msk.bf16.mxu1 %vm650_vm12, %v10752_v22  ;;  %v9901_v27 = vpop.f32.mrf.mxu0  ;;  %v16006_v22 = vld [vmem:[#allocation5 + $0xe6c] ss:$16 sps:$4 sm:$0xff]   ;;  %v16034_v17 = vld [vmem:[#allocation5 + $0xfc8] ss:$16 sps:$4 sm:$0xff]  }
 0x941   :  { %v9942_v1 = vpop.f32.mrf.mxu1  ;;  %11619 = vmatpush1.bf16.msra.mxu0 %v15983_v2  ;;  %v16037_v51 = vld [vmem:[#allocation5 + $0xda8] ss:$16 sps:$4 sm:$0xff]   ;;  %v16048_v23 = vld [vmem:[#allocation5 + $0xf8c] ss:$16 sps:$4 sm:$0xff]  }
 0x942   :  { %11660 = vmatpush1.bf16.msra.mxu1 %v15986_v47  ;;  %v9902_v50 = vpop.f32.mrf.mxu0  ;;  %11620 = vmatprep.subr.bf16.mxu0 %v15991_v12  ;;  %v16040_v2 = vld [vmem:[#allocation5 + $0xfa8] ss:$16 sps:$4 sm:$0xff]   ;;  %v16045_v47 = vld [vmem:[#allocation5 + $0xd8c] ss:$16 sps:$4 sm:$0xff]  }
 0x943   :  { %v9943_v16 = vpop.f32.mrf.mxu1  ;;  %11661 = vmatprep.subr.bf16.mxu1 %v15994_v24  ;;  %v16043_v8 = vld [vmem:[#allocation5 + $0xd88] ss:$16 sps:$4 sm:$0xff]   ;;  %v16051_v24 = vld [vmem:[#allocation5 + $0xd6c] ss:$16 sps:$4 sm:$0xff]  }
 0x944   :  { %v16046_v12 = vld [vmem:[#allocation5 + $0xf88] ss:$16 sps:$4 sm:$0xff]   ;;  %v16054_v27 = vld [vmem:[#allocation5 + $0xf6c] ss:$16 sps:$4 sm:$0xff]  }
 0x945   :  { %11621 = vmatpush1.bf16.msra.mxu0 %v15989_v49  ;;  %v16049_v1 = vld [vmem:[#allocation5 + $0xd68] ss:$16 sps:$4 sm:$0xff]   ;;  %v16060_v50 = vld [vmem:[#allocation5 + $0xf4c] ss:$16 sps:$4 sm:$0xff]  }
 0x946   :  { %11662 = vmatpush1.bf16.msra.mxu1 %v15992_v52  ;;  %11622 = vmatprep.subr.bf16.mxu0 %v15997_v56  ;;  %v16052_v49 = vld [vmem:[#allocation5 + $0xf68] ss:$16 sps:$4 sm:$0xff]   ;;  %v16057_v52 = vld [vmem:[#allocation5 + $0xd4c] ss:$16 sps:$4 sm:$0xff]  }
 0x947   :  { %11663 = vmatprep.subr.bf16.mxu1 %v16000_v43  ;;  %v16055_v16 = vld [vmem:[#allocation5 + $0xd48] ss:$16 sps:$4 sm:$0xff]   ;;  %v16063_v43 = vld [vmem:[#allocation5 + $0xd2c] ss:$16 sps:$4 sm:$0xff]  }
 0x948   :  { %v16058_v56 = vld [vmem:[#allocation5 + $0xf48] ss:$16 sps:$4 sm:$0xff]  }
 0x949   :  { %11623 = vmatpush1.bf16.msra.mxu0 %v15995_v42  ;;  %v16066_v42 = vld [vmem:[#allocation5 + $0xf2c] ss:$16 sps:$4 sm:$0xff]  }
 0x94a   :  { %11664 = vmatpush1.bf16.msra.mxu1 %v15998_v20  ;;  %11624 = vmatprep.subr.bf16.mxu0 %v16003_v36  ;;  %v16061_v20 = vld [vmem:[#allocation5 + $0xd28] ss:$16 sps:$4 sm:$0xff]  }
 0x94b   :  { %11665 = vmatprep.subr.bf16.mxu1 %v16006_v22  ;;  %v16064_v36 = vld [vmem:[#allocation5 + $0xf28] ss:$16 sps:$4 sm:$0xff]   ;;  %v16069_v22 = vld [vmem:[#allocation5 + $0xd0c] ss:$16 sps:$4 sm:$0xff]  }
 0x94d   :  { %11625 = vmatpush1.bf16.msra.mxu0 %v16001_v15  ;;  %v16072_v15 = vld [vmem:[#allocation5 + $0xf0c] ss:$16 sps:$4 sm:$0xff]  }
 0x94e   :  { %11666 = vmatpush1.bf16.msra.mxu1 %v16004_v46  ;;  %11626 = vmatprep.subr.bf16.mxu0 %v16009_v26  ;;  %v16067_v46 = vld [vmem:[#allocation5 + $0xd08] ss:$16 sps:$4 sm:$0xff]  }
 0x94f   :  { %11667 = vmatprep.subr.bf16.mxu1 %v16012_v31  ;;  %v16070_v26 = vld [vmem:[#allocation5 + $0xf08] ss:$16 sps:$4 sm:$0xff]  }
 0x950   :  { %v16073_v31 = vld [vmem:[%s17087_s8 + $0x78] sm:$0xff]  }
 0x951   :  { %11627 = vmatpush1.bf16.msra.mxu0 %v16007_v13  ;;  %v16074_v13 = vld [vmem:[%s17087_s8 + $0x38] sm:$0xff]  }
 0x952   :  { %11668 = vmatpush1.bf16.msra.mxu1 %v16010_v53  ;;  %11628 = vmatprep.subr.bf16.mxu0 %v16015_v62  ;;  %v16075_v53 = vld [vmem:[%s17087_s8 + $0x70] sm:$0xff]  }
 0x953   :  { %11669 = vmatprep.subr.bf16.mxu1 %v16018_v39 }
 0x955   :  { %11629 = vmatpush1.bf16.msra.mxu0 %v16013_v25 }
 0x956   :  { %11670 = vmatpush1.bf16.msra.mxu1 %v16016_v34  ;;  %11630 = vmatprep.subr.bf16.mxu0 %v16021_v7  ;;  %v16076_v34 = vld [vmem:[%s17087_s8 + $0x30] sm:$0xff]  }
 0x957   :  { %11671 = vmatprep.subr.bf16.mxu1 %v16024_v41 }
 0x959   :  { %11631 = vmatpush1.bf16.msra.mxu0 %v16019_v55 }
 0x95a   :  { %11672 = vmatpush1.bf16.msra.mxu1 %v16022_v9  ;;  %11632 = vmatprep.subr.bf16.mxu0 %v16027_v29 }
 0x95b   :  { %11673 = vmatprep.subr.bf16.mxu1 %v16030_v10 }
 0x95d   :  { %11633 = vmatpush2.bf16.msra.mxu0 %v16025_v32  ;;  %v16079_v32 = vld [vmem:[%s17087_s8 + $0x60] sm:$0xff]  }
 0x95e   :  { %11674 = vmatpush2.bf16.msra.mxu1 %v16028_v58  ;;  %11634 = vmatprep.subr.bf16.mxu0 %v16033_v35  ;;  %v16081_v58 = vld [vmem:[%s17087_s8 + $0x58] sm:$0xff]  }
 0x95f   :  { %11675 = vmatprep.subr.bf16.mxu1 %v16036_v11  ;;  %v16082_v35 = vld [vmem:[%s17087_s8 + $0x18] sm:$0xff]   ;;  %v16083_v11 = vld [vmem:[%s17087_s8 + $0x50] sm:$0xff]  }
 0x961   :  { %11635 = vmatpush2.bf16.msra.mxu0 %v16031_v18  ;;  %v16084_v18 = vld [vmem:[%s17087_s8 + $0x10] sm:$0xff]  }
 0x962   :  { %11676 = vmatpush2.bf16.msra.mxu1 %v16034_v17  ;;  %11636 = vmatprep.subr.bf16.mxu0 %v16039_v54  ;;  %v16085_v17 = vld [vmem:[%s17087_s8 + $0x48] sm:$0xff]  }
 0x963   :  { %11677 = vmatprep.subr.bf16.mxu1 %v16042_v19  ;;  %v16086_v54 = vld [vmem:[%s17087_s8 + $0x8] sm:$0xff]   ;;  %v16087_v19 = vld [vmem:[%s17087_s8 + $0x40] sm:$0xff]  }
 0x965   :  { %11637 = vmatpush2.bf16.msra.mxu0 %v16037_v51  ;;  %v16089_v51 = vld [vmem:[%s17087_s8 + $0xf8] sm:$0xff]  }
 0x966   :  { %11678 = vmatpush2.bf16.msra.mxu1 %v16040_v2  ;;  %11638 = vmatprep.subr.bf16.mxu0 %v16045_v47  ;;  %v16090_v2 = vld [vmem:[%s17087_s8 + $0xb8] sm:$0xff]   ;;  %v16091_v47 = vld [vmem:[%s17087_s8 + $0xf0] sm:$0xff]  }
 0x967   :  { %11679 = vmatprep.subr.bf16.mxu1 %v16048_v23  ;;  %v16088_v23 = vld [vmem:[%s17087_s8] sm:$0xff]  }
 0x969   :  { %11639 = vmatpush2.bf16.msra.mxu0 %v16043_v8  ;;  %v16092_v8 = vld [vmem:[%s17087_s8 + $0xb0] sm:$0xff]  }
 0x96a   :  { %11680 = vmatpush2.bf16.msra.mxu1 %v16046_v12  ;;  %11640 = vmatprep.subr.bf16.mxu0 %v16051_v24  ;;  %v16093_v12 = vld [vmem:[%s17087_s8 + $0xe8] sm:$0xff]  }
 0x96b   :  { %11681 = vmatprep.subr.bf16.mxu1 %v16054_v27  ;;  %v16094_v24 = vld [vmem:[%s17087_s8 + $0xa8] sm:$0xff]  }
 0x96d   :  { %11641 = vmatpush2.bf16.msra.mxu0 %v16049_v1 }
 0x96e   :  { %11682 = vmatpush2.bf16.msra.mxu1 %v16052_v49  ;;  %11642 = vmatprep.subr.bf16.mxu0 %v16057_v52  ;;  %v16095_v52 = vld [vmem:[%s17087_s8 + $0xe0] sm:$0xff]  }
 0x96f   :  { %11683 = vmatprep.subr.bf16.mxu1 %v16060_v50 }
 0x971   :  { %11643 = vmatpush2.bf16.msra.mxu0 %v16055_v16 }
 0x972   :  { %11684 = vmatpush2.bf16.msra.mxu1 %v16058_v56  ;;  %11644 = vmatprep.subr.bf16.mxu0 %v16063_v43  ;;  %v16096_v56 = vld [vmem:[%s17087_s8 + $0xa0] sm:$0xff]  }
 0x973   :  { %11685 = vmatprep.subr.bf16.mxu1 %v16066_v42 }
 0x975   :  { %11645 = vmatpush2.bf16.msra.mxu0 %v16061_v20 }
 0x976   :  { %11686 = vmatpush2.bf16.msra.mxu1 %v16064_v36  ;;  %11646 = vmatprep.subr.bf16.mxu0 %v16069_v22 }
 0x977   :  { %11687 = vmatprep.subr.bf16.mxu1 %v16072_v15 }
 0x979   :  { %11647 = vmatpush2.bf16.msra.mxu0 %v16067_v46 }
 0x97a   :  { %11688 = vmatpush2.bf16.msra.mxu1 %v16070_v26  ;;  %13792 = vmatprep.subr.bf16.mxu0 %v16073_v31  ;;  %v16098_v26 = vld [vmem:[%s17087_s8 + $0x98] sm:$0xff]   ;;  %v16100_v31 = vld [vmem:[%s17087_s8 + $0x90] sm:$0xff]  }
 0x97b   :  { %13814 = vmatprep.subr.bf16.mxu1 %v16089_v51 }
 0x97c   :  { %v10619_v62 = vpop.f32.mrf.mxu0  ;;  %13752 = vmatmul.mubr.msk.bf16.vlgmr.msra.gmra.mxu0 %vm650_vm12, %v10749_v61 }
 0x97d   :  { %v10660_v39 = vpop.f32.mrf.mxu1  ;;  %13754 = vmatmul.mubr.msk.bf16.vlgmr.msra.gmra.mxu1 %vm650_vm12, %v10751_v14  ;;  %v10620_v25 = vadd.f32 %v10619_v62, %v16906_v0  ;;  %13793 = vmatpush3.bf16.msra.mxu0 %v16074_v13  ;;  %v16078_v0 = vld [vmem:[%s17087_s8 + $0x28] sm:$0xff]   ;;  %v16103_v62 = vld [vmem:[%s17087_s8 + $0xc0] sm:$0xff]  }
 0x97e   :  { %v10621_v7 = vpop.f32.mrf.mxu0  ;;  %13794 = vmatprep.subr.bf16.mxu0 %v16075_v53  ;;  %13815 = vmatpush3.bf16.msra.mxu1 %v16090_v2  ;;  %v16101_v13 = vld [vmem:[%s17087_s8 + $0xc8] sm:$0xff]  }
 0x97f   :  { %v10662_v41 = vpop.f32.mrf.mxu1  ;;  %v16956_v55 = vadd.f32 %v10660_v39, %v10620_v25  ;;  %v10622_v21 = vadd.f32 %v10621_v7, %v16908_v30  ;;  %v16080_v30 = vld [vmem:[%s17087_s8 + $0x20] sm:$0xff]   ;;  %13816 = vmatprep.subr.bf16.mxu1 %v16091_v47  ;;  %v16102_v53 = vld [vmem:[%s17087_s8 + $0x88] sm:$0xff]  }
 0x980   :  { %v10623_v61 = vpop.f32.mrf.mxu0  ;;  %v16104_v39 = vld [vmem:[%s17087_s8 + $0x80] sm:$0xff]  }
 0x981   :  { %v10664_v14 = vpop.f32.mrf.mxu1  ;;  %v16959_v9 = vadd.f32 %v10662_v41, %v10622_v21  ;;  %13795 = vmatpush3.bf16.msra.mxu0 %v16076_v34  ;;  %v11705_v41 = vrot.slane %v16408_v3, %v16434_v45 }
 0x982   :  { %v10624_v29 = vpop.f32.mrf.mxu0  ;;  %13796 = vmatprep.subr.bf16.mxu0 %v16077_v57  ;;  %13817 = vmatpush3.bf16.msra.mxu1 %v16092_v8 }
 0x983   :  { %v10665_v10 = vpop.f32.mrf.mxu1  ;;  %13818 = vmatprep.subr.bf16.mxu1 %v16093_v12 }
 0x985   :  { %13797 = vmatpush3.bf16.msra.mxu0 %v16078_v0  ;;  %v11709_v0 = vrot.slane %v16410_v4, %v16434_v45 }
 0x986   :  { %13798 = vmatprep.subr.bf16.mxu0 %v16079_v32  ;;  %13819 = vmatpush3.bf16.msra.mxu1 %v16094_v24 }
 0x987   :  { %13820 = vmatprep.subr.bf16.mxu1 %v16095_v52 }
 0x989   :  { %13799 = vmatpush3.bf16.msra.mxu0 %v16080_v30 }
 0x98a   :  { %13800 = vmatprep.subr.bf16.mxu0 %v16081_v58  ;;  %13821 = vmatpush3.bf16.msra.mxu1 %v16096_v56 }
 0x98d   :  { %13801 = vmatpush3.bf16.msra.mxu0 %v16082_v35 }
 0x98e   :  { %13802 = vmatprep.subr.bf16.mxu0 %v16083_v11 }
 0x991   :  { %13803 = vmatpush3.bf16.msra.mxu0 %v16084_v18 }
 0x992   :  { %13804 = vmatprep.subr.bf16.mxu0 %v16085_v17 }
 0x995   :  { %13805 = vmatpush3.bf16.msra.mxu0 %v16086_v54 }
 0x996   :  { %13806 = vmatprep.subr.bf16.mxu0 %v16087_v19 }
 0x999   :  { %13807 = vmatpush3.bf16.msra.mxu0 %v16088_v23 }
 0x9bc   :  { %v10701_v27 = vpop.f32.mrf.mxu0 }
 0x9bd   :  { %v10742_v1 = vpop.f32.mrf.mxu1  ;;  %v10702_v49 = vadd.f32 %v10701_v27, %v16924_v38  ;;  %v16097_v38 = vld [vmem:[%s17087_s8 + $0xd8] sm:$0xff]  }
 0x9be   :  { %v10703_v50 = vpop.f32.mrf.mxu0  ;;  %13822 = vmatprep.subr.bf16.mxu1 %v16097_v38 }
 0x9bf   :  { %v10744_v16 = vpop.f32.mrf.mxu1  ;;  %v17019_v43 = vadd.f32 %v10742_v1, %v10702_v49  ;;  %v10704_v42 = vadd.f32 %v10703_v50, %v16926_v44  ;;  %13823 = vmatpush3.bf16.msra.mxu1 %v16098_v26  ;;  %v16099_v44 = vld [vmem:[%s17087_s8 + $0xd0] sm:$0xff]   ;;  %v11713_v49 = vrot.slane %v16412_v5, %v16434_v45  ;;  %s16333_s8 = smov [#allocation16]  }
 0x9c0   :  { %v10705_v20 = vpop.f32.mrf.mxu0  ;;  %13824 = vmatprep.subr.bf16.mxu1 %v16099_v44  ;;  %s12121_s0 = sshll.u32 %s16333_s8, 4  ;;  %s12122_s0 = int_to_ptr.vmem [resolvable:$true] %s12121_s0 }
 0x9c1   :  { %v10746_v36 = vpop.f32.mrf.mxu1  ;;  %v17022_v22 = vadd.f32 %v10744_v16, %v10704_v42  ;;  %v11717_v42 = vrot.slane %v16414_v6, %v16434_v45  ;;  %s16285_s16 = scalar_lea.vmem %s12122_s0, 32  ;;  %p16290_p4 = scmp.lt.s32.totalorder %s12122_s0, %s12122_s0 }
 0x9c2   :  { %v10706_v15 = vpop.f32.mrf.mxu0  ;;  %p16286_p3 = scmp.ne.s32.totalorder %s12122_s0, %s16285_s16  ;;  %p16291_p5 = scmp.lt.s32.totalorder %s16285_s16, %s16285_s16 }
 0x9c3   :  { %v10747_v46 = vpop.f32.mrf.mxu1  ;;  %13825 = vmatpush3.bf16.msra.mxu1 %v16100_v31 }
 0x9c4   :  { %13826 = vmatprep.subr.bf16.mxu1 %v16101_v13  ;;  %p16292_p6 = por %p16291_p5, %p16290_p4 }
 0x9c6   :  { %p16293_p7 = pnand %p16292_p6, %p16286_p3 }
 0x9c7   :  { %13827 = vmatpush3.bf16.msra.mxu1 %v16102_v53 }
 0x9c8   :  { %13828 = vmatprep.subr.bf16.mxu1 %v16103_v62 }
 0x9cb   :  { %13829 = vmatpush3.bf16.msra.mxu1 %v16104_v39 }
 0x9fc   :  { %v11568_v25 = vpop.f32.mrf.mxu0 }
 0x9fd   :  { %v11609_v34 = vpop.f32.mrf.mxu1 }
 0x9fe   :  { %v11610_v7 = vadd.f32 %v11609_v34, %v11568_v25  ;;  %v11570_v57 = vpop.f32.mrf.mxu0 }
 0x9ff   :  { %v11611_v21 = vpop.f32.mrf.mxu1 }
 0xa00   :  { %v11698_v61 = vadd.f32 %v11610_v7, %v16956_v55  ;;  %v11612_v14 = vadd.f32 %v11611_v21, %v11570_v57  ;;  %v11572_v29 = vpop.f32.mrf.mxu0 }
 0xa01   :  { %v11613_v10 = vpop.f32.mrf.mxu1  ;;  %v13755_v29 = vld [vmem:[#allocation15] ss:$0 sm:$0xff] }
 0xa02   :  { %v11718_v32 = vadd.f32 %v11705_v41, %v11698_v61  ;;  %v11699_v30 = vadd.f32 %v11612_v14, %v16959_v9  ;;  %v11573_v58 = vpop.f32.mrf.mxu0 }
 0xa03   :  { %v11614_v35 = vpop.f32.mrf.mxu1 }
 0xa04   :  { %v11722_v11 = vmax.f32 %v11718_v32, 0.0  ;;  %v11719_v18 = vadd.f32 %v11709_v0, %v11699_v30 }
 0xa06   :  { %v11726_v3 = vmul.f32 %v11722_v11, %v5903_v37  ;;  %v11723_v17 = vmax.f32 %v11719_v18, 0.0 }
 0xa08   :  { %v11734_v54 = vrot.slane %v11726_v3, 6  ;;  %v11727_v55 = vmul.f32 %v11723_v17, %v5904_v60  ;;  %v11750_v19 = vrot.slane %v11726_v3, 2 }
 0xa0a   :  { %v11742_v4 = vsel %vm537_vm2, 0.0, %v11734_v54  ;;  %v11735_v51 = vrot.slane %v11727_v55, 6  ;;  %v11751_v2 = vrot.slane %v11727_v55, 2  ;;  %v11758_v8 = vsel %vm537_vm2, %v11750_v19, 0.0 }
 0xa0b   :  { %v11746_v47 = vmax.f32 %v11726_v3, %v11742_v4 }
 0xa0c   :  { %v11743_v9 = vsel %vm537_vm2, 0.0, %v11735_v51  ;;  %v11759_v12 = vsel %vm537_vm2, %v11751_v2, 0.0 }
 0xa0d   :  { %v11747_v23 = vmax.f32 %v11727_v55, %v11743_v9  ;;  %v11762_v63 = vmax.f32 %v11746_v47, %v11758_v8 }
 0xa0f   :  { %v11763_v37 = vmax.f32 %v11747_v23, %v11759_v12  ;;  %v11830_v27 = vpack.c.bf16 %v11762_v63, %v11762_v63 }
 0xa11   :  { %v11831_v24 = vpack.c.bf16 %v11763_v37, %v11763_v37 }
 0xa13   :  { %12065 = vmatprep.mubr.bf16.mxu0 %v11831_v24 }
 0xa14   :  { %12066 = vmatmul.mubr.bf16.vlgmr.msra.gmra.mxu0 %v11830_v27 }
 0xa3c   :  { %v11650_v59 = vpop.f32.mrf.mxu0 }
 0xa3d   :  { %v11691_v60 = vpop.f32.mrf.mxu1 }
 0xa3e   :  { %v11692_v1 = vadd.f32 %v11691_v60, %v11650_v59  ;;  %v11652_v52 = vpop.f32.mrf.mxu0 }
 0xa3f   :  { %v11693_v50 = vpop.f32.mrf.mxu1 }
 0xa40   :  { %v11700_v16 = vadd.f32 %v11692_v1, %v17019_v43  ;;  %v11694_v56 = vadd.f32 %v11693_v50, %v11652_v52  ;;  %v11654_v20 = vpop.f32.mrf.mxu0 }
 0xa41   :  { %v11695_v36 = vpop.f32.mrf.mxu1 }
 0xa42   :  { %v11720_v38 = vadd.f32 %v11713_v49, %v11700_v16  ;;  %v11701_v15 = vadd.f32 %v11694_v56, %v17022_v22  ;;  %v11655_v46 = vpop.f32.mrf.mxu0 }
 0xa43   :  { %v11696_v26 = vpop.f32.mrf.mxu1 }
 0xa44   :  { %v11724_v44 = vmax.f32 %v11720_v38, 0.0  ;;  %v11721_v31 = vadd.f32 %v11717_v42, %v11701_v15 }
 0xa46   :  { %v11728_v5 = vmul.f32 %v11724_v44, %v5905_v40  ;;  %v11725_v13 = vmax.f32 %v11721_v31, 0.0 }
 0xa48   :  { %v11736_v53 = vrot.slane %v11728_v5, 6  ;;  %v11729_v43 = vmul.f32 %v11725_v13, %v5906_v48  ;;  %v11752_v62 = vrot.slane %v11728_v5, 2 }
 0xa4a   :  { %v11744_v6 = vsel %vm537_vm2, 0.0, %v11736_v53  ;;  %v11737_v45 = vrot.slane %v11729_v43, 6  ;;  %v11753_v39 = vrot.slane %v11729_v43, 2  ;;  %v11760_v7 = vsel %vm537_vm2, %v11752_v62, 0.0 }
 0xa4b   :  { %v11748_v25 = vmax.f32 %v11728_v5, %v11744_v6 }
 0xa4c   :  { %v11745_v22 = vsel %vm537_vm2, 0.0, %v11737_v45  ;;  %v11761_v41 = vsel %vm537_vm2, %v11753_v39, 0.0 }
 0xa4d   :  { %v11749_v34 = vmax.f32 %v11729_v43, %v11745_v22  ;;  %v11764_v28 = vmax.f32 %v11748_v25, %v11760_v7 }
 0xa4f   :  { %v11765_v40 = vmax.f32 %v11749_v34, %v11761_v41  ;;  %v11832_v21 = vpack.c.bf16 %v11764_v28, %v11764_v28 }
 0xa51   :  { %v11833_v57 = vpack.c.bf16 %v11765_v40, %v11765_v40 }
 0xa53   :  { %12105 = vmatprep.mubr.bf16.mxu1 %v11833_v57 }
 0xa54   :  { %12106 = vmatmul.mubr.bf16.vlgmr.msra.gmra.mxu1 %v11832_v21 }
 0xad4   :  { %v13808_v33 = vpop.f32.mrf.mxu0 }
 0xad6   :  { %v13809_v48 = vpop.f32.mrf.mxu0 }
 0xad7   :  { %v13810_v0 = vadd.f32 %v13809_v48, %v13808_v33 }
 0xad8   :  { %v13811_v61 = vpop.f32.mrf.mxu0 }
 0xad9   :  { %v12068_v30 = vadd.f32 %v13810_v0, %v13755_v29 }
 0xada   :  { %v13812_v14 = vpop.f32.mrf.mxu0 }
 0xb14   :  { %v13830_v10 = vpop.f32.mrf.mxu1 }
 0xb16   :  { %v13831_v32 = vpop.f32.mrf.mxu1 }
 0xb17   :  { %v13832_v58 = vadd.f32 %v13831_v32, %v13830_v10 }
 0xb18   :  { %v13833_v35 = vpop.f32.mrf.mxu1 }
 0xb19   :  { %v12108_v11 = vadd.f32 %v13832_v58, %v12068_v30 }
 0xb1a   :  { %v13834_v18 = vpop.f32.mrf.mxu1 }
 0xb1b   :  { %12114 = vst.msk [vmem:[#allocation16] sm:$0x3] %vm12113_vm0, %v12108_v11 }
 0xb1c   :  { %16296 = shalt.err (!%p16293_p7)
}
 0xb1d   :  { %12124 = dma.vmem_to_hbm [thread:$0]  %s12122_s0, 32, %s17089_s10, [#allocation9]  }
 0xb1e   :  { %16319 = dma.done.wait [#allocation9], 32  }
 0xb1f   :  { %16320 = vsyncadd [#allocation9], 4294967264 }
 0xb20   :  { %12128 = vsyncpa [#allocation8], 1 }
 0xb21   :  { %12129 = vsyncpa [#allocation11], 1 }
 0xb22   :  { %12130 = vsyncpa [#allocation14], 1 }
 0xb23   :  { %12131 = vsyncpa [#allocation9], 1 }
 0xb24   :  { %12132 = vsyncmov [#allocation6] }
 0xb27   :  { %s12133_s9 = vpop.sfrf %12132 }
 0xb28   :  { %p13788_p8 = scmp.ne.s32.totalorder %s12133_s9, 0 }
 0xb2a   :  { %12137 = shalt.err (%p13788_p8)  }
 0xb2b   :  { %12139 = vsyncmov [#allocation6 + $0x1] }
 0xb2e   :  { %s12140_s18 = vpop.sfrf %12139 }
 0xb2f   :  { %p13789_p9 = scmp.ne.s32.totalorder %s12140_s18, 0 }
 0xb31   :  { %12144 = shalt.err (%p13789_p9)  }
 0xb32   :  { %12146 = vsyncmov [#allocation6 + $0x2] }
 0xb35   :  { %s12147_s19 = vpop.sfrf %12146 }
 0xb36   :  { %p13790_p10 = scmp.ne.s32.totalorder %s12147_s19, 0 }
 0xb38   :  { %12151 = shalt.err (%p13790_p10)  }
 0xb39   :  { %12153 = vsyncmov [#allocation6 + $0x3] }
 0xb3c   :  { %s12154_s10 = vpop.sfrf %12153 }
 0xb3d   :  { %p13791_p11 = scmp.ne.s32.totalorder %s12154_s10, 0 }
 0xb3f   :  { %12158 = shalt.err (%p13791_p11)  }

</bundles_post_ra>
